<compile_context>
chip_gen: v7x
topology: tpu7x:2x2x1
jax: 0.10.0
libtpu: 0.0.40
codegen_flags: <defaults>
</compile_context>

<pallas_src>
import jax
import jax.numpy as jnp
from jax.experimental import pallas as pl
from jax.experimental.pallas import tpu as pltpu

EPS = 1e-5
NUM_CLASSES = 10

LAYER_CFG = [
    # (cin, cout, kernel, stride)
    (3, 16, 3, 1),
    (16, 16, 3, 1),
    (16, 32, 3, 2),
    (32, 32, 3, 1),
    (32, 32, 3, 1),
    (32, 64, 3, 2),
    (64, 64, 3, 1),
    (64, 64, 1, 1),
]


# ---------------------------------------------------------------------------
# Fused Pallas kernel: all 8 conv layers + avgpool + FC in one invocation.
# ---------------------------------------------------------------------------
def _make_kernel(layer_ks):
    """layer_ks: static tuple of kernel sizes per layer (defines ref layout)."""

    def kernel(*refs):
        out_ref = refs[-1]
        ins = refs[:-1]
        idx = 0
        # activation as 2-D (N*H, W*C), bf16 for the MXU
        x = ins[idx][...].astype(jnp.bfloat16)
        idx += 1
        for k in layer_ks:
            shs = ins[idx:idx + k]          # k x (N*Ho, N*Hin) row-select (bf16, 0/1)
            idx += k
            ms = ins[idx:idx + k]           # k x (Win*Cin, Wo*Cout) weights, BN folded
            idx += k
            shift = ins[idx][...]           # (1, Wo*Cout) f32  (bias/BN shift)
            idx += 1
            acc = None
            for di in range(k):
                rows = jnp.dot(shs[di][...], x,
                               preferred_element_type=jnp.float32)
                part = jnp.dot(rows.astype(jnp.bfloat16), ms[di][...],
                               preferred_element_type=jnp.float32)
                acc = part if acc is None else acc + part
            # f32 epilogue: add folded shift + ReLU, then back to bf16
            x = jnp.maximum(acc + shift, 0.0).astype(jnp.bfloat16)

        # Head: global average pool + FC folded into two small f32 dots.
        a_ref, bw_ref, b_ref = ins[idx], ins[idx + 1], ins[idx + 2]
        pooled = jnp.dot(a_ref[...], x.astype(jnp.float32),
                         preferred_element_type=jnp.float32)
        out_ref[...] = jnp.dot(pooled, bw_ref[...],
                               preferred_element_type=jnp.float32) + b_ref[...]

    return kernel


def build_forward():
    layer_ks = tuple(k for (_, _, k, _) in LAYER_CFG)
    kernel = _make_kernel(layer_ks)

    def forward(x_nchw, operands):
        nb, c, h, w = x_nchw.shape
        # one-time layout conversion of the network input: NCHW -> (N*H, W*C)
        x2d = jnp.transpose(x_nchw, (0, 2, 3, 1)).reshape(nb * h, w * c)
        x2d = x2d.astype(jnp.float32)
        n_inputs = 1 + len(operands)
        vmem = pltpu.MemorySpace.VMEM
        return pl.pallas_call(
            kernel,
            out_shape=jax.ShapeDtypeStruct((nb, NUM_CLASSES), jnp.float32),
            in_specs=[pl.BlockSpec(memory_space=vmem)] * n_inputs,
            out_specs=pl.BlockSpec(memory_space=vmem),
        )(x2d, *operands)

    return jax.jit(forward)


# ---------------------------------------------------------------------------
# Host-side operand preparation (eager; BN folded into the weight matrices).
# ---------------------------------------------------------------------------
def _shift_select(n_out, n_in, stride, d):
    """(n_out, n_in) 0/1 matrix; row i selects input index stride*i + d."""
    rows = stride * jnp.arange(n_out) + d
    return (jnp.arange(n_in)[None, :] == rows[:, None]).astype(jnp.float32)


def prepare_operands(params, fc_w, fc_b, n, h, w):
    args = []
    h_in, w_in = h, w
    for p in params:
        wgt = p["w"]                                   # (Cout, Cin, k, k) torch layout
        cout, cin, k, _ = wgt.shape
        s = p["stride"]
        ho = (h_in - k) // s + 1
        wo = (w_in - k) // s + 1

        scale = p["gamma"] / jnp.sqrt(p["var"] + EPS)            # (Cout,)
        shift_c = (p["b"] - p["mean"]) * scale + p["beta"]       # (Cout,)

        eye_n = jnp.eye(n, dtype=jnp.float32)
        sh_list, m_list = [], []
        for di in range(k):
            # row selection (H shift + stride), batched over N via kron with I_N
            sh = jnp.kron(eye_n, _shift_select(ho, h_in, s, di))
            sh_list.append(sh.astype(jnp.bfloat16))
            # block-banded (Win*Cin, Wo*Cout) matrix: W shift + channel mix + BN scale
            m = jnp.zeros((w_in * cin, wo * cout), jnp.float32)
            for dj in range(k):
                sw = _shift_select(wo, w_in, s, dj).T            # (Win, Wo) 0/1
                blk = wgt[:, :, di, dj].T * scale[None, :]       # (Cin, Cout)
                m = m + jnp.kron(sw, blk)
            m_list.append(m.astype(jnp.bfloat16))

        shift2 = jnp.tile(shift_c, wo).reshape(1, wo * cout).astype(jnp.float32)
        args.extend(sh_list)
        args.extend(m_list)
        args.append(shift2)
        h_in, w_in = ho, wo

    # avgpool (mean over H,W) + FC folded: logits = A @ X8 @ BW + b
    a = jnp.kron(jnp.eye(n, dtype=jnp.float32),
                 jnp.full((1, h_in), 1.0 / (h_in * w_in), jnp.float32))  # (N, N*H8)
    bw = jnp.tile(fc_w.T, (w_in, 1)).astype(jnp.float32)                 # (W8*C, ncls)
    b2 = fc_b.reshape(1, -1).astype(jnp.float32)
    args.extend([a, bw, b2])
    return args


# ---------------------------------------------------------------------------
# Parameters (deterministic, PyTorch-default-style init) + pure-JAX reference
# ---------------------------------------------------------------------------
def init_params(key):
    params = []
    for (cin, cout, k, stride) in LAYER_CFG:
        key, k1, k2 = jax.random.split(key, 3)
        fan_in = cin * k * k
        bound = 1.0 / (fan_in ** 0.5)
        w = jax.random.uniform(k1, (cout, cin, k, k), jnp.float32, -bound, bound)
        b = jax.random.uniform(k2, (cout,), jnp.float32, -bound, bound)
        params.append(dict(w=w, b=b,
                           gamma=jnp.ones((cout,), jnp.float32),
                           beta=jnp.zeros((cout,), jnp.float32),
                           mean=jnp.zeros((cout,), jnp.float32),
                           var=jnp.ones((cout,), jnp.float32),
                           stride=stride))
    key, k1, k2 = jax.random.split(key, 3)
    bound = 1.0 / (64.0 ** 0.5)
    fc_w = jax.random.uniform(k1, (NUM_CLASSES, 64), jnp.float32, -bound, bound)
    fc_b = jax.random.uniform(k2, (NUM_CLASSES,), jnp.float32, -bound, bound)
    return params, fc_w, fc_b


def reference_forward(x_nchw, params, fc_w, fc_b):
    x = x_nchw
    for p in params:
        s = p["stride"]
        y = jax.lax.conv_general_dilated(
            x, p["w"], window_strides=(s, s), padding="VALID",
            dimension_numbers=("NCHW", "OIHW", "NCHW"))
        y = y + p["b"][None, :, None, None]
        scale = (p["gamma"] / jnp.sqrt(p["var"] + EPS))[None, :, None, None]
        y = (y - p["mean"][None, :, None, None]) * scale + p["beta"][None, :, None, None]
        x = jnp.maximum(y, 0.0)
    pooled = jnp.mean(x, axis=(2, 3))
    return pooled @ fc_w.T + fc_b[None, :]


if __name__ == "__main__":
    key = jax.random.PRNGKey(0)
    key, kx, kp = jax.random.split(key, 3)
    # 32x32 input -> final spatial size 2x2 after the conv stack.
    x = jax.random.normal(kx, (2, 3, 32, 32), jnp.float32)
    params, fc_w, fc_b = init_params(kp)

    operands = prepare_operands(params, fc_w, fc_b, n=2, h=32, w=32)
    forward = build_forward()
    out = jax.block_until_ready(forward(x, operands))

    assert out.shape == (2, NUM_CLASSES), out.shape
    assert bool(jnp.all(jnp.isfinite(out)))

    # loose correctness check vs plain-JAX reference (bf16 MXU inputs => tiny rounding diffs)
    ref = reference_forward(x, params, fc_w, fc_b)
    assert bool(jnp.allclose(out, ref, atol=5e-2, rtol=5e-2)), float(jnp.max(jnp.abs(out - ref)))

    print("KERNEL_OK")
</pallas_src>

<mosaic_0001>
module attributes {stable_mosaic.version = 11 : i64} {
  func.func @kernel(%arg0: memref<64x96xf32, #tpu.memory_space<vmem>>, %arg1: memref<60x64xbf16, #tpu.memory_space<vmem>>, %arg2: memref<60x64xbf16, #tpu.memory_space<vmem>>, %arg3: memref<60x64xbf16, #tpu.memory_space<vmem>>, %arg4: memref<96x480xbf16, #tpu.memory_space<vmem>>, %arg5: memref<96x480xbf16, #tpu.memory_space<vmem>>, %arg6: memref<96x480xbf16, #tpu.memory_space<vmem>>, %arg7: memref<1x480xf32, #tpu.memory_space<vmem>>, %arg8: memref<56x60xbf16, #tpu.memory_space<vmem>>, %arg9: memref<56x60xbf16, #tpu.memory_space<vmem>>, %arg10: memref<56x60xbf16, #tpu.memory_space<vmem>>, %arg11: memref<480x448xbf16, #tpu.memory_space<vmem>>, %arg12: memref<480x448xbf16, #tpu.memory_space<vmem>>, %arg13: memref<480x448xbf16, #tpu.memory_space<vmem>>, %arg14: memref<1x448xf32, #tpu.memory_space<vmem>>, %arg15: memref<26x56xbf16, #tpu.memory_space<vmem>>, %arg16: memref<26x56xbf16, #tpu.memory_space<vmem>>, %arg17: memref<26x56xbf16, #tpu.memory_space<vmem>>, %arg18: memref<448x416xbf16, #tpu.memory_space<vmem>>, %arg19: memref<448x416xbf16, #tpu.memory_space<vmem>>, %arg20: memref<448x416xbf16, #tpu.memory_space<vmem>>, %arg21: memref<1x416xf32, #tpu.memory_space<vmem>>, %arg22: memref<22x26xbf16, #tpu.memory_space<vmem>>, %arg23: memref<22x26xbf16, #tpu.memory_space<vmem>>, %arg24: memref<22x26xbf16, #tpu.memory_space<vmem>>, %arg25: memref<416x352xbf16, #tpu.memory_space<vmem>>, %arg26: memref<416x352xbf16, #tpu.memory_space<vmem>>, %arg27: memref<416x352xbf16, #tpu.memory_space<vmem>>, %arg28: memref<1x352xf32, #tpu.memory_space<vmem>>, %arg29: memref<18x22xbf16, #tpu.memory_space<vmem>>, %arg30: memref<18x22xbf16, #tpu.memory_space<vmem>>, %arg31: memref<18x22xbf16, #tpu.memory_space<vmem>>, %arg32: memref<352x288xbf16, #tpu.memory_space<vmem>>, %arg33: memref<352x288xbf16, #tpu.memory_space<vmem>>, %arg34: memref<352x288xbf16, #tpu.memory_space<vmem>>, %arg35: memref<1x288xf32, #tpu.memory_space<vmem>>, %arg36: memref<8x18xbf16, #tpu.memory_space<vmem>>, %arg37: memref<8x18xbf16, #tpu.memory_space<vmem>>, %arg38: memref<8x18xbf16, #tpu.memory_space<vmem>>, %arg39: memref<288x256xbf16, #tpu.memory_space<vmem>>, %arg40: memref<288x256xbf16, #tpu.memory_space<vmem>>, %arg41: memref<288x256xbf16, #tpu.memory_space<vmem>>, %arg42: memref<1x256xf32, #tpu.memory_space<vmem>>, %arg43: memref<4x8xbf16, #tpu.memory_space<vmem>>, %arg44: memref<4x8xbf16, #tpu.memory_space<vmem>>, %arg45: memref<4x8xbf16, #tpu.memory_space<vmem>>, %arg46: memref<256x128xbf16, #tpu.memory_space<vmem>>, %arg47: memref<256x128xbf16, #tpu.memory_space<vmem>>, %arg48: memref<256x128xbf16, #tpu.memory_space<vmem>>, %arg49: memref<1x128xf32, #tpu.memory_space<vmem>>, %arg50: memref<4x4xbf16, #tpu.memory_space<vmem>>, %arg51: memref<128x128xbf16, #tpu.memory_space<vmem>>, %arg52: memref<1x128xf32, #tpu.memory_space<vmem>>, %arg53: memref<2x4xf32, #tpu.memory_space<vmem>>, %arg54: memref<128x10xf32, #tpu.memory_space<vmem>>, %arg55: memref<1x10xf32, #tpu.memory_space<vmem>>, %arg56: memref<2x10xf32, #tpu.memory_space<vmem>>) attributes {dimension_semantics = [], scalar_prefetch = 0 : i64, scratch_operands = 0 : i64, tpu.core_type = #tpu.core_type<tc>} {
    %c0 = arith.constant 0 : index
    %c0_0 = arith.constant 0 : index
    %0 = vector.load %arg0[%c0, %c0_0] : memref<64x96xf32, #tpu.memory_space<vmem>>, vector<64x96xf32>
    %1 = arith.truncf %0 : vector<64x96xf32> to vector<64x96xbf16>
    %c0_1 = arith.constant 0 : index
    %c0_2 = arith.constant 0 : index
    %2 = vector.load %arg7[%c0_1, %c0_2] : memref<1x480xf32, #tpu.memory_space<vmem>>, vector<1x480xf32>
    %c0_3 = arith.constant 0 : index
    %c0_4 = arith.constant 0 : index
    %3 = vector.load %arg1[%c0_3, %c0_4] : memref<60x64xbf16, #tpu.memory_space<vmem>>, vector<60x64xbf16>
    %cst = arith.constant dense<0.000000e+00> : vector<60x96xf32>
    %4 = tpu.matmul %3, %1, %cst {dimension_numbers = #tpu.dot_dimension_numbers<[1], [0], [0], [1], [0, 0, 1, 1], [], []>} : vector<60x64xbf16>, vector<64x96xbf16>, vector<60x96xf32> -> vector<60x96xf32>
    %5 = arith.truncf %4 : vector<60x96xf32> to vector<60x96xbf16>
    %c0_5 = arith.constant 0 : index
    %c0_6 = arith.constant 0 : index
    %6 = vector.load %arg4[%c0_5, %c0_6] : memref<96x480xbf16, #tpu.memory_space<vmem>>, vector<96x480xbf16>
    %cst_7 = arith.constant dense<0.000000e+00> : vector<60x480xf32>
    %7 = tpu.matmul %5, %6, %cst_7 {dimension_numbers = #tpu.dot_dimension_numbers<[1], [0], [0], [1], [0, 0, 1, 1], [], []>} : vector<60x96xbf16>, vector<96x480xbf16>, vector<60x480xf32> -> vector<60x480xf32>
    %c0_8 = arith.constant 0 : index
    %c0_9 = arith.constant 0 : index
    %8 = vector.load %arg2[%c0_8, %c0_9] : memref<60x64xbf16, #tpu.memory_space<vmem>>, vector<60x64xbf16>
    %cst_10 = arith.constant dense<0.000000e+00> : vector<60x96xf32>
    %9 = tpu.matmul %8, %1, %cst_10 {dimension_numbers = #tpu.dot_dimension_numbers<[1], [0], [0], [1], [0, 0, 1, 1], [], []>} : vector<60x64xbf16>, vector<64x96xbf16>, vector<60x96xf32> -> vector<60x96xf32>
    %10 = arith.truncf %9 : vector<60x96xf32> to vector<60x96xbf16>
    %c0_11 = arith.constant 0 : index
    %c0_12 = arith.constant 0 : index
    %11 = vector.load %arg5[%c0_11, %c0_12] : memref<96x480xbf16, #tpu.memory_space<vmem>>, vector<96x480xbf16>
    %cst_13 = arith.constant dense<0.000000e+00> : vector<60x480xf32>
    %12 = tpu.matmul %10, %11, %cst_13 {dimension_numbers = #tpu.dot_dimension_numbers<[1], [0], [0], [1], [0, 0, 1, 1], [], []>} : vector<60x96xbf16>, vector<96x480xbf16>, vector<60x480xf32> -> vector<60x480xf32>
    %13 = arith.addf %7, %12 : vector<60x480xf32>
    %c0_14 = arith.constant 0 : index
    %c0_15 = arith.constant 0 : index
    %14 = vector.load %arg3[%c0_14, %c0_15] : memref<60x64xbf16, #tpu.memory_space<vmem>>, vector<60x64xbf16>
    %cst_16 = arith.constant dense<0.000000e+00> : vector<60x96xf32>
    %15 = tpu.matmul %14, %1, %cst_16 {dimension_numbers = #tpu.dot_dimension_numbers<[1], [0], [0], [1], [0, 0, 1, 1], [], []>} : vector<60x64xbf16>, vector<64x96xbf16>, vector<60x96xf32> -> vector<60x96xf32>
    %16 = arith.truncf %15 : vector<60x96xf32> to vector<60x96xbf16>
    %c0_17 = arith.constant 0 : index
    %c0_18 = arith.constant 0 : index
    %17 = vector.load %arg6[%c0_17, %c0_18] : memref<96x480xbf16, #tpu.memory_space<vmem>>, vector<96x480xbf16>
    %cst_19 = arith.constant dense<0.000000e+00> : vector<60x480xf32>
    %18 = tpu.matmul %16, %17, %cst_19 {dimension_numbers = #tpu.dot_dimension_numbers<[1], [0], [0], [1], [0, 0, 1, 1], [], []>} : vector<60x96xbf16>, vector<96x480xbf16>, vector<60x480xf32> -> vector<60x480xf32>
    %19 = arith.addf %13, %18 : vector<60x480xf32>
    %20 = vector.broadcast %2 : vector<1x480xf32> to vector<60x480xf32>
    %21 = arith.addf %19, %20 : vector<60x480xf32>
    %cst_20 = arith.constant 0.000000e+00 : f32
    %22 = vector.broadcast %cst_20 : f32 to vector<60x480xf32>
    %23 = arith.maximumf %21, %22 : vector<60x480xf32>
    %24 = arith.truncf %23 : vector<60x480xf32> to vector<60x480xbf16>
    %c0_21 = arith.constant 0 : index
    %c0_22 = arith.constant 0 : index
    %25 = vector.load %arg14[%c0_21, %c0_22] : memref<1x448xf32, #tpu.memory_space<vmem>>, vector<1x448xf32>
    %c0_23 = arith.constant 0 : index
    %c0_24 = arith.constant 0 : index
    %26 = vector.load %arg8[%c0_23, %c0_24] : memref<56x60xbf16, #tpu.memory_space<vmem>>, vector<56x60xbf16>
    %cst_25 = arith.constant dense<0.000000e+00> : vector<56x480xf32>
    %27 = tpu.matmul %26, %24, %cst_25 {dimension_numbers = #tpu.dot_dimension_numbers<[1], [0], [0], [1], [0, 0, 1, 1], [], []>} : vector<56x60xbf16>, vector<60x480xbf16>, vector<56x480xf32> -> vector<56x480xf32>
    %28 = arith.truncf %27 : vector<56x480xf32> to vector<56x480xbf16>
    %c0_26 = arith.constant 0 : index
    %c0_27 = arith.constant 0 : index
    %29 = vector.load %arg11[%c0_26, %c0_27] : memref<480x448xbf16, #tpu.memory_space<vmem>>, vector<480x448xbf16>
    %cst_28 = arith.constant dense<0.000000e+00> : vector<56x448xf32>
    %30 = tpu.matmul %28, %29, %cst_28 {dimension_numbers = #tpu.dot_dimension_numbers<[1], [0], [0], [1], [0, 0, 1, 1], [], []>} : vector<56x480xbf16>, vector<480x448xbf16>, vector<56x448xf32> -> vector<56x448xf32>
    %c0_29 = arith.constant 0 : index
    %c0_30 = arith.constant 0 : index
    %31 = vector.load %arg9[%c0_29, %c0_30] : memref<56x60xbf16, #tpu.memory_space<vmem>>, vector<56x60xbf16>
    %cst_31 = arith.constant dense<0.000000e+00> : vector<56x480xf32>
    %32 = tpu.matmul %31, %24, %cst_31 {dimension_numbers = #tpu.dot_dimension_numbers<[1], [0], [0], [1], [0, 0, 1, 1], [], []>} : vector<56x60xbf16>, vector<60x480xbf16>, vector<56x480xf32> -> vector<56x480xf32>
    %33 = arith.truncf %32 : vector<56x480xf32> to vector<56x480xbf16>
    %c0_32 = arith.constant 0 : index
    %c0_33 = arith.constant 0 : index
    %34 = vector.load %arg12[%c0_32, %c0_33] : memref<480x448xbf16, #tpu.memory_space<vmem>>, vector<480x448xbf16>
    %cst_34 = arith.constant dense<0.000000e+00> : vector<56x448xf32>
    %35 = tpu.matmul %33, %34, %cst_34 {dimension_numbers = #tpu.dot_dimension_numbers<[1], [0], [0], [1], [0, 0, 1, 1], [], []>} : vector<56x480xbf16>, vector<480x448xbf16>, vector<56x448xf32> -> vector<56x448xf32>
    %36 = arith.addf %30, %35 : vector<56x448xf32>
    %c0_35 = arith.constant 0 : index
    %c0_36 = arith.constant 0 : index
    %37 = vector.load %arg10[%c0_35, %c0_36] : memref<56x60xbf16, #tpu.memory_space<vmem>>, vector<56x60xbf16>
    %cst_37 = arith.constant dense<0.000000e+00> : vector<56x480xf32>
    %38 = tpu.matmul %37, %24, %cst_37 {dimension_numbers = #tpu.dot_dimension_numbers<[1], [0], [0], [1], [0, 0, 1, 1], [], []>} : vector<56x60xbf16>, vector<60x480xbf16>, vector<56x480xf32> -> vector<56x480xf32>
    %39 = arith.truncf %38 : vector<56x480xf32> to vector<56x480xbf16>
    %c0_38 = arith.constant 0 : index
    %c0_39 = arith.constant 0 : index
    %40 = vector.load %arg13[%c0_38, %c0_39] : memref<480x448xbf16, #tpu.memory_space<vmem>>, vector<480x448xbf16>
    %cst_40 = arith.constant dense<0.000000e+00> : vector<56x448xf32>
    %41 = tpu.matmul %39, %40, %cst_40 {dimension_numbers = #tpu.dot_dimension_numbers<[1], [0], [0], [1], [0, 0, 1, 1], [], []>} : vector<56x480xbf16>, vector<480x448xbf16>, vector<56x448xf32> -> vector<56x448xf32>
    %42 = arith.addf %36, %41 : vector<56x448xf32>
    %43 = vector.broadcast %25 : vector<1x448xf32> to vector<56x448xf32>
    %44 = arith.addf %42, %43 : vector<56x448xf32>
    %cst_41 = arith.constant 0.000000e+00 : f32
    %45 = vector.broadcast %cst_41 : f32 to vector<56x448xf32>
    %46 = arith.maximumf %44, %45 : vector<56x448xf32>
    %47 = arith.truncf %46 : vector<56x448xf32> to vector<56x448xbf16>
    %c0_42 = arith.constant 0 : index
    %c0_43 = arith.constant 0 : index
    %48 = vector.load %arg21[%c0_42, %c0_43] : memref<1x416xf32, #tpu.memory_space<vmem>>, vector<1x416xf32>
    %c0_44 = arith.constant 0 : index
    %c0_45 = arith.constant 0 : index
    %49 = vector.load %arg15[%c0_44, %c0_45] : memref<26x56xbf16, #tpu.memory_space<vmem>>, vector<26x56xbf16>
    %cst_46 = arith.constant dense<0.000000e+00> : vector<26x448xf32>
    %50 = tpu.matmul %49, %47, %cst_46 {dimension_numbers = #tpu.dot_dimension_numbers<[1], [0], [0], [1], [0, 0, 1, 1], [], []>} : vector<26x56xbf16>, vector<56x448xbf16>, vector<26x448xf32> -> vector<26x448xf32>
    %51 = arith.truncf %50 : vector<26x448xf32> to vector<26x448xbf16>
    %c0_47 = arith.constant 0 : index
    %c0_48 = arith.constant 0 : index
    %52 = vector.load %arg18[%c0_47, %c0_48] : memref<448x416xbf16, #tpu.memory_space<vmem>>, vector<448x416xbf16>
    %cst_49 = arith.constant dense<0.000000e+00> : vector<26x416xf32>
    %53 = tpu.matmul %51, %52, %cst_49 {dimension_numbers = #tpu.dot_dimension_numbers<[1], [0], [0], [1], [0, 0, 1, 1], [], []>} : vector<26x448xbf16>, vector<448x416xbf16>, vector<26x416xf32> -> vector<26x416xf32>
    %c0_50 = arith.constant 0 : index
    %c0_51 = arith.constant 0 : index
    %54 = vector.load %arg16[%c0_50, %c0_51] : memref<26x56xbf16, #tpu.memory_space<vmem>>, vector<26x56xbf16>
    %cst_52 = arith.constant dense<0.000000e+00> : vector<26x448xf32>
    %55 = tpu.matmul %54, %47, %cst_52 {dimension_numbers = #tpu.dot_dimension_numbers<[1], [0], [0], [1], [0, 0, 1, 1], [], []>} : vector<26x56xbf16>, vector<56x448xbf16>, vector<26x448xf32> -> vector<26x448xf32>
    %56 = arith.truncf %55 : vector<26x448xf32> to vector<26x448xbf16>
    %c0_53 = arith.constant 0 : index
    %c0_54 = arith.constant 0 : index
    %57 = vector.load %arg19[%c0_53, %c0_54] : memref<448x416xbf16, #tpu.memory_space<vmem>>, vector<448x416xbf16>
    %cst_55 = arith.constant dense<0.000000e+00> : vector<26x416xf32>
    %58 = tpu.matmul %56, %57, %cst_55 {dimension_numbers = #tpu.dot_dimension_numbers<[1], [0], [0], [1], [0, 0, 1, 1], [], []>} : vector<26x448xbf16>, vector<448x416xbf16>, vector<26x416xf32> -> vector<26x416xf32>
    %59 = arith.addf %53, %58 : vector<26x416xf32>
    %c0_56 = arith.constant 0 : index
    %c0_57 = arith.constant 0 : index
    %60 = vector.load %arg17[%c0_56, %c0_57] : memref<26x56xbf16, #tpu.memory_space<vmem>>, vector<26x56xbf16>
    %cst_58 = arith.constant dense<0.000000e+00> : vector<26x448xf32>
    %61 = tpu.matmul %60, %47, %cst_58 {dimension_numbers = #tpu.dot_dimension_numbers<[1], [0], [0], [1], [0, 0, 1, 1], [], []>} : vector<26x56xbf16>, vector<56x448xbf16>, vector<26x448xf32> -> vector<26x448xf32>
    %62 = arith.truncf %61 : vector<26x448xf32> to vector<26x448xbf16>
    %c0_59 = arith.constant 0 : index
    %c0_60 = arith.constant 0 : index
    %63 = vector.load %arg20[%c0_59, %c0_60] : memref<448x416xbf16, #tpu.memory_space<vmem>>, vector<448x416xbf16>
    %cst_61 = arith.constant dense<0.000000e+00> : vector<26x416xf32>
    %64 = tpu.matmul %62, %63, %cst_61 {dimension_numbers = #tpu.dot_dimension_numbers<[1], [0], [0], [1], [0, 0, 1, 1], [], []>} : vector<26x448xbf16>, vector<448x416xbf16>, vector<26x416xf32> -> vector<26x416xf32>
    %65 = arith.addf %59, %64 : vector<26x416xf32>
    %66 = vector.broadcast %48 : vector<1x416xf32> to vector<26x416xf32>
    %67 = arith.addf %65, %66 : vector<26x416xf32>
    %cst_62 = arith.constant 0.000000e+00 : f32
    %68 = vector.broadcast %cst_62 : f32 to vector<26x416xf32>
    %69 = arith.maximumf %67, %68 : vector<26x416xf32>
    %70 = arith.truncf %69 : vector<26x416xf32> to vector<26x416xbf16>
    %c0_63 = arith.constant 0 : index
    %c0_64 = arith.constant 0 : index
    %71 = vector.load %arg28[%c0_63, %c0_64] : memref<1x352xf32, #tpu.memory_space<vmem>>, vector<1x352xf32>
    %c0_65 = arith.constant 0 : index
    %c0_66 = arith.constant 0 : index
    %72 = vector.load %arg22[%c0_65, %c0_66] : memref<22x26xbf16, #tpu.memory_space<vmem>>, vector<22x26xbf16>
    %cst_67 = arith.constant dense<0.000000e+00> : vector<22x416xf32>
    %73 = tpu.matmul %72, %70, %cst_67 {dimension_numbers = #tpu.dot_dimension_numbers<[1], [0], [0], [1], [0, 0, 1, 1], [], []>} : vector<22x26xbf16>, vector<26x416xbf16>, vector<22x416xf32> -> vector<22x416xf32>
    %74 = arith.truncf %73 : vector<22x416xf32> to vector<22x416xbf16>
    %c0_68 = arith.constant 0 : index
    %c0_69 = arith.constant 0 : index
    %75 = vector.load %arg25[%c0_68, %c0_69] : memref<416x352xbf16, #tpu.memory_space<vmem>>, vector<416x352xbf16>
    %cst_70 = arith.constant dense<0.000000e+00> : vector<22x352xf32>
    %76 = tpu.matmul %74, %75, %cst_70 {dimension_numbers = #tpu.dot_dimension_numbers<[1], [0], [0], [1], [0, 0, 1, 1], [], []>} : vector<22x416xbf16>, vector<416x352xbf16>, vector<22x352xf32> -> vector<22x352xf32>
    %c0_71 = arith.constant 0 : index
    %c0_72 = arith.constant 0 : index
    %77 = vector.load %arg23[%c0_71, %c0_72] : memref<22x26xbf16, #tpu.memory_space<vmem>>, vector<22x26xbf16>
    %cst_73 = arith.constant dense<0.000000e+00> : vector<22x416xf32>
    %78 = tpu.matmul %77, %70, %cst_73 {dimension_numbers = #tpu.dot_dimension_numbers<[1], [0], [0], [1], [0, 0, 1, 1], [], []>} : vector<22x26xbf16>, vector<26x416xbf16>, vector<22x416xf32> -> vector<22x416xf32>
    %79 = arith.truncf %78 : vector<22x416xf32> to vector<22x416xbf16>
    %c0_74 = arith.constant 0 : index
    %c0_75 = arith.constant 0 : index
    %80 = vector.load %arg26[%c0_74, %c0_75] : memref<416x352xbf16, #tpu.memory_space<vmem>>, vector<416x352xbf16>
    %cst_76 = arith.constant dense<0.000000e+00> : vector<22x352xf32>
    %81 = tpu.matmul %79, %80, %cst_76 {dimension_numbers = #tpu.dot_dimension_numbers<[1], [0], [0], [1], [0, 0, 1, 1], [], []>} : vector<22x416xbf16>, vector<416x352xbf16>, vector<22x352xf32> -> vector<22x352xf32>
    %82 = arith.addf %76, %81 : vector<22x352xf32>
    %c0_77 = arith.constant 0 : index
    %c0_78 = arith.constant 0 : index
    %83 = vector.load %arg24[%c0_77, %c0_78] : memref<22x26xbf16, #tpu.memory_space<vmem>>, vector<22x26xbf16>
    %cst_79 = arith.constant dense<0.000000e+00> : vector<22x416xf32>
    %84 = tpu.matmul %83, %70, %cst_79 {dimension_numbers = #tpu.dot_dimension_numbers<[1], [0], [0], [1], [0, 0, 1, 1], [], []>} : vector<22x26xbf16>, vector<26x416xbf16>, vector<22x416xf32> -> vector<22x416xf32>
    %85 = arith.truncf %84 : vector<22x416xf32> to vector<22x416xbf16>
    %c0_80 = arith.constant 0 : index
    %c0_81 = arith.constant 0 : index
    %86 = vector.load %arg27[%c0_80, %c0_81] : memref<416x352xbf16, #tpu.memory_space<vmem>>, vector<416x352xbf16>
    %cst_82 = arith.constant dense<0.000000e+00> : vector<22x352xf32>
    %87 = tpu.matmul %85, %86, %cst_82 {dimension_numbers = #tpu.dot_dimension_numbers<[1], [0], [0], [1], [0, 0, 1, 1], [], []>} : vector<22x416xbf16>, vector<416x352xbf16>, vector<22x352xf32> -> vector<22x352xf32>
    %88 = arith.addf %82, %87 : vector<22x352xf32>
    %89 = vector.broadcast %71 : vector<1x352xf32> to vector<22x352xf32>
    %90 = arith.addf %88, %89 : vector<22x352xf32>
    %cst_83 = arith.constant 0.000000e+00 : f32
    %91 = vector.broadcast %cst_83 : f32 to vector<22x352xf32>
    %92 = arith.maximumf %90, %91 : vector<22x352xf32>
    %93 = arith.truncf %92 : vector<22x352xf32> to vector<22x352xbf16>
    %c0_84 = arith.constant 0 : index
    %c0_85 = arith.constant 0 : index
    %94 = vector.load %arg35[%c0_84, %c0_85] : memref<1x288xf32, #tpu.memory_space<vmem>>, vector<1x288xf32>
    %c0_86 = arith.constant 0 : index
    %c0_87 = arith.constant 0 : index
    %95 = vector.load %arg29[%c0_86, %c0_87] : memref<18x22xbf16, #tpu.memory_space<vmem>>, vector<18x22xbf16>
    %cst_88 = arith.constant dense<0.000000e+00> : vector<18x352xf32>
    %96 = tpu.matmul %95, %93, %cst_88 {dimension_numbers = #tpu.dot_dimension_numbers<[1], [0], [0], [1], [0, 0, 1, 1], [], []>} : vector<18x22xbf16>, vector<22x352xbf16>, vector<18x352xf32> -> vector<18x352xf32>
    %97 = arith.truncf %96 : vector<18x352xf32> to vector<18x352xbf16>
    %c0_89 = arith.constant 0 : index
    %c0_90 = arith.constant 0 : index
    %98 = vector.load %arg32[%c0_89, %c0_90] : memref<352x288xbf16, #tpu.memory_space<vmem>>, vector<352x288xbf16>
    %cst_91 = arith.constant dense<0.000000e+00> : vector<18x288xf32>
    %99 = tpu.matmul %97, %98, %cst_91 {dimension_numbers = #tpu.dot_dimension_numbers<[1], [0], [0], [1], [0, 0, 1, 1], [], []>} : vector<18x352xbf16>, vector<352x288xbf16>, vector<18x288xf32> -> vector<18x288xf32>
    %c0_92 = arith.constant 0 : index
    %c0_93 = arith.constant 0 : index
    %100 = vector.load %arg30[%c0_92, %c0_93] : memref<18x22xbf16, #tpu.memory_space<vmem>>, vector<18x22xbf16>
    %cst_94 = arith.constant dense<0.000000e+00> : vector<18x352xf32>
    %101 = tpu.matmul %100, %93, %cst_94 {dimension_numbers = #tpu.dot_dimension_numbers<[1], [0], [0], [1], [0, 0, 1, 1], [], []>} : vector<18x22xbf16>, vector<22x352xbf16>, vector<18x352xf32> -> vector<18x352xf32>
    %102 = arith.truncf %101 : vector<18x352xf32> to vector<18x352xbf16>
    %c0_95 = arith.constant 0 : index
    %c0_96 = arith.constant 0 : index
    %103 = vector.load %arg33[%c0_95, %c0_96] : memref<352x288xbf16, #tpu.memory_space<vmem>>, vector<352x288xbf16>
    %cst_97 = arith.constant dense<0.000000e+00> : vector<18x288xf32>
    %104 = tpu.matmul %102, %103, %cst_97 {dimension_numbers = #tpu.dot_dimension_numbers<[1], [0], [0], [1], [0, 0, 1, 1], [], []>} : vector<18x352xbf16>, vector<352x288xbf16>, vector<18x288xf32> -> vector<18x288xf32>
    %105 = arith.addf %99, %104 : vector<18x288xf32>
    %c0_98 = arith.constant 0 : index
    %c0_99 = arith.constant 0 : index
    %106 = vector.load %arg31[%c0_98, %c0_99] : memref<18x22xbf16, #tpu.memory_space<vmem>>, vector<18x22xbf16>
    %cst_100 = arith.constant dense<0.000000e+00> : vector<18x352xf32>
    %107 = tpu.matmul %106, %93, %cst_100 {dimension_numbers = #tpu.dot_dimension_numbers<[1], [0], [0], [1], [0, 0, 1, 1], [], []>} : vector<18x22xbf16>, vector<22x352xbf16>, vector<18x352xf32> -> vector<18x352xf32>
    %108 = arith.truncf %107 : vector<18x352xf32> to vector<18x352xbf16>
    %c0_101 = arith.constant 0 : index
    %c0_102 = arith.constant 0 : index
    %109 = vector.load %arg34[%c0_101, %c0_102] : memref<352x288xbf16, #tpu.memory_space<vmem>>, vector<352x288xbf16>
    %cst_103 = arith.constant dense<0.000000e+00> : vector<18x288xf32>
    %110 = tpu.matmul %108, %109, %cst_103 {dimension_numbers = #tpu.dot_dimension_numbers<[1], [0], [0], [1], [0, 0, 1, 1], [], []>} : vector<18x352xbf16>, vector<352x288xbf16>, vector<18x288xf32> -> vector<18x288xf32>
    %111 = arith.addf %105, %110 : vector<18x288xf32>
    %112 = vector.broadcast %94 : vector<1x288xf32> to vector<18x288xf32>
    %113 = arith.addf %111, %112 : vector<18x288xf32>
    %cst_104 = arith.constant 0.000000e+00 : f32
    %114 = vector.broadcast %cst_104 : f32 to vector<18x288xf32>
    %115 = arith.maximumf %113, %114 : vector<18x288xf32>
    %116 = arith.truncf %115 : vector<18x288xf32> to vector<18x288xbf16>
    %c0_105 = arith.constant 0 : index
    %c0_106 = arith.constant 0 : index
    %117 = vector.load %arg42[%c0_105, %c0_106] : memref<1x256xf32, #tpu.memory_space<vmem>>, vector<1x256xf32>
    %c0_107 = arith.constant 0 : index
    %c0_108 = arith.constant 0 : index
    %118 = vector.load %arg36[%c0_107, %c0_108] : memref<8x18xbf16, #tpu.memory_space<vmem>>, vector<8x18xbf16>
    %cst_109 = arith.constant dense<0.000000e+00> : vector<8x288xf32>
    %119 = tpu.matmul %118, %116, %cst_109 {dimension_numbers = #tpu.dot_dimension_numbers<[1], [0], [0], [1], [0, 0, 1, 1], [], []>} : vector<8x18xbf16>, vector<18x288xbf16>, vector<8x288xf32> -> vector<8x288xf32>
    %120 = arith.truncf %119 : vector<8x288xf32> to vector<8x288xbf16>
    %c0_110 = arith.constant 0 : index
    %c0_111 = arith.constant 0 : index
    %121 = vector.load %arg39[%c0_110, %c0_111] : memref<288x256xbf16, #tpu.memory_space<vmem>>, vector<288x256xbf16>
    %cst_112 = arith.constant dense<0.000000e+00> : vector<8x256xf32>
    %122 = tpu.matmul %120, %121, %cst_112 {dimension_numbers = #tpu.dot_dimension_numbers<[1], [0], [0], [1], [0, 0, 1, 1], [], []>} : vector<8x288xbf16>, vector<288x256xbf16>, vector<8x256xf32> -> vector<8x256xf32>
    %c0_113 = arith.constant 0 : index
    %c0_114 = arith.constant 0 : index
    %123 = vector.load %arg37[%c0_113, %c0_114] : memref<8x18xbf16, #tpu.memory_space<vmem>>, vector<8x18xbf16>
    %cst_115 = arith.constant dense<0.000000e+00> : vector<8x288xf32>
    %124 = tpu.matmul %123, %116, %cst_115 {dimension_numbers = #tpu.dot_dimension_numbers<[1], [0], [0], [1], [0, 0, 1, 1], [], []>} : vector<8x18xbf16>, vector<18x288xbf16>, vector<8x288xf32> -> vector<8x288xf32>
    %125 = arith.truncf %124 : vector<8x288xf32> to vector<8x288xbf16>
    %c0_116 = arith.constant 0 : index
    %c0_117 = arith.constant 0 : index
    %126 = vector.load %arg40[%c0_116, %c0_117] : memref<288x256xbf16, #tpu.memory_space<vmem>>, vector<288x256xbf16>
    %cst_118 = arith.constant dense<0.000000e+00> : vector<8x256xf32>
    %127 = tpu.matmul %125, %126, %cst_118 {dimension_numbers = #tpu.dot_dimension_numbers<[1], [0], [0], [1], [0, 0, 1, 1], [], []>} : vector<8x288xbf16>, vector<288x256xbf16>, vector<8x256xf32> -> vector<8x256xf32>
    %128 = arith.addf %122, %127 : vector<8x256xf32>
    %c0_119 = arith.constant 0 : index
    %c0_120 = arith.constant 0 : index
    %129 = vector.load %arg38[%c0_119, %c0_120] : memref<8x18xbf16, #tpu.memory_space<vmem>>, vector<8x18xbf16>
    %cst_121 = arith.constant dense<0.000000e+00> : vector<8x288xf32>
    %130 = tpu.matmul %129, %116, %cst_121 {dimension_numbers = #tpu.dot_dimension_numbers<[1], [0], [0], [1], [0, 0, 1, 1], [], []>} : vector<8x18xbf16>, vector<18x288xbf16>, vector<8x288xf32> -> vector<8x288xf32>
    %131 = arith.truncf %130 : vector<8x288xf32> to vector<8x288xbf16>
    %c0_122 = arith.constant 0 : index
    %c0_123 = arith.constant 0 : index
    %132 = vector.load %arg41[%c0_122, %c0_123] : memref<288x256xbf16, #tpu.memory_space<vmem>>, vector<288x256xbf16>
    %cst_124 = arith.constant dense<0.000000e+00> : vector<8x256xf32>
    %133 = tpu.matmul %131, %132, %cst_124 {dimension_numbers = #tpu.dot_dimension_numbers<[1], [0], [0], [1], [0, 0, 1, 1], [], []>} : vector<8x288xbf16>, vector<288x256xbf16>, vector<8x256xf32> -> vector<8x256xf32>
    %134 = arith.addf %128, %133 : vector<8x256xf32>
    %135 = vector.broadcast %117 : vector<1x256xf32> to vector<8x256xf32>
    %136 = arith.addf %134, %135 : vector<8x256xf32>
    %cst_125 = arith.constant 0.000000e+00 : f32
    %137 = vector.broadcast %cst_125 : f32 to vector<8x256xf32>
    %138 = arith.maximumf %136, %137 : vector<8x256xf32>
    %139 = arith.truncf %138 : vector<8x256xf32> to vector<8x256xbf16>
    %c0_126 = arith.constant 0 : index
    %c0_127 = arith.constant 0 : index
    %140 = vector.load %arg49[%c0_126, %c0_127] : memref<1x128xf32, #tpu.memory_space<vmem>>, vector<1x128xf32>
    %c0_128 = arith.constant 0 : index
    %c0_129 = arith.constant 0 : index
    %141 = vector.load %arg43[%c0_128, %c0_129] : memref<4x8xbf16, #tpu.memory_space<vmem>>, vector<4x8xbf16>
    %cst_130 = arith.constant dense<0.000000e+00> : vector<4x256xf32>
    %142 = tpu.matmul %141, %139, %cst_130 {dimension_numbers = #tpu.dot_dimension_numbers<[1], [0], [0], [1], [0, 0, 1, 1], [], []>} : vector<4x8xbf16>, vector<8x256xbf16>, vector<4x256xf32> -> vector<4x256xf32>
    %143 = arith.truncf %142 : vector<4x256xf32> to vector<4x256xbf16>
    %c0_131 = arith.constant 0 : index
    %c0_132 = arith.constant 0 : index
    %144 = vector.load %arg46[%c0_131, %c0_132] : memref<256x128xbf16, #tpu.memory_space<vmem>>, vector<256x128xbf16>
    %cst_133 = arith.constant dense<0.000000e+00> : vector<4x128xf32>
    %145 = tpu.matmul %143, %144, %cst_133 {dimension_numbers = #tpu.dot_dimension_numbers<[1], [0], [0], [1], [0, 0, 1, 1], [], []>} : vector<4x256xbf16>, vector<256x128xbf16>, vector<4x128xf32> -> vector<4x128xf32>
    %c0_134 = arith.constant 0 : index
    %c0_135 = arith.constant 0 : index
    %146 = vector.load %arg44[%c0_134, %c0_135] : memref<4x8xbf16, #tpu.memory_space<vmem>>, vector<4x8xbf16>
    %cst_136 = arith.constant dense<0.000000e+00> : vector<4x256xf32>
    %147 = tpu.matmul %146, %139, %cst_136 {dimension_numbers = #tpu.dot_dimension_numbers<[1], [0], [0], [1], [0, 0, 1, 1], [], []>} : vector<4x8xbf16>, vector<8x256xbf16>, vector<4x256xf32> -> vector<4x256xf32>
    %148 = arith.truncf %147 : vector<4x256xf32> to vector<4x256xbf16>
    %c0_137 = arith.constant 0 : index
    %c0_138 = arith.constant 0 : index
    %149 = vector.load %arg47[%c0_137, %c0_138] : memref<256x128xbf16, #tpu.memory_space<vmem>>, vector<256x128xbf16>
    %cst_139 = arith.constant dense<0.000000e+00> : vector<4x128xf32>
    %150 = tpu.matmul %148, %149, %cst_139 {dimension_numbers = #tpu.dot_dimension_numbers<[1], [0], [0], [1], [0, 0, 1, 1], [], []>} : vector<4x256xbf16>, vector<256x128xbf16>, vector<4x128xf32> -> vector<4x128xf32>
    %151 = arith.addf %145, %150 : vector<4x128xf32>
    %c0_140 = arith.constant 0 : index
    %c0_141 = arith.constant 0 : index
    %152 = vector.load %arg45[%c0_140, %c0_141] : memref<4x8xbf16, #tpu.memory_space<vmem>>, vector<4x8xbf16>
    %cst_142 = arith.constant dense<0.000000e+00> : vector<4x256xf32>
    %153 = tpu.matmul %152, %139, %cst_142 {dimension_numbers = #tpu.dot_dimension_numbers<[1], [0], [0], [1], [0, 0, 1, 1], [], []>} : vector<4x8xbf16>, vector<8x256xbf16>, vector<4x256xf32> -> vector<4x256xf32>
    %154 = arith.truncf %153 : vector<4x256xf32> to vector<4x256xbf16>
    %c0_143 = arith.constant 0 : index
    %c0_144 = arith.constant 0 : index
    %155 = vector.load %arg48[%c0_143, %c0_144] : memref<256x128xbf16, #tpu.memory_space<vmem>>, vector<256x128xbf16>
    %cst_145 = arith.constant dense<0.000000e+00> : vector<4x128xf32>
    %156 = tpu.matmul %154, %155, %cst_145 {dimension_numbers = #tpu.dot_dimension_numbers<[1], [0], [0], [1], [0, 0, 1, 1], [], []>} : vector<4x256xbf16>, vector<256x128xbf16>, vector<4x128xf32> -> vector<4x128xf32>
    %157 = arith.addf %151, %156 : vector<4x128xf32>
    %158 = vector.broadcast %140 : vector<1x128xf32> to vector<4x128xf32>
    %159 = arith.addf %157, %158 : vector<4x128xf32>
    %cst_146 = arith.constant 0.000000e+00 : f32
    %160 = vector.broadcast %cst_146 : f32 to vector<4x128xf32>
    %161 = arith.maximumf %159, %160 : vector<4x128xf32>
    %162 = arith.truncf %161 : vector<4x128xf32> to vector<4x128xbf16>
    %c0_147 = arith.constant 0 : index
    %c0_148 = arith.constant 0 : index
    %163 = vector.load %arg52[%c0_147, %c0_148] : memref<1x128xf32, #tpu.memory_space<vmem>>, vector<1x128xf32>
    %c0_149 = arith.constant 0 : index
    %c0_150 = arith.constant 0 : index
    %164 = vector.load %arg50[%c0_149, %c0_150] : memref<4x4xbf16, #tpu.memory_space<vmem>>, vector<4x4xbf16>
    %cst_151 = arith.constant dense<0.000000e+00> : vector<4x128xf32>
    %165 = tpu.matmul %164, %162, %cst_151 {dimension_numbers = #tpu.dot_dimension_numbers<[1], [0], [0], [1], [0, 0, 1, 1], [], []>} : vector<4x4xbf16>, vector<4x128xbf16>, vector<4x128xf32> -> vector<4x128xf32>
    %166 = arith.truncf %165 : vector<4x128xf32> to vector<4x128xbf16>
    %c0_152 = arith.constant 0 : index
    %c0_153 = arith.constant 0 : index
    %167 = vector.load %arg51[%c0_152, %c0_153] : memref<128x128xbf16, #tpu.memory_space<vmem>>, vector<128x128xbf16>
    %cst_154 = arith.constant dense<0.000000e+00> : vector<4x128xf32>
    %168 = tpu.matmul %166, %167, %cst_154 {dimension_numbers = #tpu.dot_dimension_numbers<[1], [0], [0], [1], [0, 0, 1, 1], [], []>} : vector<4x128xbf16>, vector<128x128xbf16>, vector<4x128xf32> -> vector<4x128xf32>
    %169 = vector.broadcast %163 : vector<1x128xf32> to vector<4x128xf32>
    %170 = arith.addf %168, %169 : vector<4x128xf32>
    %cst_155 = arith.constant 0.000000e+00 : f32
    %171 = vector.broadcast %cst_155 : f32 to vector<4x128xf32>
    %172 = arith.maximumf %170, %171 : vector<4x128xf32>
    %173 = arith.truncf %172 : vector<4x128xf32> to vector<4x128xbf16>
    %c0_156 = arith.constant 0 : index
    %c0_157 = arith.constant 0 : index
    %174 = vector.load %arg53[%c0_156, %c0_157] : memref<2x4xf32, #tpu.memory_space<vmem>>, vector<2x4xf32>
    %175 = arith.extf %173 : vector<4x128xbf16> to vector<4x128xf32>
    %cst_158 = arith.constant dense<0.000000e+00> : vector<2x128xf32>
    %176 = tpu.matmul %174, %175, %cst_158 {dimension_numbers = #tpu.dot_dimension_numbers<[1], [0], [0], [1], [0, 0, 1, 1], [], []>} : vector<2x4xf32>, vector<4x128xf32>, vector<2x128xf32> -> vector<2x128xf32>
    %c0_159 = arith.constant 0 : index
    %c0_160 = arith.constant 0 : index
    %177 = vector.load %arg54[%c0_159, %c0_160] : memref<128x10xf32, #tpu.memory_space<vmem>>, vector<128x10xf32>
    %cst_161 = arith.constant dense<0.000000e+00> : vector<2x10xf32>
    %178 = tpu.matmul %176, %177, %cst_161 {dimension_numbers = #tpu.dot_dimension_numbers<[1], [0], [0], [1], [0, 0, 1, 1], [], []>} : vector<2x128xf32>, vector<128x10xf32>, vector<2x10xf32> -> vector<2x10xf32>
    %c0_162 = arith.constant 0 : index
    %c0_163 = arith.constant 0 : index
    %179 = vector.load %arg55[%c0_162, %c0_163] : memref<1x10xf32, #tpu.memory_space<vmem>>, vector<1x10xf32>
    %180 = vector.broadcast %179 : vector<1x10xf32> to vector<2x10xf32>
    %181 = arith.addf %178, %180 : vector<2x10xf32>
    %c0_164 = arith.constant 0 : index
    %c0_165 = arith.constant 0 : index
    %182 = vector.load %arg56[%c0_164, %c0_165] : memref<2x10xf32, #tpu.memory_space<vmem>>, vector<2x10xf32>
    tpu.vector_store %arg56[%c0_164, %c0_165], %181 {strides = array<i32>} : memref<2x10xf32, #tpu.memory_space<vmem>>, vector<2x10xf32>,
    return
  }
}

</mosaic_0001>

<bundles_post_ra>
// kernel: forward.1
= control target key start
LH: loop header
LB: loop body
LE: loop exit
PB: predicated region body
PF: predicated region fallthrough
CT: control target
= control target key end

     0   :  { %s20708_s6 = smov 1   ;;  %s20709_s10 = smov 2   ;;  %s23681_s0 = inlined_call_operand.smem [shape: u32[57], index: -1, kind: input, shape index: {}] }
   0x1   :  { %s20787_s5 = sld [smem:[%s23681_s0]]   ;;  %s20710_s14 = smov 3  }
   0x2   :  { %s20792_s9 = sld [smem:[%s23681_s0 + %s20708_s6]]   ;;  %s20711_s18 = smov 4  }
   0x3   :  { %s20797_s13 = sld [smem:[%s23681_s0 + %s20709_s10]]   ;;  %s20712_s22 = smov 5  }
   0x4   :  { %s20802_s17 = sld [smem:[%s23681_s0 + %s20710_s14]]   ;;  %s20713_s26 = smov 6  }
   0x5   :  { %s20807_s21 = sld [smem:[%s23681_s0 + %s20711_s18]]   ;;  %s20714_s30 = smov 7  }
   0x6   :  { %s20812_s25 = sld [smem:[%s23681_s0 + %s20712_s22]]   ;;  %s20715_s4 = smov 8  }
   0x7   :  { %s20817_s29 = sld [smem:[%s23681_s0 + %s20713_s26]]   ;;  %s20716_s10 = smov 9  }
   0x8   :  { %s20822_s3 = sld [smem:[%s23681_s0 + %s20714_s30]]   ;;  %s20717_s15 = smov 10  }
   0x9   :  { %s20827_s8 = sld [smem:[%s23681_s0 + %s20715_s4]]   ;;  %s20718_s20 = smov 11  }
   0xa   :  { %23714 = sst [smem:[#allocation27_spill]] %s20802_s17  ;;  %s20719_s26 = smov 12  }
   0xb   :  { %s20832_s14 = sld [smem:[%s23681_s0 + %s20716_s10]]   ;;  %s20720_s1 = smov 13  }
   0xc   :  { %s20837_s19 = sld [smem:[%s23681_s0 + %s20717_s15]]   ;;  %s20721_s7 = smov 14  }
   0xd   :  { %s20842_s24 = sld [smem:[%s23681_s0 + %s20718_s20]]   ;;  %s20722_s15 = smov 15  }
   0xe   :  { %23715 = sst [smem:[#allocation28_spill]] %s20822_s3  ;;  %s20723_s22 = smov 16  }
   0xf   :  { %23716 = sst [smem:[#allocation29_spill]] %s20827_s8  ;;  %s20724_s28 = smov 17  }
  0x10   :  { %s20847_s30 = sld [smem:[%s23681_s0 + %s20719_s26]]  }
  0x11   :  { %23717 = sst [smem:[#allocation30_spill]] %s20832_s14 }
  0x12   :  { %23718 = sst [smem:[#allocation31_spill]] %s20837_s19 }
  0x13   :  { %23719 = sst [smem:[#allocation32_spill]] %s20842_s24 }
  0x14   :  { %s20852_s6 = sld [smem:[%s23681_s0 + %s20720_s1]]  }
  0x15   :  { %s20857_s12 = sld [smem:[%s23681_s0 + %s20721_s7]]   ;;  %s20725_s7 = smov 18  }
  0x16   :  { %23720 = sst [smem:[#allocation33_spill]] %s20847_s30 }
  0x17   :  { %s20862_s20 = sld [smem:[%s23681_s0 + %s20722_s15]]   ;;  %s20726_s15 = smov 19  }
  0x18   :  { %s20867_s27 = sld [smem:[%s23681_s0 + %s20723_s22]]   ;;  %s20727_s22 = smov 20  }
  0x19   :  { %s20872_s4 = sld [smem:[%s23681_s0 + %s20724_s28]]   ;;  %s20728_s28 = smov 21  }
  0x1a   :  { %23721 = sst [smem:[#allocation34_spill]] %s20852_s6 }
  0x1b   :  { %23722 = sst [smem:[#allocation35_spill]] %s20857_s12 }
  0x1c   :  { %s20877_s12 = sld [smem:[%s23681_s0 + %s20725_s7]]   ;;  %s20729_s7 = smov 22  }
  0x1d   :  { %23723 = sst [smem:[#allocation36_spill]] %s20862_s20 }
  0x1e   :  { %23724 = sst [smem:[#allocation37_spill]] %s20867_s27 }
  0x1f   :  { %23725 = sst [smem:[#allocation38_spill]] %s20872_s4 }
  0x20   :  { %s20882_s20 = sld [smem:[%s23681_s0 + %s20726_s15]]   ;;  %s20730_s15 = smov 23  }
  0x21   :  { %s20887_s27 = sld [smem:[%s23681_s0 + %s20727_s22]]   ;;  %s20731_s22 = smov 24  }
  0x22   :  { %23726 = sst [smem:[#allocation39_spill]] %s20877_s12 }
  0x23   :  { %s20892_s4 = sld [smem:[%s23681_s0 + %s20728_s28]]   ;;  %s20732_s28 = smov 25  }
  0x24   :  { %s20897_s12 = sld [smem:[%s23681_s0 + %s20729_s7]]   ;;  %s20733_s7 = smov 26  }
  0x26   :  { %23727 = sst [smem:[#allocation40_spill]] %s20882_s20 }
  0x27   :  { %23728 = sst [smem:[#allocation41_spill]] %s20887_s27 }
  0x28   :  { %s20902_s20 = sld [smem:[%s23681_s0 + %s20730_s15]]   ;;  %s20734_s15 = smov 27  }
  0x29   :  { %23729 = sst [smem:[#allocation42_spill]] %s20892_s4 }
  0x2a   :  { %23730 = sst [smem:[#allocation43_spill]] %s20897_s12 }
  0x2b   :  { %s20907_s27 = sld [smem:[%s23681_s0 + %s20731_s22]]   ;;  %s20735_s22 = smov 28  }
  0x2c   :  { %s20912_s4 = sld [smem:[%s23681_s0 + %s20732_s28]]   ;;  %s20736_s28 = smov 29  }
  0x2d   :  { %s20917_s12 = sld [smem:[%s23681_s0 + %s20733_s7]]   ;;  %s20737_s7 = smov 30  }
  0x2e   :  { %23731 = sst [smem:[#allocation44_spill]] %s20902_s20 }
  0x2f   :  { %s20922_s20 = sld [smem:[%s23681_s0 + %s20734_s15]]   ;;  %s20738_s15 = smov 31  }
  0x31   :  { %23732 = sst [smem:[#allocation45_spill]] %s20907_s27 }
  0x32   :  { %23733 = sst [smem:[#allocation46_spill]] %s20912_s4 }
  0x33   :  { %23734 = sst [smem:[#allocation47_spill]] %s20917_s12 }
  0x34   :  { %s20927_s27 = sld [smem:[%s23681_s0 + %s20735_s22]]   ;;  %s20739_s22 = smov 32  }
  0x35   :  { %23735 = sst [smem:[#allocation48_spill]] %s20922_s20 }
  0x36   :  { %s20932_s4 = sld [smem:[%s23681_s0 + %s20736_s28]]   ;;  %s20740_s28 = smov 33  }
  0x37   :  { %s20937_s12 = sld [smem:[%s23681_s0 + %s20737_s7]]   ;;  %s20741_s7 = smov 34  }
  0x38   :  { %s20942_s20 = sld [smem:[%s23681_s0 + %s20738_s15]]   ;;  %s20742_s15 = smov 35  }
  0x3a   :  { %23736 = sst [smem:[#allocation49_spill]] %s20927_s27 }
  0x3b   :  { %s20947_s27 = sld [smem:[%s23681_s0 + %s20739_s22]]   ;;  %s20743_s22 = smov 36  }
  0x3c   :  { %23737 = sst [smem:[#allocation50_spill]] %s20932_s4 }
  0x3d   :  { %23738 = sst [smem:[#allocation51_spill]] %s20937_s12 }
  0x3e   :  { %23739 = sst [smem:[#allocation52_spill]] %s20942_s20 }
  0x3f   :  { %s20952_s4 = sld [smem:[%s23681_s0 + %s20740_s28]]   ;;  %s20744_s28 = smov 37  }
  0x40   :  { %s20957_s12 = sld [smem:[%s23681_s0 + %s20741_s7]]   ;;  %s20745_s7 = smov 38  }
  0x41   :  { %23740 = sst [smem:[#allocation53_spill]] %s20947_s27 }
  0x42   :  { %s20962_s20 = sld [smem:[%s23681_s0 + %s20742_s15]]   ;;  %s20746_s15 = smov 39  }
  0x43   :  { %s20967_s27 = sld [smem:[%s23681_s0 + %s20743_s22]]   ;;  %s20747_s22 = smov 40  }
  0x44   :  { %s20982_s6 = sld [smem:[%s23681_s0 + %s20746_s15]]   ;;  %s20750_s15 = smov 43  }
  0x45   :  { %23741 = sst [smem:[#allocation54_spill]] %s20952_s4 }
  0x46   :  { %23742 = sst [smem:[#allocation55_spill]] %s20957_s12 }
  0x47   :  { %s20972_s4 = sld [smem:[%s23681_s0 + %s20744_s28]]   ;;  %s20748_s28 = smov 41  }
  0x48   :  { %s20977_s12 = sld [smem:[%s23681_s0 + %s20745_s7]]   ;;  %s20749_s7 = smov 42  }
  0x49   :  { %23743 = sst [smem:[#allocation56_spill]] %s20967_s27 }
  0x4a   :  { %23746 = sst [smem:[#allocation59_spill]] %s20982_s6 }
  0x4b   :  { %s20987_s27 = sld [smem:[%s23681_s0 + %s20747_s22]]   ;;  %s20751_s22 = smov 44  }
  0x4c   :  { %s21002_s6 = sld [smem:[%s23681_s0 + %s20750_s15]]   ;;  %s20754_s15 = smov 47  }
  0x4d   :  { %23744 = sst [smem:[#allocation57_spill]] %s20972_s4 }
  0x4e   :  { %23745 = sst [smem:[#allocation58_spill]] %s20977_s12 }
  0x4f   :  { %s20992_s4 = sld [smem:[%s23681_s0 + %s20748_s28]]   ;;  %s20752_s28 = smov 45  }
  0x50   :  { %s20997_s12 = sld [smem:[%s23681_s0 + %s20749_s7]]   ;;  %s20753_s7 = smov 46  }
  0x51   :  { %23747 = sst [smem:[#allocation60_spill]] %s20987_s27 }
  0x52   :  { %s21007_s27 = sld [smem:[%s23681_s0 + %s20751_s22]]   ;;  %s20755_s22 = smov 48  }
  0x53   :  { %s21017_s19 = sld [smem:[%s23681_s0 + %s20753_s7]]   ;;  %s20757_s7 = smov 50  }
  0x54   :  { %s21022_s24 = sld [smem:[%s23681_s0 + %s20754_s15]]   ;;  %s20758_s15 = smov 51  }
  0x55   :  { %23748 = sst [smem:[#allocation61_spill]] %s20992_s4 }
  0x56   :  { %s21012_s4 = sld [smem:[%s23681_s0 + %s20752_s28]]   ;;  %s20756_s28 = smov 49  }
  0x57   :  { %s21027_s14 = sld [smem:[%s23681_s0 + %s20755_s22]]   ;;  %s20759_s22 = smov 52  }
  0x58   :  { %s21032_s30 = sld [smem:[%s23681_s0 + %s20756_s28]]   ;;  %s20760_s28 = smov 53  }
  0x59   :  { %23749 = sst [smem:[#allocation62_spill]] %s21017_s19 }
  0x5a   :  { %23750 = sst [smem:[#allocation63_spill]] %s21022_s24 }
  0x5b   :  { %s21037_s19 = sld [smem:[%s23681_s0 + %s20757_s7]]   ;;  %s20761_s7 = smov 54  }
  0x5c   :  { %s21042_s24 = sld [smem:[%s23681_s0 + %s20758_s15]]   ;;  %s20762_s15 = smov 55  }
  0x5d   :  { %23751 = sst [smem:[#allocation64_spill]] %s21027_s14 }
  0x5e   :  { %s21047_s14 = sld [smem:[%s23681_s0 + %s20759_s22]]   ;;  %s20763_s22 = smov 56  }
  0x5f   :  { %s21052_s8 = sld [smem:[%s23681_s0 + %s20760_s28]]  }
  0x60   :  { %s21057_s3 = sld [smem:[%s23681_s0 + %s20761_s7]]  }
  0x61   :  { %s21067_s17 = sld [smem:[%s23681_s0 + %s20763_s22]]  }
  0x62   :  { %23752 = sst [smem:[#allocation65_spill]] %s21042_s24 }
  0x63   :  { %s21062_s24 = sld [smem:[%s23681_s0 + %s20762_s15]]  }
  0x64   :  { %118 = vsyncpa [#allocation3], 0 }
  0x65   :  { %119 = vsyncpa [#allocation6], 0 }
  0x66   :  { %120 = vsyncpa [#allocation9], 0 }
  0x67   :  { %121 = vsyncpa [#allocation12], 0 }
  0x68   :  { %122 = vsyncpa [#allocation15], 0 }
  0x69   :  { %123 = vsyncpa [#allocation18], 0 }
  0x6a   :  { %124 = vsyncpa [#allocation4], 0  ;;  %s20764_s28 = smov [#allocation5]   ;;  %s20765_s2 = smov [#allocation8]  }
  0x6b   :  { %s223_s1 = sshll.u32 %s20764_s28, 4  ;;  %s243_s7 = sshll.u32 %s20765_s2, 4  ;;  %s224_s1 = int_to_ptr.vmem [resolvable:$true] %s223_s1  ;;  %s244_s7 = int_to_ptr.vmem [resolvable:$true] %s243_s7 }
  0x6c   :  { %s20452_s10 = scalar_lea.hbm %s20997_s12, 32 }
  0x6d   :  { %p20453_p0 = scmp.ne.s32.totalorder %s20997_s12, %s20452_s10  ;;  %p20456_p1 = scmp.lt.u32.totalorder %s20452_s10, %s20997_s12 }
  0x6f   :  { %p20458_p2 = pnand %p20456_p1, %p20453_p0 }
  0x71   :  { %20461 = shalt.err (!%p20458_p2)
}
  0x72   :  { %s20462_s0 = scalar_lea.vmem %s224_s1, 32  ;;  %p20467_p4 = scmp.lt.s32.totalorder %s224_s1, %s224_s1 }
  0x73   :  { %p20463_p3 = scmp.ne.s32.totalorder %s224_s1, %s20462_s0  ;;  %p20468_p5 = scmp.lt.s32.totalorder %s20462_s0, %s20462_s0 }
  0x75   :  { %p20469_p6 = por %p20468_p5, %p20467_p4 }
  0x77   :  { %p20470_p7 = pnand %p20469_p6, %p20463_p3 }
  0x79   :  { %20473 = shalt.err (!%p20470_p7)
}
  0x7a   :  { %226 = dma.hbm_to_vmem [thread:$0]  %s20997_s12, 32, %s224_s1, [#allocation6]  }
  0x7b   :  { %s20474_s11 = scalar_lea.hbm %s21007_s27, 32 }
  0x7c   :  { %p20475_p8 = scmp.ne.s32.totalorder %s21007_s27, %s20474_s11  ;;  %p20478_p9 = scmp.lt.u32.totalorder %s20474_s11, %s21007_s27 }
  0x7e   :  { %p20480_p10 = pnand %p20478_p9, %p20475_p8 }
  0x80   :  { %20483 = shalt.err (!%p20480_p10)
}
  0x81   :  { %s20484_s15 = scalar_lea.vmem %s244_s7, 32  ;;  %p20489_p12 = scmp.lt.s32.totalorder %s244_s7, %s244_s7 }
  0x82   :  { %p20485_p11 = scmp.ne.s32.totalorder %s244_s7, %s20484_s15  ;;  %p20490_p13 = scmp.lt.s32.totalorder %s20484_s15, %s20484_s15 }
  0x84   :  { %p20491_p0 = por %p20490_p13, %p20489_p12 }
  0x86   :  { %p20492_p1 = pnand %p20491_p0, %p20485_p11 }
  0x88   :  { %20495 = shalt.err (!%p20492_p1)
}
  0x89   :  { %246 = dma.hbm_to_vmem [thread:$0]  %s21007_s27, 32, %s244_s7, [#allocation9]  }
  0x8a   :  { %s20766_s16 = smov [#allocation11]   ;;  %s20767_s12 = smov [#allocation14]  }
  0x8b   :  { %s269_s18 = sshll.u32 %s20766_s16, 4  ;;  %s291_s22 = sshll.u32 %s20767_s12, 4  ;;  %s270_s18 = int_to_ptr.vmem [resolvable:$true] %s269_s18  ;;  %s292_s22 = int_to_ptr.vmem [resolvable:$true] %s291_s22 }
  0x8c   :  { %s20496_s23 = scalar_lea.hbm %s21032_s30, 16 }
  0x8d   :  { %p20497_p2 = scmp.ne.s32.totalorder %s21032_s30, %s20496_s23  ;;  %p20500_p3 = scmp.lt.u32.totalorder %s20496_s23, %s21032_s30 }
  0x8f   :  { %p20502_p4 = pnand %p20500_p3, %p20497_p2 }
  0x91   :  { %20505 = shalt.err (!%p20502_p4)
}
  0x92   :  { %s20506_s26 = scalar_lea.vmem %s270_s18, 16  ;;  %s20510_s28 = scalar_lea.vmem %s270_s18, 32 }
  0x93   :  { %p20507_p5 = scmp.ne.s32.totalorder %s270_s18, %s20506_s26  ;;  %p20511_p6 = scmp.lt.s32.totalorder %s270_s18, %s270_s18 }
  0x94   :  { %p20512_p7 = scmp.lt.s32.totalorder %s20510_s28, %s20506_s26 }
  0x96   :  { %p20513_p8 = por %p20512_p7, %p20511_p6 }
  0x98   :  { %p20514_p9 = pnand %p20513_p8, %p20507_p5 }
  0x9a   :  { %20517 = shalt.err (!%p20514_p9)
}
  0x9b   :  { %272 = dma.hbm_to_vmem [thread:$0]  %s21032_s30, 16, %s270_s18, [#allocation12]  }
  0x9c   :  { %s20518_s27 = scalar_lea.hbm %s21047_s14, 16 }
  0x9d   :  { %p20519_p10 = scmp.ne.s32.totalorder %s21047_s14, %s20518_s27  ;;  %p20522_p11 = scmp.lt.u32.totalorder %s20518_s27, %s21047_s14 }
  0x9f   :  { %p20524_p12 = pnand %p20522_p11, %p20519_p10 }
  0xa1   :  { %20527 = shalt.err (!%p20524_p12)
}
  0xa2   :  { %s20528_s1 = scalar_lea.vmem %s292_s22, 16  ;;  %s20532_s2 = scalar_lea.vmem %s292_s22, 32 }
  0xa3   :  { %p20529_p13 = scmp.ne.s32.totalorder %s292_s22, %s20528_s1  ;;  %p20533_p0 = scmp.lt.s32.totalorder %s292_s22, %s292_s22 }
  0xa4   :  { %p20534_p1 = scmp.lt.s32.totalorder %s20532_s2, %s20528_s1 }
  0xa6   :  { %p20535_p2 = por %p20534_p1, %p20533_p0 }
  0xa8   :  { %p20536_p3 = pnand %p20535_p2, %p20529_p13 }
  0xaa   :  { %20539 = shalt.err (!%p20536_p3)
}
  0xab   :  { %294 = dma.hbm_to_vmem [thread:$0]  %s21047_s14, 16, %s292_s22, [#allocation15]  }
  0xac   :  { %s20768_s7 = smov [#allocation2]   ;;  %s20769_s10 = smov [#allocation7]  }
  0xad   :  { %s201_s30 = sshll.u32 %s20768_s7, 4  ;;  %s233_s0 = sshll.u32 %s20769_s10, 4  ;;  %s202_s30 = int_to_ptr.vmem [resolvable:$true] %s201_s30  ;;  %s234_s0 = int_to_ptr.vmem [resolvable:$true] %s233_s0 }
  0xae   :  { %s20540_s11 = scalar_lea.hbm %s20962_s20, 48 }
  0xaf   :  { %p20541_p4 = scmp.ne.s32.totalorder %s20962_s20, %s20540_s11  ;;  %p20544_p5 = scmp.lt.u32.totalorder %s20540_s11, %s20962_s20 }
  0xb1   :  { %p20546_p6 = pnand %p20544_p5, %p20541_p4 }
  0xb3   :  { %20549 = shalt.err (!%p20546_p6)
}
  0xb4   :  { %s20550_s15 = scalar_lea.vmem %s202_s30, 48  ;;  %s20554_s16 = scalar_lea.vmem %s202_s30, 64 }
  0xb5   :  { %p20551_p7 = scmp.ne.s32.totalorder %s202_s30, %s20550_s15  ;;  %p20555_p8 = scmp.lt.s32.totalorder %s202_s30, %s202_s30 }
  0xb6   :  { %p20556_p9 = scmp.lt.s32.totalorder %s20554_s16, %s20550_s15 }
  0xb8   :  { %p20557_p10 = por %p20556_p9, %p20555_p8 }
  0xba   :  { %p20558_p11 = pnand %p20557_p10, %p20551_p7 }
  0xbc   :  { %20561 = shalt.err (!%p20558_p11)
}
  0xbd   :  { %204 = dma.hbm_to_vmem [thread:$0]  %s20962_s20, 48, %s202_s30, [#allocation3]  }
  0xbe   :  { %s20562_s14 = scalar_lea.hbm %s21002_s6, 32 }
  0xbf   :  { %p20563_p12 = scmp.ne.s32.totalorder %s21002_s6, %s20562_s14  ;;  %p20566_p13 = scmp.lt.u32.totalorder %s20562_s14, %s21002_s6 }
  0xc1   :  { %p20568_p0 = pnand %p20566_p13, %p20563_p12 }
  0xc3   :  { %20571 = shalt.err (!%p20568_p0)
}
  0xc4   :  { %s20572_s18 = scalar_lea.vmem %s234_s0, 32  ;;  %p20577_p2 = scmp.lt.s32.totalorder %s234_s0, %s234_s0 }
  0xc5   :  { %p20573_p1 = scmp.ne.s32.totalorder %s234_s0, %s20572_s18  ;;  %p20578_p3 = scmp.lt.s32.totalorder %s20572_s18, %s20572_s18 }
  0xc7   :  { %p20579_p4 = por %p20578_p3, %p20577_p2 }
  0xc9   :  { %p20580_p5 = pnand %p20579_p4, %p20573_p1 }
  0xcb   :  { %20583 = shalt.err (!%p20580_p5)
}
  0xcc   :  { %236 = dma.hbm_to_vmem [thread:$0]  %s21002_s6, 32, %s234_s0, [#allocation6]  }
  0xcd   :  { %s20770_s12 = smov [#allocation10]   ;;  %s20771_s20 = smov [#allocation13]  }
  0xce   :  { %s253_s22 = sshll.u32 %s20770_s12, 4  ;;  %s279_s23 = sshll.u32 %s20771_s20, 4  ;;  %s254_s22 = int_to_ptr.vmem [resolvable:$true] %s253_s22  ;;  %s280_s23 = int_to_ptr.vmem [resolvable:$true] %s279_s23 }
  0xcf   :  { %s20584_s26 = scalar_lea.hbm %s21012_s4, 32 }
  0xd0   :  { %p20585_p6 = scmp.ne.s32.totalorder %s21012_s4, %s20584_s26  ;;  %p20588_p7 = scmp.lt.u32.totalorder %s20584_s26, %s21012_s4 }
  0xd2   :  { %p20590_p8 = pnand %p20588_p7, %p20585_p6 }
  0xd4   :  { %20593 = shalt.err (!%p20590_p8)
}
  0xd5   :  { %s20594_s28 = scalar_lea.vmem %s254_s22, 32  ;;  %p20599_p10 = scmp.lt.s32.totalorder %s254_s22, %s254_s22 }
  0xd6   :  { %p20595_p9 = scmp.ne.s32.totalorder %s254_s22, %s20594_s28  ;;  %p20600_p11 = scmp.lt.s32.totalorder %s20594_s28, %s20594_s28 }
  0xd8   :  { %p20601_p12 = por %p20600_p11, %p20599_p10 }
  0xda   :  { %p20602_p13 = pnand %p20601_p12, %p20595_p9 }
  0xdc   :  { %20605 = shalt.err (!%p20602_p13)
}
  0xdd   :  { %256 = dma.hbm_to_vmem [thread:$0]  %s21012_s4, 32, %s254_s22, [#allocation9]  }
  0xde   :  { %s20606_s6 = scalar_lea.hbm %s21037_s19, 32 }
  0xdf   :  { %p20607_p0 = scmp.ne.s32.totalorder %s21037_s19, %s20606_s6  ;;  %p20610_p1 = scmp.lt.u32.totalorder %s20606_s6, %s21037_s19 }
  0xe1   :  { %p20612_p2 = pnand %p20610_p1, %p20607_p0 }
  0xe3   :  { %20615 = shalt.err (!%p20612_p2)
}
  0xe4   :  { %s20616_s27 = scalar_lea.vmem %s280_s23, 32  ;;  %p20621_p4 = scmp.lt.s32.totalorder %s280_s23, %s280_s23 }
  0xe5   :  { %p20617_p3 = scmp.ne.s32.totalorder %s280_s23, %s20616_s27  ;;  %p20622_p5 = scmp.lt.s32.totalorder %s20616_s27, %s20616_s27 }
  0xe7   :  { %p20623_p6 = por %p20622_p5, %p20621_p4 }
  0xe9   :  { %p20624_p7 = pnand %p20623_p6, %p20617_p3 }
  0xeb   :  { %20627 = shalt.err (!%p20624_p7)
}
  0xec   :  { %282 = dma.hbm_to_vmem [thread:$0]  %s21037_s19, 32, %s280_s23, [#allocation12]  }
  0xed   :  { %s20772_s1 = smov [#allocation16]   ;;  %s20773_s4 = smov [#allocation17]  }
  0xee   :  { %s301_s2 = sshll.u32 %s20772_s1, 4  ;;  %s313_s7 = sshll.u32 %s20773_s4, 4  ;;  %s302_s2 = int_to_ptr.vmem [resolvable:$true] %s301_s2  ;;  %s314_s7 = int_to_ptr.vmem [resolvable:$true] %s313_s7 }
  0xef   :  { %s20628_s30 = scalar_lea.hbm %s21052_s8, 32 }
  0xf0   :  { %p20629_p8 = scmp.ne.s32.totalorder %s21052_s8, %s20628_s30  ;;  %p20632_p9 = scmp.lt.u32.totalorder %s20628_s30, %s21052_s8 }
  0xf2   :  { %p20634_p10 = pnand %p20632_p9, %p20629_p8 }
  0xf4   :  { %20637 = shalt.err (!%p20634_p10)
}
  0xf5   :  { %s20638_s10 = scalar_lea.vmem %s302_s2, 32  ;;  %p20643_p12 = scmp.lt.s32.totalorder %s302_s2, %s302_s2 }
  0xf6   :  { %p20639_p11 = scmp.ne.s32.totalorder %s302_s2, %s20638_s10  ;;  %p20644_p13 = scmp.lt.s32.totalorder %s20638_s10, %s20638_s10 }
  0xf8   :  { %p20645_p0 = por %p20644_p13, %p20643_p12 }
  0xfa   :  { %p20646_p1 = pnand %p20645_p0, %p20639_p11 }
  0xfc   :  { %20649 = shalt.err (!%p20646_p1)
}
  0xfd   :  { %304 = dma.hbm_to_vmem [thread:$0]  %s21052_s8, 32, %s302_s2, [#allocation15]  }
  0xfe   :  { %s20650_s19 = scalar_lea.hbm %s21062_s24, 16 }
  0xff   :  { %p20651_p2 = scmp.ne.s32.totalorder %s21062_s24, %s20650_s19  ;;  %p20654_p3 = scmp.lt.u32.totalorder %s20650_s19, %s21062_s24 }
 0x101   :  { %p20656_p4 = pnand %p20654_p3, %p20651_p2 }
 0x103   :  { %20659 = shalt.err (!%p20656_p4)
}
 0x104   :  { %s20660_s0 = scalar_lea.vmem %s314_s7, 16  ;;  %s20664_s11 = scalar_lea.vmem %s314_s7, 32 }
 0x105   :  { %p20661_p5 = scmp.ne.s32.totalorder %s314_s7, %s20660_s0  ;;  %p20665_p6 = scmp.lt.s32.totalorder %s314_s7, %s314_s7 }
 0x106   :  { %p20666_p7 = scmp.lt.s32.totalorder %s20664_s11, %s20660_s0 }
 0x108   :  { %p20667_p8 = por %p20666_p7, %p20665_p6 }
 0x10a   :  { %p20668_p9 = pnand %p20667_p8, %p20661_p5 }
 0x10c   :  { %20671 = shalt.err (!%p20668_p9)
}
 0x10d   :  { %316 = dma.hbm_to_vmem [thread:$0]  %s21062_s24, 16, %s314_s7, [#allocation18]  }
 0x10e   :  { %20694 = dma.done.wait [#allocation3], 48  }
 0x10f   :  { %20695 = vsyncadd [#allocation3], 4294967248 }
 0x110   :  { %20696 = dma.done.wait [#allocation6], 64  }
 0x111   :  { %20697 = vsyncadd [#allocation6], 4294967232 }
 0x112   :  { %20698 = dma.done.wait [#allocation9], 64  }
 0x113   :  { %20699 = vsyncadd [#allocation9], 4294967232 }
 0x114   :  { %20700 = dma.done.wait [#allocation12], 48  }
 0x115   :  { %20701 = vsyncadd [#allocation12], 4294967248 }
 0x116   :  { %20702 = dma.done.wait [#allocation15], 48  }
 0x117   :  { %20703 = vsyncadd [#allocation15], 4294967248 }
 0x118   :  { %20704 = dma.done.wait [#allocation18], 16  }
 0x119   :  { %20705 = vsyncadd [#allocation18], 4294967280  ;;  %v348_v0 = vld [vmem:[%s20787_s5] sm:$0xff]  ;;  %v349_v1 = vld [vmem:[%s20787_s5 + $0x8] sm:$0xff]  ;;  %vm389_vm0 = vcmask 523264   ;;  %v20774_v44 = vmov 0  }
 0x11a   :  { %v350_v2 = vld [vmem:[%s20787_s5 + $0x10] sm:$0xff]  ;;  %v21112_v3 = vpack.c.bf16 %v349_v1, %v348_v0  ;;  %v351_v4 = vld [vmem:[%s20787_s5 + $0x18] sm:$0xff]  ;;  %v352_v6 = vld [vmem:[%s20787_s5 + $0x20] sm:$0xff]  ;;  %vm748_vm1 = vcmask 785408   ;;  %vm1768_vm2 = vcmask 1045504   ;;  %vm1755_vm3 = vcmask 490496  }
 0x11b   :  { %v21115_v5 = vpack.c.bf16 %v351_v4, %v350_v2  ;;  %v353_v7 = vld [vmem:[%s20787_s5 + $0x28] sm:$0xff]  ;;  %v18464_v8 = vld [vmem:[%s20797_s13] sm:$0xff]   ;;  %v354_v10 = vld [vmem:[%s20787_s5 + $0x30] sm:$0xff]  ;;  %s23759_s8 = sld [smem:[#allocation31_spill]]  ;;  %s23760_s24 = sld [smem:[#allocation34_spill]]  ;;  %vm5520_vm4 = vcmask 1043456  }
 0x11c   :  { %17868 = vmatprep.subr.bf16.mxu1 %v21112_v3  ;;  %17852 = vmatprep.subr.bf16.mxu0 %v21112_v3  ;;  %v21125_v9 = vpack.c.bf16 %v353_v7, %v352_v6  ;;  %v355_v11 = vld [vmem:[%s20787_s5 + $0x38] sm:$0xff]  ;;  %v18468_v12 = vld [vmem:[%s20792_s9] sm:$0xff]   ;;  %v18465_v16 = vld [vmem:[%s20797_s13 + $0x8] sm:$0xff]   ;;  %s23753_s5 = sld [smem:[#allocation27_spill]]  ;;  %s23762_s16 = sld [smem:[#allocation40_spill]]  ;;  %vm5513_vm5 = vcmask 457728  }
 0x11d   :  { %17869 = vmatpush3.bf16.msra.mxu1 %v21112_v3  ;;  %17853 = vmatpush3.bf16.msra.mxu0 %v21112_v3  ;;  %v21135_v13 = vpack.c.bf16 %v355_v11, %v354_v10  ;;  %v18474_v14 = vld [vmem:[%s20812_s25 + $0x4] ss:$16 sps:$4 sm:$0xff]   ;;  %v18477_v15 = vld [vmem:[%s20812_s25 + $0xc] ss:$16 sps:$4 sm:$0xff]   ;;  %v18472_v20 = vld [vmem:[%s20812_s25] ss:$16 sps:$4 sm:$0xff]  }
 0x11e   :  { %17870 = vmatprep.subr.bf16.mxu1 %v21115_v5  ;;  %17876 = vmatprep.mubr.msk.bf16.mxu1 %vm389_vm0, %v18464_v8  ;;  %v18466_v17 = vld [vmem:[%s20797_s13 + $0x10] sm:$0xff]   ;;  %v18469_v18 = vld [vmem:[%s20792_s9 + $0x8] sm:$0xff]   ;;  %v18467_v25 = vld [vmem:[%s20797_s13 + $0x18] sm:$0x3f]   ;;  %s23755_s13 = sld [smem:[#allocation29_spill]]  ;;  %s23761_s15 = sld [smem:[#allocation35_spill]] }
 0x11f   :  { %17854 = vmatprep.subr.bf16.mxu0 %v21115_v5  ;;  %17860 = vmatprep.mubr.msk.bf16.mxu0 %vm389_vm0, %v18468_v12  ;;  %v18470_v19 = vld [vmem:[%s20792_s9 + $0x10] sm:$0xff]   ;;  %v18475_v21 = vld [vmem:[%s20812_s25 + $0x8] ss:$16 sps:$4 sm:$0xff]   ;;  %v18483_v23 = vld [vmem:[%s20812_s25 + $0x2c] ss:$16 sps:$4 sm:$0xff]   ;;  %s23763_s14 = sld [smem:[#allocation37_spill]] }
 0x120   :  { %v18480_v22 = vld [vmem:[%s20812_s25 + $0x24] ss:$16 sps:$4 sm:$0xff]   ;;  %v18478_v24 = vld [vmem:[%s20812_s25 + $0x20] ss:$16 sps:$4 sm:$0xff]   ;;  %v18471_v26 = vld [vmem:[%s20792_s9 + $0x18] sm:$0x3f]  }
 0x121   :  { %17871 = vmatpush3.bf16.msra.mxu1 %v21115_v5  ;;  %17855 = vmatpush3.bf16.msra.mxu0 %v21115_v5  ;;  %v18481_v27 = vld [vmem:[%s20812_s25 + $0x28] ss:$16 sps:$4 sm:$0xff]   ;;  %v18486_v28 = vld [vmem:[%s20812_s25 + $0x44] ss:$16 sps:$4 sm:$0xff]   ;;  %v18489_v29 = vld [vmem:[%s20812_s25 + $0x4c] ss:$16 sps:$4 sm:$0xff]  }
 0x122   :  { %17872 = vmatprep.subr.bf16.mxu1 %v21125_v9  ;;  %17856 = vmatprep.subr.bf16.mxu0 %v21125_v9  ;;  %v18484_v30 = vld [vmem:[%s20812_s25 + $0x40] ss:$16 sps:$4 sm:$0xff]   ;;  %v18487_v31 = vld [vmem:[%s20812_s25 + $0x48] ss:$16 sps:$4 sm:$0xff]   ;;  %v18492_v32 = vld [vmem:[%s20812_s25 + $0x64] ss:$16 sps:$4 sm:$0xff]  }
 0x123   :  { %v18495_v33 = vld [vmem:[%s20812_s25 + $0x6c] ss:$16 sps:$4 sm:$0xff]   ;;  %v18490_v34 = vld [vmem:[%s20812_s25 + $0x60] ss:$16 sps:$4 sm:$0xff]   ;;  %v18493_v35 = vld [vmem:[%s20812_s25 + $0x68] ss:$16 sps:$4 sm:$0xff]  }
 0x124   :  { %v18498_v36 = vld [vmem:[%s20812_s25 + $0x84] ss:$16 sps:$4 sm:$0xff]   ;;  %v18501_v37 = vld [vmem:[%s20812_s25 + $0x8c] ss:$16 sps:$4 sm:$0xff]   ;;  %v18496_v38 = vld [vmem:[%s20812_s25 + $0x80] ss:$16 sps:$4 sm:$0xff]  }
 0x125   :  { %17873 = vmatpush3.bf16.msra.mxu1 %v21125_v9  ;;  %17857 = vmatpush3.bf16.msra.mxu0 %v21125_v9  ;;  %v18499_v39 = vld [vmem:[%s20812_s25 + $0x88] ss:$16 sps:$4 sm:$0xff]   ;;  %v18504_v40 = vld [vmem:[%s20812_s25 + $0xa4] ss:$16 sps:$4 sm:$0xff]   ;;  %v18507_v41 = vld [vmem:[%s20812_s25 + $0xac] ss:$16 sps:$4 sm:$0xff]  }
 0x126   :  { %17874 = vmatprep.subr.bf16.mxu1 %v21135_v13  ;;  %17858 = vmatprep.subr.bf16.mxu0 %v21135_v13  ;;  %v18502_v42 = vld [vmem:[%s20812_s25 + $0xa0] ss:$16 sps:$4 sm:$0xff]   ;;  %v18505_v43 = vld [vmem:[%s20812_s25 + $0xa8] ss:$16 sps:$4 sm:$0xff]   ;;  %v18510_v45 = vld [vmem:[%s20807_s21 + $0x4] ss:$16 sps:$4 sm:$0xff]  }
 0x127   :  { %v18513_v46 = vld [vmem:[%s20807_s21 + $0xc] ss:$16 sps:$4 sm:$0xff]   ;;  %v18508_v52 = vld [vmem:[%s20807_s21] ss:$16 sps:$4 sm:$0xff]   ;;  %v18511_v53 = vld [vmem:[%s20807_s21 + $0x8] ss:$16 sps:$4 sm:$0xff]  }
 0x128   :  { %v18516_v57 = vld [vmem:[%s20807_s21 + $0x24] ss:$16 sps:$4 sm:$0xff]   ;;  %v18519_v58 = vld [vmem:[%s20807_s21 + $0x2c] ss:$16 sps:$4 sm:$0xff]   ;;  %v18514_v63 = vld [vmem:[%s20807_s21 + $0x20] ss:$16 sps:$4 sm:$0xff]  }
 0x129   :  { %17875 = vmatpush3.bf16.msra.mxu1 %v21135_v13  ;;  %17859 = vmatpush3.bf16.msra.mxu0 %v21135_v13  ;;  %v18517_v0 = vld [vmem:[%s20807_s21 + $0x28] ss:$16 sps:$4 sm:$0xff]   ;;  %v18522_v1 = vld [vmem:[%s20807_s21 + $0x44] ss:$16 sps:$4 sm:$0xff]   ;;  %v18525_v2 = vld [vmem:[%s20807_s21 + $0x4c] ss:$16 sps:$4 sm:$0xff]  }
 0x12a   :  { %761 = vmatprep.subr.bf16.mxu0 %v18474_v14  ;;  %834 = vmatprep.subr.bf16.mxu1 %v18477_v15  ;;  %v18520_v11 = vld [vmem:[%s20807_s21 + $0x40] ss:$16 sps:$4 sm:$0xff]   ;;  %v18523_v12 = vld [vmem:[%s20807_s21 + $0x48] ss:$16 sps:$4 sm:$0xff]   ;;  %s23754_s9 = sld [smem:[#allocation28_spill]]  ;;  %s23757_s25 = sld [smem:[#allocation30_spill]] }
 0x12b   :  { %s23764_s18 = sld [smem:[#allocation36_spill]]  ;;  %s23765_s12 = sld [smem:[#allocation39_spill]]  ;;  %vm8681_vm6 = vcmask 1044480   ;;  %vm8674_vm7 = vcmask 211968   ;;  %vm9555_vm8 = vcmask 261120   ;;  %vm11299_vm9 = vcmask 1042432  }
 0x12c   :  { %17877 = vmatmul.mubr.msk.bf16.vlgmr.msra.gmra.mrb[0].mxu1 %vm389_vm0, %v18465_v16  ;;  %17861 = vmatmul.mubr.msk.bf16.vlgmr.msra.gmra.mrb[0].mxu0 %vm389_vm0, %v18469_v18  ;;  %v18531_v18 = vld [vmem:[%s20807_s21 + $0x6c] ss:$16 sps:$4 sm:$0xff]   ;;  %s23766_s22 = sld [smem:[#allocation41_spill]]  ;;  %s23767_s20 = sld [smem:[#allocation38_spill]]  ;;  %vm11292_vm10 = vcmask 179200   ;;  %vm13645_vm11 = vcmask 1040384  }
 0x12d   :  { %17880 = vmatprep.mubr.msk.bf16.mxu1 %vm389_vm0, %v18466_v17  ;;  %17864 = vmatprep.mubr.msk.bf16.mxu0 %vm389_vm0, %v18470_v19  ;;  %v18528_v17 = vld [vmem:[%s20807_s21 + $0x64] ss:$16 sps:$4 sm:$0xff]   ;;  %s23768_s23 = sld [smem:[#allocation42_spill]]  ;;  %s23769_s26 = sld [smem:[#allocation43_spill]]  ;;  %vm13641_vm12 = vcmask 146432   ;;  %vm20776_vm13 = vmmov 0  }
 0x12e   :  { %762 = vmatpush1.bf16.msra.mxu0 %v18472_v20  ;;  %835 = vmatpush1.bf16.msra.mxu1 %v18475_v21  ;;  %s23770_s28 = sld [smem:[#allocation47_spill]]  ;;  %s23771_s6 = sld [smem:[#allocation44_spill]]  ;;  %vm14839_vm14 = vcmask 64512   ;;  %vm15506_vm15 = vcmask 1041408  }
 0x12f   :  { %763 = vmatprep.subr.bf16.mxu0 %v18480_v22  ;;  %836 = vmatprep.subr.bf16.mxu1 %v18483_v23  ;;  %v18526_v23 = vld [vmem:[%s20807_s21 + $0x60] ss:$16 sps:$4 sm:$0xff]   ;;  %s23772_s27 = sld [smem:[#allocation46_spill]]  ;;  %s23773_s1 = sld [smem:[#allocation45_spill]] }
 0x130   :  { %s23774_s2 = sld [smem:[#allocation48_spill]]  ;;  %s23775_s4 = sld [smem:[#allocation54_spill]] }
 0x131   :  { %s23776_s7 = sld [smem:[#allocation49_spill]]  ;;  %s23777_s30 = sld [smem:[#allocation50_spill]] }
 0x132   :  { %764 = vmatpush1.bf16.msra.mxu0 %v18478_v24  ;;  %837 = vmatpush1.bf16.msra.mxu1 %v18481_v27  ;;  %v18529_v24 = vld [vmem:[%s20807_s21 + $0x68] ss:$16 sps:$4 sm:$0xff]   ;;  %v18532_v27 = vld [vmem:[%s20807_s21 + $0x80] ss:$16 sps:$4 sm:$0xff]   ;;  %s23778_s10 = sld [smem:[#allocation51_spill]]  ;;  %s23779_s19 = sld [smem:[#allocation53_spill]] }
 0x133   :  { %765 = vmatprep.subr.bf16.mxu0 %v18486_v28  ;;  %838 = vmatprep.subr.bf16.mxu1 %v18489_v29  ;;  %v18535_v28 = vld [vmem:[%s20807_s21 + $0x88] ss:$16 sps:$4 sm:$0xff]   ;;  %v18540_v29 = vld [vmem:[%s20807_s21 + $0xa4] ss:$16 sps:$4 sm:$0xff]   ;;  %s23780_s0 = sld [smem:[#allocation52_spill]]  ;;  %s23781_s11 = sld [smem:[#allocation55_spill]] }
 0x134   :  { %17881 = vmatmul.mubr.msk.bf16.gmra.mrb[4].mxu1 %vm389_vm0, %v18467_v25  ;;  %17865 = vmatmul.mubr.msk.bf16.gmra.mrb[4].mxu0 %vm389_vm0, %v18471_v26  ;;  %v18534_v25 = vld [vmem:[%s20807_s21 + $0x84] ss:$16 sps:$4 sm:$0xff]   ;;  %v18537_v26 = vld [vmem:[%s20807_s21 + $0x8c] ss:$16 sps:$4 sm:$0xff]  }
 0x135   :  { %793 = vmatprep.mubr.bf16.mxu0 %v20774_v44  ;;  %866 = vmatprep.mubr.bf16.mxu1 %v20774_v44 }
 0x136   :  { %766 = vmatpush1.bf16.msra.mxu0 %v18484_v30  ;;  %839 = vmatpush1.bf16.msra.mxu1 %v18487_v31  ;;  %v18543_v30 = vld [vmem:[%s20807_s21 + $0xac] ss:$16 sps:$4 sm:$0xff]   ;;  %v18538_v31 = vld [vmem:[%s20807_s21 + $0xa0] ss:$16 sps:$4 sm:$0xff]  }
 0x137   :  { %767 = vmatprep.subr.bf16.mxu0 %v18492_v32  ;;  %840 = vmatprep.subr.bf16.mxu1 %v18495_v33  ;;  %v18541_v32 = vld [vmem:[%s20807_s21 + $0xa8] ss:$16 sps:$4 sm:$0xff]   ;;  %v18553_v33 = vld [vmem:[%s20817_s29 + $0xc] ss:$16 sps:$4 sm:$0xff]   ;;  %s23756_s21 = sld [smem:[#allocation33_spill]] }
 0x13a   :  { %768 = vmatpush1.bf16.msra.mxu0 %v18490_v34  ;;  %841 = vmatpush1.bf16.msra.mxu1 %v18493_v35  ;;  %v18551_v34 = vld [vmem:[%s20817_s29 + $0x8] ss:$16 sps:$4 sm:$0xff]   ;;  %v18559_v35 = vld [vmem:[%s20817_s29 + $0x2c] ss:$16 sps:$4 sm:$0xff]  }
 0x13b   :  { %769 = vmatprep.subr.bf16.mxu0 %v18498_v36  ;;  %842 = vmatprep.subr.bf16.mxu1 %v18501_v37  ;;  %v18557_v36 = vld [vmem:[%s20817_s29 + $0x28] ss:$16 sps:$4 sm:$0xff]   ;;  %v18565_v37 = vld [vmem:[%s20817_s29 + $0x4c] ss:$16 sps:$4 sm:$0xff]  }
 0x13e   :  { %770 = vmatpush1.bf16.msra.mxu0 %v18496_v38  ;;  %843 = vmatpush1.bf16.msra.mxu1 %v18499_v39  ;;  %v18563_v38 = vld [vmem:[%s20817_s29 + $0x48] ss:$16 sps:$4 sm:$0xff]   ;;  %v18571_v39 = vld [vmem:[%s20817_s29 + $0x6c] ss:$16 sps:$4 sm:$0xff]  }
 0x13f   :  { %771 = vmatprep.subr.bf16.mxu0 %v18504_v40  ;;  %844 = vmatprep.subr.bf16.mxu1 %v18507_v41  ;;  %v18550_v40 = vld [vmem:[%s20817_s29 + $0x4] ss:$16 sps:$4 sm:$0xff]   ;;  %v18577_v41 = vld [vmem:[%s20817_s29 + $0x8c] ss:$16 sps:$4 sm:$0xff]  }
 0x142   :  { %772 = vmatpush1.bf16.msra.mxu0 %v18502_v42  ;;  %845 = vmatpush1.bf16.msra.mxu1 %v18505_v43  ;;  %v18546_v42 = vld [vmem:[%s23753_s5 + $0x10] sm:$0xff]  }
 0x143   :  { %1039 = vmatprep.subr.bf16.mxu0 %v18510_v45  ;;  %1112 = vmatprep.subr.bf16.mxu1 %v18513_v46  ;;  %v18548_v43 = vld [vmem:[%s20817_s29] ss:$16 sps:$4 sm:$0xff]   ;;  %v18556_v45 = vld [vmem:[%s20817_s29 + $0x24] ss:$16 sps:$4 sm:$0xff]  }
 0x144   :  { %v18554_v46 = vld [vmem:[%s20817_s29 + $0x20] ss:$16 sps:$4 sm:$0xff]  }
 0x1ff   :  { %v17878_v47 = vpop.f32.mrb[0].mxu1  ;;  %v17862_v48 = vpop.f32.mrb[0].mxu0 }
 0x200   :  { %v569_v49 = vpop.f32.mrb[1].mxu1  ;;  %v436_v50 = vpop.f32.mrb[1].mxu0 }
 0x201   :  { %v17879_v51 = vpop.f32.mrb[2].mxu1  ;;  %v17863_v54 = vpop.f32.mrb[2].mxu0 }
 0x202   :  { %v601_v55 = vpack.c.bf16 %v17879_v51, %v17878_v47  ;;  %v572_v56 = vpop.f32.mrb[3].mxu1  ;;  %v21189_v59 = vpack.c.bf16 %v17863_v54, %v17862_v48  ;;  %v439_v60 = vpop.f32.mrb[3].mxu0  ;;  %v18562_v47 = vld [vmem:[%s20817_s29 + $0x44] ss:$16 sps:$4 sm:$0xff]   ;;  %v18547_v48 = vld [vmem:[%s23753_s5 + $0x18] sm:$0x3f]  }
 0x203   :  { %v600_v61 = vpack.c.bf16 %v572_v56, %v569_v49  ;;  %v21191_v62 = vpack.c.bf16 %v439_v60, %v436_v50  ;;  %v18560_v49 = vld [vmem:[%s20817_s29 + $0x40] ss:$16 sps:$4 sm:$0xff]   ;;  %v18568_v50 = vld [vmem:[%s20817_s29 + $0x64] ss:$16 sps:$4 sm:$0xff]  }
 0x204   :  { %v18566_v51 = vld [vmem:[%s20817_s29 + $0x60] ss:$16 sps:$4 sm:$0xff]   ;;  %v18580_v54 = vld [vmem:[%s20817_s29 + $0xa4] ss:$16 sps:$4 sm:$0xff]  }
 0x205   :  { %15952 = vmatmul.mubr.msk.bf16.vlgmr.msra.gmra.mrb[8].mxu0 %vm748_vm1, %v600_v61  ;;  %15956 = vmatmul.mubr.msk.bf16.vlgmr.msra.gmra.mrb[8].mxu1 %vm748_vm1, %v600_v61  ;;  %v18578_v56 = vld [vmem:[%s20817_s29 + $0xa0] ss:$16 sps:$4 sm:$0xff]  }
 0x206   :  { %803 = vmatprep.mubr.bf16.mxu0 %v20774_v44  ;;  %876 = vmatprep.mubr.bf16.mxu1 %v20774_v44 }
 0x207   :  { %v17882_v4 = vpop.f32.mrb[4].mxu1  ;;  %1040 = vmatpush1.bf16.msra.mxu0 %v18508_v52  ;;  %1113 = vmatpush1.bf16.msra.mxu1 %v18511_v53  ;;  %v17866_v6 = vpop.f32.mrb[4].mxu0  ;;  %v18574_v52 = vld [vmem:[%s20817_s29 + $0x84] ss:$16 sps:$4 sm:$0xff]   ;;  %v18572_v53 = vld [vmem:[%s20817_s29 + $0x80] ss:$16 sps:$4 sm:$0xff]  }
 0x208   :  { %v585_v7 = vpop.f32.mrb[5].mxu1  ;;  %1041 = vmatprep.subr.bf16.mxu0 %v18516_v57  ;;  %1114 = vmatprep.subr.bf16.mxu1 %v18519_v58  ;;  %v452_v8 = vpop.f32.mrb[5].mxu0  ;;  %v18581_v57 = vld [vmem:[%s20817_s29 + $0xa8] ss:$16 sps:$4 sm:$0xff]  }
 0x209   :  { %v17883_v10 = vpop.f32.mrb[6].mxu1  ;;  %v17867_v14 = vpop.f32.mrb[6].mxu0 }
 0x20a   :  { %v603_v15 = vpack.c.bf16 %v17883_v10, %v17882_v4  ;;  %v588_v16 = vpop.f32.mrb[7].mxu1  ;;  %v21205_v19 = vpack.c.bf16 %v17867_v14, %v17866_v6  ;;  %v455_v20 = vpop.f32.mrb[7].mxu0  ;;  %v360_v14 = vld [vmem:[%s23754_s9] sm:$0xf]  ;;  %s23783_s9 = sld [smem:[#allocation56_spill]] }
 0x20b   :  { %v602_v21 = vpack.c.bf16 %v588_v16, %v585_v7  ;;  %1042 = vmatpush1.bf16.msra.mxu0 %v18514_v63  ;;  %1115 = vmatpush1.bf16.msra.mxu1 %v18517_v0  ;;  %v21207_v22 = vpack.c.bf16 %v455_v20, %v452_v8  ;;  %v1629_v8 = vlaneseq }
 0x20c   :  { %1043 = vmatprep.subr.bf16.mxu0 %v18522_v1  ;;  %1116 = vmatprep.subr.bf16.mxu1 %v18525_v2 }
 0x20d   :  { %15953 = vmatmul.mubr.msk.bf16.gmra.mrb[12].mxu0 %vm748_vm1, %v601_v55  ;;  %15957 = vmatmul.mubr.msk.bf16.gmra.mrb[12].mxu1 %vm748_vm1, %v601_v55  ;;  %v18583_v55 = vld [vmem:[%s20817_s29 + $0xac] ss:$16 sps:$4 sm:$0xff]   ;;  %v1630_v10 = vshrl.u32 %v1629_v8, 7 }
 0x20e   :  { %813 = vmatprep.mubr.bf16.mxu0 %v20774_v44  ;;  %886 = vmatprep.mubr.bf16.mxu1 %v20774_v44 }
 0x20f   :  { %1044 = vmatpush1.bf16.msra.mxu0 %v18520_v11  ;;  %1117 = vmatpush1.bf16.msra.mxu1 %v18523_v12  ;;  %v21311_v11 = vsub.s32 0, %v1630_v10  ;;  %v21313_v12 = vsub.s32 2, %v1630_v10  ;;  %v21318_v16 = vsub.s32 3, %v1630_v10 }
 0x210   :  { %1045 = vmatprep.subr.bf16.mxu0 %v18528_v17  ;;  %1118 = vmatprep.subr.bf16.mxu1 %v18531_v18 }
 0x211   :  { %v21321_v17 = vrot.slane %v360_v14, %v21311_v11  ;;  %v21324_v18 = vrot.slane %v360_v14, %v21313_v12  ;;  %v21330_v20 = vrot.slane %v360_v14, %v21318_v16 }
 0x213   :  { %1046 = vmatpush1.bf16.msra.mxu0 %v18526_v23  ;;  %1119 = vmatpush1.bf16.msra.mxu1 %v18529_v24 }
 0x214   :  { %1047 = vmatprep.subr.bf16.mxu0 %v18534_v25  ;;  %1120 = vmatprep.subr.bf16.mxu1 %v18537_v26 }
 0x215   :  { %15954 = vmatmul.mubr.msk.bf16.gmra.mrb[16].mxu0 %vm748_vm1, %v602_v21  ;;  %15958 = vmatmul.mubr.msk.bf16.gmra.mrb[16].mxu1 %vm748_vm1, %v602_v21 }
 0x216   :  { %823 = vmatprep.mubr.bf16.mxu0 %v20774_v44  ;;  %896 = vmatprep.mubr.bf16.mxu1 %v20774_v44 }
 0x217   :  { %1048 = vmatpush1.bf16.msra.mxu0 %v18532_v27  ;;  %1121 = vmatpush1.bf16.msra.mxu1 %v18535_v28 }
 0x218   :  { %1049 = vmatprep.subr.bf16.mxu0 %v18540_v29  ;;  %1122 = vmatprep.subr.bf16.mxu1 %v18543_v30 }
 0x21b   :  { %1050 = vmatpush1.bf16.msra.mxu0 %v18538_v31  ;;  %1123 = vmatpush1.bf16.msra.mxu1 %v18541_v32 }
 0x21c   :  { %17884 = vmatprep.subr.bf16.mxu0 %v21112_v3  ;;  %1523 = vmatprep.subr.bf16.mxu1 %v18553_v33 }
 0x21d   :  { %15955 = vmatmul.mubr.msk.bf16.gmra.mrb[20].mxu0 %vm748_vm1, %v603_v15  ;;  %15959 = vmatmul.mubr.msk.bf16.gmra.mrb[20].mxu1 %vm748_vm1, %v603_v15  ;;  %v21316_v15 = vsub.s32 1, %v1630_v10 }
 0x21e   :  { %1071 = vmatprep.mubr.bf16.mxu0 %v20774_v44  ;;  %1144 = vmatprep.mubr.bf16.mxu1 %v20774_v44 }
 0x225   :  { %15984 = vmatmul.mubr.msk.bf16.vlgmr.msra.gmra.mrb[8].mxu0 %vm748_vm1, %v21191_v62  ;;  %15988 = vmatmul.mubr.msk.bf16.vlgmr.msra.gmra.mrb[8].mxu1 %vm748_vm1, %v21191_v62 }
 0x226   :  { %1081 = vmatprep.mubr.bf16.mxu0 %v20774_v44  ;;  %1154 = vmatprep.mubr.bf16.mxu1 %v20774_v44 }
 0x227   :  { %17885 = vmatpush3.bf16.msra.mxu0 %v21112_v3  ;;  %1524 = vmatpush1.bf16.msra.mxu1 %v18551_v34  ;;  %v18569_v3 = vld [vmem:[%s20817_s29 + $0x68] ss:$16 sps:$4 sm:$0xff]  }
 0x228   :  { %17886 = vmatprep.subr.bf16.mxu0 %v21115_v5  ;;  %1525 = vmatprep.subr.bf16.mxu1 %v18559_v35 }
 0x22b   :  { %17887 = vmatpush3.bf16.msra.mxu0 %v21115_v5  ;;  %1526 = vmatpush1.bf16.msra.mxu1 %v18557_v36  ;;  %v18575_v5 = vld [vmem:[%s20817_s29 + $0x88] ss:$16 sps:$4 sm:$0xff]   ;;  %s23758_s29 = sld [smem:[#allocation32_spill]] }
 0x22c   :  { %17888 = vmatprep.subr.bf16.mxu0 %v21125_v9  ;;  %1527 = vmatprep.subr.bf16.mxu1 %v18565_v37 }
 0x22d   :  { %15985 = vmatmul.mubr.msk.bf16.gmra.mrb[12].mxu0 %vm748_vm1, %v21189_v59  ;;  %15989 = vmatmul.mubr.msk.bf16.gmra.mrb[12].mxu1 %vm748_vm1, %v21189_v59 }
 0x22e   :  { %1091 = vmatprep.mubr.bf16.mxu0 %v20774_v44  ;;  %1164 = vmatprep.mubr.bf16.mxu1 %v20774_v44 }
 0x22f   :  { %17889 = vmatpush3.bf16.msra.mxu0 %v21125_v9  ;;  %1528 = vmatpush1.bf16.msra.mxu1 %v18563_v38  ;;  %v18544_v9 = vld [vmem:[%s23753_s5] sm:$0xff]  }
 0x230   :  { %17890 = vmatprep.subr.bf16.mxu0 %v21135_v13  ;;  %1529 = vmatprep.subr.bf16.mxu1 %v18571_v39 }
 0x233   :  { %17891 = vmatpush3.bf16.msra.mxu0 %v21135_v13  ;;  %1530 = vmatpush1.bf16.msra.mxu1 %v18569_v3  ;;  %v18545_v13 = vld [vmem:[%s23753_s5 + $0x8] sm:$0xff]   ;;  %s23782_s5 = sld [smem:[#allocation59_spill]] }
 0x234   :  { %1450 = vmatprep.subr.bf16.mxu0 %v18550_v40  ;;  %1531 = vmatprep.subr.bf16.mxu1 %v18577_v41 }
 0x235   :  { %15986 = vmatmul.mubr.msk.bf16.gmra.mrb[16].mxu0 %vm748_vm1, %v21207_v22  ;;  %15990 = vmatmul.mubr.msk.bf16.gmra.mrb[16].mxu1 %vm748_vm1, %v21207_v22 }
 0x236   :  { %1101 = vmatprep.mubr.bf16.mxu0 %v20774_v44  ;;  %1174 = vmatprep.mubr.bf16.mxu1 %v20774_v44 }
 0x237   :  { %1532 = vmatpush1.bf16.msra.mxu1 %v18575_v5 }
 0x238   :  { %1533 = vmatprep.subr.bf16.mxu1 %v18583_v55 }
 0x23b   :  { %1534 = vmatpush1.bf16.msra.mxu1 %v18581_v57 }
 0x23d   :  { %15987 = vmatmul.mubr.msk.bf16.gmra.mrb[20].mxu0 %vm748_vm1, %v21205_v19  ;;  %15991 = vmatmul.mubr.msk.bf16.gmra.mrb[20].mxu1 %vm748_vm1, %v21205_v19  ;;  %v21327_v19 = vrot.slane %v360_v14, %v21316_v15 }
 0x23e   :  { %17892 = vmatprep.mubr.msk.bf16.mxu0 %vm389_vm0, %v18544_v9  ;;  %1555 = vmatprep.mubr.bf16.mxu1 %v20774_v44 }
 0x245   :  { %17893 = vmatmul.mubr.msk.bf16.vlgmr.msra.gmra.mrb[24].mxu0 %vm389_vm0, %v18545_v13 }
 0x246   :  { %17896 = vmatprep.mubr.msk.bf16.mxu0 %vm389_vm0, %v18546_v42  ;;  %1451 = vmatpush1.bf16.msra.mxu0 %v18548_v43 }
 0x247   :  { %1452 = vmatprep.subr.bf16.mxu0 %v18556_v45 }
 0x24a   :  { %1453 = vmatpush1.bf16.msra.mxu0 %v18554_v46 }
 0x24b   :  { %1454 = vmatprep.subr.bf16.mxu0 %v18562_v47 }
 0x24d   :  { %17897 = vmatmul.mubr.msk.bf16.gmra.mrb[28].mxu0 %vm389_vm0, %v18547_v48 }
 0x24e   :  { %1455 = vmatpush1.bf16.msra.mxu0 %v18560_v49  ;;  %1482 = vmatprep.mubr.bf16.mxu0 %v20774_v44 }
 0x24f   :  { %1456 = vmatprep.subr.bf16.mxu0 %v18568_v50 }
 0x252   :  { %1457 = vmatpush1.bf16.msra.mxu0 %v18566_v51 }
 0x253   :  { %1458 = vmatprep.subr.bf16.mxu0 %v18574_v52 }
 0x256   :  { %1459 = vmatpush1.bf16.msra.mxu0 %v18572_v53 }
 0x257   :  { %1460 = vmatprep.subr.bf16.mxu0 %v18580_v54 }
 0x25a   :  { %1461 = vmatpush1.bf16.msra.mxu0 %v18578_v56 }
 0x318   :  { %v17894_v58 = vpop.f32.mrb[24].mxu0 }
 0x319   :  { %v1259_v59 = vpop.f32.mrb[25].mxu0 }
 0x31a   :  { %v17895_v60 = vpop.f32.mrb[26].mxu0 }
 0x31b   :  { %v1291_v61 = vpack.c.bf16 %v17895_v60, %v17894_v58  ;;  %v1262_v62 = vpop.f32.mrb[27].mxu0 }
 0x31c   :  { %v1290_v63 = vpack.c.bf16 %v1262_v62, %v1259_v59 }
 0x31e   :  { %16024 = vmatmul.mubr.msk.bf16.vlgmr.msra.gmra.mrb[8].mxu0 %vm748_vm1, %v1290_v63  ;;  %16028 = vmatmul.mubr.msk.bf16.vlgmr.msra.gmra.mrb[8].mxu1 %vm748_vm1, %v1290_v63 }
 0x31f   :  { %1492 = vmatprep.mubr.bf16.mxu0 %v20774_v44  ;;  %1565 = vmatprep.mubr.bf16.mxu1 %v20774_v44 }
 0x320   :  { %v17898_v0 = vpop.f32.mrb[28].mxu0 }
 0x321   :  { %v1275_v1 = vpop.f32.mrb[29].mxu0 }
 0x322   :  { %v17899_v2 = vpop.f32.mrb[30].mxu0 }
 0x323   :  { %v1293_v4 = vpack.c.bf16 %v17899_v2, %v17898_v0  ;;  %v1278_v6 = vpop.f32.mrb[31].mxu0 }
 0x324   :  { %v1292_v7 = vpack.c.bf16 %v1278_v6, %v1275_v1 }
 0x326   :  { %16025 = vmatmul.mubr.msk.bf16.gmra.mrb[12].mxu0 %vm748_vm1, %v1291_v61  ;;  %16029 = vmatmul.mubr.msk.bf16.gmra.mrb[12].mxu1 %vm748_vm1, %v1291_v61 }
 0x327   :  { %1502 = vmatprep.mubr.bf16.mxu0 %v20774_v44  ;;  %1575 = vmatprep.mubr.bf16.mxu1 %v20774_v44 }
 0x32e   :  { %16026 = vmatmul.mubr.msk.bf16.gmra.mrb[16].mxu0 %vm748_vm1, %v1292_v7  ;;  %16030 = vmatmul.mubr.msk.bf16.gmra.mrb[16].mxu1 %vm748_vm1, %v1292_v7 }
 0x32f   :  { %1512 = vmatprep.mubr.bf16.mxu0 %v20774_v44  ;;  %1585 = vmatprep.mubr.bf16.mxu1 %v20774_v44 }
 0x336   :  { %16027 = vmatmul.mubr.msk.bf16.gmra.mrb[20].mxu0 %vm748_vm1, %v1293_v4  ;;  %16031 = vmatmul.mubr.msk.bf16.gmra.mrb[20].mxu1 %vm748_vm1, %v1293_v4 }
 0x337   :  { %1813 = vmatprep.mubr.bf16.mxu1 %v20774_v44  ;;  %1884 = vmatprep.mubr.bf16.mxu0 %v20774_v44 }
 0x3f1   :  { %v1484_v21 = vpop.f32.mrb[8].mxu0  ;;  %v1557_v22 = vpop.f32.mrb[8].mxu1 }
 0x3f2   :  { %v1649_v23 = vadd.f32 %v21321_v17, %v1484_v21  ;;  %v1651_v24 = vadd.f32 %v21324_v18, %v1557_v22  ;;  %v1486_v25 = vpop.f32.mrb[9].mxu0  ;;  %v1559_v26 = vpop.f32.mrb[9].mxu1 }
 0x3f3   :  { %v1650_v27 = vadd.f32 %v21327_v19, %v1486_v25  ;;  %v1652_v28 = vadd.f32 %v21330_v20, %v1559_v26  ;;  %v1488_v29 = vpop.f32.mrb[10].mxu0  ;;  %v1561_v30 = vpop.f32.mrb[10].mxu1 }
 0x3f4   :  { %v1653_v31 = vadd.f32 %v21321_v17, %v1488_v29  ;;  %v1655_v32 = vadd.f32 %v21324_v18, %v1561_v30  ;;  %v1490_v33 = vpop.f32.mrb[11].mxu0  ;;  %v1563_v34 = vpop.f32.mrb[11].mxu1  ;;  %v1681_v37 = vmax.f32 %v1649_v23, 0.0  ;;  %v1683_v38 = vmax.f32 %v1651_v24, 0.0 }
 0x3f5   :  { %v1654_v35 = vadd.f32 %v21327_v19, %v1490_v33  ;;  %v1656_v36 = vadd.f32 %v21330_v20, %v1563_v34  ;;  %v1682_v40 = vmax.f32 %v1650_v27, 0.0  ;;  %v1684_v41 = vmax.f32 %v1652_v28, 0.0 }
 0x3f6   :  { %v1685_v39 = vmax.f32 %v1653_v31, 0.0  ;;  %v1687_v3 = vmax.f32 %v1655_v32, 0.0 }
 0x3f7   :  { %v1686_v5 = vmax.f32 %v1654_v35, 0.0  ;;  %v1688_v9 = vmax.f32 %v1656_v36, 0.0 }
 0x3f8   :  { %v21340_v13 = vpack.c.bf16 %v1685_v39, %v1681_v37  ;;  %v21342_v42 = vpack.c.bf16 %v1687_v3, %v1683_v38 }
 0x3f9   :  { %v21344_v43 = vpack.c.bf16 %v1686_v5, %v1682_v40  ;;  %v1494_v45 = vpop.f32.mrb[12].mxu0  ;;  %v1567_v46 = vpop.f32.mrb[12].mxu1  ;;  %v21346_v47 = vpack.c.bf16 %v1688_v9, %v1684_v41 }
 0x3fa   :  { %v1657_v48 = vadd.f32 %v21321_v17, %v1494_v45  ;;  %v1659_v49 = vadd.f32 %v21324_v18, %v1567_v46  ;;  %v1496_v50 = vpop.f32.mrb[13].mxu0  ;;  %v1569_v51 = vpop.f32.mrb[13].mxu1 }
 0x3fb   :  { %v1658_v52 = vadd.f32 %v21327_v19, %v1496_v50  ;;  %v1660_v53 = vadd.f32 %v21330_v20, %v1569_v51  ;;  %v1498_v54 = vpop.f32.mrb[14].mxu0  ;;  %v1571_v55 = vpop.f32.mrb[14].mxu1  ;;  %1781 = vmatprep.subr.bf16.mxu1 %v21344_v43  ;;  %1852 = vmatprep.subr.bf16.mxu0 %v21346_v47 }
 0x3fc   :  { %v1661_v56 = vadd.f32 %v21321_v17, %v1498_v54  ;;  %v1663_v57 = vadd.f32 %v21324_v18, %v1571_v55  ;;  %v1500_v58 = vpop.f32.mrb[15].mxu0  ;;  %v1573_v59 = vpop.f32.mrb[15].mxu1  ;;  %1782 = vmatpush1.bf16.msra.mxu1 %v21340_v13  ;;  %1853 = vmatpush1.bf16.msra.mxu0 %v21342_v42  ;;  %v1689_v62 = vmax.f32 %v1657_v48, 0.0  ;;  %v1691_v63 = vmax.f32 %v1659_v49, 0.0 }
 0x3fd   :  { %v1662_v60 = vadd.f32 %v21327_v19, %v1500_v58  ;;  %v1664_v61 = vadd.f32 %v21330_v20, %v1573_v59  ;;  %v1690_v2 = vmax.f32 %v1658_v52, 0.0  ;;  %v1692_v4 = vmax.f32 %v1660_v53, 0.0 }
 0x3fe   :  { %v1693_v0 = vmax.f32 %v1661_v56, 0.0  ;;  %v1695_v1 = vmax.f32 %v1663_v57, 0.0 }
 0x3ff   :  { %v1694_v6 = vmax.f32 %v1662_v60, 0.0  ;;  %v1696_v7 = vmax.f32 %v1664_v61, 0.0 }
 0x400   :  { %v21360_v8 = vpack.c.bf16 %v1693_v0, %v1689_v62  ;;  %v21362_v10 = vpack.c.bf16 %v1695_v1, %v1691_v63 }
 0x401   :  { %v21364_v14 = vpack.c.bf16 %v1694_v6, %v1690_v2  ;;  %v1504_v21 = vpop.f32.mrb[16].mxu0  ;;  %v1577_v22 = vpop.f32.mrb[16].mxu1  ;;  %v21366_v23 = vpack.c.bf16 %v1696_v7, %v1692_v4 }
 0x402   :  { %v1665_v24 = vadd.f32 %v21321_v17, %v1504_v21  ;;  %v1667_v25 = vadd.f32 %v21324_v18, %v1577_v22  ;;  %v1506_v26 = vpop.f32.mrb[17].mxu0  ;;  %v1579_v27 = vpop.f32.mrb[17].mxu1 }
 0x403   :  { %v1666_v28 = vadd.f32 %v21327_v19, %v1506_v26  ;;  %v1668_v29 = vadd.f32 %v21330_v20, %v1579_v27  ;;  %v1508_v30 = vpop.f32.mrb[18].mxu0  ;;  %v1581_v31 = vpop.f32.mrb[18].mxu1  ;;  %1783 = vmatprep.subr.bf16.mxu1 %v21364_v14  ;;  %1854 = vmatprep.subr.bf16.mxu0 %v21366_v23 }
 0x404   :  { %v1669_v32 = vadd.f32 %v21321_v17, %v1508_v30  ;;  %v1671_v33 = vadd.f32 %v21324_v18, %v1581_v31  ;;  %v1510_v34 = vpop.f32.mrb[19].mxu0  ;;  %v1583_v35 = vpop.f32.mrb[19].mxu1  ;;  %1784 = vmatpush1.bf16.msra.mxu1 %v21360_v8  ;;  %1855 = vmatpush1.bf16.msra.mxu0 %v21362_v10  ;;  %v1697_v38 = vmax.f32 %v1665_v24, 0.0  ;;  %v1699_v39 = vmax.f32 %v1667_v25, 0.0  ;;  %v18585_v30 = vld [vmem:[%s23755_s13 + $0x8] sm:$0xff]  }
 0x405   :  { %v1670_v36 = vadd.f32 %v21327_v19, %v1510_v34  ;;  %v1672_v37 = vadd.f32 %v21330_v20, %v1583_v35  ;;  %v1698_v41 = vmax.f32 %v1666_v28, 0.0  ;;  %v1700_v5 = vmax.f32 %v1668_v29, 0.0  ;;  %v18584_v29 = vld [vmem:[%s23755_s13] sm:$0xff]   ;;  %v18587_v34 = vld [vmem:[%s23755_s13 + $0x18] ss:$0 sps:$4 sm:$0xff]  }
 0x406   :  { %v1701_v3 = vmax.f32 %v1669_v32, 0.0  ;;  %v1703_v40 = vmax.f32 %v1671_v33, 0.0  ;;  %v18594_v31 = vld [vmem:[%s23756_s21 + $0x4] ss:$16 sps:$4 sm:$0xff]   ;;  %v18597_v32 = vld [vmem:[%s23756_s21 + $0xc] ss:$16 sps:$4 sm:$0xff]  }
 0x407   :  { %v1702_v9 = vmax.f32 %v1670_v36, 0.0  ;;  %v1704_v45 = vmax.f32 %v1672_v37, 0.0  ;;  %v18586_v33 = vld [vmem:[%s23755_s13 + $0x10] sm:$0xff]   ;;  %v18588_v35 = vld [vmem:[%s23757_s25] sm:$0xff]   ;;  %v18595_v37 = vld [vmem:[%s23756_s21 + $0x8] ss:$16 sps:$4 sm:$0xff]  }
 0x408   :  { %v21380_v46 = vpack.c.bf16 %v1701_v3, %v1697_v38  ;;  %v21382_v48 = vpack.c.bf16 %v1703_v40, %v1699_v39  ;;  %v18592_v36 = vld [vmem:[%s23756_s21] ss:$16 sps:$4 sm:$0xff]   ;;  %v18600_v38 = vld [vmem:[%s23756_s21 + $0x24] ss:$16 sps:$4 sm:$0xff]   ;;  %v18603_v39 = vld [vmem:[%s23756_s21 + $0x2c] ss:$16 sps:$4 sm:$0xff]  }
 0x409   :  { %v21384_v49 = vpack.c.bf16 %v1702_v9, %v1698_v41  ;;  %v1514_v50 = vpop.f32.mrb[20].mxu0  ;;  %v1587_v51 = vpop.f32.mrb[20].mxu1  ;;  %v21386_v52 = vpack.c.bf16 %v1704_v45, %v1700_v5  ;;  %v18598_v3 = vld [vmem:[%s23756_s21 + $0x20] ss:$16 sps:$4 sm:$0xff]   ;;  %v18601_v40 = vld [vmem:[%s23756_s21 + $0x28] ss:$16 sps:$4 sm:$0xff]  }
 0x40a   :  { %v1673_v53 = vadd.f32 %v21321_v17, %v1514_v50  ;;  %v1675_v54 = vadd.f32 %v21324_v18, %v1587_v51  ;;  %v1516_v55 = vpop.f32.mrb[21].mxu0  ;;  %v1589_v56 = vpop.f32.mrb[21].mxu1  ;;  %v18606_v41 = vld [vmem:[%s23756_s21 + $0x44] ss:$16 sps:$4 sm:$0xff]   ;;  %v18609_v5 = vld [vmem:[%s23756_s21 + $0x4c] ss:$16 sps:$4 sm:$0xff]  }
 0x40b   :  { %v1674_v57 = vadd.f32 %v21327_v19, %v1516_v55  ;;  %v1676_v58 = vadd.f32 %v21330_v20, %v1589_v56  ;;  %v1518_v59 = vpop.f32.mrb[22].mxu0  ;;  %v1591_v60 = vpop.f32.mrb[22].mxu1  ;;  %1785 = vmatprep.subr.bf16.mxu1 %v21384_v49  ;;  %1856 = vmatprep.subr.bf16.mxu0 %v21386_v52  ;;  %v18589_v9 = vld [vmem:[%s23757_s25 + $0x8] sm:$0xff]   ;;  %v18604_v45 = vld [vmem:[%s23756_s21 + $0x40] ss:$16 sps:$4 sm:$0xff]   ;;  %s23784_s13 = sld [smem:[#allocation57_spill]] }
 0x40c   :  { %v1677_v61 = vadd.f32 %v21321_v17, %v1518_v59  ;;  %v1679_v62 = vadd.f32 %v21324_v18, %v1591_v60  ;;  %v1520_v63 = vpop.f32.mrb[23].mxu0  ;;  %v1593_v0 = vpop.f32.mrb[23].mxu1  ;;  %1786 = vmatpush1.bf16.msra.mxu1 %v21380_v46  ;;  %1857 = vmatpush1.bf16.msra.mxu0 %v21382_v48  ;;  %v1705_v4 = vmax.f32 %v1673_v53, 0.0  ;;  %v1707_v6 = vmax.f32 %v1675_v54, 0.0  ;;  %v18607_v50 = vld [vmem:[%s23756_s21 + $0x48] ss:$16 sps:$4 sm:$0xff]  }
 0x40d   :  { %v1678_v1 = vadd.f32 %v21327_v19, %v1520_v63  ;;  %v1680_v2 = vadd.f32 %v21330_v20, %v1593_v0  ;;  %v1706_v22 = vmax.f32 %v1674_v57, 0.0  ;;  %v1708_v17 = vmax.f32 %v1676_v58, 0.0  ;;  %v18612_v51 = vld [vmem:[%s23756_s21 + $0x64] ss:$16 sps:$4 sm:$0xff]   ;;  %v18615_v53 = vld [vmem:[%s23756_s21 + $0x6c] ss:$16 sps:$4 sm:$0xff]  }
 0x40e   :  { %v1709_v7 = vmax.f32 %v1677_v61, 0.0  ;;  %v1711_v21 = vmax.f32 %v1679_v62, 0.0  ;;  %v18610_v54 = vld [vmem:[%s23756_s21 + $0x60] ss:$16 sps:$4 sm:$0xff]   ;;  %v18613_v55 = vld [vmem:[%s23756_s21 + $0x68] ss:$16 sps:$4 sm:$0xff]  }
 0x40f   :  { %v1710_v24 = vmax.f32 %v1678_v1, 0.0  ;;  %v1712_v18 = vmax.f32 %v1680_v2, 0.0  ;;  %v18618_v56 = vld [vmem:[%s23756_s21 + $0x84] ss:$16 sps:$4 sm:$0xff]   ;;  %v18621_v57 = vld [vmem:[%s23756_s21 + $0x8c] ss:$16 sps:$4 sm:$0xff]  }
 0x410   :  { %v1725_v25 = vpack.c.bf16 %v1709_v7, %v1705_v4  ;;  %v1727_v26 = vpack.c.bf16 %v1711_v21, %v1707_v6  ;;  %v18590_v58 = vld [vmem:[%s23757_s25 + $0x10] sm:$0xff]   ;;  %v18619_v60 = vld [vmem:[%s23756_s21 + $0x88] ss:$16 sps:$4 sm:$0xff]   ;;  %v18627_v62 = vld [vmem:[%s23756_s21 + $0xac] ss:$16 sps:$4 sm:$0xff]  }
 0x411   :  { %v21400_v27 = vpack.c.bf16 %v1710_v24, %v1706_v22  ;;  %v21402_v28 = vpack.c.bf16 %v1712_v18, %v1708_v17  ;;  %v18616_v59 = vld [vmem:[%s23756_s21 + $0x80] ss:$16 sps:$4 sm:$0xff]   ;;  %v18624_v61 = vld [vmem:[%s23756_s21 + $0xa4] ss:$16 sps:$4 sm:$0xff]   ;;  %v18625_v0 = vld [vmem:[%s23756_s21 + $0xa8] ss:$16 sps:$4 sm:$0xff]  }
 0x412   :  { %v21405_v19 = vsel %vm1768_vm2, %v1725_v25, 0  ;;  %v21408_v20 = vsel %vm1768_vm2, %v1727_v26, 0  ;;  %v18622_v63 = vld [vmem:[%s23756_s21 + $0xa0] ss:$16 sps:$4 sm:$0xff]   ;;  %v18630_v1 = vld [vmem:[%s23756_s21 + $0xc4] ss:$16 sps:$4 sm:$0xff]  }
 0x413   :  { %16036 = vmatprep.subr.msk.bf16.mxu1 %vm1768_vm2, %v21400_v27  ;;  %16041 = vmatprep.subr.msk.bf16.mxu0 %vm1768_vm2, %v21402_v28  ;;  %v18633_v2 = vld [vmem:[%s23756_s21 + $0xcc] ss:$16 sps:$4 sm:$0xff]   ;;  %v18591_v4 = vld [vmem:[%s23757_s25 + $0x18] ss:$0 sps:$4 sm:$0xff]   ;;  %v18628_v6 = vld [vmem:[%s23756_s21 + $0xc0] ss:$16 sps:$4 sm:$0xff]  }
 0x414   :  { %1788 = vmatpush1.bf16.msra.mxu1 %v21405_v19  ;;  %1859 = vmatpush1.bf16.msra.mxu0 %v21408_v20  ;;  %v18631_v7 = vld [vmem:[%s23756_s21 + $0xc8] ss:$16 sps:$4 sm:$0xff]   ;;  %v18636_v21 = vld [vmem:[%s23756_s21 + $0xe4] ss:$16 sps:$4 sm:$0xff]   ;;  %v18639_v22 = vld [vmem:[%s23756_s21 + $0xec] ss:$16 sps:$4 sm:$0xff]  }
 0x415   :  { %2096 = vmatprep.subr.bf16.mxu1 %v21344_v43  ;;  %2167 = vmatprep.subr.bf16.mxu0 %v21346_v47  ;;  %v18634_v17 = vld [vmem:[%s23756_s21 + $0xe0] ss:$16 sps:$4 sm:$0xff]   ;;  %v18637_v24 = vld [vmem:[%s23756_s21 + $0xe8] ss:$16 sps:$4 sm:$0xff]   ;;  %v18642_v25 = vld [vmem:[%s23756_s21 + $0x104] ss:$16 sps:$4 sm:$0xff]  }
 0x416   :  { %v18640_v18 = vld [vmem:[%s23756_s21 + $0x100] ss:$16 sps:$4 sm:$0xff]   ;;  %v18643_v26 = vld [vmem:[%s23756_s21 + $0x108] ss:$16 sps:$4 sm:$0xff]   ;;  %s23786_s25 = sld [smem:[#allocation58_spill]] }
 0x417   :  { %16037 = vmatmul.mubr.msk.bf16.vlgmr.msra.gmra.mrb[24].mxu1 %vm1755_vm3, %v18584_v29  ;;  %16042 = vmatmul.mubr.msk.bf16.vlgmr.msra.gmra.mrb[32].mxu0 %vm1755_vm3, %v18584_v29  ;;  %v18645_v29 = vld [vmem:[%s23756_s21 + $0x10c] ss:$16 sps:$4 sm:$0xff]  }
 0x418   :  { %2097 = vmatpush1.bf16.msra.mxu1 %v21340_v13  ;;  %2168 = vmatpush1.bf16.msra.mxu0 %v21342_v42 }
 0x419   :  { %2098 = vmatprep.subr.bf16.mxu1 %v21364_v14  ;;  %2169 = vmatprep.subr.bf16.mxu0 %v21366_v23 }
 0x41a   :  { %1823 = vmatprep.mubr.bf16.mxu1 %v20774_v44  ;;  %1894 = vmatprep.mubr.bf16.mxu0 %v20774_v44 }
 0x41c   :  { %2099 = vmatpush1.bf16.msra.mxu1 %v21360_v8  ;;  %2170 = vmatpush1.bf16.msra.mxu0 %v21362_v10 }
 0x41d   :  { %2100 = vmatprep.subr.bf16.mxu1 %v21384_v49  ;;  %2171 = vmatprep.subr.bf16.mxu0 %v21386_v52 }
 0x41f   :  { %16038 = vmatmul.mubr.msk.bf16.gmra.mrb[28].mxu1 %vm1755_vm3, %v18585_v30  ;;  %16043 = vmatmul.mubr.msk.bf16.gmra.mrb[36].mxu0 %vm1755_vm3, %v18585_v30  ;;  %v18648_v30 = vld [vmem:[%s23756_s21 + $0x124] ss:$16 sps:$4 sm:$0xff]  }
 0x420   :  { %2101 = vmatpush1.bf16.msra.mxu1 %v21380_v46  ;;  %2172 = vmatpush1.bf16.msra.mxu0 %v21382_v48 }
 0x421   :  { %16050 = vmatprep.subr.msk.bf16.mxu1 %vm1768_vm2, %v21400_v27  ;;  %16055 = vmatprep.subr.msk.bf16.mxu0 %vm1768_vm2, %v21402_v28 }
 0x422   :  { %1833 = vmatprep.mubr.bf16.mxu1 %v20774_v44  ;;  %1904 = vmatprep.mubr.bf16.mxu0 %v20774_v44 }
 0x424   :  { %2103 = vmatpush1.bf16.msra.mxu1 %v21405_v19  ;;  %2174 = vmatpush1.bf16.msra.mxu0 %v21408_v20 }
 0x425   :  { %2986 = vmatprep.subr.bf16.mxu1 %v18594_v31  ;;  %3128 = vmatprep.subr.bf16.mxu0 %v18597_v32  ;;  %v18651_v31 = vld [vmem:[%s23756_s21 + $0x12c] ss:$16 sps:$4 sm:$0xff]   ;;  %v18646_v32 = vld [vmem:[%s23756_s21 + $0x120] ss:$16 sps:$4 sm:$0xff]  }
 0x427   :  { %16039 = vmatmul.mubr.msk.bf16.gmra.mrb[32].mxu1 %vm1755_vm3, %v18586_v33  ;;  %16044 = vmatmul.mubr.msk.bf16.gmra.mrb[40].mxu0 %vm1755_vm3, %v18586_v33  ;;  %v18649_v33 = vld [vmem:[%s23756_s21 + $0x128] ss:$16 sps:$4 sm:$0xff]  }
 0x428   :  { %1843 = vmatprep.mubr.bf16.mxu1 %v20774_v44  ;;  %1914 = vmatprep.mubr.bf16.mxu0 %v20774_v44 }
 0x42f   :  { %16040 = vmatmul.mubr.msk.bf16.gmra.mrb[36].mxu1 %vm1755_vm3, %v18587_v34  ;;  %16045 = vmatmul.mubr.msk.bf16.gmra.mrb[44].mxu0 %vm1755_vm3, %v18587_v34  ;;  %v18652_v34 = vld [vmem:[%s23756_s21 + $0x140] ss:$16 sps:$4 sm:$0xff]  }
 0x430   :  { %2128 = vmatprep.mubr.bf16.mxu1 %v20774_v44  ;;  %2199 = vmatprep.mubr.bf16.mxu0 %v20774_v44 }
 0x437   :  { %16051 = vmatmul.mubr.msk.bf16.vlgmr.msra.gmra.mrb[40].mxu1 %vm1755_vm3, %v18588_v35  ;;  %16056 = vmatmul.mubr.msk.bf16.vlgmr.msra.gmra.mrb[48].mxu0 %vm1755_vm3, %v18588_v35  ;;  %v18654_v35 = vld [vmem:[%s23756_s21 + $0x144] ss:$16 sps:$4 sm:$0xff]  }
 0x438   :  { %2138 = vmatprep.mubr.bf16.mxu1 %v20774_v44  ;;  %2209 = vmatprep.mubr.bf16.mxu0 %v20774_v44 }
 0x439   :  { %2987 = vmatpush1.bf16.msra.mxu1 %v18592_v36  ;;  %3129 = vmatpush1.bf16.msra.mxu0 %v18595_v37  ;;  %v18655_v36 = vld [vmem:[%s23756_s21 + $0x148] ss:$16 sps:$4 sm:$0xff]   ;;  %v18657_v37 = vld [vmem:[%s23756_s21 + $0x14c] ss:$16 sps:$4 sm:$0xff]  }
 0x43a   :  { %2988 = vmatprep.subr.bf16.mxu1 %v18600_v38  ;;  %3130 = vmatprep.subr.bf16.mxu0 %v18603_v39  ;;  %v18660_v38 = vld [vmem:[%s23756_s21 + $0x164] ss:$16 sps:$4 sm:$0xff]   ;;  %v18663_v39 = vld [vmem:[%s23756_s21 + $0x16c] ss:$16 sps:$4 sm:$0xff]  }
 0x43d   :  { %2989 = vmatpush1.bf16.msra.mxu1 %v18598_v3  ;;  %3131 = vmatpush1.bf16.msra.mxu0 %v18601_v40  ;;  %v18658_v3 = vld [vmem:[%s23756_s21 + $0x160] ss:$16 sps:$4 sm:$0xff]   ;;  %v18661_v40 = vld [vmem:[%s23756_s21 + $0x168] ss:$16 sps:$4 sm:$0xff]  }
 0x43e   :  { %2990 = vmatprep.subr.bf16.mxu1 %v18606_v41  ;;  %3132 = vmatprep.subr.bf16.mxu0 %v18609_v5  ;;  %v18664_v41 = vld [vmem:[%s23756_s21 + $0x180] ss:$16 sps:$4 sm:$0xff]   ;;  %v18666_v5 = vld [vmem:[%s23756_s21 + $0x184] ss:$16 sps:$4 sm:$0xff]  }
 0x43f   :  { %16052 = vmatmul.mubr.msk.bf16.gmra.mrb[44].mxu1 %vm1755_vm3, %v18589_v9  ;;  %16057 = vmatmul.mubr.msk.bf16.gmra.mrb[52].mxu0 %vm1755_vm3, %v18589_v9  ;;  %v18667_v9 = vld [vmem:[%s23756_s21 + $0x188] ss:$16 sps:$4 sm:$0xff]  }
 0x440   :  { %2148 = vmatprep.mubr.bf16.mxu1 %v20774_v44  ;;  %2219 = vmatprep.mubr.bf16.mxu0 %v20774_v44 }
 0x441   :  { %2991 = vmatpush1.bf16.msra.mxu1 %v18604_v45  ;;  %3133 = vmatpush1.bf16.msra.mxu0 %v18607_v50  ;;  %v18669_v45 = vld [vmem:[%s23756_s21 + $0x18c] ss:$16 sps:$4 sm:$0xff]   ;;  %v18672_v50 = vld [vmem:[%s23756_s21 + $0x1a4] ss:$16 sps:$4 sm:$0xff]  }
 0x442   :  { %2992 = vmatprep.subr.bf16.mxu1 %v18612_v51  ;;  %3134 = vmatprep.subr.bf16.mxu0 %v18615_v53  ;;  %v18675_v51 = vld [vmem:[%s23756_s21 + $0x1ac] ss:$16 sps:$4 sm:$0xff]   ;;  %v18670_v53 = vld [vmem:[%s23756_s21 + $0x1a0] ss:$16 sps:$4 sm:$0xff]  }
 0x445   :  { %2993 = vmatpush1.bf16.msra.mxu1 %v18610_v54  ;;  %3135 = vmatpush1.bf16.msra.mxu0 %v18613_v55  ;;  %v18673_v54 = vld [vmem:[%s23756_s21 + $0x1a8] ss:$16 sps:$4 sm:$0xff]   ;;  %v18676_v55 = vld [vmem:[%s23756_s21 + $0x1c0] ss:$16 sps:$4 sm:$0xff]  }
 0x446   :  { %2994 = vmatprep.subr.bf16.mxu1 %v18618_v56  ;;  %3136 = vmatprep.subr.bf16.mxu0 %v18621_v57  ;;  %v18678_v56 = vld [vmem:[%s23756_s21 + $0x1c4] ss:$16 sps:$4 sm:$0xff]   ;;  %v18679_v57 = vld [vmem:[%s23756_s21 + $0x1c8] ss:$16 sps:$4 sm:$0xff]  }
 0x447   :  { %16053 = vmatmul.mubr.msk.bf16.gmra.mrb[48].mxu1 %vm1755_vm3, %v18590_v58  ;;  %16058 = vmatmul.mubr.msk.bf16.gmra.mrb[56].mxu0 %vm1755_vm3, %v18590_v58  ;;  %v18681_v58 = vld [vmem:[%s23756_s21 + $0x1cc] ss:$16 sps:$4 sm:$0xff]  }
 0x448   :  { %2158 = vmatprep.mubr.bf16.mxu1 %v20774_v44  ;;  %2229 = vmatprep.mubr.bf16.mxu0 %v20774_v44 }
 0x449   :  { %2995 = vmatpush1.bf16.msra.mxu1 %v18616_v59  ;;  %3137 = vmatpush1.bf16.msra.mxu0 %v18619_v60  ;;  %v18684_v59 = vld [vmem:[%s23756_s21 + $0x1e4] ss:$16 sps:$4 sm:$0xff]   ;;  %v18687_v60 = vld [vmem:[%s23756_s21 + $0x1ec] ss:$16 sps:$4 sm:$0xff]  }
 0x44a   :  { %2996 = vmatprep.subr.bf16.mxu1 %v18624_v61  ;;  %3138 = vmatprep.subr.bf16.mxu0 %v18627_v62  ;;  %v18682_v61 = vld [vmem:[%s23756_s21 + $0x1e0] ss:$16 sps:$4 sm:$0xff]   ;;  %v18685_v62 = vld [vmem:[%s23756_s21 + $0x1e8] ss:$16 sps:$4 sm:$0xff]  }
 0x44d   :  { %2997 = vmatpush1.bf16.msra.mxu1 %v18622_v63  ;;  %3139 = vmatpush1.bf16.msra.mxu0 %v18625_v0  ;;  %v18690_v63 = vld [vmem:[%s23756_s21 + $0x204] ss:$16 sps:$4 sm:$0xff]   ;;  %v18693_v0 = vld [vmem:[%s23756_s21 + $0x20c] ss:$16 sps:$4 sm:$0xff]  }
 0x44e   :  { %2998 = vmatprep.subr.bf16.mxu1 %v18630_v1  ;;  %3140 = vmatprep.subr.bf16.mxu0 %v18633_v2 }
 0x44f   :  { %16054 = vmatmul.mubr.msk.bf16.gmra.mrb[52].mxu1 %vm1755_vm3, %v18591_v4  ;;  %16059 = vmatmul.mubr.msk.bf16.gmra.mrb[60].mxu0 %vm1755_vm3, %v18591_v4 }
 0x451   :  { %2999 = vmatpush1.bf16.msra.mxu1 %v18628_v6  ;;  %3141 = vmatpush1.bf16.msra.mxu0 %v18631_v7 }
 0x452   :  { %3000 = vmatprep.subr.bf16.mxu1 %v18636_v21  ;;  %3142 = vmatprep.subr.bf16.mxu0 %v18639_v22 }
 0x455   :  { %3001 = vmatpush1.bf16.msra.mxu1 %v18634_v17  ;;  %3143 = vmatpush1.bf16.msra.mxu0 %v18637_v24 }
 0x456   :  { %3002 = vmatprep.subr.bf16.mxu1 %v18642_v25  ;;  %3144 = vmatprep.subr.bf16.mxu0 %v18645_v29 }
 0x459   :  { %3003 = vmatpush1.bf16.msra.mxu1 %v18640_v18  ;;  %3145 = vmatpush1.bf16.msra.mxu0 %v18643_v26 }
 0x45a   :  { %3004 = vmatprep.subr.bf16.mxu1 %v18648_v30  ;;  %3146 = vmatprep.subr.bf16.mxu0 %v18651_v31 }
 0x45d   :  { %3005 = vmatpush1.bf16.msra.mxu1 %v18646_v32  ;;  %3147 = vmatpush1.bf16.msra.mxu0 %v18649_v33 }
 0x45e   :  { %3006 = vmatprep.subr.bf16.mxu1 %v18654_v35  ;;  %3148 = vmatprep.subr.bf16.mxu0 %v18657_v37 }
 0x461   :  { %3007 = vmatpush1.bf16.msra.mxu1 %v18652_v34  ;;  %3149 = vmatpush1.bf16.msra.mxu0 %v18655_v36 }
 0x462   :  { %3008 = vmatprep.subr.bf16.mxu1 %v18660_v38  ;;  %3150 = vmatprep.subr.bf16.mxu0 %v18663_v39 }
 0x465   :  { %3009 = vmatpush1.bf16.msra.mxu1 %v18658_v3  ;;  %3151 = vmatpush1.bf16.msra.mxu0 %v18661_v40 }
 0x466   :  { %3010 = vmatprep.subr.bf16.mxu1 %v18666_v5  ;;  %3152 = vmatprep.subr.bf16.mxu0 %v18669_v45 }
 0x469   :  { %3011 = vmatpush1.bf16.msra.mxu1 %v18664_v41  ;;  %3153 = vmatpush1.bf16.msra.mxu0 %v18667_v9 }
 0x46a   :  { %3012 = vmatprep.subr.bf16.mxu1 %v18672_v50  ;;  %3154 = vmatprep.subr.bf16.mxu0 %v18675_v51 }
 0x46d   :  { %3013 = vmatpush1.bf16.msra.mxu1 %v18670_v53  ;;  %3155 = vmatpush1.bf16.msra.mxu0 %v18673_v54 }
 0x46e   :  { %3014 = vmatprep.subr.bf16.mxu1 %v18678_v56  ;;  %3156 = vmatprep.subr.bf16.mxu0 %v18681_v58 }
 0x471   :  { %3015 = vmatpush1.bf16.msra.mxu1 %v18676_v55  ;;  %3157 = vmatpush1.bf16.msra.mxu0 %v18679_v57 }
 0x472   :  { %3016 = vmatprep.subr.bf16.mxu1 %v18684_v59  ;;  %3158 = vmatprep.subr.bf16.mxu0 %v18687_v60 }
 0x475   :  { %3017 = vmatpush1.bf16.msra.mxu1 %v18682_v61  ;;  %3159 = vmatpush1.bf16.msra.mxu0 %v18685_v62 }
 0x476   :  { %3057 = vmatprep.subr.bf16.mxu1 %v18690_v63  ;;  %3199 = vmatprep.subr.bf16.mxu0 %v18693_v0 }
 0x4ea   :  { %v1815_v1 = vpop.f32.mrb[24].mxu1  ;;  %v1886_v2 = vpop.f32.mrb[32].mxu0 }
 0x4eb   :  { %v1817_v4 = vpop.f32.mrb[25].mxu1  ;;  %v1888_v6 = vpop.f32.mrb[33].mxu0 }
 0x4ec   :  { %v1819_v7 = vpop.f32.mrb[26].mxu1  ;;  %v1890_v21 = vpop.f32.mrb[34].mxu0 }
 0x4ed   :  { %v21538_v22 = vpack.c.bf16 %v1819_v7, %v1815_v1  ;;  %v1821_v17 = vpop.f32.mrb[27].mxu1  ;;  %v21540_v24 = vpack.c.bf16 %v1890_v21, %v1886_v2  ;;  %v1892_v18 = vpop.f32.mrb[35].mxu0 }
 0x4ee   :  { %v21542_v25 = vpack.c.bf16 %v1821_v17, %v1817_v4  ;;  %v21544_v26 = vpack.c.bf16 %v1892_v18, %v1888_v6 }
 0x4f2   :  { %v1825_v29 = vpop.f32.mrb[28].mxu1  ;;  %v1896_v30 = vpop.f32.mrb[36].mxu0 }
 0x4f3   :  { %v1827_v31 = vpop.f32.mrb[29].mxu1  ;;  %v1898_v32 = vpop.f32.mrb[37].mxu0 }
 0x4f4   :  { %v1829_v33 = vpop.f32.mrb[30].mxu1  ;;  %v1900_v34 = vpop.f32.mrb[38].mxu0 }
 0x4f5   :  { %v21546_v35 = vpack.c.bf16 %v1829_v33, %v1825_v29  ;;  %v1831_v36 = vpop.f32.mrb[31].mxu1  ;;  %v21548_v37 = vpack.c.bf16 %v1900_v34, %v1896_v30  ;;  %v1902_v38 = vpop.f32.mrb[39].mxu0  ;;  %v18688_v33 = vld [vmem:[%s23756_s21 + $0x200] ss:$16 sps:$4 sm:$0xff]   ;;  %v18691_v34 = vld [vmem:[%s23756_s21 + $0x208] ss:$16 sps:$4 sm:$0xff]  }
 0x4f6   :  { %v21550_v39 = vpack.c.bf16 %v1831_v36, %v1827_v31  ;;  %v21552_v3 = vpack.c.bf16 %v1902_v38, %v1898_v32  ;;  %v18696_v38 = vld [vmem:[%s23756_s21 + $0x224] ss:$16 sps:$4 sm:$0xff]  }
 0x4fa   :  { %v1835_v40 = vpop.f32.mrb[32].mxu1  ;;  %v1906_v41 = vpop.f32.mrb[40].mxu0 }
 0x4fb   :  { %v1837_v5 = vpop.f32.mrb[33].mxu1  ;;  %v1908_v9 = vpop.f32.mrb[41].mxu0 }
 0x4fc   :  { %v1839_v45 = vpop.f32.mrb[34].mxu1  ;;  %v1910_v50 = vpop.f32.mrb[42].mxu0 }
 0x4fd   :  { %v21554_v51 = vpack.c.bf16 %v1839_v45, %v1835_v40  ;;  %v1841_v53 = vpop.f32.mrb[35].mxu1  ;;  %v21556_v54 = vpack.c.bf16 %v1910_v50, %v1906_v41  ;;  %v1912_v55 = vpop.f32.mrb[43].mxu0  ;;  %v18699_v40 = vld [vmem:[%s23756_s21 + $0x22c] ss:$16 sps:$4 sm:$0xff]   ;;  %v18694_v41 = vld [vmem:[%s23756_s21 + $0x220] ss:$16 sps:$4 sm:$0xff]  }
 0x4fe   :  { %v21558_v56 = vpack.c.bf16 %v1841_v53, %v1837_v5  ;;  %v21560_v57 = vpack.c.bf16 %v1912_v55, %v1908_v9  ;;  %v18697_v5 = vld [vmem:[%s23756_s21 + $0x228] ss:$16 sps:$4 sm:$0xff]   ;;  %v18702_v50 = vld [vmem:[%s23756_s21 + $0x244] ss:$16 sps:$4 sm:$0xff]   ;;  %v18705_v53 = vld [vmem:[%s23756_s21 + $0x24c] ss:$16 sps:$4 sm:$0xff]  }
 0x502   :  { %v21562_v58 = vpop.f32.mrb[36].mxu1  ;;  %v21564_v59 = vpop.f32.mrb[44].mxu0 }
 0x503   :  { %v21566_v60 = vpop.f32.mrb[37].mxu1  ;;  %v21568_v61 = vpop.f32.mrb[45].mxu0 }
 0x504   :  { %v1849_v62 = vpop.f32.mrb[38].mxu1  ;;  %v1920_v63 = vpop.f32.mrb[46].mxu0 }
 0x505   :  { %v1850_v0 = vpop.f32.mrb[39].mxu1  ;;  %v1921_v1 = vpop.f32.mrb[47].mxu0 }
 0x50a   :  { %v2130_v2 = vpop.f32.mrb[40].mxu1  ;;  %v2201_v4 = vpop.f32.mrb[48].mxu0 }
 0x50b   :  { %v2132_v6 = vpop.f32.mrb[41].mxu1  ;;  %v2203_v7 = vpop.f32.mrb[49].mxu0 }
 0x50c   :  { %v2134_v21 = vpop.f32.mrb[42].mxu1  ;;  %v2205_v17 = vpop.f32.mrb[50].mxu0 }
 0x50d   :  { %v2238_v18 = vpack.c.bf16 %v2134_v21, %v2130_v2  ;;  %v2136_v29 = vpop.f32.mrb[43].mxu1  ;;  %v21570_v30 = vpack.c.bf16 %v2205_v17, %v2201_v4  ;;  %v2207_v31 = vpop.f32.mrb[51].mxu0  ;;  %v18703_v21 = vld [vmem:[%s23756_s21 + $0x248] ss:$16 sps:$4 sm:$0xff]  }
 0x50e   :  { %v2239_v32 = vpack.c.bf16 %v2136_v29, %v2132_v6  ;;  %v21574_v36 = vpack.c.bf16 %v2207_v31, %v2203_v7  ;;  %v18700_v7 = vld [vmem:[%s23756_s21 + $0x240] ss:$16 sps:$4 sm:$0xff]   ;;  %v18708_v29 = vld [vmem:[%s23756_s21 + $0x264] ss:$16 sps:$4 sm:$0xff]   ;;  %v18711_v31 = vld [vmem:[%s23756_s21 + $0x26c] ss:$16 sps:$4 sm:$0xff]  }
 0x510   :  { %3018 = vmatprep.mubr.bf16.mxu1 %v2239_v32  ;;  %3160 = vmatprep.mubr.bf16.mxu0 %v2239_v32  ;;  %v18706_v32 = vld [vmem:[%s23756_s21 + $0x260] ss:$16 sps:$4 sm:$0xff]  }
 0x511   :  { %3019 = vmatmul.mubr.bf16.vlgmr.msra.gmra.mrb[56].mxu1 %v2238_v18  ;;  %3161 = vmatmul.mubr.bf16.vlgmr.msra.gmra.mrb[64].mxu0 %v2238_v18 }
 0x512   :  { %3058 = vmatpush1.bf16.msra.mxu1 %v18688_v33  ;;  %3200 = vmatpush1.bf16.msra.mxu0 %v18691_v34  ;;  %v2140_v9 = vpop.f32.mrb[44].mxu1  ;;  %v2211_v45 = vpop.f32.mrb[52].mxu0  ;;  %v18709_v33 = vld [vmem:[%s23756_s21 + $0x268] ss:$16 sps:$4 sm:$0xff]  }
 0x513   :  { %3059 = vmatprep.subr.bf16.mxu1 %v18696_v38  ;;  %3201 = vmatprep.subr.bf16.mxu0 %v18699_v40  ;;  %v2142_v55 = vpop.f32.mrb[45].mxu1  ;;  %v2213_v62 = vpop.f32.mrb[53].mxu0  ;;  %v18714_v40 = vld [vmem:[%s23756_s21 + $0x284] ss:$16 sps:$4 sm:$0xff]  }
 0x514   :  { %v2144_v63 = vpop.f32.mrb[46].mxu1  ;;  %v2215_v0 = vpop.f32.mrb[54].mxu0 }
 0x515   :  { %v2242_v1 = vpack.c.bf16 %v2144_v63, %v2140_v9  ;;  %v2146_v2 = vpop.f32.mrb[47].mxu1  ;;  %v21582_v4 = vpack.c.bf16 %v2215_v0, %v2211_v45  ;;  %v2217_v6 = vpop.f32.mrb[55].mxu0  ;;  %v18712_v0 = vld [vmem:[%s23756_s21 + $0x280] ss:$16 sps:$4 sm:$0xff]  }
 0x516   :  { %3060 = vmatpush1.bf16.msra.mxu1 %v18694_v41  ;;  %3202 = vmatpush1.bf16.msra.mxu0 %v18697_v5  ;;  %v2243_v17 = vpack.c.bf16 %v2146_v2, %v2142_v55  ;;  %v21586_v18 = vpack.c.bf16 %v2217_v6, %v2213_v62  ;;  %v18717_v41 = vld [vmem:[%s23756_s21 + $0x28c] ss:$16 sps:$4 sm:$0xff]  }
 0x517   :  { %3061 = vmatprep.subr.bf16.mxu1 %v18702_v50  ;;  %3203 = vmatprep.subr.bf16.mxu0 %v18705_v53 }
 0x518   :  { %3028 = vmatprep.mubr.bf16.mxu1 %v2243_v17  ;;  %3170 = vmatprep.mubr.bf16.mxu0 %v2243_v17  ;;  %v18718_v17 = vld [vmem:[%s23756_s21 + $0x2a0] ss:$16 sps:$4 sm:$0xff]  }
 0x519   :  { %3029 = vmatmul.mubr.bf16.gmra.mrb[60].mxu1 %v2242_v1  ;;  %3171 = vmatmul.mubr.bf16.gmra.mrb[68].mxu0 %v2242_v1  ;;  %v18715_v1 = vld [vmem:[%s23756_s21 + $0x288] ss:$16 sps:$4 sm:$0xff]  }
 0x51a   :  { %3062 = vmatpush1.bf16.msra.mxu1 %v18700_v7  ;;  %3204 = vmatpush1.bf16.msra.mxu0 %v18703_v21  ;;  %v2150_v34 = vpop.f32.mrb[48].mxu1  ;;  %v2221_v38 = vpop.f32.mrb[56].mxu0  ;;  %v18720_v7 = vld [vmem:[%s23756_s21 + $0x2a4] ss:$16 sps:$4 sm:$0xff]   ;;  %v18723_v21 = vld [vmem:[%s23756_s21 + $0x2ac] ss:$16 sps:$4 sm:$0xff]  }
 0x51b   :  { %3063 = vmatprep.subr.bf16.mxu1 %v18708_v29  ;;  %3205 = vmatprep.subr.bf16.mxu0 %v18711_v31  ;;  %v2152_v5 = vpop.f32.mrb[49].mxu1  ;;  %v2223_v9 = vpop.f32.mrb[57].mxu0  ;;  %v18721_v29 = vld [vmem:[%s23756_s21 + $0x2a8] ss:$16 sps:$4 sm:$0xff]  }
 0x51c   :  { %v2154_v45 = vpop.f32.mrb[50].mxu1  ;;  %v2225_v50 = vpop.f32.mrb[58].mxu0 }
 0x51d   :  { %v2246_v53 = vpack.c.bf16 %v2154_v45, %v2150_v34  ;;  %v2156_v55 = vpop.f32.mrb[51].mxu1  ;;  %v21594_v62 = vpack.c.bf16 %v2225_v50, %v2221_v38  ;;  %v2227_v63 = vpop.f32.mrb[59].mxu0  ;;  %v18729_v34 = vld [vmem:[%s23756_s21 + $0x2cc] ss:$16 sps:$4 sm:$0xff]  }
 0x51e   :  { %3064 = vmatpush1.bf16.msra.mxu1 %v18706_v32  ;;  %3206 = vmatpush1.bf16.msra.mxu0 %v18709_v33  ;;  %v2247_v2 = vpack.c.bf16 %v2156_v55, %v2152_v5  ;;  %v21598_v6 = vpack.c.bf16 %v2227_v63, %v2223_v9  ;;  %v18726_v33 = vld [vmem:[%s23756_s21 + $0x2c4] ss:$16 sps:$4 sm:$0xff]   ;;  %v18724_v55 = vld [vmem:[%s23756_s21 + $0x2c0] ss:$16 sps:$4 sm:$0xff]   ;;  %v18727_v63 = vld [vmem:[%s23756_s21 + $0x2c8] ss:$16 sps:$4 sm:$0xff]  }
 0x51f   :  { %3065 = vmatprep.subr.bf16.mxu1 %v18714_v40  ;;  %3207 = vmatprep.subr.bf16.mxu0 %v18717_v41 }
 0x520   :  { %3038 = vmatprep.mubr.bf16.mxu1 %v2247_v2  ;;  %3180 = vmatprep.mubr.bf16.mxu0 %v2247_v2  ;;  %v18730_v2 = vld [vmem:[%s23756_s21 + $0x2e0] ss:$16 sps:$4 sm:$0xff]  }
 0x521   :  { %3039 = vmatmul.mubr.bf16.gmra.mrb[64].mxu1 %v2246_v53  ;;  %3181 = vmatmul.mubr.bf16.gmra.mrb[72].mxu0 %v2246_v53 }
 0x522   :  { %3066 = vmatpush1.bf16.msra.mxu1 %v18712_v0  ;;  %3208 = vmatpush1.bf16.msra.mxu0 %v18715_v1  ;;  %v2160_v31 = vpop.f32.mrb[52].mxu1  ;;  %v21604_v32 = vpop.f32.mrb[60].mxu0  ;;  %v18732_v0 = vld [vmem:[%s23756_s21 + $0x2e4] ss:$16 sps:$4 sm:$0xff]   ;;  %v18735_v1 = vld [vmem:[%s23756_s21 + $0x2ec] ss:$16 sps:$4 sm:$0xff]  }
 0x523   :  { %3067 = vmatprep.subr.bf16.mxu1 %v18720_v7  ;;  %3209 = vmatprep.subr.bf16.mxu0 %v18723_v21  ;;  %v2162_v38 = vpop.f32.mrb[53].mxu1  ;;  %v21608_v40 = vpop.f32.mrb[61].mxu0  ;;  %v2250_v45 = vpack.c.bf16 %v2160_v31, %v2160_v31  ;;  %v18733_v7 = vld [vmem:[%s23756_s21 + $0x2e8] ss:$16 sps:$4 sm:$0xff]   ;;  %v18738_v21 = vld [vmem:[%s23756_s21 + $0x304] ss:$16 sps:$4 sm:$0xff]  }
 0x524   :  { %v2251_v41 = vpack.c.bf16 %v2162_v38, %v2162_v38  ;;  %v2164_v5 = vpop.f32.mrb[54].mxu1  ;;  %v2235_v9 = vpop.f32.mrb[62].mxu0  ;;  %v18739_v31 = vld [vmem:[%s23756_s21 + $0x308] ss:$16 sps:$4 sm:$0xff]   ;;  %v18742_v38 = vld [vmem:[%s23756_s21 + $0x320] ss:$16 sps:$4 sm:$0xff]  }
 0x525   :  { %v2165_v50 = vpop.f32.mrb[55].mxu1  ;;  %v2236_v53 = vpop.f32.mrb[63].mxu0  ;;  %v18753_v5 = vld [vmem:[%s23756_s21 + $0x34c] ss:$16 sps:$4 sm:$0xff]   ;;  %v18748_v9 = vld [vmem:[%s23756_s21 + $0x340] ss:$16 sps:$4 sm:$0xff]  }
 0x526   :  { %3068 = vmatpush1.bf16.msra.mxu1 %v18718_v17  ;;  %3210 = vmatpush1.bf16.msra.mxu0 %v18721_v29  ;;  %v18741_v17 = vld [vmem:[%s23756_s21 + $0x30c] ss:$16 sps:$4 sm:$0xff]   ;;  %v18736_v29 = vld [vmem:[%s23756_s21 + $0x300] ss:$16 sps:$4 sm:$0xff]   ;;  %v18756_v50 = vld [vmem:[%s23756_s21 + $0x364] ss:$16 sps:$4 sm:$0xff]  }
 0x527   :  { %3069 = vmatprep.subr.bf16.mxu1 %v18726_v33  ;;  %3211 = vmatprep.subr.bf16.mxu0 %v18729_v34  ;;  %v18744_v33 = vld [vmem:[%s23756_s21 + $0x324] ss:$16 sps:$4 sm:$0xff]   ;;  %v18747_v34 = vld [vmem:[%s23756_s21 + $0x32c] ss:$16 sps:$4 sm:$0xff]  }
 0x528   :  { %3048 = vmatprep.mubr.bf16.mxu1 %v2251_v41  ;;  %3190 = vmatprep.mubr.bf16.mxu0 %v2251_v41  ;;  %v18745_v41 = vld [vmem:[%s23756_s21 + $0x328] ss:$16 sps:$4 sm:$0xff]   ;;  %v18759_v53 = vld [vmem:[%s23756_s21 + $0x36c] ss:$16 sps:$4 sm:$0xff]  }
 0x529   :  { %3049 = vmatmul.mubr.bf16.gmra.mrb[68].mxu1 %v2250_v45  ;;  %3191 = vmatmul.mubr.bf16.gmra.mrb[76].mxu0 %v2250_v45  ;;  %v18751_v45 = vld [vmem:[%s23756_s21 + $0x348] ss:$16 sps:$4 sm:$0xff]  }
 0x52a   :  { %3070 = vmatpush1.bf16.msra.mxu1 %v18724_v55  ;;  %3212 = vmatpush1.bf16.msra.mxu0 %v18727_v63  ;;  %v18754_v55 = vld [vmem:[%s23756_s21 + $0x360] ss:$16 sps:$4 sm:$0xff]   ;;  %v18757_v63 = vld [vmem:[%s23756_s21 + $0x368] ss:$16 sps:$4 sm:$0xff]  }
 0x52b   :  { %3071 = vmatprep.subr.bf16.mxu1 %v18732_v0  ;;  %3213 = vmatprep.subr.bf16.mxu0 %v18735_v1  ;;  %v18762_v0 = vld [vmem:[%s23756_s21 + $0x384] ss:$16 sps:$4 sm:$0xff]   ;;  %v18765_v1 = vld [vmem:[%s23756_s21 + $0x38c] ss:$16 sps:$4 sm:$0xff]  }
 0x52c   :  { %16180 = vmatprep.mubr.msk.bf16.mxu1 %vm748_vm1, %v21574_v36  ;;  %16184 = vmatprep.mubr.msk.bf16.mxu0 %vm748_vm1, %v21574_v36  ;;  %v18750_v36 = vld [vmem:[%s23756_s21 + $0x344] ss:$16 sps:$4 sm:$0xff]  }
 0x52e   :  { %3072 = vmatpush1.bf16.msra.mxu1 %v18730_v2  ;;  %3214 = vmatpush1.bf16.msra.mxu0 %v18733_v7  ;;  %v18760_v2 = vld [vmem:[%s23756_s21 + $0x380] ss:$16 sps:$4 sm:$0xff]   ;;  %v18763_v7 = vld [vmem:[%s23756_s21 + $0x388] ss:$16 sps:$4 sm:$0xff]  }
 0x52f   :  { %3073 = vmatprep.subr.bf16.mxu1 %v18738_v21  ;;  %3215 = vmatprep.subr.bf16.mxu0 %v18741_v17  ;;  %v18768_v21 = vld [vmem:[%s23756_s21 + $0x3a4] ss:$16 sps:$4 sm:$0xff]   ;;  %v18771_v17 = vld [vmem:[%s23756_s21 + $0x3ac] ss:$16 sps:$4 sm:$0xff]  }
 0x532   :  { %3074 = vmatpush1.bf16.msra.mxu1 %v18736_v29  ;;  %3216 = vmatpush1.bf16.msra.mxu0 %v18739_v31  ;;  %v18766_v29 = vld [vmem:[%s23756_s21 + $0x3a0] ss:$16 sps:$4 sm:$0xff]   ;;  %v18769_v31 = vld [vmem:[%s23756_s21 + $0x3a8] ss:$16 sps:$4 sm:$0xff]   ;;  %s23785_s21 = sld [smem:[#allocation60_spill]] }
 0x533   :  { %3075 = vmatprep.subr.bf16.mxu1 %v18744_v33  ;;  %3217 = vmatprep.subr.bf16.mxu0 %v18747_v34  ;;  %v18774_v33 = vld [vmem:[%s23758_s29 + $0x4] ss:$16 sps:$4 sm:$0xff]   ;;  %v18777_v34 = vld [vmem:[%s23758_s29 + $0xc] ss:$16 sps:$4 sm:$0xff]  }
 0x536   :  { %3076 = vmatpush1.bf16.msra.mxu1 %v18742_v38  ;;  %3218 = vmatpush1.bf16.msra.mxu0 %v18745_v41  ;;  %v18772_v38 = vld [vmem:[%s23758_s29] ss:$16 sps:$4 sm:$0xff]   ;;  %v18775_v41 = vld [vmem:[%s23758_s29 + $0x8] ss:$16 sps:$4 sm:$0xff]  }
 0x537   :  { %3077 = vmatprep.subr.bf16.mxu1 %v18750_v36  ;;  %3219 = vmatprep.subr.bf16.mxu0 %v18753_v5  ;;  %v18780_v36 = vld [vmem:[%s23758_s29 + $0x24] ss:$16 sps:$4 sm:$0xff]   ;;  %v18783_v5 = vld [vmem:[%s23758_s29 + $0x2c] ss:$16 sps:$4 sm:$0xff]  }
 0x53a   :  { %3078 = vmatpush1.bf16.msra.mxu1 %v18748_v9  ;;  %3220 = vmatpush1.bf16.msra.mxu0 %v18751_v45  ;;  %v18778_v9 = vld [vmem:[%s23758_s29 + $0x20] ss:$16 sps:$4 sm:$0xff]   ;;  %v18781_v45 = vld [vmem:[%s23758_s29 + $0x28] ss:$16 sps:$4 sm:$0xff]  }
 0x53b   :  { %3079 = vmatprep.subr.bf16.mxu1 %v18756_v50  ;;  %3221 = vmatprep.subr.bf16.mxu0 %v18759_v53  ;;  %v18786_v50 = vld [vmem:[%s23758_s29 + $0x44] ss:$16 sps:$4 sm:$0xff]   ;;  %v18789_v53 = vld [vmem:[%s23758_s29 + $0x4c] ss:$16 sps:$4 sm:$0xff]  }
 0x53e   :  { %3080 = vmatpush1.bf16.msra.mxu1 %v18754_v55  ;;  %3222 = vmatpush1.bf16.msra.mxu0 %v18757_v63  ;;  %v18787_v55 = vld [vmem:[%s23758_s29 + $0x48] ss:$16 sps:$4 sm:$0xff]   ;;  %v18792_v63 = vld [vmem:[%s23758_s29 + $0x64] ss:$16 sps:$4 sm:$0xff]  }
 0x53f   :  { %3081 = vmatprep.subr.bf16.mxu1 %v18762_v0  ;;  %3223 = vmatprep.subr.bf16.mxu0 %v18765_v1  ;;  %v18795_v0 = vld [vmem:[%s23758_s29 + $0x6c] ss:$16 sps:$4 sm:$0xff]   ;;  %v18793_v1 = vld [vmem:[%s23758_s29 + $0x68] ss:$16 sps:$4 sm:$0xff]  }
 0x542   :  { %3082 = vmatpush1.bf16.msra.mxu1 %v18760_v2  ;;  %3224 = vmatpush1.bf16.msra.mxu0 %v18763_v7  ;;  %v18798_v2 = vld [vmem:[%s23758_s29 + $0x84] ss:$16 sps:$4 sm:$0xff]   ;;  %v18801_v7 = vld [vmem:[%s23758_s29 + $0x8c] ss:$16 sps:$4 sm:$0xff]  }
 0x543   :  { %3083 = vmatprep.subr.bf16.mxu1 %v18768_v21  ;;  %3225 = vmatprep.subr.bf16.mxu0 %v18771_v17  ;;  %v18799_v21 = vld [vmem:[%s23758_s29 + $0x88] ss:$16 sps:$4 sm:$0xff]   ;;  %v18804_v17 = vld [vmem:[%s23758_s29 + $0xa4] ss:$16 sps:$4 sm:$0xff]  }
 0x546   :  { %3084 = vmatpush1.bf16.msra.mxu1 %v18766_v29  ;;  %3226 = vmatpush1.bf16.msra.mxu0 %v18769_v31  ;;  %v18807_v29 = vld [vmem:[%s23758_s29 + $0xac] ss:$16 sps:$4 sm:$0xff]   ;;  %v2253_v31 = vpack.c.bf16 %v21608_v40, %v21608_v40  ;;  %v2252_v40 = vpack.c.bf16 %v21604_v32, %v21604_v32  ;;  %v18814_v32 = vld [vmem:[%s23758_s29 + $0xe0] ss:$16 sps:$4 sm:$0xff]  }
 0x547   :  { %3882 = vmatprep.subr.bf16.mxu1 %v18774_v33  ;;  %4024 = vmatprep.subr.bf16.mxu0 %v18777_v34  ;;  %v18805_v33 = vld [vmem:[%s23758_s29 + $0xa8] ss:$16 sps:$4 sm:$0xff]   ;;  %v18810_v34 = vld [vmem:[%s23758_s29 + $0xc4] ss:$16 sps:$4 sm:$0xff]  }
 0x549   :  { %3090 = vmatmul.mubr.bf16.vlgmr.msra.gmra.mrb[56].mxu1 %v21570_v30  ;;  %3232 = vmatmul.mubr.bf16.vlgmr.msra.gmra.mrb[64].mxu0 %v21570_v30  ;;  %v18784_v30 = vld [vmem:[%s23758_s29 + $0x40] ss:$16 sps:$4 sm:$0xff]  }
 0x54a   :  { %3883 = vmatpush1.bf16.msra.mxu1 %v18772_v38  ;;  %4025 = vmatpush1.bf16.msra.mxu0 %v18775_v41  ;;  %v18813_v38 = vld [vmem:[%s23758_s29 + $0xcc] ss:$16 sps:$4 sm:$0xff]   ;;  %v18811_v41 = vld [vmem:[%s23758_s29 + $0xc8] ss:$16 sps:$4 sm:$0xff]  }
 0x54b   :  { %3884 = vmatprep.subr.bf16.mxu1 %v18780_v36  ;;  %4026 = vmatprep.subr.bf16.mxu0 %v18783_v5  ;;  %v18816_v36 = vld [vmem:[%s23758_s29 + $0xe4] ss:$16 sps:$4 sm:$0xff]   ;;  %v18819_v5 = vld [vmem:[%s23758_s29 + $0xec] ss:$16 sps:$4 sm:$0xff]  }
 0x54c   :  { %16181 = vmatprep.mubr.msk.bf16.mxu1 %vm748_vm1, %v21586_v18  ;;  %16185 = vmatprep.mubr.msk.bf16.mxu0 %vm748_vm1, %v21586_v18  ;;  %v18790_v18 = vld [vmem:[%s23758_s29 + $0x60] ss:$16 sps:$4 sm:$0xff]  }
 0x54e   :  { %3885 = vmatpush1.bf16.msra.mxu1 %v18778_v9  ;;  %4027 = vmatpush1.bf16.msra.mxu0 %v18781_v45  ;;  %v18817_v9 = vld [vmem:[%s23758_s29 + $0xe8] ss:$16 sps:$4 sm:$0xff]   ;;  %v18822_v45 = vld [vmem:[%s23758_s29 + $0x104] ss:$16 sps:$4 sm:$0xff]  }
 0x54f   :  { %3886 = vmatprep.subr.bf16.mxu1 %v18786_v50  ;;  %4028 = vmatprep.subr.bf16.mxu0 %v18789_v53  ;;  %v18825_v50 = vld [vmem:[%s23758_s29 + $0x10c] ss:$16 sps:$4 sm:$0xff]   ;;  %v18820_v53 = vld [vmem:[%s23758_s29 + $0x100] ss:$16 sps:$4 sm:$0xff]  }
 0x551   :  { %3100 = vmatmul.mubr.bf16.gmra.mrb[60].mxu1 %v21582_v4  ;;  %3242 = vmatmul.mubr.bf16.gmra.mrb[68].mxu0 %v21582_v4  ;;  %v18796_v4 = vld [vmem:[%s23758_s29 + $0x80] ss:$16 sps:$4 sm:$0xff]  }
 0x552   :  { %3887 = vmatpush1.bf16.msra.mxu1 %v18784_v30  ;;  %4029 = vmatpush1.bf16.msra.mxu0 %v18787_v55  ;;  %v18823_v30 = vld [vmem:[%s23758_s29 + $0x108] ss:$16 sps:$4 sm:$0xff]   ;;  %v18828_v55 = vld [vmem:[%s23758_s29 + $0x124] ss:$16 sps:$4 sm:$0xff]  }
 0x553   :  { %3888 = vmatprep.subr.bf16.mxu1 %v18792_v63  ;;  %4030 = vmatprep.subr.bf16.mxu0 %v18795_v0  ;;  %v18831_v63 = vld [vmem:[%s23758_s29 + $0x12c] ss:$16 sps:$4 sm:$0xff]   ;;  %v18829_v0 = vld [vmem:[%s23758_s29 + $0x128] ss:$16 sps:$4 sm:$0xff]  }
 0x554   :  { %16182 = vmatprep.mubr.msk.bf16.mxu1 %vm748_vm1, %v21598_v6  ;;  %16186 = vmatprep.mubr.msk.bf16.mxu0 %vm748_vm1, %v21598_v6  ;;  %v18802_v6 = vld [vmem:[%s23758_s29 + $0xa0] ss:$16 sps:$4 sm:$0xff]  }
 0x556   :  { %3889 = vmatpush1.bf16.msra.mxu1 %v18790_v18  ;;  %4031 = vmatpush1.bf16.msra.mxu0 %v18793_v1  ;;  %v18834_v18 = vld [vmem:[%s23758_s29 + $0x144] ss:$16 sps:$4 sm:$0xff]   ;;  %v18837_v1 = vld [vmem:[%s23758_s29 + $0x14c] ss:$16 sps:$4 sm:$0xff]  }
 0x557   :  { %3890 = vmatprep.subr.bf16.mxu1 %v18798_v2  ;;  %4032 = vmatprep.subr.bf16.mxu0 %v18801_v7  ;;  %v18832_v2 = vld [vmem:[%s23758_s29 + $0x140] ss:$16 sps:$4 sm:$0xff]   ;;  %v18835_v7 = vld [vmem:[%s23758_s29 + $0x148] ss:$16 sps:$4 sm:$0xff]  }
 0x559   :  { %3110 = vmatmul.mubr.bf16.gmra.mrb[64].mxu1 %v21594_v62  ;;  %3252 = vmatmul.mubr.bf16.gmra.mrb[72].mxu0 %v21594_v62  ;;  %v18808_v62 = vld [vmem:[%s23758_s29 + $0xc0] ss:$16 sps:$4 sm:$0xff]  }
 0x55a   :  { %3891 = vmatpush1.bf16.msra.mxu1 %v18796_v4  ;;  %4033 = vmatpush1.bf16.msra.mxu0 %v18799_v21  ;;  %v18840_v4 = vld [vmem:[%s23758_s29 + $0x164] ss:$16 sps:$4 sm:$0xff]   ;;  %v18843_v21 = vld [vmem:[%s23758_s29 + $0x16c] ss:$16 sps:$4 sm:$0xff]  }
 0x55b   :  { %3892 = vmatprep.subr.bf16.mxu1 %v18804_v17  ;;  %4034 = vmatprep.subr.bf16.mxu0 %v18807_v29  ;;  %v18838_v17 = vld [vmem:[%s23758_s29 + $0x160] ss:$16 sps:$4 sm:$0xff]   ;;  %v18841_v29 = vld [vmem:[%s23758_s29 + $0x168] ss:$16 sps:$4 sm:$0xff]  }
 0x55c   :  { %16183 = vmatprep.mubr.msk.bf16.mxu1 %vm748_vm1, %v2253_v31  ;;  %16187 = vmatprep.mubr.msk.bf16.mxu0 %vm748_vm1, %v2253_v31  ;;  %v18846_v31 = vld [vmem:[%s23758_s29 + $0x184] ss:$16 sps:$4 sm:$0xff]  }
 0x55e   :  { %3893 = vmatpush1.bf16.msra.mxu1 %v18802_v6  ;;  %4035 = vmatpush1.bf16.msra.mxu0 %v18805_v33  ;;  %v18849_v6 = vld [vmem:[%s23758_s29 + $0x18c] ss:$16 sps:$4 sm:$0xff]   ;;  %v18844_v33 = vld [vmem:[%s23758_s29 + $0x180] ss:$16 sps:$4 sm:$0xff]  }
 0x55f   :  { %3894 = vmatprep.subr.bf16.mxu1 %v18810_v34  ;;  %4036 = vmatprep.subr.bf16.mxu0 %v18813_v38  ;;  %v18847_v34 = vld [vmem:[%s23758_s29 + $0x188] ss:$16 sps:$4 sm:$0xff]   ;;  %v18852_v38 = vld [vmem:[%s23758_s29 + $0x1a4] ss:$16 sps:$4 sm:$0xff]  }
 0x561   :  { %3120 = vmatmul.mubr.bf16.gmra.mrb[72].mxu1 %v2252_v40  ;;  %3262 = vmatmul.mubr.bf16.gmra.mrb[80].mxu0 %v2252_v40  ;;  %v18855_v40 = vld [vmem:[%s23758_s29 + $0x1ac] ss:$16 sps:$4 sm:$0xff]  }
 0x562   :  { %3895 = vmatpush1.bf16.msra.mxu1 %v18808_v62  ;;  %3914 = vmatprep.mubr.bf16.mxu1 %v21542_v25  ;;  %v18850_v62 = vld [vmem:[%s23758_s29 + $0x1a0] ss:$16 sps:$4 sm:$0xff]  }
 0x563   :  { %4037 = vmatpush1.bf16.msra.mxu0 %v18811_v41  ;;  %4056 = vmatprep.mubr.bf16.mxu0 %v21542_v25  ;;  %v18826_v25 = vld [vmem:[%s23758_s29 + $0x120] ss:$16 sps:$4 sm:$0xff]   ;;  %v18853_v41 = vld [vmem:[%s23758_s29 + $0x1a8] ss:$16 sps:$4 sm:$0xff]  }
 0x564   :  { %3896 = vmatprep.subr.bf16.mxu1 %v18816_v36  ;;  %4038 = vmatprep.subr.bf16.mxu0 %v18819_v5  ;;  %v18858_v36 = vld [vmem:[%s23758_s29 + $0x1c4] ss:$16 sps:$4 sm:$0xff]   ;;  %v18861_v5 = vld [vmem:[%s23758_s29 + $0x1cc] ss:$16 sps:$4 sm:$0xff]  }
 0x566   :  { %3897 = vmatpush1.bf16.msra.mxu1 %v18814_v32  ;;  %v18856_v32 = vld [vmem:[%s23758_s29 + $0x1c0] ss:$16 sps:$4 sm:$0xff]  }
 0x567   :  { %4039 = vmatpush1.bf16.msra.mxu0 %v18817_v9  ;;  %3898 = vmatprep.subr.bf16.mxu1 %v18822_v45  ;;  %v18859_v9 = vld [vmem:[%s23758_s29 + $0x1c8] ss:$16 sps:$4 sm:$0xff]   ;;  %v18864_v45 = vld [vmem:[%s23758_s29 + $0x1e4] ss:$16 sps:$4 sm:$0xff]  }
 0x568   :  { %4040 = vmatprep.subr.bf16.mxu0 %v18825_v50  ;;  %v18867_v50 = vld [vmem:[%s23758_s29 + $0x1ec] ss:$16 sps:$4 sm:$0xff]  }
 0x56a   :  { %3899 = vmatpush1.bf16.msra.mxu1 %v18820_v53  ;;  %v18862_v53 = vld [vmem:[%s23758_s29 + $0x1e0] ss:$16 sps:$4 sm:$0xff]  }
 0x56b   :  { %4041 = vmatpush1.bf16.msra.mxu0 %v18823_v30  ;;  %3900 = vmatprep.subr.bf16.mxu1 %v18828_v55  ;;  %v18865_v30 = vld [vmem:[%s23758_s29 + $0x1e8] ss:$16 sps:$4 sm:$0xff]   ;;  %v18870_v55 = vld [vmem:[%s23758_s29 + $0x204] ss:$16 sps:$4 sm:$0xff]  }
 0x56c   :  { %4042 = vmatprep.subr.bf16.mxu0 %v18831_v63  ;;  %v18873_v63 = vld [vmem:[%s23758_s29 + $0x20c] ss:$16 sps:$4 sm:$0xff]  }
 0x56e   :  { %3901 = vmatpush1.bf16.msra.mxu1 %v18826_v25  ;;  %v18868_v25 = vld [vmem:[%s23758_s29 + $0x200] ss:$16 sps:$4 sm:$0xff]  }
 0x56f   :  { %4043 = vmatpush1.bf16.msra.mxu0 %v18829_v0  ;;  %3902 = vmatprep.subr.bf16.mxu1 %v18834_v18  ;;  %v18871_v0 = vld [vmem:[%s23758_s29 + $0x208] ss:$16 sps:$4 sm:$0xff]   ;;  %v18876_v18 = vld [vmem:[%s23758_s29 + $0x224] ss:$16 sps:$4 sm:$0xff]  }
 0x570   :  { %4044 = vmatprep.subr.bf16.mxu0 %v18837_v1  ;;  %v18879_v1 = vld [vmem:[%s23758_s29 + $0x22c] ss:$16 sps:$4 sm:$0xff]  }
 0x572   :  { %3903 = vmatpush1.bf16.msra.mxu1 %v18832_v2  ;;  %v18874_v2 = vld [vmem:[%s23758_s29 + $0x220] ss:$16 sps:$4 sm:$0xff]  }
 0x573   :  { %4045 = vmatpush1.bf16.msra.mxu0 %v18835_v7  ;;  %3904 = vmatprep.subr.bf16.mxu1 %v18840_v4  ;;  %v18877_v7 = vld [vmem:[%s23758_s29 + $0x228] ss:$16 sps:$4 sm:$0xff]   ;;  %v18882_v4 = vld [vmem:[%s23758_s29 + $0x244] ss:$16 sps:$4 sm:$0xff]  }
 0x574   :  { %4046 = vmatprep.subr.bf16.mxu0 %v18843_v21  ;;  %v18885_v21 = vld [vmem:[%s23758_s29 + $0x24c] ss:$16 sps:$4 sm:$0xff]  }
 0x576   :  { %3905 = vmatpush1.bf16.msra.mxu1 %v18838_v17  ;;  %v18880_v17 = vld [vmem:[%s23758_s29 + $0x240] ss:$16 sps:$4 sm:$0xff]  }
 0x577   :  { %4047 = vmatpush1.bf16.msra.mxu0 %v18841_v29  ;;  %3906 = vmatprep.subr.bf16.mxu1 %v18846_v31  ;;  %v18888_v29 = vld [vmem:[%s23758_s29 + $0x264] ss:$16 sps:$4 sm:$0xff]   ;;  %v18886_v31 = vld [vmem:[%s23758_s29 + $0x260] ss:$16 sps:$4 sm:$0xff]  }
 0x578   :  { %4048 = vmatprep.subr.bf16.mxu0 %v18849_v6  ;;  %v18889_v6 = vld [vmem:[%s23758_s29 + $0x268] ss:$16 sps:$4 sm:$0xff]  }
 0x57a   :  { %3907 = vmatpush1.bf16.msra.mxu1 %v18844_v33  ;;  %v18894_v33 = vld [vmem:[%s23758_s29 + $0x284] ss:$16 sps:$4 sm:$0xff]  }
 0x57b   :  { %4049 = vmatpush1.bf16.msra.mxu0 %v18847_v34  ;;  %3908 = vmatprep.subr.bf16.mxu1 %v18852_v38  ;;  %v18897_v34 = vld [vmem:[%s23758_s29 + $0x28c] ss:$16 sps:$4 sm:$0xff]   ;;  %v18892_v38 = vld [vmem:[%s23758_s29 + $0x280] ss:$16 sps:$4 sm:$0xff]  }
 0x57c   :  { %4050 = vmatprep.subr.bf16.mxu0 %v18855_v40  ;;  %v18900_v40 = vld [vmem:[%s23758_s29 + $0x2a4] ss:$16 sps:$4 sm:$0xff]  }
 0x57e   :  { %3909 = vmatpush1.bf16.msra.mxu1 %v18850_v62  ;;  %v18903_v62 = vld [vmem:[%s23758_s29 + $0x2ac] ss:$16 sps:$4 sm:$0xff]  }
 0x57f   :  { %4051 = vmatpush1.bf16.msra.mxu0 %v18853_v41  ;;  %3910 = vmatprep.subr.bf16.mxu1 %v18858_v36  ;;  %v18898_v41 = vld [vmem:[%s23758_s29 + $0x2a0] ss:$16 sps:$4 sm:$0xff]   ;;  %v18906_v36 = vld [vmem:[%s23758_s29 + $0x2c4] ss:$16 sps:$4 sm:$0xff]  }
 0x580   :  { %4052 = vmatprep.subr.bf16.mxu0 %v18861_v5  ;;  %v18909_v5 = vld [vmem:[%s23758_s29 + $0x2cc] ss:$16 sps:$4 sm:$0xff]  }
 0x582   :  { %3911 = vmatpush1.bf16.msra.mxu1 %v18856_v32  ;;  %v1935_v32 = vpack.c.bf16 %v21562_v58, %v21562_v58  ;;  %v18910_v58 = vld [vmem:[%s23758_s29 + $0x2e0] ss:$16 sps:$4 sm:$0xff]  }
 0x583   :  { %4053 = vmatpush1.bf16.msra.mxu0 %v18859_v9  ;;  %3912 = vmatprep.subr.bf16.mxu1 %v18864_v45  ;;  %v18907_v9 = vld [vmem:[%s23758_s29 + $0x2c8] ss:$16 sps:$4 sm:$0xff]   ;;  %v18912_v45 = vld [vmem:[%s23758_s29 + $0x2e4] ss:$16 sps:$4 sm:$0xff]  }
 0x584   :  { %4054 = vmatprep.subr.bf16.mxu0 %v18867_v50  ;;  %v18915_v50 = vld [vmem:[%s23758_s29 + $0x2ec] ss:$16 sps:$4 sm:$0xff]  }
 0x586   :  { %3913 = vmatpush1.bf16.msra.mxu1 %v18862_v53  ;;  %v18913_v53 = vld [vmem:[%s23758_s29 + $0x2e8] ss:$16 sps:$4 sm:$0xff]  }
 0x587   :  { %4055 = vmatpush1.bf16.msra.mxu0 %v18865_v30  ;;  %3953 = vmatprep.subr.bf16.mxu1 %v18870_v55  ;;  %v18918_v30 = vld [vmem:[%s23758_s29 + $0x304] ss:$16 sps:$4 sm:$0xff]   ;;  %v18921_v55 = vld [vmem:[%s23758_s29 + $0x30c] ss:$16 sps:$4 sm:$0xff]  }
 0x588   :  { %4095 = vmatprep.subr.bf16.mxu0 %v18873_v63  ;;  %v18916_v63 = vld [vmem:[%s23758_s29 + $0x300] ss:$16 sps:$4 sm:$0xff]  }
 0x589   :  { %3915 = vmatmul.mubr.bf16.vlgmr.msra.gmra.mrb[56].mxu1 %v21538_v22 }
 0x58a   :  { %4057 = vmatmul.mubr.bf16.vlgmr.msra.gmra.mrb[64].mxu0 %v21538_v22  ;;  %3924 = vmatprep.mubr.bf16.mxu1 %v21550_v39  ;;  %v18883_v22 = vld [vmem:[%s23758_s29 + $0x248] ss:$16 sps:$4 sm:$0xff]  }
 0x58b   :  { %3954 = vmatpush1.bf16.msra.mxu1 %v18868_v25  ;;  %4066 = vmatprep.mubr.bf16.mxu0 %v21550_v39  ;;  %v18891_v39 = vld [vmem:[%s23758_s29 + $0x26c] ss:$16 sps:$4 sm:$0xff]   ;;  %v18919_v25 = vld [vmem:[%s23758_s29 + $0x308] ss:$16 sps:$4 sm:$0xff]  }
 0x58c   :  { %4096 = vmatpush1.bf16.msra.mxu0 %v18871_v0  ;;  %3955 = vmatprep.subr.bf16.mxu1 %v18876_v18  ;;  %v18924_v0 = vld [vmem:[%s23758_s29 + $0x324] ss:$16 sps:$4 sm:$0xff]   ;;  %v18922_v18 = vld [vmem:[%s23758_s29 + $0x320] ss:$16 sps:$4 sm:$0xff]  }
 0x58d   :  { %4097 = vmatprep.subr.bf16.mxu0 %v18879_v1  ;;  %v18925_v1 = vld [vmem:[%s23758_s29 + $0x328] ss:$16 sps:$4 sm:$0xff]  }
 0x58f   :  { %3956 = vmatpush1.bf16.msra.mxu1 %v18874_v2  ;;  %v18930_v2 = vld [vmem:[%s23758_s29 + $0x344] ss:$16 sps:$4 sm:$0xff]  }
 0x590   :  { %4098 = vmatpush1.bf16.msra.mxu0 %v18877_v7  ;;  %3957 = vmatprep.subr.bf16.mxu1 %v18882_v4  ;;  %v18933_v7 = vld [vmem:[%s23758_s29 + $0x34c] ss:$16 sps:$4 sm:$0xff]   ;;  %v18928_v4 = vld [vmem:[%s23758_s29 + $0x340] ss:$16 sps:$4 sm:$0xff]  }
 0x591   :  { %3925 = vmatmul.mubr.bf16.gmra.mrb[60].mxu1 %v21546_v35  ;;  %4099 = vmatprep.subr.bf16.mxu0 %v18885_v21  ;;  %v18931_v21 = vld [vmem:[%s23758_s29 + $0x348] ss:$16 sps:$4 sm:$0xff]  }
 0x592   :  { %4067 = vmatmul.mubr.bf16.gmra.mrb[68].mxu0 %v21546_v35  ;;  %3934 = vmatprep.mubr.bf16.mxu1 %v21558_v56  ;;  %v1936_v35 = vpack.c.bf16 %v21566_v60, %v21566_v60  ;;  %v18901_v60 = vld [vmem:[%s23758_s29 + $0x2a8] ss:$16 sps:$4 sm:$0xff]  }
 0x593   :  { %3958 = vmatpush1.bf16.msra.mxu1 %v18880_v17  ;;  %4076 = vmatprep.mubr.bf16.mxu0 %v21558_v56  ;;  %v18895_v56 = vld [vmem:[%s23758_s29 + $0x288] ss:$16 sps:$4 sm:$0xff]   ;;  %v18936_v17 = vld [vmem:[%s23758_s29 + $0x364] ss:$16 sps:$4 sm:$0xff]  }
 0x594   :  { %4100 = vmatpush1.bf16.msra.mxu0 %v18883_v22  ;;  %3959 = vmatprep.subr.bf16.mxu1 %v18888_v29  ;;  %v18939_v22 = vld [vmem:[%s23758_s29 + $0x36c] ss:$16 sps:$4 sm:$0xff]   ;;  %v18934_v29 = vld [vmem:[%s23758_s29 + $0x360] ss:$16 sps:$4 sm:$0xff]  }
 0x595   :  { %4101 = vmatprep.subr.bf16.mxu0 %v18891_v39  ;;  %v18937_v39 = vld [vmem:[%s23758_s29 + $0x368] ss:$16 sps:$4 sm:$0xff]  }
 0x597   :  { %3960 = vmatpush1.bf16.msra.mxu1 %v18886_v31  ;;  %v18942_v31 = vld [vmem:[%s23758_s29 + $0x384] ss:$16 sps:$4 sm:$0xff]  }
 0x598   :  { %4102 = vmatpush1.bf16.msra.mxu0 %v18889_v6  ;;  %3961 = vmatprep.subr.bf16.mxu1 %v18894_v33  ;;  %v18945_v6 = vld [vmem:[%s23758_s29 + $0x38c] ss:$16 sps:$4 sm:$0xff]   ;;  %v18940_v33 = vld [vmem:[%s23758_s29 + $0x380] ss:$16 sps:$4 sm:$0xff]  }
 0x599   :  { %3935 = vmatmul.mubr.bf16.gmra.mrb[64].mxu1 %v21554_v51  ;;  %4103 = vmatprep.subr.bf16.mxu0 %v18897_v34  ;;  %v18943_v34 = vld [vmem:[%s23758_s29 + $0x388] ss:$16 sps:$4 sm:$0xff]  }
 0x59a   :  { %4077 = vmatmul.mubr.bf16.gmra.mrb[72].mxu0 %v21554_v51  ;;  %3944 = vmatprep.mubr.bf16.mxu1 %v1936_v35  ;;  %v18904_v51 = vld [vmem:[%s23758_s29 + $0x2c0] ss:$16 sps:$4 sm:$0xff]  }
 0x59b   :  { %3962 = vmatpush1.bf16.msra.mxu1 %v18892_v38  ;;  %4086 = vmatprep.mubr.bf16.mxu0 %v1936_v35  ;;  %v18948_v38 = vld [vmem:[%s23758_s29 + $0x3a4] ss:$16 sps:$4 sm:$0xff]   ;;  %v18951_v35 = vld [vmem:[%s23758_s29 + $0x3ac] ss:$16 sps:$4 sm:$0xff]  }
 0x59c   :  { %4104 = vmatpush1.bf16.msra.mxu0 %v18895_v56  ;;  %3963 = vmatprep.subr.bf16.mxu1 %v18900_v40  ;;  %v18946_v56 = vld [vmem:[%s23758_s29 + $0x3a0] ss:$16 sps:$4 sm:$0xff]   ;;  %v18949_v40 = vld [vmem:[%s23758_s29 + $0x3a8] ss:$16 sps:$4 sm:$0xff]  }
 0x59d   :  { %4105 = vmatprep.subr.bf16.mxu0 %v18903_v62 }
 0x59f   :  { %3964 = vmatpush1.bf16.msra.mxu1 %v18898_v41  ;;  %v18968_v41 = vld [vmem:[%s23760_s24 + $0x40] ss:$16 sps:$4 sm:$0xff]  }
 0x5a0   :  { %4106 = vmatpush1.bf16.msra.mxu0 %v18901_v60  ;;  %3965 = vmatprep.subr.bf16.mxu1 %v18906_v36  ;;  %v18971_v60 = vld [vmem:[%s23760_s24 + $0x48] ss:$16 sps:$4 sm:$0xff]   ;;  %v18976_v36 = vld [vmem:[%s23760_s24 + $0x64] ss:$16 sps:$4 sm:$0xff]  }
 0x5a1   :  { %3945 = vmatmul.mubr.bf16.gmra.mrb[76].mxu1 %v1935_v32  ;;  %4107 = vmatprep.subr.bf16.mxu0 %v18909_v5  ;;  %v18979_v5 = vld [vmem:[%s23760_s24 + $0x6c] ss:$16 sps:$4 sm:$0xff]  }
 0x5a2   :  { %4087 = vmatmul.mubr.bf16.gmra.mrb[84].mxu0 %v1935_v32  ;;  %16308 = vmatprep.mubr.msk.bf16.mxu1 %vm748_vm1, %v21544_v26  ;;  %v18974_v32 = vld [vmem:[%s23760_s24 + $0x60] ss:$16 sps:$4 sm:$0xff]  }
 0x5a3   :  { %3966 = vmatpush1.bf16.msra.mxu1 %v18904_v51  ;;  %16312 = vmatprep.mubr.msk.bf16.mxu0 %vm748_vm1, %v21544_v26  ;;  %v18927_v26 = vld [vmem:[%s23758_s29 + $0x32c] ss:$16 sps:$4 sm:$0xff]   ;;  %v18977_v51 = vld [vmem:[%s23760_s24 + $0x68] ss:$16 sps:$4 sm:$0xff]   ;;  %s23787_s29 = sld [smem:[#allocation61_spill]] }
 0x5a4   :  { %4108 = vmatpush1.bf16.msra.mxu0 %v18907_v9  ;;  %3967 = vmatprep.subr.bf16.mxu1 %v18912_v45  ;;  %v18982_v9 = vld [vmem:[%s23760_s24 + $0x84] ss:$16 sps:$4 sm:$0xff]   ;;  %v18985_v45 = vld [vmem:[%s23760_s24 + $0x8c] ss:$16 sps:$4 sm:$0xff]  }
 0x5a5   :  { %4109 = vmatprep.subr.bf16.mxu0 %v18915_v50  ;;  %v18980_v50 = vld [vmem:[%s23760_s24 + $0x80] ss:$16 sps:$4 sm:$0xff]  }
 0x5a7   :  { %3968 = vmatpush1.bf16.msra.mxu1 %v18910_v58  ;;  %v18983_v58 = vld [vmem:[%s23760_s24 + $0x88] ss:$16 sps:$4 sm:$0xff]  }
 0x5a8   :  { %4110 = vmatpush1.bf16.msra.mxu0 %v18913_v53  ;;  %3969 = vmatprep.subr.bf16.mxu1 %v18918_v30  ;;  %v18988_v53 = vld [vmem:[%s23760_s24 + $0xa4] ss:$16 sps:$4 sm:$0xff]   ;;  %v18991_v30 = vld [vmem:[%s23760_s24 + $0xac] ss:$16 sps:$4 sm:$0xff]  }
 0x5a9   :  { %4111 = vmatprep.subr.bf16.mxu0 %v18921_v55  ;;  %v18986_v55 = vld [vmem:[%s23760_s24 + $0xa0] ss:$16 sps:$4 sm:$0xff]  }
 0x5ab   :  { %3970 = vmatpush1.bf16.msra.mxu1 %v18916_v63  ;;  %v18989_v63 = vld [vmem:[%s23760_s24 + $0xa8] ss:$16 sps:$4 sm:$0xff]  }
 0x5ac   :  { %4112 = vmatpush1.bf16.msra.mxu0 %v18919_v25  ;;  %3971 = vmatprep.subr.bf16.mxu1 %v18924_v0  ;;  %v18994_v25 = vld [vmem:[%s23760_s24 + $0xc4] ss:$16 sps:$4 sm:$0xff]   ;;  %v18997_v0 = vld [vmem:[%s23760_s24 + $0xcc] ss:$16 sps:$4 sm:$0xff]  }
 0x5ad   :  { %4113 = vmatprep.subr.bf16.mxu0 %v18927_v26  ;;  %v18992_v26 = vld [vmem:[%s23760_s24 + $0xc0] ss:$16 sps:$4 sm:$0xff]  }
 0x5af   :  { %3972 = vmatpush1.bf16.msra.mxu1 %v18922_v18  ;;  %v18995_v18 = vld [vmem:[%s23760_s24 + $0xc8] ss:$16 sps:$4 sm:$0xff]  }
 0x5b0   :  { %4114 = vmatpush1.bf16.msra.mxu0 %v18925_v1  ;;  %3973 = vmatprep.subr.bf16.mxu1 %v18930_v2  ;;  %v19000_v1 = vld [vmem:[%s23760_s24 + $0xe4] ss:$16 sps:$4 sm:$0xff]   ;;  %v19003_v2 = vld [vmem:[%s23760_s24 + $0xec] ss:$16 sps:$4 sm:$0xff]  }
 0x5b1   :  { %4115 = vmatprep.subr.bf16.mxu0 %v18933_v7  ;;  %v18998_v7 = vld [vmem:[%s23760_s24 + $0xe0] ss:$16 sps:$4 sm:$0xff]  }
 0x5b3   :  { %3974 = vmatpush1.bf16.msra.mxu1 %v18928_v4  ;;  %v19001_v4 = vld [vmem:[%s23760_s24 + $0xe8] ss:$16 sps:$4 sm:$0xff]  }
 0x5b4   :  { %4116 = vmatpush1.bf16.msra.mxu0 %v18931_v21  ;;  %3975 = vmatprep.subr.bf16.mxu1 %v18936_v17  ;;  %v19006_v21 = vld [vmem:[%s23760_s24 + $0x104] ss:$16 sps:$4 sm:$0xff]   ;;  %v19009_v17 = vld [vmem:[%s23760_s24 + $0x10c] ss:$16 sps:$4 sm:$0xff]  }
 0x5b5   :  { %4117 = vmatprep.subr.bf16.mxu0 %v18939_v22  ;;  %v19004_v22 = vld [vmem:[%s23760_s24 + $0x100] ss:$16 sps:$4 sm:$0xff]  }
 0x5b7   :  { %3976 = vmatpush1.bf16.msra.mxu1 %v18934_v29  ;;  %v19007_v29 = vld [vmem:[%s23760_s24 + $0x108] ss:$16 sps:$4 sm:$0xff]  }
 0x5b8   :  { %4118 = vmatpush1.bf16.msra.mxu0 %v18937_v39  ;;  %3977 = vmatprep.subr.bf16.mxu1 %v18942_v31  ;;  %v19012_v39 = vld [vmem:[%s23760_s24 + $0x124] ss:$16 sps:$4 sm:$0xff]   ;;  %v19015_v31 = vld [vmem:[%s23760_s24 + $0x12c] ss:$16 sps:$4 sm:$0xff]  }
 0x5b9   :  { %4119 = vmatprep.subr.bf16.mxu0 %v18945_v6  ;;  %v19010_v6 = vld [vmem:[%s23760_s24 + $0x120] ss:$16 sps:$4 sm:$0xff]  }
 0x5bb   :  { %3978 = vmatpush1.bf16.msra.mxu1 %v18940_v33  ;;  %v19013_v33 = vld [vmem:[%s23760_s24 + $0x128] ss:$16 sps:$4 sm:$0xff]  }
 0x5bc   :  { %4120 = vmatpush1.bf16.msra.mxu0 %v18943_v34  ;;  %3979 = vmatprep.subr.bf16.mxu1 %v18948_v38  ;;  %v19018_v34 = vld [vmem:[%s23760_s24 + $0x144] ss:$16 sps:$4 sm:$0xff]   ;;  %v19021_v38 = vld [vmem:[%s23760_s24 + $0x14c] ss:$16 sps:$4 sm:$0xff]  }
 0x5bd   :  { %4121 = vmatprep.subr.bf16.mxu0 %v18951_v35  ;;  %v19016_v35 = vld [vmem:[%s23760_s24 + $0x140] ss:$16 sps:$4 sm:$0xff]  }
 0x5bf   :  { %3980 = vmatpush1.bf16.msra.mxu1 %v18946_v56  ;;  %v19019_v56 = vld [vmem:[%s23760_s24 + $0x148] ss:$16 sps:$4 sm:$0xff]  }
 0x5c0   :  { %4122 = vmatpush1.bf16.msra.mxu0 %v18949_v40  ;;  %4203 = vmatprep.subr.bf16.mxu1 %v21344_v43  ;;  %v18952_v43 = vld [vmem:[%s23759_s8] sm:$0xff]  }
 0x5c1   :  { %4274 = vmatprep.subr.bf16.mxu0 %v21346_v47  ;;  %v18953_v47 = vld [vmem:[%s23759_s8 + $0x8] sm:$0xff]   ;;  %v19024_v40 = vld [vmem:[%s23760_s24 + $0x164] ss:$16 sps:$4 sm:$0xff]  }
 0x5c2   :  { %3986 = vmatmul.mubr.bf16.vlgmr.msra.gmra.mrb[56].mxu1 %v21540_v24 }
 0x5c3   :  { %4128 = vmatmul.mubr.bf16.vlgmr.msra.gmra.mrb[64].mxu0 %v21540_v24  ;;  %16309 = vmatprep.mubr.msk.bf16.mxu1 %vm748_vm1, %v21552_v3 }
 0x5c4   :  { %16313 = vmatprep.mubr.msk.bf16.mxu0 %vm748_vm1, %v21552_v3  ;;  %4204 = vmatpush1.bf16.msra.mxu1 %v21340_v13  ;;  %v1938_v13 = vpack.c.bf16 %v21568_v61, %v21568_v61  ;;  %v18970_v3 = vld [vmem:[%s23760_s24 + $0x44] ss:$16 sps:$4 sm:$0xff]  }
 0x5c5   :  { %4275 = vmatpush1.bf16.msra.mxu0 %v21342_v42  ;;  %4205 = vmatprep.subr.bf16.mxu1 %v21364_v14  ;;  %v1937_v42 = vpack.c.bf16 %v21564_v59, %v21564_v59  ;;  %v18956_v14 = vld [vmem:[%s23760_s24] ss:$16 sps:$4 sm:$0xff]  }
 0x5c6   :  { %4276 = vmatprep.subr.bf16.mxu0 %v21366_v23  ;;  %v18958_v23 = vld [vmem:[%s23760_s24 + $0x4] ss:$16 sps:$4 sm:$0xff]  }
 0x5c8   :  { %4206 = vmatpush1.bf16.msra.mxu1 %v21360_v8  ;;  %v18954_v8 = vld [vmem:[%s23759_s8 + $0x10] sm:$0xff]  }
 0x5c9   :  { %4277 = vmatpush1.bf16.msra.mxu0 %v21362_v10  ;;  %4207 = vmatprep.subr.bf16.mxu1 %v21384_v49  ;;  %v18955_v10 = vld [vmem:[%s23759_s8 + $0x18] ss:$0 sps:$4 sm:$0xff]   ;;  %v18964_v49 = vld [vmem:[%s23760_s24 + $0x24] ss:$16 sps:$4 sm:$0xff]   ;;  %s23788_s8 = sld [smem:[#allocation62_spill]] }
 0x5ca   :  { %4278 = vmatprep.subr.bf16.mxu0 %v21386_v52  ;;  %3996 = vmatmul.mubr.bf16.gmra.mrb[60].mxu1 %v21548_v37  ;;  %v18967_v52 = vld [vmem:[%s23760_s24 + $0x2c] ss:$16 sps:$4 sm:$0xff]  }
 0x5cb   :  { %4138 = vmatmul.mubr.bf16.gmra.mrb[68].mxu0 %v21548_v37  ;;  %16310 = vmatprep.mubr.msk.bf16.mxu1 %vm748_vm1, %v21560_v57 }
 0x5cc   :  { %16314 = vmatprep.mubr.msk.bf16.mxu0 %vm748_vm1, %v21560_v57  ;;  %4208 = vmatpush1.bf16.msra.mxu1 %v21380_v46  ;;  %v18959_v46 = vld [vmem:[%s23760_s24 + $0x8] ss:$16 sps:$4 sm:$0xff]  }
 0x5cd   :  { %4279 = vmatpush1.bf16.msra.mxu0 %v21382_v48  ;;  %16320 = vmatprep.subr.msk.bf16.mxu1 %vm1768_vm2, %v21400_v27  ;;  %v18961_v48 = vld [vmem:[%s23760_s24 + $0xc] ss:$16 sps:$4 sm:$0xff]  }
 0x5ce   :  { %16325 = vmatprep.subr.msk.bf16.mxu0 %vm1768_vm2, %v21402_v28 }
 0x5d0   :  { %4210 = vmatpush1.bf16.msra.mxu1 %v21405_v19  ;;  %v18962_v19 = vld [vmem:[%s23760_s24 + $0x20] ss:$16 sps:$4 sm:$0xff]  }
 0x5d1   :  { %4281 = vmatpush1.bf16.msra.mxu0 %v21408_v20  ;;  %5093 = vmatprep.subr.bf16.mxu1 %v18958_v23  ;;  %v18965_v20 = vld [vmem:[%s23760_s24 + $0x28] ss:$16 sps:$4 sm:$0xff]   ;;  %v19036_v23 = vld [vmem:[%s23760_s24 + $0x1a4] ss:$16 sps:$4 sm:$0xff]  }
 0x5d2   :  { %4006 = vmatmul.mubr.bf16.gmra.mrb[64].mxu1 %v21556_v54  ;;  %5235 = vmatprep.subr.bf16.mxu0 %v18961_v48  ;;  %v19034_v48 = vld [vmem:[%s23760_s24 + $0x1a0] ss:$16 sps:$4 sm:$0xff]  }
 0x5d3   :  { %4148 = vmatmul.mubr.bf16.gmra.mrb[72].mxu0 %v21556_v54  ;;  %16311 = vmatprep.mubr.msk.bf16.mxu1 %vm748_vm1, %v1938_v13  ;;  %v18973_v54 = vld [vmem:[%s23760_s24 + $0x4c] ss:$16 sps:$4 sm:$0xff]  }
 0x5d4   :  { %16315 = vmatprep.mubr.msk.bf16.mxu0 %vm748_vm1, %v1938_v13  ;;  %v19027_v13 = vld [vmem:[%s23760_s24 + $0x16c] ss:$16 sps:$4 sm:$0xff]  }
 0x5da   :  { %4016 = vmatmul.mubr.bf16.gmra.mrb[80].mxu1 %v1937_v42 }
 0x5db   :  { %4158 = vmatmul.mubr.bf16.gmra.mrb[88].mxu0 %v1937_v42  ;;  %4235 = vmatprep.mubr.bf16.mxu1 %v20774_v44  ;;  %v19022_v42 = vld [vmem:[%s23760_s24 + $0x160] ss:$16 sps:$4 sm:$0xff]  }
 0x5dc   :  { %4306 = vmatprep.mubr.bf16.mxu0 %v20774_v44 }
 0x5e2   :  { %16321 = vmatmul.mubr.msk.bf16.vlgmr.msra.gmra.mrb[84].mxu1 %vm1755_vm3, %v18952_v43 }
 0x5e3   :  { %4245 = vmatprep.mubr.bf16.mxu1 %v20774_v44  ;;  %16326 = vmatmul.mubr.msk.bf16.vlgmr.msra.gmra.mrb[92].mxu0 %vm1755_vm3, %v18952_v43  ;;  %v19025_v43 = vld [vmem:[%s23760_s24 + $0x168] ss:$16 sps:$4 sm:$0xff]  }
 0x5e4   :  { %4316 = vmatprep.mubr.bf16.mxu0 %v20774_v44  ;;  %5094 = vmatpush1.bf16.msra.mxu1 %v18956_v14  ;;  %v19031_v14 = vld [vmem:[%s23760_s24 + $0x188] ss:$16 sps:$4 sm:$0xff]  }
 0x5e5   :  { %5236 = vmatpush1.bf16.msra.mxu0 %v18959_v46  ;;  %5095 = vmatprep.subr.bf16.mxu1 %v18964_v49  ;;  %v19039_v46 = vld [vmem:[%s23760_s24 + $0x1ac] ss:$16 sps:$4 sm:$0xff]   ;;  %v19037_v49 = vld [vmem:[%s23760_s24 + $0x1a8] ss:$16 sps:$4 sm:$0xff]  }
 0x5e6   :  { %5237 = vmatprep.subr.bf16.mxu0 %v18967_v52  ;;  %v19042_v52 = vld [vmem:[%s23760_s24 + $0x1c4] ss:$16 sps:$4 sm:$0xff]  }
 0x5e8   :  { %5096 = vmatpush1.bf16.msra.mxu1 %v18962_v19  ;;  %v19040_v19 = vld [vmem:[%s23760_s24 + $0x1c0] ss:$16 sps:$4 sm:$0xff]  }
 0x5e9   :  { %5238 = vmatpush1.bf16.msra.mxu0 %v18965_v20  ;;  %5097 = vmatprep.subr.bf16.mxu1 %v18970_v3  ;;  %v19043_v20 = vld [vmem:[%s23760_s24 + $0x1c8] ss:$16 sps:$4 sm:$0xff]   ;;  %v19045_v3 = vld [vmem:[%s23760_s24 + $0x1cc] ss:$16 sps:$4 sm:$0xff]  }
 0x5ea   :  { %16322 = vmatmul.mubr.msk.bf16.gmra.mrb[88].mxu1 %vm1755_vm3, %v18953_v47  ;;  %5239 = vmatprep.subr.bf16.mxu0 %v18973_v54 }
 0x5eb   :  { %4255 = vmatprep.mubr.bf16.mxu1 %v20774_v44  ;;  %16327 = vmatmul.mubr.msk.bf16.gmra.mrb[96].mxu0 %vm1755_vm3, %v18953_v47  ;;  %v19030_v47 = vld [vmem:[%s23760_s24 + $0x184] ss:$16 sps:$4 sm:$0xff]  }
 0x5ec   :  { %4326 = vmatprep.mubr.bf16.mxu0 %v20774_v44  ;;  %5098 = vmatpush1.bf16.msra.mxu1 %v18968_v41 }
 0x5ed   :  { %5240 = vmatpush1.bf16.msra.mxu0 %v18971_v60  ;;  %5099 = vmatprep.subr.bf16.mxu1 %v18976_v36 }
 0x5ee   :  { %5241 = vmatprep.subr.bf16.mxu0 %v18979_v5 }
 0x5f0   :  { %5100 = vmatpush1.bf16.msra.mxu1 %v18974_v32 }
 0x5f1   :  { %5242 = vmatpush1.bf16.msra.mxu0 %v18977_v51  ;;  %5101 = vmatprep.subr.bf16.mxu1 %v18982_v9 }
 0x5f2   :  { %16323 = vmatmul.mubr.msk.bf16.gmra.mrb[92].mxu1 %vm1755_vm3, %v18954_v8  ;;  %5243 = vmatprep.subr.bf16.mxu0 %v18985_v45  ;;  %v19048_v45 = vld [vmem:[%s23760_s24 + $0x1e4] ss:$16 sps:$4 sm:$0xff]  }
 0x5f3   :  { %4265 = vmatprep.mubr.bf16.mxu1 %v20774_v44  ;;  %16328 = vmatmul.mubr.msk.bf16.gmra.mrb[100].mxu0 %vm1755_vm3, %v18954_v8  ;;  %v19033_v8 = vld [vmem:[%s23760_s24 + $0x18c] ss:$16 sps:$4 sm:$0xff]  }
 0x5f4   :  { %4336 = vmatprep.mubr.bf16.mxu0 %v20774_v44  ;;  %5102 = vmatpush1.bf16.msra.mxu1 %v18980_v50  ;;  %v19051_v50 = vld [vmem:[%s23760_s24 + $0x1ec] ss:$16 sps:$4 sm:$0xff]  }
 0x5f5   :  { %5244 = vmatpush1.bf16.msra.mxu0 %v18983_v58  ;;  %5103 = vmatprep.subr.bf16.mxu1 %v18988_v53  ;;  %v19046_v58 = vld [vmem:[%s23760_s24 + $0x1e0] ss:$16 sps:$4 sm:$0xff]  }
 0x5f6   :  { %5245 = vmatprep.subr.bf16.mxu0 %v18991_v30 }
 0x5f8   :  { %5104 = vmatpush1.bf16.msra.mxu1 %v18986_v55 }
 0x5f9   :  { %5246 = vmatpush1.bf16.msra.mxu0 %v18989_v63  ;;  %5105 = vmatprep.subr.bf16.mxu1 %v18994_v25 }
 0x5fa   :  { %16324 = vmatmul.mubr.msk.bf16.gmra.mrb[96].mxu1 %vm1755_vm3, %v18955_v10  ;;  %5247 = vmatprep.subr.bf16.mxu0 %v18997_v0 }
 0x5fb   :  { %16329 = vmatmul.mubr.msk.bf16.gmra.mrb[104].mxu0 %vm1755_vm3, %v18955_v10  ;;  %v19028_v10 = vld [vmem:[%s23760_s24 + $0x180] ss:$16 sps:$4 sm:$0xff]  }
 0x5fc   :  { %v21868_v27 = vpop.f32.mrb[68].mxu1  ;;  %v21870_v28 = vpop.f32.mrb[76].mxu0  ;;  %5106 = vmatpush1.bf16.msra.mxu1 %v18992_v26 }
 0x5fd   :  { %v21874_v24 = vpop.f32.mrb[69].mxu1  ;;  %v21876_v37 = vpop.f32.mrb[77].mxu0  ;;  %5248 = vmatpush1.bf16.msra.mxu0 %v18995_v18  ;;  %5107 = vmatprep.subr.bf16.mxu1 %v19000_v1 }
 0x5fe   :  { %v3054_v57 = vpop.f32.mrb[70].mxu1  ;;  %v3196_v59 = vpop.f32.mrb[78].mxu0  ;;  %5249 = vmatprep.subr.bf16.mxu0 %v19003_v2 }
 0x5ff   :  { %v3055_v61 = vpop.f32.mrb[71].mxu1  ;;  %v3197_v62 = vpop.f32.mrb[79].mxu0 }
 0x600   :  { %5108 = vmatpush1.bf16.msra.mxu1 %v18998_v7 }
 0x601   :  { %5250 = vmatpush1.bf16.msra.mxu0 %v19001_v4  ;;  %5109 = vmatprep.subr.bf16.mxu1 %v19006_v21 }
 0x602   :  { %5251 = vmatprep.subr.bf16.mxu0 %v19009_v17 }
 0x604   :  { %5110 = vmatpush1.bf16.msra.mxu1 %v19004_v22 }
 0x605   :  { %5252 = vmatpush1.bf16.msra.mxu0 %v19007_v29  ;;  %5111 = vmatprep.subr.bf16.mxu1 %v19012_v39 }
 0x606   :  { %5253 = vmatprep.subr.bf16.mxu0 %v19015_v31 }
 0x608   :  { %5112 = vmatpush1.bf16.msra.mxu1 %v19010_v6 }
 0x609   :  { %5254 = vmatpush1.bf16.msra.mxu0 %v19013_v33  ;;  %5113 = vmatprep.subr.bf16.mxu1 %v19018_v34 }
 0x60a   :  { %5255 = vmatprep.subr.bf16.mxu0 %v19021_v38 }
 0x60c   :  { %5114 = vmatpush1.bf16.msra.mxu1 %v19016_v35 }
 0x60d   :  { %5256 = vmatpush1.bf16.msra.mxu0 %v19019_v56  ;;  %5115 = vmatprep.subr.bf16.mxu1 %v19024_v40 }
 0x60e   :  { %5257 = vmatprep.subr.bf16.mxu0 %v19027_v13 }
 0x610   :  { %5116 = vmatpush1.bf16.msra.mxu1 %v19022_v42 }
 0x611   :  { %5258 = vmatpush1.bf16.msra.mxu0 %v19025_v43  ;;  %5117 = vmatprep.subr.bf16.mxu1 %v19030_v47 }
 0x612   :  { %5259 = vmatprep.subr.bf16.mxu0 %v19033_v8 }
 0x614   :  { %5118 = vmatpush1.bf16.msra.mxu1 %v19028_v10 }
 0x615   :  { %5260 = vmatpush1.bf16.msra.mxu0 %v19031_v14  ;;  %5119 = vmatprep.subr.bf16.mxu1 %v19036_v23  ;;  %v19052_v23 = vld [vmem:[%s23760_s24 + $0x200] ss:$16 sps:$4 sm:$0xff]  }
 0x616   :  { %5261 = vmatprep.subr.bf16.mxu0 %v19039_v46  ;;  %v19055_v46 = vld [vmem:[%s23760_s24 + $0x208] ss:$16 sps:$4 sm:$0xff]  }
 0x618   :  { %5120 = vmatpush1.bf16.msra.mxu1 %v19034_v48 }
 0x619   :  { %5262 = vmatpush1.bf16.msra.mxu0 %v19037_v49  ;;  %5121 = vmatprep.subr.bf16.mxu1 %v19042_v52  ;;  %v19060_v52 = vld [vmem:[%s23760_s24 + $0x224] ss:$16 sps:$4 sm:$0xff]  }
 0x61a   :  { %5263 = vmatprep.subr.bf16.mxu0 %v19045_v3  ;;  %v19058_v3 = vld [vmem:[%s23760_s24 + $0x220] ss:$16 sps:$4 sm:$0xff]  }
 0x61c   :  { %5122 = vmatpush1.bf16.msra.mxu1 %v19040_v19  ;;  %v19063_v19 = vld [vmem:[%s23760_s24 + $0x22c] ss:$16 sps:$4 sm:$0xff]  }
 0x61d   :  { %5264 = vmatpush1.bf16.msra.mxu0 %v19043_v20  ;;  %5123 = vmatprep.subr.bf16.mxu1 %v19048_v45  ;;  %v19067_v45 = vld [vmem:[%s23760_s24 + $0x248] ss:$16 sps:$4 sm:$0xff]  }
 0x61e   :  { %5265 = vmatprep.subr.bf16.mxu0 %v19051_v50 }
 0x620   :  { %5124 = vmatpush1.bf16.msra.mxu1 %v19046_v58 }
 0x634   :  { %v3121_v54 = vpop.f32.mrb[72].mxu1  ;;  %v3263_v57 = vpop.f32.mrb[80].mxu0 }
 0x635   :  { %v3122_v59 = vadd.f32 %v3121_v54, %v21868_v27  ;;  %v3264_v61 = vadd.f32 %v3263_v57, %v21870_v28  ;;  %v3123_v62 = vpop.f32.mrb[73].mxu1  ;;  %v3265_v41 = vpop.f32.mrb[81].mxu0  ;;  %v19049_v27 = vld [vmem:[%s23760_s24 + $0x1e8] ss:$16 sps:$4 sm:$0xff]   ;;  %v19054_v28 = vld [vmem:[%s23760_s24 + $0x204] ss:$16 sps:$4 sm:$0xff]  }
 0x636   :  { %v3124_v60 = vadd.f32 %v3123_v62, %v21874_v24  ;;  %v3266_v36 = vadd.f32 %v3265_v41, %v21876_v37  ;;  %v3125_v5 = vpop.f32.mrb[74].mxu1  ;;  %v3267_v32 = vpop.f32.mrb[82].mxu0  ;;  %5266 = vmatpush1.bf16.msra.mxu0 %v19049_v27  ;;  %v19057_v24 = vld [vmem:[%s23760_s24 + $0x20c] ss:$16 sps:$4 sm:$0xff]   ;;  %5164 = vmatprep.subr.bf16.mxu1 %v19054_v28  ;;  %v19061_v54 = vld [vmem:[%s23760_s24 + $0x228] ss:$16 sps:$4 sm:$0xff]  }
 0x637   :  { %v3126_v51 = vpop.f32.mrb[75].mxu1  ;;  %v3268_v9 = vpop.f32.mrb[83].mxu0  ;;  %5306 = vmatprep.subr.bf16.mxu0 %v19057_v24  ;;  %v19072_v28 = vld [vmem:[%s23760_s24 + $0x264] ss:$16 sps:$4 sm:$0xff]   ;;  %v19075_v24 = vld [vmem:[%s23760_s24 + $0x26c] ss:$16 sps:$4 sm:$0xff]  }
 0x638   :  { %v19064_v9 = vld [vmem:[%s23760_s24 + $0x240] ss:$16 sps:$4 sm:$0xff]  }
 0x674   :  { %v3946_v37 = vpop.f32.mrb[76].mxu1 }
 0x675   :  { %v3947_v53 = vadd.f32 %v3946_v37, %v3122_v59  ;;  %v4088_v30 = vpop.f32.mrb[84].mxu0  ;;  %v3948_v55 = vpop.f32.mrb[77].mxu1  ;;  %v19066_v59 = vld [vmem:[%s23760_s24 + $0x244] ss:$16 sps:$4 sm:$0xff]  }
 0x676   :  { %v4089_v63 = vadd.f32 %v4088_v30, %v3264_v61  ;;  %v3949_v25 = vadd.f32 %v3948_v55, %v3124_v60  ;;  %v4090_v0 = vpop.f32.mrb[85].mxu0  ;;  %v3950_v26 = vpop.f32.mrb[78].mxu1  ;;  %v19069_v61 = vld [vmem:[%s23760_s24 + $0x24c] ss:$16 sps:$4 sm:$0xff]   ;;  %v19073_v30 = vld [vmem:[%s23760_s24 + $0x268] ss:$16 sps:$4 sm:$0xff]  }
 0x677   :  { %v4091_v18 = vadd.f32 %v4090_v0, %v3266_v36  ;;  %v4092_v1 = vpop.f32.mrb[86].mxu0  ;;  %v3951_v2 = vpop.f32.mrb[79].mxu1 }
 0x678   :  { %v4093_v7 = vpop.f32.mrb[87].mxu0 }
 0x6ad   :  { %v4017_v4 = vpop.f32.mrb[80].mxu1 }
 0x6ae   :  { %v21940_v21 = vadd.f32 %v4017_v4, %v3947_v53  ;;  %v4159_v17 = vpop.f32.mrb[88].mxu0  ;;  %v4019_v22 = vpop.f32.mrb[81].mxu1  ;;  %v19070_v53 = vld [vmem:[%s23760_s24 + $0x260] ss:$16 sps:$4 sm:$0xff]  }
 0x6af   :  { %v21942_v29 = vadd.f32 %v4159_v17, %v4089_v63  ;;  %v21944_v39 = vadd.f32 %v4019_v22, %v3949_v25  ;;  %v4161_v31 = vpop.f32.mrb[89].mxu0  ;;  %v4021_v6 = vpop.f32.mrb[82].mxu1  ;;  %v19078_v63 = vld [vmem:[%s23760_s24 + $0x284] ss:$16 sps:$4 sm:$0xff]   ;;  %v19081_v25 = vld [vmem:[%s23760_s24 + $0x28c] ss:$16 sps:$4 sm:$0xff]  }
 0x6b0   :  { %v21946_v33 = vadd.f32 %v4161_v31, %v4091_v18  ;;  %v4163_v34 = vpop.f32.mrb[90].mxu0  ;;  %v4022_v38 = vpop.f32.mrb[83].mxu1  ;;  %v19076_v17 = vld [vmem:[%s23760_s24 + $0x280] ss:$16 sps:$4 sm:$0xff]   ;;  %v19079_v22 = vld [vmem:[%s23760_s24 + $0x288] ss:$16 sps:$4 sm:$0xff]  }
 0x6b1   :  { %v4164_v35 = vpop.f32.mrb[91].mxu0  ;;  %v19084_v38 = vld [vmem:[%s23760_s24 + $0x2a4] ss:$16 sps:$4 sm:$0xff]  }
 0x6b2   :  { %v19087_v35 = vld [vmem:[%s23760_s24 + $0x2ac] ss:$16 sps:$4 sm:$0xff]  }
 0x6b5   :  { %v4237_v56 = vpop.f32.mrb[84].mxu1 }
 0x6b6   :  { %v4239_v40 = vpop.f32.mrb[85].mxu1  ;;  %v4308_v13 = vpop.f32.mrb[92].mxu0 }
 0x6b7   :  { %v4241_v42 = vpop.f32.mrb[86].mxu1  ;;  %v4310_v43 = vpop.f32.mrb[93].mxu0 }
 0x6b8   :  { %v4345_v47 = vpack.c.bf16 %v4241_v42, %v4237_v56  ;;  %v4243_v8 = vpop.f32.mrb[87].mxu1  ;;  %v4312_v10 = vpop.f32.mrb[94].mxu0 }
 0x6b9   :  { %v4346_v14 = vpack.c.bf16 %v4243_v8, %v4239_v40  ;;  %v21950_v48 = vpack.c.bf16 %v4312_v10, %v4308_v13  ;;  %v4314_v49 = vpop.f32.mrb[95].mxu0  ;;  %v19082_v40 = vld [vmem:[%s23760_s24 + $0x2a0] ss:$16 sps:$4 sm:$0xff]   ;;  %v19085_v13 = vld [vmem:[%s23760_s24 + $0x2a8] ss:$16 sps:$4 sm:$0xff]  }
 0x6ba   :  { %v21954_v20 = vpack.c.bf16 %v4314_v49, %v4310_v43  ;;  %v19090_v43 = vld [vmem:[%s23760_s24 + $0x2c4] ss:$16 sps:$4 sm:$0xff]  }
 0x6bb   :  { %5125 = vmatprep.mubr.bf16.mxu1 %v4346_v14  ;;  %5267 = vmatprep.mubr.bf16.mxu0 %v4346_v14 }
 0x6bc   :  { %5126 = vmatmul.mubr.bf16.vlgmr.msra.gmra.mrb[56].mxu1 %v4345_v47  ;;  %5268 = vmatmul.mubr.bf16.vlgmr.msra.gmra.mrb[64].mxu0 %v4345_v47  ;;  %v19093_v47 = vld [vmem:[%s23760_s24 + $0x2cc] ss:$16 sps:$4 sm:$0xff]  }
 0x6bd   :  { %5165 = vmatpush1.bf16.msra.mxu1 %v19052_v23  ;;  %5307 = vmatpush1.bf16.msra.mxu0 %v19055_v46  ;;  %v4247_v57 = vpop.f32.mrb[88].mxu1 }
 0x6be   :  { %5166 = vmatprep.subr.bf16.mxu1 %v19060_v52  ;;  %5308 = vmatprep.subr.bf16.mxu0 %v19063_v19  ;;  %v4249_v62 = vpop.f32.mrb[89].mxu1  ;;  %v4318_v41 = vpop.f32.mrb[96].mxu0 }
 0x6bf   :  { %v4251_v60 = vpop.f32.mrb[90].mxu1  ;;  %v4320_v36 = vpop.f32.mrb[97].mxu0 }
 0x6c0   :  { %v4349_v5 = vpack.c.bf16 %v4251_v60, %v4247_v57  ;;  %v4253_v32 = vpop.f32.mrb[91].mxu1  ;;  %v4322_v51 = vpop.f32.mrb[98].mxu0  ;;  %v19102_v60 = vld [vmem:[%s23760_s24 + $0x304] ss:$16 sps:$4 sm:$0xff]  }
 0x6c1   :  { %5167 = vmatpush1.bf16.msra.mxu1 %v19058_v3  ;;  %5309 = vmatpush1.bf16.msra.mxu0 %v19061_v54  ;;  %v4350_v50 = vpack.c.bf16 %v4253_v32, %v4249_v62  ;;  %v21962_v58 = vpack.c.bf16 %v4322_v51, %v4318_v41  ;;  %v4324_v27 = vpop.f32.mrb[99].mxu0  ;;  %v19088_v3 = vld [vmem:[%s23760_s24 + $0x2c0] ss:$16 sps:$4 sm:$0xff]   ;;  %v19091_v54 = vld [vmem:[%s23760_s24 + $0x2c8] ss:$16 sps:$4 sm:$0xff]  }
 0x6c2   :  { %5168 = vmatprep.subr.bf16.mxu1 %v19066_v59  ;;  %5310 = vmatprep.subr.bf16.mxu0 %v19069_v61  ;;  %v21966_v37 = vpack.c.bf16 %v4324_v27, %v4320_v36  ;;  %v19096_v59 = vld [vmem:[%s23760_s24 + $0x2e4] ss:$16 sps:$4 sm:$0xff]   ;;  %v19099_v61 = vld [vmem:[%s23760_s24 + $0x2ec] ss:$16 sps:$4 sm:$0xff]   ;;  %v19094_v62 = vld [vmem:[%s23760_s24 + $0x2e0] ss:$16 sps:$4 sm:$0xff]  }
 0x6c3   :  { %5135 = vmatprep.mubr.bf16.mxu1 %v4350_v50  ;;  %5277 = vmatprep.mubr.bf16.mxu0 %v4350_v50  ;;  %v19097_v41 = vld [vmem:[%s23760_s24 + $0x2e8] ss:$16 sps:$4 sm:$0xff]   ;;  %v19105_v36 = vld [vmem:[%s23760_s24 + $0x30c] ss:$16 sps:$4 sm:$0xff]   ;;  %v19108_v51 = vld [vmem:[%s23760_s24 + $0x324] ss:$16 sps:$4 sm:$0xff]  }
 0x6c4   :  { %5136 = vmatmul.mubr.bf16.gmra.mrb[60].mxu1 %v4349_v5  ;;  %5278 = vmatmul.mubr.bf16.gmra.mrb[68].mxu0 %v4349_v5  ;;  %v19100_v5 = vld [vmem:[%s23760_s24 + $0x300] ss:$16 sps:$4 sm:$0xff]   ;;  %v19103_v32 = vld [vmem:[%s23760_s24 + $0x308] ss:$16 sps:$4 sm:$0xff]   ;;  %v19117_v27 = vld [vmem:[%s23760_s24 + $0x34c] ss:$16 sps:$4 sm:$0xff]  }
 0x6c5   :  { %5169 = vmatpush1.bf16.msra.mxu1 %v19064_v9  ;;  %5311 = vmatpush1.bf16.msra.mxu0 %v19067_v45  ;;  %v4257_v55 = vpop.f32.mrb[92].mxu1  ;;  %v19111_v9 = vld [vmem:[%s23760_s24 + $0x32c] ss:$16 sps:$4 sm:$0xff]   ;;  %v19106_v45 = vld [vmem:[%s23760_s24 + $0x320] ss:$16 sps:$4 sm:$0xff]  }
 0x6c6   :  { %5170 = vmatprep.subr.bf16.mxu1 %v19072_v28  ;;  %5312 = vmatprep.subr.bf16.mxu0 %v19075_v24  ;;  %v4259_v0 = vpop.f32.mrb[93].mxu1  ;;  %v4328_v26 = vpop.f32.mrb[100].mxu0  ;;  %v19109_v50 = vld [vmem:[%s23760_s24 + $0x328] ss:$16 sps:$4 sm:$0xff]   ;;  %v19112_v28 = vld [vmem:[%s23760_s24 + $0x340] ss:$16 sps:$4 sm:$0xff]  }
 0x6c7   :  { %v4261_v18 = vpop.f32.mrb[94].mxu1  ;;  %v4330_v1 = vpop.f32.mrb[101].mxu0  ;;  %v19115_v24 = vld [vmem:[%s23760_s24 + $0x348] ss:$16 sps:$4 sm:$0xff]  }
 0x6c8   :  { %v4353_v2 = vpack.c.bf16 %v4261_v18, %v4257_v55  ;;  %v4263_v7 = vpop.f32.mrb[95].mxu1  ;;  %v4332_v4 = vpop.f32.mrb[102].mxu0  ;;  %v19118_v55 = vld [vmem:[%s23760_s24 + $0x360] ss:$16 sps:$4 sm:$0xff]   ;;  %v19127_v18 = vld [vmem:[%s23760_s24 + $0x388] ss:$16 sps:$4 sm:$0xff]  }
 0x6c9   :  { %5171 = vmatpush1.bf16.msra.mxu1 %v19070_v53  ;;  %5313 = vmatpush1.bf16.msra.mxu0 %v19073_v30  ;;  %v4354_v31 = vpack.c.bf16 %v4263_v7, %v4259_v0  ;;  %v21974_v6 = vpack.c.bf16 %v4332_v4, %v4328_v26  ;;  %v4334_v34 = vpop.f32.mrb[103].mxu0  ;;  %v19120_v53 = vld [vmem:[%s23760_s24 + $0x364] ss:$16 sps:$4 sm:$0xff]   ;;  %v19123_v30 = vld [vmem:[%s23760_s24 + $0x36c] ss:$16 sps:$4 sm:$0xff]  }
 0x6ca   :  { %5172 = vmatprep.subr.bf16.mxu1 %v19078_v63  ;;  %5314 = vmatprep.subr.bf16.mxu0 %v19081_v25  ;;  %v21978_v56 = vpack.c.bf16 %v4334_v34, %v4330_v1  ;;  %v19121_v63 = vld [vmem:[%s23760_s24 + $0x368] ss:$16 sps:$4 sm:$0xff]   ;;  %v19126_v25 = vld [vmem:[%s23760_s24 + $0x384] ss:$16 sps:$4 sm:$0xff]   ;;  %v19129_v0 = vld [vmem:[%s23760_s24 + $0x38c] ss:$16 sps:$4 sm:$0xff]  }
 0x6cb   :  { %5145 = vmatprep.mubr.bf16.mxu1 %v4354_v31  ;;  %5287 = vmatprep.mubr.bf16.mxu0 %v4354_v31  ;;  %v19124_v26 = vld [vmem:[%s23760_s24 + $0x380] ss:$16 sps:$4 sm:$0xff]   ;;  %v19132_v1 = vld [vmem:[%s23760_s24 + $0x3a4] ss:$16 sps:$4 sm:$0xff]   ;;  %v19133_v4 = vld [vmem:[%s23760_s24 + $0x3a8] ss:$16 sps:$4 sm:$0xff]  }
 0x6cc   :  { %5146 = vmatmul.mubr.bf16.gmra.mrb[64].mxu1 %v4353_v2  ;;  %5288 = vmatmul.mubr.bf16.gmra.mrb[72].mxu0 %v4353_v2  ;;  %v19135_v2 = vld [vmem:[%s23760_s24 + $0x3ac] ss:$16 sps:$4 sm:$0xff]   ;;  %v19130_v7 = vld [vmem:[%s23760_s24 + $0x3a0] ss:$16 sps:$4 sm:$0xff]  }
 0x6cd   :  { %5173 = vmatpush1.bf16.msra.mxu1 %v19076_v17  ;;  %5315 = vmatpush1.bf16.msra.mxu0 %v19079_v22  ;;  %v4267_v42 = vpop.f32.mrb[96].mxu1 }
 0x6ce   :  { %5174 = vmatprep.subr.bf16.mxu1 %v19084_v38  ;;  %5316 = vmatprep.subr.bf16.mxu0 %v19087_v35  ;;  %v4269_v8 = vpop.f32.mrb[97].mxu1  ;;  %v21984_v10 = vpop.f32.mrb[104].mxu0  ;;  %v4357_v49 = vpack.c.bf16 %v4267_v42, %v4267_v42 }
 0x6cf   :  { %v4358_v14 = vpack.c.bf16 %v4269_v8, %v4269_v8  ;;  %v4271_v23 = vpop.f32.mrb[98].mxu1  ;;  %v21986_v46 = vpop.f32.mrb[105].mxu0 }
 0x6d0   :  { %v4272_v52 = vpop.f32.mrb[99].mxu1  ;;  %v4342_v19 = vpop.f32.mrb[106].mxu0  ;;  %v4360_v17 = vpack.c.bf16 %v21986_v46, %v21986_v46 }
 0x6d1   :  { %5175 = vmatpush1.bf16.msra.mxu1 %v19082_v40  ;;  %5317 = vmatpush1.bf16.msra.mxu0 %v19085_v13  ;;  %v4343_v57 = vpop.f32.mrb[107].mxu0 }
 0x6d2   :  { %5176 = vmatprep.subr.bf16.mxu1 %v19090_v43  ;;  %5318 = vmatprep.subr.bf16.mxu0 %v19093_v47 }
 0x6d3   :  { %5155 = vmatprep.mubr.bf16.mxu1 %v4358_v14  ;;  %5297 = vmatprep.mubr.bf16.mxu0 %v4358_v14 }
 0x6d4   :  { %5156 = vmatmul.mubr.bf16.gmra.mrb[100].mxu1 %v4357_v49  ;;  %5298 = vmatmul.mubr.bf16.gmra.mrb[108].mxu0 %v4357_v49 }
 0x6d5   :  { %5177 = vmatpush1.bf16.msra.mxu1 %v19088_v3  ;;  %5319 = vmatpush1.bf16.msra.mxu0 %v19091_v54 }
 0x6d6   :  { %5178 = vmatprep.subr.bf16.mxu1 %v19096_v59  ;;  %5320 = vmatprep.subr.bf16.mxu0 %v19099_v61 }
 0x6d7   :  { %16450 = vmatprep.mubr.msk.bf16.mxu1 %vm748_vm1, %v21954_v20  ;;  %16454 = vmatprep.mubr.msk.bf16.mxu0 %vm748_vm1, %v21954_v20  ;;  %v19114_v20 = vld [vmem:[%s23760_s24 + $0x344] ss:$16 sps:$4 sm:$0xff]   ;;  %s23789_s24 = sld [smem:[#allocation63_spill]] }
 0x6d9   :  { %5179 = vmatpush1.bf16.msra.mxu1 %v19094_v62  ;;  %5321 = vmatpush1.bf16.msra.mxu0 %v19097_v41 }
 0x6da   :  { %5180 = vmatprep.subr.bf16.mxu1 %v19102_v60  ;;  %5322 = vmatprep.subr.bf16.mxu0 %v19105_v36 }
 0x6dd   :  { %5181 = vmatpush1.bf16.msra.mxu1 %v19100_v5  ;;  %5323 = vmatpush1.bf16.msra.mxu0 %v19103_v32 }
 0x6de   :  { %5182 = vmatprep.subr.bf16.mxu1 %v19108_v51  ;;  %5324 = vmatprep.subr.bf16.mxu0 %v19111_v9 }
 0x6e1   :  { %5183 = vmatpush1.bf16.msra.mxu1 %v19106_v45  ;;  %5325 = vmatpush1.bf16.msra.mxu0 %v19109_v50 }
 0x6e2   :  { %5184 = vmatprep.subr.bf16.mxu1 %v19114_v20  ;;  %5326 = vmatprep.subr.bf16.mxu0 %v19117_v27 }
 0x6e5   :  { %5185 = vmatpush1.bf16.msra.mxu1 %v19112_v28  ;;  %5327 = vmatpush1.bf16.msra.mxu0 %v19115_v24 }
 0x6e6   :  { %5186 = vmatprep.subr.bf16.mxu1 %v19120_v53  ;;  %5328 = vmatprep.subr.bf16.mxu0 %v19123_v30 }
 0x6e9   :  { %5187 = vmatpush1.bf16.msra.mxu1 %v19118_v55  ;;  %5329 = vmatpush1.bf16.msra.mxu0 %v19121_v63 }
 0x6ea   :  { %5188 = vmatprep.subr.bf16.mxu1 %v19126_v25  ;;  %5330 = vmatprep.subr.bf16.mxu0 %v19129_v0 }
 0x6ed   :  { %5189 = vmatpush1.bf16.msra.mxu1 %v19124_v26  ;;  %5331 = vmatpush1.bf16.msra.mxu0 %v19127_v18 }
 0x6ee   :  { %5190 = vmatprep.subr.bf16.mxu1 %v19132_v1  ;;  %5332 = vmatprep.subr.bf16.mxu0 %v19135_v2 }
 0x6f1   :  { %5191 = vmatpush1.bf16.msra.mxu1 %v19130_v7  ;;  %5333 = vmatpush1.bf16.msra.mxu0 %v19133_v4 }
 0x6f4   :  { %5197 = vmatmul.mubr.bf16.vlgmr.msra.gmra.mrb[56].mxu1 %v21950_v48  ;;  %5339 = vmatmul.mubr.bf16.vlgmr.msra.gmra.mrb[64].mxu0 %v21950_v48  ;;  %v4359_v48 = vpack.c.bf16 %v21984_v10, %v21984_v10 }
 0x6f5   :  { %16451 = vmatprep.mubr.msk.bf16.mxu1 %vm748_vm1, %v21966_v37  ;;  %16455 = vmatprep.mubr.msk.bf16.mxu0 %vm748_vm1, %v21966_v37 }
 0x6fc   :  { %5207 = vmatmul.mubr.bf16.gmra.mrb[60].mxu1 %v21962_v58  ;;  %5349 = vmatmul.mubr.bf16.gmra.mrb[68].mxu0 %v21962_v58 }
 0x6fd   :  { %16452 = vmatprep.mubr.msk.bf16.mxu1 %vm748_vm1, %v21978_v56  ;;  %16456 = vmatprep.mubr.msk.bf16.mxu0 %vm748_vm1, %v21978_v56  ;;  %v1729_v56 = vld [vmem:[%s23761_s15] sm:$0xf]  ;;  %s23790_s15 = sld [smem:[#allocation64_spill]] }
 0x6fe   :  { %v22054_v40 = vrot.slane %v1729_v56, %v21311_v11  ;;  %v22057_v13 = vrot.slane %v1729_v56, %v21313_v12  ;;  %v22060_v42 = vrot.slane %v1729_v56, %v21316_v15  ;;  %v22063_v43 = vrot.slane %v1729_v56, %v21318_v16 }
 0x704   :  { %5217 = vmatmul.mubr.bf16.gmra.mrb[64].mxu1 %v21974_v6  ;;  %5359 = vmatmul.mubr.bf16.gmra.mrb[72].mxu0 %v21974_v6 }
 0x705   :  { %16453 = vmatprep.mubr.msk.bf16.mxu1 %vm748_vm1, %v4360_v17  ;;  %16457 = vmatprep.mubr.msk.bf16.mxu0 %vm748_vm1, %v4360_v17 }
 0x70c   :  { %5227 = vmatmul.mubr.bf16.gmra.mrb[104].mxu1 %v4359_v48  ;;  %5369 = vmatmul.mubr.bf16.gmra.mrb[112].mxu0 %v4359_v48 }
 0x70d   :  { %5811 = vmatprep.mubr.bf16.mxu0 %v20774_v44  ;;  %5565 = vmatprep.mubr.bf16.mxu1 %v20774_v44 }
 0x7a7   :  { %v22044_v58 = vpop.f32.mrb[100].mxu1  ;;  %v22046_v37 = vpop.f32.mrb[108].mxu0 }
 0x7a8   :  { %v22048_v22 = vpop.f32.mrb[101].mxu1  ;;  %v22050_v31 = vpop.f32.mrb[109].mxu0 }
 0x7a9   :  { %v5161_v6 = vpop.f32.mrb[102].mxu1  ;;  %v5303_v34 = vpop.f32.mrb[110].mxu0 }
 0x7aa   :  { %v5162_v38 = vpop.f32.mrb[103].mxu1  ;;  %v5304_v35 = vpop.f32.mrb[111].mxu0 }
 0x7c7   :  { %v5198_v47 = vpop.f32.mrb[56].mxu1  ;;  %v5340_v8 = vpop.f32.mrb[64].mxu0 }
 0x7c8   :  { %v5426_v10 = vadd.f32 %v22054_v40, %v5198_v47  ;;  %v5428_v14 = vadd.f32 %v22057_v13, %v5340_v8  ;;  %v5200_v23 = vpop.f32.mrb[57].mxu1  ;;  %v5342_v46 = vpop.f32.mrb[65].mxu0 }
 0x7c9   :  { %v5427_v49 = vadd.f32 %v22060_v42, %v5200_v23  ;;  %v5429_v52 = vadd.f32 %v22063_v43, %v5342_v46  ;;  %v5202_v19 = vpop.f32.mrb[58].mxu1  ;;  %v5344_v3 = vpop.f32.mrb[66].mxu0 }
 0x7ca   :  { %v5430_v54 = vadd.f32 %v22054_v40, %v5202_v19  ;;  %v5432_v57 = vadd.f32 %v22057_v13, %v5344_v3  ;;  %v5204_v59 = vpop.f32.mrb[59].mxu1  ;;  %v5346_v61 = vpop.f32.mrb[67].mxu0  ;;  %v5454_v60 = vmax.f32 %v5426_v10, 0.0  ;;  %v5456_v36 = vmax.f32 %v5428_v14, 0.0 }
 0x7cb   :  { %v5431_v62 = vadd.f32 %v22060_v42, %v5204_v59  ;;  %v5433_v41 = vadd.f32 %v22063_v43, %v5346_v61  ;;  %v5455_v51 = vmax.f32 %v5427_v49, 0.0  ;;  %v5457_v9 = vmax.f32 %v5429_v52, 0.0 }
 0x7cc   :  { %v5458_v5 = vmax.f32 %v5430_v54, 0.0  ;;  %v5460_v32 = vmax.f32 %v5432_v57, 0.0 }
 0x7cd   :  { %v5459_v45 = vmax.f32 %v5431_v62, 0.0  ;;  %v5461_v50 = vmax.f32 %v5433_v41, 0.0 }
 0x7ce   :  { %v22073_v20 = vpack.c.bf16 %v5458_v5, %v5454_v60  ;;  %v22075_v27 = vpack.c.bf16 %v5460_v32, %v5456_v36 }
 0x7cf   :  { %v22077_v28 = vpack.c.bf16 %v5461_v50, %v5457_v9  ;;  %v5208_v24 = vpop.f32.mrb[60].mxu1  ;;  %v5350_v53 = vpop.f32.mrb[68].mxu0  ;;  %v22079_v30 = vpack.c.bf16 %v5459_v45, %v5455_v51 }
 0x7d0   :  { %v5434_v55 = vadd.f32 %v22054_v40, %v5208_v24  ;;  %v5436_v63 = vadd.f32 %v22057_v13, %v5350_v53  ;;  %v5210_v25 = vpop.f32.mrb[61].mxu1  ;;  %v5352_v0 = vpop.f32.mrb[69].mxu0 }
 0x7d1   :  { %v5435_v26 = vadd.f32 %v22060_v42, %v5210_v25  ;;  %v5437_v18 = vadd.f32 %v22063_v43, %v5352_v0  ;;  %v5212_v1 = vpop.f32.mrb[62].mxu1  ;;  %v5354_v2 = vpop.f32.mrb[70].mxu0  ;;  %5533 = vmatprep.subr.bf16.mxu1 %v22079_v30  ;;  %5779 = vmatprep.subr.bf16.mxu0 %v22079_v30 }
 0x7d2   :  { %v5438_v7 = vadd.f32 %v22054_v40, %v5212_v1  ;;  %v5440_v4 = vadd.f32 %v22057_v13, %v5354_v2  ;;  %v5214_v17 = vpop.f32.mrb[63].mxu1  ;;  %v5356_v48 = vpop.f32.mrb[71].mxu0  ;;  %5534 = vmatpush1.bf16.msra.mxu1 %v22073_v20  ;;  %5780 = vmatpush1.bf16.msra.mxu0 %v22073_v20  ;;  %v5462_v38 = vmax.f32 %v5434_v55, 0.0  ;;  %v5464_v35 = vmax.f32 %v5436_v63, 0.0 }
 0x7d3   :  { %v5439_v6 = vadd.f32 %v22060_v42, %v5214_v17  ;;  %v5441_v34 = vadd.f32 %v22063_v43, %v5356_v48  ;;  %v5463_v8 = vmax.f32 %v5435_v26, 0.0  ;;  %v5465_v10 = vmax.f32 %v5437_v18, 0.0 }
 0x7d4   :  { %v5466_v56 = vmax.f32 %v5438_v7, 0.0  ;;  %v5468_v47 = vmax.f32 %v5440_v4, 0.0 }
 0x7d5   :  { %v5467_v14 = vmax.f32 %v5439_v6, 0.0  ;;  %v5469_v23 = vmax.f32 %v5441_v34, 0.0 }
 0x7d6   :  { %v22093_v46 = vpack.c.bf16 %v5466_v56, %v5462_v38  ;;  %v22095_v49 = vpack.c.bf16 %v5468_v47, %v5464_v35 }
 0x7d7   :  { %v22097_v52 = vpack.c.bf16 %v5467_v14, %v5463_v8  ;;  %v22099_v19 = vpack.c.bf16 %v5469_v23, %v5465_v10  ;;  %v5218_v3 = vpop.f32.mrb[64].mxu1  ;;  %v5360_v54 = vpop.f32.mrb[72].mxu0 }
 0x7d8   :  { %v5442_v57 = vadd.f32 %v22054_v40, %v5218_v3  ;;  %v5444_v59 = vadd.f32 %v22057_v13, %v5360_v54  ;;  %v5220_v61 = vpop.f32.mrb[65].mxu1  ;;  %v5362_v62 = vpop.f32.mrb[73].mxu0 }
 0x7d9   :  { %v5443_v41 = vadd.f32 %v22060_v42, %v5220_v61  ;;  %v5445_v60 = vadd.f32 %v22063_v43, %v5362_v62  ;;  %v5222_v36 = vpop.f32.mrb[66].mxu1  ;;  %v5364_v5 = vpop.f32.mrb[74].mxu0  ;;  %5535 = vmatprep.subr.bf16.mxu1 %v22097_v52  ;;  %5781 = vmatprep.subr.bf16.mxu0 %v22097_v52  ;;  %v19142_v62 = vld [vmem:[%s23762_s16 + $0x4] ss:$16 sps:$4 sm:$0xff]  }
 0x7da   :  { %v5446_v32 = vadd.f32 %v22054_v40, %v5222_v36  ;;  %v5448_v51 = vadd.f32 %v22057_v13, %v5364_v5  ;;  %v5224_v9 = vpop.f32.mrb[67].mxu1  ;;  %v5366_v45 = vpop.f32.mrb[75].mxu0  ;;  %5536 = vmatpush1.bf16.msra.mxu1 %v22093_v46  ;;  %5782 = vmatpush1.bf16.msra.mxu0 %v22093_v46  ;;  %v5470_v53 = vmax.f32 %v5442_v57, 0.0  ;;  %v5472_v55 = vmax.f32 %v5444_v59, 0.0  ;;  %v19148_v36 = vld [vmem:[%s23762_s16 + $0x24] ss:$16 sps:$4 sm:$0xff]  }
 0x7db   :  { %v5447_v50 = vadd.f32 %v22060_v42, %v5224_v9  ;;  %v5449_v24 = vadd.f32 %v22063_v43, %v5366_v45  ;;  %v5471_v0 = vmax.f32 %v5443_v41, 0.0  ;;  %v5473_v26 = vmax.f32 %v5445_v60, 0.0  ;;  %v19154_v9 = vld [vmem:[%s23762_s16 + $0x44] ss:$16 sps:$4 sm:$0xff]   ;;  %v19152_v45 = vld [vmem:[%s23762_s16 + $0x40] ss:$16 sps:$4 sm:$0xff]  }
 0x7dc   :  { %v5474_v63 = vmax.f32 %v5446_v32, 0.0  ;;  %v5476_v25 = vmax.f32 %v5448_v51, 0.0  ;;  %v19138_v32 = vld [vmem:[%s23764_s18 + $0x8] sm:$0x1f]  }
 0x7dd   :  { %v5475_v18 = vmax.f32 %v5447_v50, 0.0  ;;  %v5477_v1 = vmax.f32 %v5449_v24, 0.0  ;;  %v22166_v51 = vld [vmem:[%s23763_s14 + $0x8] sm:$0x1f]  }
 0x7de   :  { %v22113_v2 = vpack.c.bf16 %v5474_v63, %v5470_v53  ;;  %v22115_v7 = vpack.c.bf16 %v5476_v25, %v5472_v55  ;;  %v19160_v53 = vld [vmem:[%s23762_s16 + $0x64] ss:$16 sps:$4 sm:$0xff]   ;;  %v19158_v55 = vld [vmem:[%s23762_s16 + $0x60] ss:$16 sps:$4 sm:$0xff]  }
 0x7df   :  { %v22117_v4 = vpack.c.bf16 %v5475_v18, %v5471_v0  ;;  %v22119_v17 = vpack.c.bf16 %v5477_v1, %v5473_v26  ;;  %v5228_v48 = vpop.f32.mrb[104].mxu1  ;;  %v5370_v6 = vpop.f32.mrb[112].mxu0  ;;  %v19166_v25 = vld [vmem:[%s23762_s16 + $0x84] ss:$16 sps:$4 sm:$0xff]   ;;  %v19164_v0 = vld [vmem:[%s23762_s16 + $0x80] ss:$16 sps:$4 sm:$0xff]  }
 0x7e0   :  { %v5229_v34 = vadd.f32 %v5228_v48, %v22044_v58  ;;  %v5371_v38 = vadd.f32 %v5370_v6, %v22046_v37  ;;  %v5230_v35 = vpop.f32.mrb[105].mxu1  ;;  %v5372_v56 = vpop.f32.mrb[113].mxu0  ;;  %v19172_v26 = vld [vmem:[%s23762_s16 + $0xa4] ss:$16 sps:$4 sm:$0xff]   ;;  %v19170_v18 = vld [vmem:[%s23762_s16 + $0xa0] ss:$16 sps:$4 sm:$0xff]  }
 0x7e1   :  { %v5231_v47 = vadd.f32 %v5230_v35, %v22048_v22  ;;  %v5373_v8 = vadd.f32 %v5372_v56, %v22050_v31  ;;  %v5232_v10 = vpop.f32.mrb[106].mxu1  ;;  %v5374_v14 = vpop.f32.mrb[114].mxu0  ;;  %5537 = vmatprep.subr.bf16.mxu1 %v22117_v4  ;;  %5783 = vmatprep.subr.bf16.mxu0 %v22117_v4  ;;  %v19178_v1 = vld [vmem:[%s23762_s16 + $0xc4] ss:$16 sps:$4 sm:$0xff]   ;;  %v19176_v48 = vld [vmem:[%s23762_s16 + $0xc0] ss:$16 sps:$4 sm:$0xff]  }
 0x7e2   :  { %v5401_v23 = vadd.f32 %v5229_v34, %v21940_v21  ;;  %v5403_v3 = vadd.f32 %v5371_v38, %v21942_v29  ;;  %v5233_v58 = vpop.f32.mrb[107].mxu1  ;;  %v5375_v54 = vpop.f32.mrb[115].mxu0  ;;  %5538 = vmatpush1.bf16.msra.mxu1 %v22113_v2  ;;  %5784 = vmatpush1.bf16.msra.mxu0 %v22113_v2  ;;  %v19184_v6 = vld [vmem:[%s23762_s16 + $0xe4] ss:$16 sps:$4 sm:$0xff]   ;;  %v19145_v34 = vld [vmem:[%s23762_s16 + $0xc] ss:$16 sps:$4 sm:$0xff]  }
 0x7e3   :  { %v5402_v37 = vadd.f32 %v5231_v47, %v21944_v39  ;;  %v5404_v22 = vadd.f32 %v5373_v8, %v21946_v33  ;;  %v22146_v39 = vld [vmem:[%s23763_s14] sm:$0xff]   ;;  %v19143_v56 = vld [vmem:[%s23762_s16 + $0x8] ss:$16 sps:$4 sm:$0xff]   ;;  %v19151_v47 = vld [vmem:[%s23762_s16 + $0x2c] ss:$16 sps:$4 sm:$0xff]   ;;  %s20778_s14 = smov [#allocation19]  }
 0x7e4   :  { %v5450_v31 = vadd.f32 %v22054_v40, %v5401_v23  ;;  %v19137_v33 = vld [vmem:[%s23764_s18] sm:$0xff]   ;;  %v19149_v14 = vld [vmem:[%s23762_s16 + $0x28] ss:$16 sps:$4 sm:$0xff]   ;;  %v19157_v23 = vld [vmem:[%s23762_s16 + $0x4c] ss:$16 sps:$4 sm:$0xff]   ;;  %s15842_s18 = sshll.u32 %s20778_s14, 4  ;;  %s15843_s18 = int_to_ptr.vmem [resolvable:$true] %s15842_s18 }
 0x7e5   :  { %v5451_v57 = vadd.f32 %v22060_v42, %v5402_v37  ;;  %v19140_v40 = vld [vmem:[%s23762_s16] ss:$16 sps:$4 sm:$0xff]   ;;  %v5452_v42 = vadd.f32 %v22057_v13, %v5403_v3  ;;  %v5453_v60 = vadd.f32 %v22063_v43, %v5404_v22  ;;  %v19190_v35 = vld [vmem:[%s23762_s16 + $0x104] ss:$16 sps:$4 sm:$0xff]   ;;  %v19155_v54 = vld [vmem:[%s23762_s16 + $0x48] ss:$16 sps:$4 sm:$0xff]   ;;  %p20677_p11 = scmp.lt.s32.totalorder %s15843_s18, %s15843_s18 }
 0x7e6   :  { %v5478_v59 = vmax.f32 %v5450_v31, 0.0  ;;  %v19146_v13 = vld [vmem:[%s23762_s16 + $0x20] ss:$16 sps:$4 sm:$0xff]   ;;  %v19196_v10 = vld [vmem:[%s23762_s16 + $0x124] ss:$16 sps:$4 sm:$0xff]  }
 0x7e7   :  { %v5479_v21 = vmax.f32 %v5451_v57, 0.0  ;;  %v5480_v43 = vmax.f32 %v5452_v42, 0.0  ;;  %v5481_v5 = vmax.f32 %v5453_v60, 0.0  ;;  %v19182_v38 = vld [vmem:[%s23762_s16 + $0xe0] ss:$16 sps:$4 sm:$0xff]  }
 0x7e8   :  { %v5494_v29 = vpack.c.bf16 %v5478_v59, %v5478_v59  ;;  %v19188_v8 = vld [vmem:[%s23762_s16 + $0x100] ss:$16 sps:$4 sm:$0xff]   ;;  %v19202_v58 = vld [vmem:[%s23762_s16 + $0x144] ss:$16 sps:$4 sm:$0xff]   ;;  %v19163_v37 = vld [vmem:[%s23762_s16 + $0x6c] ss:$16 sps:$4 sm:$0xff]  }
 0x7e9   :  { %v22135_v61 = vpack.c.bf16 %v5479_v21, %v5479_v21  ;;  %v22172_v50 = vpack.c.bf16 %v5481_v5, %v5481_v5  ;;  %v5496_v24 = vpack.c.bf16 %v5480_v43, %v5480_v43  ;;  %v19194_v3 = vld [vmem:[%s23762_s16 + $0x120] ss:$16 sps:$4 sm:$0xff]   ;;  %v19208_v31 = vld [vmem:[%s23762_s16 + $0x164] ss:$16 sps:$4 sm:$0xff]   ;;  %v19161_v57 = vld [vmem:[%s23762_s16 + $0x68] ss:$16 sps:$4 sm:$0xff]  }
 0x7ea   :  { %v22139_v41 = vsel %vm5520_vm4, %v5494_v29, 0  ;;  %v19200_v22 = vld [vmem:[%s23762_s16 + $0x140] ss:$16 sps:$4 sm:$0xff]   ;;  %v19169_v59 = vld [vmem:[%s23762_s16 + $0x8c] ss:$16 sps:$4 sm:$0xff]  }
 0x7eb   :  { %16460 = vmatprep.subr.msk.bf16.mxu1 %vm5520_vm4, %v22135_v61  ;;  %16468 = vmatprep.subr.msk.bf16.mxu0 %vm5520_vm4, %v22135_v61  ;;  %v22184_v63 = vsel %vm5520_vm4, %v5496_v24, 0  ;;  %v19206_v21 = vld [vmem:[%s23762_s16 + $0x160] ss:$16 sps:$4 sm:$0xff]   ;;  %v19214_v29 = vld [vmem:[%s23762_s16 + $0x184] ss:$16 sps:$4 sm:$0xff]  }
 0x7ec   :  { %5540 = vmatpush1.bf16.msra.mxu1 %v22139_v41  ;;  %5786 = vmatpush1.bf16.msra.mxu0 %v22139_v41  ;;  %v19173_v42 = vld [vmem:[%s23762_s16 + $0xa8] ss:$16 sps:$4 sm:$0xff]   ;;  %v19181_v60 = vld [vmem:[%s23762_s16 + $0xcc] ss:$16 sps:$4 sm:$0xff]  }
 0x7ed   :  { %5586 = vmatprep.subr.bf16.mxu1 %v22077_v28  ;;  %6571 = vmatprep.subr.bf16.mxu0 %v19142_v62  ;;  %v19167_v62 = vld [vmem:[%s23762_s16 + $0x88] ss:$16 sps:$4 sm:$0xff]   ;;  %v19187_v5 = vld [vmem:[%s23762_s16 + $0xec] ss:$16 sps:$4 sm:$0xff]  }
 0x7ee   :  { %v19179_v43 = vld [vmem:[%s23762_s16 + $0xc8] ss:$16 sps:$4 sm:$0xff]   ;;  %v19199_v24 = vld [vmem:[%s23762_s16 + $0x12c] ss:$16 sps:$4 sm:$0xff]  }
 0x7ef   :  { %16469 = vmatmul.mubr.msk.bf16.vlgmr.msra.gmra.mrb[116].mxu0 %vm5513_vm5, %v22146_v39  ;;  %16461 = vmatmul.mubr.msk.bf16.vlgmr.msra.gmra.mrb[108].mxu1 %vm5513_vm5, %v19137_v33 }
 0x7f0   :  { %5587 = vmatpush1.bf16.msra.mxu1 %v22075_v27  ;;  %5575 = vmatprep.mubr.bf16.mxu1 %v20774_v44 }
 0x7f1   :  { %5588 = vmatprep.subr.bf16.mxu1 %v22099_v19  ;;  %5821 = vmatprep.mubr.bf16.mxu0 %v20774_v44 }
 0x7f2   :  { %6572 = vmatpush1.bf16.msra.mxu0 %v19140_v40  ;;  %v19220_v40 = vld [vmem:[%s23762_s16 + $0x1a4] ss:$16 sps:$4 sm:$0xff]  }
 0x7f3   :  { %6573 = vmatprep.subr.bf16.mxu0 %v19148_v36  ;;  %v19218_v36 = vld [vmem:[%s23762_s16 + $0x1a0] ss:$16 sps:$4 sm:$0xff]  }
 0x7f4   :  { %5589 = vmatpush1.bf16.msra.mxu1 %v22095_v49 }
 0x7f5   :  { %5590 = vmatprep.subr.bf16.mxu1 %v22119_v17 }
 0x7f6   :  { %6574 = vmatpush1.bf16.msra.mxu0 %v19146_v13  ;;  %v19226_v13 = vld [vmem:[%s23762_s16 + $0x1c4] ss:$16 sps:$4 sm:$0xff]  }
 0x7f7   :  { %16462 = vmatmul.mubr.msk.bf16.gmra.mrb[112].mxu1 %vm5513_vm5, %v19138_v32  ;;  %16470 = vmatmul.mubr.msk.bf16.gmra.mrb[120].mxu0 %vm5513_vm5, %v22166_v51 }
 0x7f8   :  { %5591 = vmatpush1.bf16.msra.mxu1 %v22115_v7  ;;  %5618 = vmatprep.mubr.bf16.mxu1 %v20774_v44 }
 0x7f9   :  { %16463 = vmatprep.subr.msk.bf16.mxu1 %vm5520_vm4, %v22172_v50  ;;  %6575 = vmatprep.subr.bf16.mxu0 %v19154_v9  ;;  %v19193_v9 = vld [vmem:[%s23762_s16 + $0x10c] ss:$16 sps:$4 sm:$0xff]  }
 0x7fa   :  { %6576 = vmatpush1.bf16.msra.mxu0 %v19152_v45  ;;  %v19191_v45 = vld [vmem:[%s23762_s16 + $0x108] ss:$16 sps:$4 sm:$0xff]  }
 0x7fb   :  { %6577 = vmatprep.subr.bf16.mxu0 %v19160_v53  ;;  %v19197_v53 = vld [vmem:[%s23762_s16 + $0x128] ss:$16 sps:$4 sm:$0xff]  }
 0x7fc   :  { %5593 = vmatpush1.bf16.msra.mxu1 %v22184_v63 }
 0x7fd   :  { %5832 = vmatprep.subr.bf16.mxu1 %v22077_v28 }
 0x7fe   :  { %6578 = vmatpush1.bf16.msra.mxu0 %v19158_v55  ;;  %v19205_v55 = vld [vmem:[%s23762_s16 + $0x14c] ss:$16 sps:$4 sm:$0xff]  }
 0x7ff   :  { %16464 = vmatmul.mubr.msk.bf16.vlgmr.msra.gmra.mrb[116].mxu1 %vm5513_vm5, %v19137_v33  ;;  %6579 = vmatprep.subr.bf16.mxu0 %v19166_v25  ;;  %v19212_v33 = vld [vmem:[%s23762_s16 + $0x180] ss:$16 sps:$4 sm:$0xff]   ;;  %v19203_v25 = vld [vmem:[%s23762_s16 + $0x148] ss:$16 sps:$4 sm:$0xff]  }
 0x800   :  { %5833 = vmatpush1.bf16.msra.mxu1 %v22075_v27  ;;  %5628 = vmatprep.mubr.bf16.mxu1 %v20774_v44 }
 0x801   :  { %5834 = vmatprep.subr.bf16.mxu1 %v22099_v19 }
 0x802   :  { %6580 = vmatpush1.bf16.msra.mxu0 %v19164_v0  ;;  %v19211_v0 = vld [vmem:[%s23762_s16 + $0x16c] ss:$16 sps:$4 sm:$0xff]  }
 0x803   :  { %6581 = vmatprep.subr.bf16.mxu0 %v19172_v26  ;;  %v19209_v26 = vld [vmem:[%s23762_s16 + $0x168] ss:$16 sps:$4 sm:$0xff]  }
 0x804   :  { %5835 = vmatpush1.bf16.msra.mxu1 %v22095_v49 }
 0x805   :  { %5836 = vmatprep.subr.bf16.mxu1 %v22119_v17 }
 0x806   :  { %6582 = vmatpush1.bf16.msra.mxu0 %v19170_v18  ;;  %v19217_v18 = vld [vmem:[%s23762_s16 + $0x18c] ss:$16 sps:$4 sm:$0xff]  }
 0x807   :  { %16465 = vmatmul.mubr.msk.bf16.gmra.mrb[120].mxu1 %vm5513_vm5, %v19138_v32  ;;  %6583 = vmatprep.subr.bf16.mxu0 %v19178_v1  ;;  %v19224_v32 = vld [vmem:[%s23762_s16 + $0x1c0] ss:$16 sps:$4 sm:$0xff]   ;;  %v19215_v1 = vld [vmem:[%s23762_s16 + $0x188] ss:$16 sps:$4 sm:$0xff]  }
 0x808   :  { %5837 = vmatpush1.bf16.msra.mxu1 %v22115_v7  ;;  %5864 = vmatprep.mubr.bf16.mxu1 %v20774_v44 }
 0x809   :  { %16471 = vmatprep.subr.msk.bf16.mxu1 %vm5520_vm4, %v22172_v50 }
 0x80a   :  { %6584 = vmatpush1.bf16.msra.mxu0 %v19176_v48  ;;  %v19223_v48 = vld [vmem:[%s23762_s16 + $0x1ac] ss:$16 sps:$4 sm:$0xff]  }
 0x80b   :  { %6585 = vmatprep.subr.bf16.mxu0 %v19184_v6  ;;  %v19221_v6 = vld [vmem:[%s23762_s16 + $0x1a8] ss:$16 sps:$4 sm:$0xff]  }
 0x80c   :  { %5839 = vmatpush1.bf16.msra.mxu1 %v22184_v63 }
 0x80d   :  { %6677 = vmatprep.subr.bf16.mxu1 %v19145_v34  ;;  %v19229_v34 = vld [vmem:[%s23762_s16 + $0x1cc] ss:$16 sps:$4 sm:$0xff]  }
 0x80e   :  { %6586 = vmatpush1.bf16.msra.mxu0 %v19182_v38  ;;  %v19232_v38 = vld [vmem:[%s23762_s16 + $0x1e4] ss:$16 sps:$4 sm:$0xff]  }
 0x80f   :  { %16472 = vmatmul.mubr.msk.bf16.vlgmr.msra.gmra.mrb[124].mxu1 %vm5513_vm5, %v22146_v39  ;;  %6587 = vmatprep.subr.bf16.mxu0 %v19190_v35  ;;  %v19175_v39 = vld [vmem:[%s23762_s16 + $0xac] ss:$16 sps:$4 sm:$0xff]   ;;  %v19227_v35 = vld [vmem:[%s23762_s16 + $0x1c8] ss:$16 sps:$4 sm:$0xff]  }
 0x810   :  { %5874 = vmatprep.mubr.bf16.mxu1 %v20774_v44  ;;  %6678 = vmatpush1.bf16.msra.mxu1 %v19143_v56  ;;  %v19230_v56 = vld [vmem:[%s23762_s16 + $0x1e0] ss:$16 sps:$4 sm:$0xff]  }
 0x811   :  { %6679 = vmatprep.subr.bf16.mxu1 %v19151_v47  ;;  %v19235_v47 = vld [vmem:[%s23762_s16 + $0x1ec] ss:$16 sps:$4 sm:$0xff]  }
 0x812   :  { %6588 = vmatpush1.bf16.msra.mxu0 %v19188_v8  ;;  %v19238_v8 = vld [vmem:[%s23762_s16 + $0x204] ss:$16 sps:$4 sm:$0xff]  }
 0x813   :  { %6589 = vmatprep.subr.bf16.mxu0 %v19196_v10  ;;  %v19233_v10 = vld [vmem:[%s23762_s16 + $0x1e8] ss:$16 sps:$4 sm:$0xff]  }
 0x814   :  { %6680 = vmatpush1.bf16.msra.mxu1 %v19149_v14  ;;  %v19241_v14 = vld [vmem:[%s23762_s16 + $0x20c] ss:$16 sps:$4 sm:$0xff]  }
 0x815   :  { %6681 = vmatprep.subr.bf16.mxu1 %v19157_v23 }
 0x816   :  { %6590 = vmatpush1.bf16.msra.mxu0 %v19194_v3 }
 0x817   :  { %16473 = vmatmul.mubr.msk.bf16.gmra.mrb[128].mxu1 %vm5513_vm5, %v22166_v51  ;;  %6591 = vmatprep.subr.bf16.mxu0 %v19202_v58  ;;  %v19185_v51 = vld [vmem:[%s23762_s16 + $0xe8] ss:$16 sps:$4 sm:$0xff]  }
 0x818   :  { %6682 = vmatpush1.bf16.msra.mxu1 %v19155_v54 }
 0x819   :  { %6683 = vmatprep.subr.bf16.mxu1 %v19163_v37 }
 0x81a   :  { %6592 = vmatpush1.bf16.msra.mxu0 %v19200_v22 }
 0x81b   :  { %6593 = vmatprep.subr.bf16.mxu0 %v19208_v31 }
 0x81c   :  { %6684 = vmatpush1.bf16.msra.mxu1 %v19161_v57 }
 0x81d   :  { %6685 = vmatprep.subr.bf16.mxu1 %v19169_v59 }
 0x81e   :  { %6594 = vmatpush1.bf16.msra.mxu0 %v19206_v21 }
 0x81f   :  { %6595 = vmatprep.subr.bf16.mxu0 %v19214_v29 }
 0x820   :  { %6686 = vmatpush1.bf16.msra.mxu1 %v19167_v62  ;;  %v19236_v62 = vld [vmem:[%s23762_s16 + $0x200] ss:$16 sps:$4 sm:$0xff]  }
 0x821   :  { %6687 = vmatprep.subr.bf16.mxu1 %v19175_v39  ;;  %v19239_v39 = vld [vmem:[%s23762_s16 + $0x208] ss:$16 sps:$4 sm:$0xff]  }
 0x822   :  { %6596 = vmatpush1.bf16.msra.mxu0 %v19212_v33 }
 0x823   :  { %6597 = vmatprep.subr.bf16.mxu0 %v19220_v40  ;;  %v19244_v40 = vld [vmem:[%s23762_s16 + $0x224] ss:$16 sps:$4 sm:$0xff]  }
 0x824   :  { %6688 = vmatpush1.bf16.msra.mxu1 %v19173_v42  ;;  %v19247_v42 = vld [vmem:[%s23762_s16 + $0x22c] ss:$16 sps:$4 sm:$0xff]  }
 0x825   :  { %6689 = vmatprep.subr.bf16.mxu1 %v19181_v60  ;;  %v19242_v60 = vld [vmem:[%s23762_s16 + $0x220] ss:$16 sps:$4 sm:$0xff]  }
 0x826   :  { %6598 = vmatpush1.bf16.msra.mxu0 %v19218_v36  ;;  %v19245_v36 = vld [vmem:[%s23762_s16 + $0x228] ss:$16 sps:$4 sm:$0xff]  }
 0x827   :  { %6599 = vmatprep.subr.bf16.mxu0 %v19226_v13 }
 0x828   :  { %6690 = vmatpush1.bf16.msra.mxu1 %v19179_v43 }
 0x829   :  { %6691 = vmatprep.subr.bf16.mxu1 %v19187_v5  ;;  %v19250_v5 = vld [vmem:[%s23762_s16 + $0x244] ss:$16 sps:$4 sm:$0xff]  }
 0x82a   :  { %6600 = vmatpush1.bf16.msra.mxu0 %v19224_v32  ;;  %v19253_v32 = vld [vmem:[%s23762_s16 + $0x24c] ss:$16 sps:$4 sm:$0xff]  }
 0x82b   :  { %6601 = vmatprep.subr.bf16.mxu0 %v19232_v38  ;;  %v19254_v38 = vld [vmem:[%s23762_s16 + $0x260] ss:$16 sps:$4 sm:$0xff]  }
 0x82c   :  { %6692 = vmatpush1.bf16.msra.mxu1 %v19185_v51 }
 0x82d   :  { %6693 = vmatprep.subr.bf16.mxu1 %v19193_v9 }
 0x82e   :  { %6602 = vmatpush1.bf16.msra.mxu0 %v19230_v56 }
 0x82f   :  { %6624 = vmatprep.subr.bf16.mxu0 %v19238_v8  ;;  %v19265_v8 = vld [vmem:[%s23762_s16 + $0x28c] ss:$16 sps:$4 sm:$0xff]  }
 0x830   :  { %6694 = vmatpush1.bf16.msra.mxu1 %v19191_v45 }
 0x831   :  { %6695 = vmatprep.subr.bf16.mxu1 %v19199_v24 }
 0x834   :  { %6696 = vmatpush1.bf16.msra.mxu1 %v19197_v53 }
 0x835   :  { %6697 = vmatprep.subr.bf16.mxu1 %v19205_v55 }
 0x838   :  { %6698 = vmatpush1.bf16.msra.mxu1 %v19203_v25 }
 0x839   :  { %6699 = vmatprep.subr.bf16.mxu1 %v19211_v0 }
 0x83c   :  { %6700 = vmatpush1.bf16.msra.mxu1 %v19209_v26  ;;  %v19248_v26 = vld [vmem:[%s23762_s16 + $0x240] ss:$16 sps:$4 sm:$0xff]  }
 0x83d   :  { %6701 = vmatprep.subr.bf16.mxu1 %v19217_v18  ;;  %v19251_v18 = vld [vmem:[%s23762_s16 + $0x248] ss:$16 sps:$4 sm:$0xff]  }
 0x840   :  { %6702 = vmatpush1.bf16.msra.mxu1 %v19215_v1 }
 0x841   :  { %6703 = vmatprep.subr.bf16.mxu1 %v19223_v48 }
 0x844   :  { %6704 = vmatpush1.bf16.msra.mxu1 %v19221_v6  ;;  %v19256_v6 = vld [vmem:[%s23762_s16 + $0x264] ss:$16 sps:$4 sm:$0xff]  }
 0x845   :  { %6705 = vmatprep.subr.bf16.mxu1 %v19229_v34  ;;  %v19259_v34 = vld [vmem:[%s23762_s16 + $0x26c] ss:$16 sps:$4 sm:$0xff]  }
 0x848   :  { %6706 = vmatpush1.bf16.msra.mxu1 %v19227_v35  ;;  %v19257_v35 = vld [vmem:[%s23762_s16 + $0x268] ss:$16 sps:$4 sm:$0xff]  }
 0x849   :  { %6707 = vmatprep.subr.bf16.mxu1 %v19235_v47  ;;  %v19262_v47 = vld [vmem:[%s23762_s16 + $0x284] ss:$16 sps:$4 sm:$0xff]  }
 0x84c   :  { %6708 = vmatpush1.bf16.msra.mxu1 %v19233_v10 }
 0x84d   :  { %6730 = vmatprep.subr.bf16.mxu1 %v19241_v14 }
 0x8c2   :  { %v5813_v23 = vpop.f32.mrb[116].mxu0  ;;  %v5567_v3 = vpop.f32.mrb[108].mxu1 }
 0x8c3   :  { %v5815_v58 = vpop.f32.mrb[117].mxu0  ;;  %v5569_v54 = vpop.f32.mrb[109].mxu1 }
 0x8c4   :  { %v5817_v37 = vpop.f32.mrb[118].mxu0  ;;  %v5571_v22 = vpop.f32.mrb[110].mxu1 }
 0x8c5   :  { %v5885_v31 = vpack.c.bf16 %v5817_v37, %v5813_v23  ;;  %v5819_v57 = vpop.f32.mrb[119].mxu0  ;;  %v22263_v59 = vpack.c.bf16 %v5571_v22, %v5567_v3  ;;  %v5573_v21 = vpop.f32.mrb[111].mxu1  ;;  %v19268_v22 = vld [vmem:[%s23762_s16 + $0x2a4] ss:$16 sps:$4 sm:$0xff]  }
 0x8c6   :  { %v5886_v29 = vpack.c.bf16 %v5819_v57, %v5815_v58  ;;  %v22267_v33 = vpack.c.bf16 %v5573_v21, %v5569_v54  ;;  %v19260_v58 = vld [vmem:[%s23762_s16 + $0x280] ss:$16 sps:$4 sm:$0xff]   ;;  %v19263_v54 = vld [vmem:[%s23762_s16 + $0x288] ss:$16 sps:$4 sm:$0xff]  }
 0x8c7   :  { %v19266_v57 = vld [vmem:[%s23762_s16 + $0x2a0] ss:$16 sps:$4 sm:$0xff]   ;;  %v19269_v21 = vld [vmem:[%s23762_s16 + $0x2a8] ss:$16 sps:$4 sm:$0xff]  }
 0x8c8   :  { %6603 = vmatprep.mubr.bf16.mxu0 %v5886_v29  ;;  %6709 = vmatprep.mubr.bf16.mxu1 %v5886_v29 }
 0x8c9   :  { %6604 = vmatmul.mubr.bf16.vlgmr.msra.gmra.mrb[124].mxu0 %v5885_v31  ;;  %6710 = vmatmul.mubr.bf16.vlgmr.msra.gmra.mrb[132].mxu1 %v5885_v31  ;;  %v19271_v31 = vld [vmem:[%s23762_s16 + $0x2ac] ss:$16 sps:$4 sm:$0xff]  }
 0x8ca   :  { %6625 = vmatpush1.bf16.msra.mxu0 %v19236_v62  ;;  %6731 = vmatpush1.bf16.msra.mxu1 %v19239_v39  ;;  %v5577_v13 = vpop.f32.mrb[112].mxu1  ;;  %v5823_v43 = vpop.f32.mrb[120].mxu0  ;;  %v19274_v62 = vld [vmem:[%s23762_s16 + $0x2c4] ss:$16 sps:$4 sm:$0xff]   ;;  %v19277_v39 = vld [vmem:[%s23762_s16 + $0x2cc] ss:$16 sps:$4 sm:$0xff]  }
 0x8cb   :  { %6626 = vmatprep.subr.bf16.mxu0 %v19244_v40  ;;  %6732 = vmatprep.subr.bf16.mxu1 %v19247_v42  ;;  %v5579_v51 = vpop.f32.mrb[113].mxu1  ;;  %v5825_v9 = vpop.f32.mrb[121].mxu0 }
 0x8cc   :  { %v5581_v45 = vpop.f32.mrb[114].mxu1  ;;  %v5827_v24 = vpop.f32.mrb[122].mxu0 }
 0x8cd   :  { %v22275_v53 = vpack.c.bf16 %v5581_v45, %v5577_v13  ;;  %v5583_v55 = vpop.f32.mrb[115].mxu1  ;;  %v5889_v25 = vpack.c.bf16 %v5827_v24, %v5823_v43  ;;  %v5829_v0 = vpop.f32.mrb[123].mxu0  ;;  %v19272_v13 = vld [vmem:[%s23762_s16 + $0x2c0] ss:$16 sps:$4 sm:$0xff]   ;;  %v19275_v43 = vld [vmem:[%s23762_s16 + $0x2c8] ss:$16 sps:$4 sm:$0xff]  }
 0x8ce   :  { %6627 = vmatpush1.bf16.msra.mxu0 %v19242_v60  ;;  %6733 = vmatpush1.bf16.msra.mxu1 %v19245_v36  ;;  %v22279_v1 = vpack.c.bf16 %v5583_v55, %v5579_v51  ;;  %v5890_v48 = vpack.c.bf16 %v5829_v0, %v5825_v9  ;;  %v19283_v51 = vld [vmem:[%s23762_s16 + $0x2ec] ss:$16 sps:$4 sm:$0xff]   ;;  %v19278_v9 = vld [vmem:[%s23762_s16 + $0x2e0] ss:$16 sps:$4 sm:$0xff]   ;;  %v19281_v45 = vld [vmem:[%s23762_s16 + $0x2e8] ss:$16 sps:$4 sm:$0xff]  }
 0x8cf   :  { %6628 = vmatprep.subr.bf16.mxu0 %v19250_v5  ;;  %6734 = vmatprep.subr.bf16.mxu1 %v19253_v32  ;;  %v19280_v32 = vld [vmem:[%s23762_s16 + $0x2e4] ss:$16 sps:$4 sm:$0xff]  }
 0x8d0   :  { %6613 = vmatprep.mubr.bf16.mxu0 %v5890_v48  ;;  %6719 = vmatprep.mubr.bf16.mxu1 %v5890_v48  ;;  %v19286_v55 = vld [vmem:[%s23762_s16 + $0x304] ss:$16 sps:$4 sm:$0xff]  }
 0x8d1   :  { %6614 = vmatmul.mubr.bf16.gmra.mrb[128].mxu0 %v5889_v25  ;;  %6720 = vmatmul.mubr.bf16.gmra.mrb[136].mxu1 %v5889_v25  ;;  %v19289_v25 = vld [vmem:[%s23762_s16 + $0x30c] ss:$16 sps:$4 sm:$0xff]  }
 0x8d2   :  { %6629 = vmatpush1.bf16.msra.mxu0 %v19248_v26  ;;  %6735 = vmatpush1.bf16.msra.mxu1 %v19251_v18  ;;  %v5620_v56 = vpop.f32.mrb[116].mxu1 }
 0x8d3   :  { %6630 = vmatprep.subr.bf16.mxu0 %v19256_v6  ;;  %6736 = vmatprep.subr.bf16.mxu1 %v19259_v34  ;;  %v5622_v10 = vpop.f32.mrb[117].mxu1  ;;  %v19284_v6 = vld [vmem:[%s23762_s16 + $0x300] ss:$16 sps:$4 sm:$0xff]   ;;  %v19287_v34 = vld [vmem:[%s23762_s16 + $0x308] ss:$16 sps:$4 sm:$0xff]  }
 0x8d4   :  { %v5624_v14 = vpop.f32.mrb[118].mxu1 }
 0x8d5   :  { %v22287_v23 = vpack.c.bf16 %v5624_v14, %v5620_v56  ;;  %v5626_v3 = vpop.f32.mrb[119].mxu1  ;;  %v19295_v56 = vld [vmem:[%s23762_s16 + $0x32c] ss:$16 sps:$4 sm:$0xff]   ;;  %v19298_v14 = vld [vmem:[%s23762_s16 + $0x344] ss:$16 sps:$4 sm:$0xff]  }
 0x8d6   :  { %6631 = vmatpush1.bf16.msra.mxu0 %v19254_v38  ;;  %6737 = vmatpush1.bf16.msra.mxu1 %v19257_v35  ;;  %v22291_v37 = vpack.c.bf16 %v5626_v3, %v5622_v10  ;;  %v19292_v35 = vld [vmem:[%s23762_s16 + $0x324] ss:$16 sps:$4 sm:$0xff]   ;;  %v19301_v3 = vld [vmem:[%s23762_s16 + $0x34c] ss:$16 sps:$4 sm:$0xff]  }
 0x8d7   :  { %6632 = vmatprep.subr.bf16.mxu0 %v19262_v47  ;;  %6738 = vmatprep.subr.bf16.mxu1 %v19265_v8  ;;  %v19290_v47 = vld [vmem:[%s23762_s16 + $0x320] ss:$16 sps:$4 sm:$0xff]   ;;  %v19293_v8 = vld [vmem:[%s23762_s16 + $0x328] ss:$16 sps:$4 sm:$0xff]  }
 0x8da   :  { %6633 = vmatpush1.bf16.msra.mxu0 %v19260_v58  ;;  %6739 = vmatpush1.bf16.msra.mxu1 %v19263_v54  ;;  %v5630_v29 = vpop.f32.mrb[120].mxu1 }
 0x8db   :  { %6634 = vmatprep.subr.bf16.mxu0 %v19268_v22  ;;  %6740 = vmatprep.subr.bf16.mxu1 %v19271_v31  ;;  %v5632_v40 = vpop.f32.mrb[121].mxu1 }
 0x8dc   :  { %v5634_v42 = vpop.f32.mrb[122].mxu1 }
 0x8dd   :  { %v22299_v60 = vpack.c.bf16 %v5634_v42, %v5630_v29  ;;  %v5636_v36 = vpop.f32.mrb[123].mxu1  ;;  %v19305_v42 = vld [vmem:[%s23762_s16 + $0x368] ss:$16 sps:$4 sm:$0xff]  }
 0x8de   :  { %6635 = vmatpush1.bf16.msra.mxu0 %v19266_v57  ;;  %6741 = vmatpush1.bf16.msra.mxu1 %v19269_v21  ;;  %v22303_v5 = vpack.c.bf16 %v5636_v36, %v5632_v40  ;;  %v19296_v57 = vld [vmem:[%s23762_s16 + $0x340] ss:$16 sps:$4 sm:$0xff]   ;;  %v19299_v21 = vld [vmem:[%s23762_s16 + $0x348] ss:$16 sps:$4 sm:$0xff]   ;;  %v19310_v36 = vld [vmem:[%s23765_s12 + $0x4] ss:$16 sps:$4 sm:$0xff]  }
 0x8df   :  { %6636 = vmatprep.subr.bf16.mxu0 %v19274_v62  ;;  %6742 = vmatprep.subr.bf16.mxu1 %v19277_v39  ;;  %v19304_v62 = vld [vmem:[%s23762_s16 + $0x364] ss:$16 sps:$4 sm:$0xff]   ;;  %v19307_v39 = vld [vmem:[%s23762_s16 + $0x36c] ss:$16 sps:$4 sm:$0xff]   ;;  %v19302_v40 = vld [vmem:[%s23762_s16 + $0x360] ss:$16 sps:$4 sm:$0xff]  }
 0x8e0   :  { %s23791_s16 = sld [smem:[#allocation65_spill]] }
 0x8e2   :  { %6637 = vmatpush1.bf16.msra.mxu0 %v19272_v13  ;;  %6743 = vmatpush1.bf16.msra.mxu1 %v19275_v43  ;;  %v5866_v24 = vpop.f32.mrb[124].mxu1  ;;  %v19313_v13 = vld [vmem:[%s23765_s12 + $0xc] ss:$16 sps:$4 sm:$0xff]   ;;  %v19308_v43 = vld [vmem:[%s23765_s12] ss:$16 sps:$4 sm:$0xff]  }
 0x8e3   :  { %6638 = vmatprep.subr.bf16.mxu0 %v19280_v32  ;;  %6744 = vmatprep.subr.bf16.mxu1 %v19283_v51  ;;  %v5868_v0 = vpop.f32.mrb[125].mxu1  ;;  %v19311_v32 = vld [vmem:[%s23765_s12 + $0x8] ss:$16 sps:$4 sm:$0xff]   ;;  %v19316_v51 = vld [vmem:[%s23765_s12 + $0x24] ss:$16 sps:$4 sm:$0xff]  }
 0x8e4   :  { %v5870_v26 = vpop.f32.mrb[126].mxu1 }
 0x8e5   :  { %v5887_v18 = vpack.c.bf16 %v5870_v26, %v5866_v24  ;;  %v5872_v48 = vpop.f32.mrb[127].mxu1  ;;  %v19317_v24 = vld [vmem:[%s23765_s12 + $0x28] ss:$16 sps:$4 sm:$0xff]  }
 0x8e6   :  { %6639 = vmatpush1.bf16.msra.mxu0 %v19278_v9  ;;  %6745 = vmatpush1.bf16.msra.mxu1 %v19281_v45  ;;  %v5888_v38 = vpack.c.bf16 %v5872_v48, %v5868_v0  ;;  %v19319_v9 = vld [vmem:[%s23765_s12 + $0x2c] ss:$16 sps:$4 sm:$0xff]   ;;  %v19314_v45 = vld [vmem:[%s23765_s12 + $0x20] ss:$16 sps:$4 sm:$0xff]   ;;  %v19323_v26 = vld [vmem:[%s23765_s12 + $0x48] ss:$16 sps:$4 sm:$0xff]  }
 0x8e7   :  { %6640 = vmatprep.subr.bf16.mxu0 %v19286_v55  ;;  %6746 = vmatprep.subr.bf16.mxu1 %v19289_v25  ;;  %v19322_v55 = vld [vmem:[%s23765_s12 + $0x44] ss:$16 sps:$4 sm:$0xff]   ;;  %v19325_v25 = vld [vmem:[%s23765_s12 + $0x4c] ss:$16 sps:$4 sm:$0xff]   ;;  %v19320_v0 = vld [vmem:[%s23765_s12 + $0x40] ss:$16 sps:$4 sm:$0xff]  }
 0x8e8   :  { %16586 = vmatprep.mubr.msk.bf16.mxu0 %vm389_vm0, %v5888_v38  ;;  %16588 = vmatprep.mubr.msk.bf16.mxu1 %vm389_vm0, %v5888_v38  ;;  %v19331_v48 = vld [vmem:[%s23765_s12 + $0x6c] ss:$16 sps:$4 sm:$0xff]   ;;  %v19334_v38 = vld [vmem:[%s23765_s12 + $0x84] ss:$16 sps:$4 sm:$0xff]  }
 0x8ea   :  { %6641 = vmatpush1.bf16.msra.mxu0 %v19284_v6  ;;  %6747 = vmatpush1.bf16.msra.mxu1 %v19287_v34  ;;  %v5876_v10 = vpop.f32.mrb[128].mxu1  ;;  %v19326_v6 = vld [vmem:[%s23765_s12 + $0x60] ss:$16 sps:$4 sm:$0xff]   ;;  %v19329_v34 = vld [vmem:[%s23765_s12 + $0x68] ss:$16 sps:$4 sm:$0xff]  }
 0x8eb   :  { %6642 = vmatprep.subr.bf16.mxu0 %v19292_v35  ;;  %6748 = vmatprep.subr.bf16.mxu1 %v19295_v56  ;;  %v5878_v58 = vpop.f32.mrb[129].mxu1  ;;  %v19337_v35 = vld [vmem:[%s23765_s12 + $0x8c] ss:$16 sps:$4 sm:$0xff]   ;;  %v19332_v56 = vld [vmem:[%s23765_s12 + $0x80] ss:$16 sps:$4 sm:$0xff]  }
 0x8ec   :  { %v5880_v54 = vpop.f32.mrb[130].mxu1 }
 0x8ed   :  { %v5891_v22 = vpack.c.bf16 %v5880_v54, %v5876_v10  ;;  %v5882_v31 = vpop.f32.mrb[131].mxu1  ;;  %v19343_v10 = vld [vmem:[%s23765_s12 + $0xac] ss:$16 sps:$4 sm:$0xff]   ;;  %v19344_v54 = vld [vmem:[%s23765_s12 + $0xc0] ss:$16 sps:$4 sm:$0xff]  }
 0x8ee   :  { %6643 = vmatpush1.bf16.msra.mxu0 %v19290_v47  ;;  %6749 = vmatpush1.bf16.msra.mxu1 %v19293_v8  ;;  %v5892_v29 = vpack.c.bf16 %v5882_v31, %v5878_v58  ;;  %v19335_v47 = vld [vmem:[%s23765_s12 + $0x88] ss:$16 sps:$4 sm:$0xff]   ;;  %v19340_v8 = vld [vmem:[%s23765_s12 + $0xa4] ss:$16 sps:$4 sm:$0xff]   ;;  %v19349_v58 = vld [vmem:[%s23765_s12 + $0xcc] ss:$16 sps:$4 sm:$0xff]  }
 0x8ef   :  { %6644 = vmatprep.subr.bf16.mxu0 %v19298_v14  ;;  %6750 = vmatprep.subr.bf16.mxu1 %v19301_v3  ;;  %v19341_v14 = vld [vmem:[%s23765_s12 + $0xa8] ss:$16 sps:$4 sm:$0xff]   ;;  %v19346_v3 = vld [vmem:[%s23765_s12 + $0xc4] ss:$16 sps:$4 sm:$0xff]  }
 0x8f0   :  { %v19352_v31 = vld [vmem:[%s23765_s12 + $0xe4] ss:$16 sps:$4 sm:$0xff]  }
 0x8f2   :  { %6645 = vmatpush1.bf16.msra.mxu0 %v19296_v57  ;;  %6751 = vmatpush1.bf16.msra.mxu1 %v19299_v21  ;;  %v19355_v57 = vld [vmem:[%s23765_s12 + $0xec] ss:$16 sps:$4 sm:$0xff]   ;;  %v19350_v21 = vld [vmem:[%s23765_s12 + $0xe0] ss:$16 sps:$4 sm:$0xff]  }
 0x8f3   :  { %6646 = vmatprep.subr.bf16.mxu0 %v19304_v62  ;;  %6752 = vmatprep.subr.bf16.mxu1 %v19307_v39  ;;  %v19358_v62 = vld [vmem:[%s23765_s12 + $0x104] ss:$16 sps:$4 sm:$0xff]   ;;  %v19361_v39 = vld [vmem:[%s23765_s12 + $0x10c] ss:$16 sps:$4 sm:$0xff]  }
 0x8f6   :  { %6647 = vmatpush1.bf16.msra.mxu0 %v19302_v40  ;;  %6753 = vmatpush1.bf16.msra.mxu1 %v19305_v42  ;;  %v19356_v40 = vld [vmem:[%s23765_s12 + $0x100] ss:$16 sps:$4 sm:$0xff]   ;;  %v19359_v42 = vld [vmem:[%s23765_s12 + $0x108] ss:$16 sps:$4 sm:$0xff]  }
 0x8f7   :  { %7349 = vmatprep.subr.bf16.mxu0 %v19310_v36  ;;  %7455 = vmatprep.subr.bf16.mxu1 %v19313_v13  ;;  %v19364_v36 = vld [vmem:[%s23765_s12 + $0x124] ss:$16 sps:$4 sm:$0xff]   ;;  %v19367_v13 = vld [vmem:[%s23765_s12 + $0x12c] ss:$16 sps:$4 sm:$0xff]  }
 0x8f9   :  { %6657 = vmatmul.mubr.bf16.vlgmr.msra.gmra.mrb[124].mxu0 %v5887_v18  ;;  %6763 = vmatmul.mubr.bf16.vlgmr.msra.gmra.mrb[132].mxu1 %v5887_v18  ;;  %v19328_v18 = vld [vmem:[%s23765_s12 + $0x64] ss:$16 sps:$4 sm:$0xff]  }
 0x8fa   :  { %7350 = vmatpush1.bf16.msra.mxu0 %v19308_v43  ;;  %7456 = vmatpush1.bf16.msra.mxu1 %v19311_v32  ;;  %v19362_v43 = vld [vmem:[%s23765_s12 + $0x120] ss:$16 sps:$4 sm:$0xff]   ;;  %v19365_v32 = vld [vmem:[%s23765_s12 + $0x128] ss:$16 sps:$4 sm:$0xff]  }
 0x8fb   :  { %7351 = vmatprep.subr.bf16.mxu0 %v19316_v51  ;;  %7457 = vmatprep.subr.bf16.mxu1 %v19319_v9  ;;  %v19370_v51 = vld [vmem:[%s23765_s12 + $0x144] ss:$16 sps:$4 sm:$0xff]   ;;  %v19373_v9 = vld [vmem:[%s23765_s12 + $0x14c] ss:$16 sps:$4 sm:$0xff]  }
 0x8fc   :  { %16587 = vmatprep.mubr.msk.bf16.mxu0 %vm389_vm0, %v5892_v29  ;;  %16589 = vmatprep.mubr.msk.bf16.mxu1 %vm389_vm0, %v5892_v29  ;;  %v19353_v29 = vld [vmem:[%s23765_s12 + $0xe8] ss:$16 sps:$4 sm:$0xff]  }
 0x8fe   :  { %7352 = vmatpush1.bf16.msra.mxu0 %v19314_v45  ;;  %7458 = vmatpush1.bf16.msra.mxu1 %v19317_v24  ;;  %v19368_v45 = vld [vmem:[%s23765_s12 + $0x140] ss:$16 sps:$4 sm:$0xff]   ;;  %v19371_v24 = vld [vmem:[%s23765_s12 + $0x148] ss:$16 sps:$4 sm:$0xff]  }
 0x8ff   :  { %7353 = vmatprep.subr.bf16.mxu0 %v19322_v55  ;;  %7459 = vmatprep.subr.bf16.mxu1 %v19325_v25  ;;  %v19376_v55 = vld [vmem:[%s23765_s12 + $0x164] ss:$16 sps:$4 sm:$0xff]   ;;  %v19379_v25 = vld [vmem:[%s23765_s12 + $0x16c] ss:$16 sps:$4 sm:$0xff]  }
 0x901   :  { %6667 = vmatmul.mubr.bf16.gmra.mrb[128].mxu0 %v5891_v22  ;;  %6773 = vmatmul.mubr.bf16.gmra.mrb[136].mxu1 %v5891_v22  ;;  %v19347_v22 = vld [vmem:[%s23765_s12 + $0xc8] ss:$16 sps:$4 sm:$0xff]  }
 0x902   :  { %7354 = vmatpush1.bf16.msra.mxu0 %v19320_v0  ;;  %7381 = vmatprep.mubr.bf16.mxu0 %v22267_v33  ;;  %v19374_v0 = vld [vmem:[%s23765_s12 + $0x160] ss:$16 sps:$4 sm:$0xff]  }
 0x903   :  { %7460 = vmatpush1.bf16.msra.mxu1 %v19323_v26  ;;  %7487 = vmatprep.mubr.bf16.mxu1 %v22267_v33  ;;  %v19338_v33 = vld [vmem:[%s23765_s12 + $0xa0] ss:$16 sps:$4 sm:$0xff]   ;;  %v19377_v26 = vld [vmem:[%s23765_s12 + $0x168] ss:$16 sps:$4 sm:$0xff]  }
 0x904   :  { %7355 = vmatprep.subr.bf16.mxu0 %v19328_v18  ;;  %7461 = vmatprep.subr.bf16.mxu1 %v19331_v48  ;;  %v19382_v18 = vld [vmem:[%s23765_s12 + $0x184] ss:$16 sps:$4 sm:$0xff]   ;;  %v19385_v48 = vld [vmem:[%s23765_s12 + $0x18c] ss:$16 sps:$4 sm:$0xff]  }
 0x906   :  { %7356 = vmatpush1.bf16.msra.mxu0 %v19326_v6  ;;  %v19380_v6 = vld [vmem:[%s23765_s12 + $0x180] ss:$16 sps:$4 sm:$0xff]  }
 0x907   :  { %7462 = vmatpush1.bf16.msra.mxu1 %v19329_v34  ;;  %7357 = vmatprep.subr.bf16.mxu0 %v19334_v38  ;;  %v19383_v34 = vld [vmem:[%s23765_s12 + $0x188] ss:$16 sps:$4 sm:$0xff]   ;;  %v19388_v38 = vld [vmem:[%s23765_s12 + $0x1a4] ss:$16 sps:$4 sm:$0xff]  }
 0x908   :  { %7463 = vmatprep.subr.bf16.mxu1 %v19337_v35  ;;  %v19391_v35 = vld [vmem:[%s23765_s12 + $0x1ac] ss:$16 sps:$4 sm:$0xff]  }
 0x90a   :  { %7358 = vmatpush1.bf16.msra.mxu0 %v19332_v56  ;;  %v19386_v56 = vld [vmem:[%s23765_s12 + $0x1a0] ss:$16 sps:$4 sm:$0xff]  }
 0x90b   :  { %7464 = vmatpush1.bf16.msra.mxu1 %v19335_v47  ;;  %7359 = vmatprep.subr.bf16.mxu0 %v19340_v8  ;;  %v19389_v47 = vld [vmem:[%s23765_s12 + $0x1a8] ss:$16 sps:$4 sm:$0xff]   ;;  %v19394_v8 = vld [vmem:[%s23765_s12 + $0x1c4] ss:$16 sps:$4 sm:$0xff]  }
 0x90c   :  { %7465 = vmatprep.subr.bf16.mxu1 %v19343_v10  ;;  %v19397_v10 = vld [vmem:[%s23765_s12 + $0x1cc] ss:$16 sps:$4 sm:$0xff]  }
 0x90e   :  { %7360 = vmatpush1.bf16.msra.mxu0 %v19338_v33  ;;  %v19392_v33 = vld [vmem:[%s23765_s12 + $0x1c0] ss:$16 sps:$4 sm:$0xff]  }
 0x90f   :  { %7466 = vmatpush1.bf16.msra.mxu1 %v19341_v14  ;;  %7361 = vmatprep.subr.bf16.mxu0 %v19346_v3  ;;  %v19395_v14 = vld [vmem:[%s23765_s12 + $0x1c8] ss:$16 sps:$4 sm:$0xff]   ;;  %v19400_v3 = vld [vmem:[%s23765_s12 + $0x1e4] ss:$16 sps:$4 sm:$0xff]  }
 0x910   :  { %7467 = vmatprep.subr.bf16.mxu1 %v19349_v58  ;;  %v19403_v58 = vld [vmem:[%s23765_s12 + $0x1ec] ss:$16 sps:$4 sm:$0xff]  }
 0x912   :  { %7362 = vmatpush1.bf16.msra.mxu0 %v19344_v54  ;;  %v19398_v54 = vld [vmem:[%s23765_s12 + $0x1e0] ss:$16 sps:$4 sm:$0xff]  }
 0x913   :  { %7468 = vmatpush1.bf16.msra.mxu1 %v19347_v22  ;;  %7363 = vmatprep.subr.bf16.mxu0 %v19352_v31  ;;  %v19401_v22 = vld [vmem:[%s23765_s12 + $0x1e8] ss:$16 sps:$4 sm:$0xff]   ;;  %v19406_v31 = vld [vmem:[%s23765_s12 + $0x204] ss:$16 sps:$4 sm:$0xff]  }
 0x914   :  { %7469 = vmatprep.subr.bf16.mxu1 %v19355_v57  ;;  %v19409_v57 = vld [vmem:[%s23765_s12 + $0x20c] ss:$16 sps:$4 sm:$0xff]  }
 0x916   :  { %7364 = vmatpush1.bf16.msra.mxu0 %v19350_v21  ;;  %v19404_v21 = vld [vmem:[%s23765_s12 + $0x200] ss:$16 sps:$4 sm:$0xff]  }
 0x917   :  { %7470 = vmatpush1.bf16.msra.mxu1 %v19353_v29  ;;  %7365 = vmatprep.subr.bf16.mxu0 %v19358_v62  ;;  %v19407_v29 = vld [vmem:[%s23765_s12 + $0x208] ss:$16 sps:$4 sm:$0xff]   ;;  %v19412_v62 = vld [vmem:[%s23765_s12 + $0x224] ss:$16 sps:$4 sm:$0xff]  }
 0x918   :  { %7471 = vmatprep.subr.bf16.mxu1 %v19361_v39  ;;  %v19415_v39 = vld [vmem:[%s23765_s12 + $0x22c] ss:$16 sps:$4 sm:$0xff]  }
 0x91a   :  { %7366 = vmatpush1.bf16.msra.mxu0 %v19356_v40  ;;  %v19410_v40 = vld [vmem:[%s23765_s12 + $0x220] ss:$16 sps:$4 sm:$0xff]  }
 0x91b   :  { %7472 = vmatpush1.bf16.msra.mxu1 %v19359_v42  ;;  %7367 = vmatprep.subr.bf16.mxu0 %v19364_v36  ;;  %v19413_v42 = vld [vmem:[%s23765_s12 + $0x228] ss:$16 sps:$4 sm:$0xff]   ;;  %v19418_v36 = vld [vmem:[%s23765_s12 + $0x244] ss:$16 sps:$4 sm:$0xff]  }
 0x91c   :  { %7473 = vmatprep.subr.bf16.mxu1 %v19367_v13  ;;  %v19421_v13 = vld [vmem:[%s23765_s12 + $0x24c] ss:$16 sps:$4 sm:$0xff]  }
 0x91e   :  { %7368 = vmatpush1.bf16.msra.mxu0 %v19362_v43  ;;  %v19416_v43 = vld [vmem:[%s23765_s12 + $0x240] ss:$16 sps:$4 sm:$0xff]  }
 0x91f   :  { %7474 = vmatpush1.bf16.msra.mxu1 %v19365_v32  ;;  %7369 = vmatprep.subr.bf16.mxu0 %v19370_v51  ;;  %v19424_v32 = vld [vmem:[%s23765_s12 + $0x264] ss:$16 sps:$4 sm:$0xff]   ;;  %v19422_v51 = vld [vmem:[%s23765_s12 + $0x260] ss:$16 sps:$4 sm:$0xff]  }
 0x920   :  { %7475 = vmatprep.subr.bf16.mxu1 %v19373_v9  ;;  %v19425_v9 = vld [vmem:[%s23765_s12 + $0x268] ss:$16 sps:$4 sm:$0xff]  }
 0x922   :  { %7370 = vmatpush1.bf16.msra.mxu0 %v19368_v45  ;;  %v19430_v45 = vld [vmem:[%s23765_s12 + $0x284] ss:$16 sps:$4 sm:$0xff]  }
 0x923   :  { %7476 = vmatpush1.bf16.msra.mxu1 %v19371_v24  ;;  %7371 = vmatprep.subr.bf16.mxu0 %v19376_v55  ;;  %v19433_v24 = vld [vmem:[%s23765_s12 + $0x28c] ss:$16 sps:$4 sm:$0xff]   ;;  %v19431_v55 = vld [vmem:[%s23765_s12 + $0x288] ss:$16 sps:$4 sm:$0xff]  }
 0x924   :  { %7477 = vmatprep.subr.bf16.mxu1 %v19379_v25  ;;  %v19436_v25 = vld [vmem:[%s23765_s12 + $0x2a4] ss:$16 sps:$4 sm:$0xff]  }
 0x926   :  { %7372 = vmatpush1.bf16.msra.mxu0 %v19374_v0  ;;  %v19434_v0 = vld [vmem:[%s23765_s12 + $0x2a0] ss:$16 sps:$4 sm:$0xff]  }
 0x927   :  { %7478 = vmatpush1.bf16.msra.mxu1 %v19377_v26  ;;  %7373 = vmatprep.subr.bf16.mxu0 %v19382_v18  ;;  %v19437_v26 = vld [vmem:[%s23765_s12 + $0x2a8] ss:$16 sps:$4 sm:$0xff]   ;;  %v19442_v18 = vld [vmem:[%s23765_s12 + $0x2c4] ss:$16 sps:$4 sm:$0xff]  }
 0x928   :  { %7479 = vmatprep.subr.bf16.mxu1 %v19385_v48  ;;  %v19445_v48 = vld [vmem:[%s23765_s12 + $0x2cc] ss:$16 sps:$4 sm:$0xff]  }
 0x92a   :  { %7374 = vmatpush1.bf16.msra.mxu0 %v19380_v6  ;;  %v19440_v6 = vld [vmem:[%s23765_s12 + $0x2c0] ss:$16 sps:$4 sm:$0xff]  }
 0x92b   :  { %7480 = vmatpush1.bf16.msra.mxu1 %v19383_v34  ;;  %7375 = vmatprep.subr.bf16.mxu0 %v19388_v38  ;;  %v19443_v34 = vld [vmem:[%s23765_s12 + $0x2c8] ss:$16 sps:$4 sm:$0xff]   ;;  %v19448_v38 = vld [vmem:[%s23765_s12 + $0x2e4] ss:$16 sps:$4 sm:$0xff]  }
 0x92c   :  { %7481 = vmatprep.subr.bf16.mxu1 %v19391_v35  ;;  %v19451_v35 = vld [vmem:[%s23765_s12 + $0x2ec] ss:$16 sps:$4 sm:$0xff]  }
 0x92e   :  { %7376 = vmatpush1.bf16.msra.mxu0 %v19386_v56  ;;  %v19446_v56 = vld [vmem:[%s23765_s12 + $0x2e0] ss:$16 sps:$4 sm:$0xff]  }
 0x92f   :  { %7482 = vmatpush1.bf16.msra.mxu1 %v19389_v47  ;;  %7377 = vmatprep.subr.bf16.mxu0 %v19394_v8  ;;  %v19449_v47 = vld [vmem:[%s23765_s12 + $0x2e8] ss:$16 sps:$4 sm:$0xff]   ;;  %v19454_v8 = vld [vmem:[%s23765_s12 + $0x304] ss:$16 sps:$4 sm:$0xff]  }
 0x930   :  { %7483 = vmatprep.subr.bf16.mxu1 %v19397_v10  ;;  %v19457_v10 = vld [vmem:[%s23765_s12 + $0x30c] ss:$16 sps:$4 sm:$0xff]  }
 0x932   :  { %7378 = vmatpush1.bf16.msra.mxu0 %v19392_v33  ;;  %v19452_v33 = vld [vmem:[%s23765_s12 + $0x300] ss:$16 sps:$4 sm:$0xff]  }
 0x933   :  { %7484 = vmatpush1.bf16.msra.mxu1 %v19395_v14  ;;  %7379 = vmatprep.subr.bf16.mxu0 %v19400_v3  ;;  %v19455_v14 = vld [vmem:[%s23765_s12 + $0x308] ss:$16 sps:$4 sm:$0xff]   ;;  %v19460_v3 = vld [vmem:[%s23765_s12 + $0x324] ss:$16 sps:$4 sm:$0xff]  }
 0x934   :  { %7485 = vmatprep.subr.bf16.mxu1 %v19403_v58  ;;  %v19463_v58 = vld [vmem:[%s23765_s12 + $0x32c] ss:$16 sps:$4 sm:$0xff]  }
 0x936   :  { %7380 = vmatpush1.bf16.msra.mxu0 %v19398_v54  ;;  %v19458_v54 = vld [vmem:[%s23765_s12 + $0x320] ss:$16 sps:$4 sm:$0xff]  }
 0x937   :  { %7486 = vmatpush1.bf16.msra.mxu1 %v19401_v22  ;;  %7402 = vmatprep.subr.bf16.mxu0 %v19406_v31  ;;  %v19461_v22 = vld [vmem:[%s23765_s12 + $0x328] ss:$16 sps:$4 sm:$0xff]   ;;  %v19466_v31 = vld [vmem:[%s23765_s12 + $0x344] ss:$16 sps:$4 sm:$0xff]  }
 0x938   :  { %7508 = vmatprep.subr.bf16.mxu1 %v19409_v57  ;;  %v19469_v57 = vld [vmem:[%s23765_s12 + $0x34c] ss:$16 sps:$4 sm:$0xff]  }
 0x939   :  { %7382 = vmatmul.mubr.bf16.vlgmr.msra.gmra.mrb[124].mxu0 %v22263_v59 }
 0x93a   :  { %7488 = vmatmul.mubr.bf16.vlgmr.msra.gmra.mrb[132].mxu1 %v22263_v59  ;;  %7391 = vmatprep.mubr.bf16.mxu0 %v22279_v1  ;;  %v19419_v59 = vld [vmem:[%s23765_s12 + $0x248] ss:$16 sps:$4 sm:$0xff]  }
 0x93b   :  { %7403 = vmatpush1.bf16.msra.mxu0 %v19404_v21  ;;  %7497 = vmatprep.mubr.bf16.mxu1 %v22279_v1  ;;  %v19427_v1 = vld [vmem:[%s23765_s12 + $0x26c] ss:$16 sps:$4 sm:$0xff]   ;;  %v19464_v21 = vld [vmem:[%s23765_s12 + $0x340] ss:$16 sps:$4 sm:$0xff]  }
 0x93c   :  { %7509 = vmatpush1.bf16.msra.mxu1 %v19407_v29  ;;  %7404 = vmatprep.subr.bf16.mxu0 %v19412_v62  ;;  %v19467_v29 = vld [vmem:[%s23765_s12 + $0x348] ss:$16 sps:$4 sm:$0xff]   ;;  %v19472_v62 = vld [vmem:[%s23765_s12 + $0x364] ss:$16 sps:$4 sm:$0xff]  }
 0x93d   :  { %7510 = vmatprep.subr.bf16.mxu1 %v19415_v39  ;;  %v19475_v39 = vld [vmem:[%s23765_s12 + $0x36c] ss:$16 sps:$4 sm:$0xff]  }
 0x93f   :  { %7405 = vmatpush1.bf16.msra.mxu0 %v19410_v40  ;;  %v19470_v40 = vld [vmem:[%s23765_s12 + $0x360] ss:$16 sps:$4 sm:$0xff]  }
 0x940   :  { %7511 = vmatpush1.bf16.msra.mxu1 %v19413_v42  ;;  %7406 = vmatprep.subr.bf16.mxu0 %v19418_v36  ;;  %v19473_v42 = vld [vmem:[%s23765_s12 + $0x368] ss:$16 sps:$4 sm:$0xff]   ;;  %v19507_v36 = vld [vmem:[%s23766_s22 + $0x8c] ss:$16 sps:$4 sm:$0xff]  }
 0x941   :  { %7392 = vmatmul.mubr.bf16.gmra.mrb[128].mxu0 %v22275_v53  ;;  %7512 = vmatprep.subr.bf16.mxu1 %v19421_v13  ;;  %v19502_v13 = vld [vmem:[%s23766_s22 + $0x80] ss:$16 sps:$4 sm:$0xff]  }
 0x942   :  { %7498 = vmatmul.mubr.bf16.gmra.mrb[136].mxu1 %v22275_v53  ;;  %16702 = vmatprep.mubr.msk.bf16.mxu0 %vm389_vm0, %v22291_v37  ;;  %v19428_v53 = vld [vmem:[%s23765_s12 + $0x280] ss:$16 sps:$4 sm:$0xff]  }
 0x943   :  { %7407 = vmatpush1.bf16.msra.mxu0 %v19416_v43  ;;  %16704 = vmatprep.mubr.msk.bf16.mxu1 %vm389_vm0, %v22291_v37  ;;  %v19439_v37 = vld [vmem:[%s23765_s12 + $0x2ac] ss:$16 sps:$4 sm:$0xff]   ;;  %v19505_v43 = vld [vmem:[%s23766_s22 + $0x88] ss:$16 sps:$4 sm:$0xff]   ;;  %s20672_s12 = scalar_lea.vmem %s15843_s18, 32 }
 0x944   :  { %7513 = vmatpush1.bf16.msra.mxu1 %v19419_v59  ;;  %7408 = vmatprep.subr.bf16.mxu0 %v19424_v32  ;;  %v19510_v59 = vld [vmem:[%s23766_s22 + $0xa4] ss:$16 sps:$4 sm:$0xff]   ;;  %v19513_v32 = vld [vmem:[%s23766_s22 + $0xac] ss:$16 sps:$4 sm:$0xff]   ;;  %p20673_p10 = scmp.ne.s32.totalorder %s15843_s18, %s20672_s12  ;;  %p20678_p12 = scmp.lt.s32.totalorder %s20672_s12, %s20672_s12 }
 0x945   :  { %7514 = vmatprep.subr.bf16.mxu1 %v19427_v1  ;;  %v19508_v1 = vld [vmem:[%s23766_s22 + $0xa0] ss:$16 sps:$4 sm:$0xff]  }
 0x946   :  { %p20679_p13 = por %p20678_p12, %p20677_p11 }
 0x947   :  { %7409 = vmatpush1.bf16.msra.mxu0 %v19422_v51  ;;  %v19511_v51 = vld [vmem:[%s23766_s22 + $0xa8] ss:$16 sps:$4 sm:$0xff]  }
 0x948   :  { %7515 = vmatpush1.bf16.msra.mxu1 %v19425_v9  ;;  %7410 = vmatprep.subr.bf16.mxu0 %v19430_v45  ;;  %v19516_v9 = vld [vmem:[%s23766_s22 + $0xc4] ss:$16 sps:$4 sm:$0xff]   ;;  %v19519_v45 = vld [vmem:[%s23766_s22 + $0xcc] ss:$16 sps:$4 sm:$0xff]   ;;  %p20680_p0 = pnand %p20679_p13, %p20673_p10 }
 0x949   :  { %7516 = vmatprep.subr.bf16.mxu1 %v19433_v24  ;;  %v19514_v24 = vld [vmem:[%s23766_s22 + $0xc0] ss:$16 sps:$4 sm:$0xff]  }
 0x94b   :  { %7411 = vmatpush1.bf16.msra.mxu0 %v19428_v53  ;;  %v19517_v53 = vld [vmem:[%s23766_s22 + $0xc8] ss:$16 sps:$4 sm:$0xff]  }
 0x94c   :  { %7517 = vmatpush1.bf16.msra.mxu1 %v19431_v55  ;;  %7412 = vmatprep.subr.bf16.mxu0 %v19436_v25  ;;  %v19522_v55 = vld [vmem:[%s23766_s22 + $0xe4] ss:$16 sps:$4 sm:$0xff]   ;;  %v19525_v25 = vld [vmem:[%s23766_s22 + $0xec] ss:$16 sps:$4 sm:$0xff]  }
 0x94d   :  { %7518 = vmatprep.subr.bf16.mxu1 %v19439_v37  ;;  %v19520_v37 = vld [vmem:[%s23766_s22 + $0xe0] ss:$16 sps:$4 sm:$0xff]  }
 0x94f   :  { %7413 = vmatpush1.bf16.msra.mxu0 %v19434_v0  ;;  %v19523_v0 = vld [vmem:[%s23766_s22 + $0xe8] ss:$16 sps:$4 sm:$0xff]  }
 0x950   :  { %7519 = vmatpush1.bf16.msra.mxu1 %v19437_v26  ;;  %7414 = vmatprep.subr.bf16.mxu0 %v19442_v18  ;;  %v19528_v26 = vld [vmem:[%s23766_s22 + $0x104] ss:$16 sps:$4 sm:$0xff]   ;;  %v19531_v18 = vld [vmem:[%s23766_s22 + $0x10c] ss:$16 sps:$4 sm:$0xff]  }
 0x951   :  { %7520 = vmatprep.subr.bf16.mxu1 %v19445_v48  ;;  %v19526_v48 = vld [vmem:[%s23766_s22 + $0x100] ss:$16 sps:$4 sm:$0xff]  }
 0x953   :  { %7415 = vmatpush1.bf16.msra.mxu0 %v19440_v6  ;;  %v19529_v6 = vld [vmem:[%s23766_s22 + $0x108] ss:$16 sps:$4 sm:$0xff]  }
 0x954   :  { %7521 = vmatpush1.bf16.msra.mxu1 %v19443_v34  ;;  %7416 = vmatprep.subr.bf16.mxu0 %v19448_v38  ;;  %v19534_v34 = vld [vmem:[%s23766_s22 + $0x124] ss:$16 sps:$4 sm:$0xff]   ;;  %v19537_v38 = vld [vmem:[%s23766_s22 + $0x12c] ss:$16 sps:$4 sm:$0xff]  }
 0x955   :  { %7522 = vmatprep.subr.bf16.mxu1 %v19451_v35  ;;  %v19532_v35 = vld [vmem:[%s23766_s22 + $0x120] ss:$16 sps:$4 sm:$0xff]  }
 0x957   :  { %7417 = vmatpush1.bf16.msra.mxu0 %v19446_v56  ;;  %v19535_v56 = vld [vmem:[%s23766_s22 + $0x128] ss:$16 sps:$4 sm:$0xff]  }
 0x958   :  { %7523 = vmatpush1.bf16.msra.mxu1 %v19449_v47  ;;  %7418 = vmatprep.subr.bf16.mxu0 %v19454_v8  ;;  %v19540_v47 = vld [vmem:[%s23766_s22 + $0x144] ss:$16 sps:$4 sm:$0xff]   ;;  %v19543_v8 = vld [vmem:[%s23766_s22 + $0x14c] ss:$16 sps:$4 sm:$0xff]  }
 0x959   :  { %7524 = vmatprep.subr.bf16.mxu1 %v19457_v10  ;;  %v19538_v10 = vld [vmem:[%s23766_s22 + $0x140] ss:$16 sps:$4 sm:$0xff]  }
 0x95b   :  { %7419 = vmatpush1.bf16.msra.mxu0 %v19452_v33  ;;  %v19541_v33 = vld [vmem:[%s23766_s22 + $0x148] ss:$16 sps:$4 sm:$0xff]  }
 0x95c   :  { %7525 = vmatpush1.bf16.msra.mxu1 %v19455_v14  ;;  %7420 = vmatprep.subr.bf16.mxu0 %v19460_v3  ;;  %v19546_v14 = vld [vmem:[%s23766_s22 + $0x164] ss:$16 sps:$4 sm:$0xff]   ;;  %v19549_v3 = vld [vmem:[%s23766_s22 + $0x16c] ss:$16 sps:$4 sm:$0xff]  }
 0x95d   :  { %7526 = vmatprep.subr.bf16.mxu1 %v19463_v58  ;;  %v19544_v58 = vld [vmem:[%s23766_s22 + $0x160] ss:$16 sps:$4 sm:$0xff]  }
 0x95f   :  { %7421 = vmatpush1.bf16.msra.mxu0 %v19458_v54  ;;  %v19547_v54 = vld [vmem:[%s23766_s22 + $0x168] ss:$16 sps:$4 sm:$0xff]  }
 0x960   :  { %7527 = vmatpush1.bf16.msra.mxu1 %v19461_v22  ;;  %7422 = vmatprep.subr.bf16.mxu0 %v19466_v31  ;;  %v19552_v22 = vld [vmem:[%s23766_s22 + $0x184] ss:$16 sps:$4 sm:$0xff]   ;;  %v19555_v31 = vld [vmem:[%s23766_s22 + $0x18c] ss:$16 sps:$4 sm:$0xff]  }
 0x961   :  { %7528 = vmatprep.subr.bf16.mxu1 %v19469_v57  ;;  %v19550_v57 = vld [vmem:[%s23766_s22 + $0x180] ss:$16 sps:$4 sm:$0xff]  }
 0x963   :  { %7423 = vmatpush1.bf16.msra.mxu0 %v19464_v21  ;;  %v19553_v21 = vld [vmem:[%s23766_s22 + $0x188] ss:$16 sps:$4 sm:$0xff]  }
 0x964   :  { %7529 = vmatpush1.bf16.msra.mxu1 %v19467_v29  ;;  %7424 = vmatprep.subr.bf16.mxu0 %v19472_v62  ;;  %v19558_v29 = vld [vmem:[%s23766_s22 + $0x1a4] ss:$16 sps:$4 sm:$0xff]   ;;  %v19561_v62 = vld [vmem:[%s23766_s22 + $0x1ac] ss:$16 sps:$4 sm:$0xff]  }
 0x965   :  { %7530 = vmatprep.subr.bf16.mxu1 %v19475_v39  ;;  %v19556_v39 = vld [vmem:[%s23766_s22 + $0x1a0] ss:$16 sps:$4 sm:$0xff]  }
 0x967   :  { %7425 = vmatpush1.bf16.msra.mxu0 %v19470_v40  ;;  %v19559_v40 = vld [vmem:[%s23766_s22 + $0x1a8] ss:$16 sps:$4 sm:$0xff]  }
 0x968   :  { %7531 = vmatpush1.bf16.msra.mxu1 %v19473_v42  ;;  %7581 = vmatprep.subr.bf16.mxu0 %v22079_v30  ;;  %v19478_v30 = vld [vmem:[%s23766_s22] ss:$16 sps:$4 sm:$0xff]   ;;  %v19564_v42 = vld [vmem:[%s23766_s22 + $0x1c4] ss:$16 sps:$4 sm:$0xff]  }
 0x969   :  { %7634 = vmatprep.subr.bf16.mxu1 %v22077_v28  ;;  %v19476_v28 = vld [vmem:[%s23767_s20] sm:$0xff]  }
 0x96a   :  { %7435 = vmatmul.mubr.bf16.vlgmr.msra.gmra.mrb[124].mxu0 %v22287_v23 }
 0x96b   :  { %7541 = vmatmul.mubr.bf16.vlgmr.msra.gmra.mrb[132].mxu1 %v22287_v23  ;;  %16703 = vmatprep.mubr.msk.bf16.mxu0 %vm389_vm0, %v22303_v5  ;;  %v19496_v23 = vld [vmem:[%s23766_s22 + $0x60] ss:$16 sps:$4 sm:$0xff]  }
 0x96c   :  { %16705 = vmatprep.mubr.msk.bf16.mxu1 %vm389_vm0, %v22303_v5  ;;  %7582 = vmatpush1.bf16.msra.mxu0 %v22073_v20  ;;  %v19480_v20 = vld [vmem:[%s23766_s22 + $0x4] ss:$16 sps:$4 sm:$0xff]  }
 0x96d   :  { %7635 = vmatpush1.bf16.msra.mxu1 %v22075_v27  ;;  %7583 = vmatprep.subr.bf16.mxu0 %v22097_v52  ;;  %v19483_v27 = vld [vmem:[%s23766_s22 + $0xc] ss:$16 sps:$4 sm:$0xff]   ;;  %v19504_v5 = vld [vmem:[%s23766_s22 + $0x84] ss:$16 sps:$4 sm:$0xff]  }
 0x96e   :  { %7636 = vmatprep.subr.bf16.mxu1 %v22099_v19  ;;  %v19489_v52 = vld [vmem:[%s23766_s22 + $0x2c] ss:$16 sps:$4 sm:$0xff]   ;;  %v19484_v19 = vld [vmem:[%s23766_s22 + $0x20] ss:$16 sps:$4 sm:$0xff]  }
 0x970   :  { %7584 = vmatpush1.bf16.msra.mxu0 %v22093_v46  ;;  %v19481_v46 = vld [vmem:[%s23766_s22 + $0x8] ss:$16 sps:$4 sm:$0xff]  }
 0x971   :  { %7637 = vmatpush1.bf16.msra.mxu1 %v22095_v49  ;;  %7585 = vmatprep.subr.bf16.mxu0 %v22117_v4  ;;  %v19486_v49 = vld [vmem:[%s23766_s22 + $0x24] ss:$16 sps:$4 sm:$0xff]   ;;  %v19477_v4 = vld [vmem:[%s23767_s20 + $0x8] sm:$0x1f]  }
 0x972   :  { %7638 = vmatprep.subr.bf16.mxu1 %v22119_v17  ;;  %7445 = vmatmul.mubr.bf16.gmra.mrb[128].mxu0 %v22299_v60  ;;  %v19495_v17 = vld [vmem:[%s23766_s22 + $0x4c] ss:$16 sps:$4 sm:$0xff]  }
 0x973   :  { %7551 = vmatmul.mubr.bf16.gmra.mrb[136].mxu1 %v22299_v60  ;;  %7613 = vmatprep.mubr.bf16.mxu0 %v20774_v44  ;;  %v19499_v60 = vld [vmem:[%s23766_s22 + $0x68] ss:$16 sps:$4 sm:$0xff]  }
 0x974   :  { %7586 = vmatpush1.bf16.msra.mxu0 %v22113_v2  ;;  %7666 = vmatprep.mubr.bf16.mxu1 %v20774_v44  ;;  %v19487_v2 = vld [vmem:[%s23766_s22 + $0x28] ss:$16 sps:$4 sm:$0xff]  }
 0x975   :  { %7639 = vmatpush1.bf16.msra.mxu1 %v22115_v7  ;;  %16708 = vmatprep.subr.msk.bf16.mxu0 %vm5520_vm4, %v22135_v61  ;;  %v19492_v7 = vld [vmem:[%s23766_s22 + $0x44] ss:$16 sps:$4 sm:$0xff]   ;;  %v19490_v61 = vld [vmem:[%s23766_s22 + $0x40] ss:$16 sps:$4 sm:$0xff]  }
 0x976   :  { %16711 = vmatprep.subr.msk.bf16.mxu1 %vm5520_vm4, %v22172_v50  ;;  %v19498_v50 = vld [vmem:[%s23766_s22 + $0x64] ss:$16 sps:$4 sm:$0xff]  }
 0x978   :  { %7588 = vmatpush1.bf16.msra.mxu0 %v22139_v41  ;;  %v19493_v41 = vld [vmem:[%s23766_s22 + $0x48] ss:$16 sps:$4 sm:$0xff]  }
 0x979   :  { %7641 = vmatpush1.bf16.msra.mxu1 %v22184_v63  ;;  %8373 = vmatprep.subr.bf16.mxu0 %v19480_v20  ;;  %v19501_v63 = vld [vmem:[%s23766_s22 + $0x6c] ss:$16 sps:$4 sm:$0xff]  }
 0x97a   :  { %8479 = vmatprep.subr.bf16.mxu1 %v19483_v27  ;;  %v19567_v20 = vld [vmem:[%s23766_s22 + $0x1cc] ss:$16 sps:$4 sm:$0xff]   ;;  %v19562_v27 = vld [vmem:[%s23766_s22 + $0x1c0] ss:$16 sps:$4 sm:$0xff]  }
 0x97b   :  { %16709 = vmatmul.mubr.msk.bf16.vlgmr.msra.gmra.mrb[132].mxu0 %vm5513_vm5, %v19476_v28 }
 0x97c   :  { %7623 = vmatprep.mubr.bf16.mxu0 %v20774_v44  ;;  %16712 = vmatmul.mubr.msk.bf16.vlgmr.msra.gmra.mrb[140].mxu1 %vm5513_vm5, %v19476_v28  ;;  %v19565_v28 = vld [vmem:[%s23766_s22 + $0x1c8] ss:$16 sps:$4 sm:$0xff]  }
 0x97d   :  { %7676 = vmatprep.mubr.bf16.mxu1 %v20774_v44  ;;  %8374 = vmatpush1.bf16.msra.mxu0 %v19478_v30  ;;  %v19570_v30 = vld [vmem:[%s23766_s22 + $0x1e4] ss:$16 sps:$4 sm:$0xff]  }
 0x97e   :  { %8480 = vmatpush1.bf16.msra.mxu1 %v19481_v46  ;;  %8375 = vmatprep.subr.bf16.mxu0 %v19486_v49  ;;  %v19573_v46 = vld [vmem:[%s23766_s22 + $0x1ec] ss:$16 sps:$4 sm:$0xff]   ;;  %v19568_v49 = vld [vmem:[%s23766_s22 + $0x1e0] ss:$16 sps:$4 sm:$0xff]  }
 0x97f   :  { %8481 = vmatprep.subr.bf16.mxu1 %v19489_v52  ;;  %v19571_v52 = vld [vmem:[%s23766_s22 + $0x1e8] ss:$16 sps:$4 sm:$0xff]  }
 0x981   :  { %8376 = vmatpush1.bf16.msra.mxu0 %v19484_v19  ;;  %v19576_v19 = vld [vmem:[%s23766_s22 + $0x204] ss:$16 sps:$4 sm:$0xff]  }
 0x982   :  { %8482 = vmatpush1.bf16.msra.mxu1 %v19487_v2  ;;  %8377 = vmatprep.subr.bf16.mxu0 %v19492_v7  ;;  %v19579_v2 = vld [vmem:[%s23766_s22 + $0x20c] ss:$16 sps:$4 sm:$0xff]  }
 0x983   :  { %16710 = vmatmul.mubr.msk.bf16.gmra.mrb[136].mxu0 %vm5513_vm5, %v19477_v4  ;;  %8483 = vmatprep.subr.bf16.mxu1 %v19495_v17 }
 0x984   :  { %16713 = vmatmul.mubr.msk.bf16.gmra.mrb[144].mxu1 %vm5513_vm5, %v19477_v4 }
 0x985   :  { %8378 = vmatpush1.bf16.msra.mxu0 %v19490_v61 }
 0x986   :  { %8484 = vmatpush1.bf16.msra.mxu1 %v19493_v41  ;;  %8379 = vmatprep.subr.bf16.mxu0 %v19498_v50 }
 0x987   :  { %8485 = vmatprep.subr.bf16.mxu1 %v19501_v63 }
 0x989   :  { %8380 = vmatpush1.bf16.msra.mxu0 %v19496_v23 }
 0x98a   :  { %8486 = vmatpush1.bf16.msra.mxu1 %v19499_v60  ;;  %8381 = vmatprep.subr.bf16.mxu0 %v19504_v5  ;;  %v19574_v5 = vld [vmem:[%s23766_s22 + $0x200] ss:$16 sps:$4 sm:$0xff]  }
 0x98b   :  { %8487 = vmatprep.subr.bf16.mxu1 %v19507_v36  ;;  %v19577_v36 = vld [vmem:[%s23766_s22 + $0x208] ss:$16 sps:$4 sm:$0xff]  }
 0x98d   :  { %8382 = vmatpush1.bf16.msra.mxu0 %v19502_v13 }
 0x98e   :  { %8488 = vmatpush1.bf16.msra.mxu1 %v19505_v43  ;;  %8383 = vmatprep.subr.bf16.mxu0 %v19510_v59  ;;  %v19582_v59 = vld [vmem:[%s23766_s22 + $0x224] ss:$16 sps:$4 sm:$0xff]  }
 0x98f   :  { %8489 = vmatprep.subr.bf16.mxu1 %v19513_v32  ;;  %v19585_v32 = vld [vmem:[%s23766_s22 + $0x22c] ss:$16 sps:$4 sm:$0xff]  }
 0x991   :  { %8384 = vmatpush1.bf16.msra.mxu0 %v19508_v1 }
 0x992   :  { %8490 = vmatpush1.bf16.msra.mxu1 %v19511_v51  ;;  %8385 = vmatprep.subr.bf16.mxu0 %v19516_v9  ;;  %v19580_v51 = vld [vmem:[%s23766_s22 + $0x220] ss:$16 sps:$4 sm:$0xff]   ;;  %v19583_v9 = vld [vmem:[%s23766_s22 + $0x228] ss:$16 sps:$4 sm:$0xff]  }
 0x993   :  { %8491 = vmatprep.subr.bf16.mxu1 %v19519_v45 }
 0x995   :  { %8386 = vmatpush1.bf16.msra.mxu0 %v19514_v24  ;;  %v19588_v24 = vld [vmem:[%s23766_s22 + $0x244] ss:$16 sps:$4 sm:$0xff]  }
 0x996   :  { %8492 = vmatpush1.bf16.msra.mxu1 %v19517_v53  ;;  %8387 = vmatprep.subr.bf16.mxu0 %v19522_v55  ;;  %v19591_v53 = vld [vmem:[%s23766_s22 + $0x24c] ss:$16 sps:$4 sm:$0xff]  }
 0x997   :  { %8493 = vmatprep.subr.bf16.mxu1 %v19525_v25 }
 0x999   :  { %8388 = vmatpush1.bf16.msra.mxu0 %v19520_v37 }
 0x99a   :  { %8494 = vmatpush1.bf16.msra.mxu1 %v19523_v0  ;;  %8389 = vmatprep.subr.bf16.mxu0 %v19528_v26 }
 0x99b   :  { %8495 = vmatprep.subr.bf16.mxu1 %v19531_v18 }
 0x99d   :  { %8390 = vmatpush1.bf16.msra.mxu0 %v19526_v48 }
 0x99e   :  { %8496 = vmatpush1.bf16.msra.mxu1 %v19529_v6  ;;  %8391 = vmatprep.subr.bf16.mxu0 %v19534_v34  ;;  %v19586_v6 = vld [vmem:[%s23766_s22 + $0x240] ss:$16 sps:$4 sm:$0xff]   ;;  %v19589_v34 = vld [vmem:[%s23766_s22 + $0x248] ss:$16 sps:$4 sm:$0xff]  }
 0x99f   :  { %8497 = vmatprep.subr.bf16.mxu1 %v19537_v38 }
 0x9a1   :  { %8392 = vmatpush1.bf16.msra.mxu0 %v19532_v35 }
 0x9a2   :  { %8498 = vmatpush1.bf16.msra.mxu1 %v19535_v56  ;;  %8393 = vmatprep.subr.bf16.mxu0 %v19540_v47  ;;  %v19594_v47 = vld [vmem:[%s23766_s22 + $0x264] ss:$16 sps:$4 sm:$0xff]  }
 0x9a3   :  { %8499 = vmatprep.subr.bf16.mxu1 %v19543_v8  ;;  %v19597_v8 = vld [vmem:[%s23766_s22 + $0x26c] ss:$16 sps:$4 sm:$0xff]  }
 0x9a5   :  { %8394 = vmatpush1.bf16.msra.mxu0 %v19538_v10 }
 0x9a6   :  { %8500 = vmatpush1.bf16.msra.mxu1 %v19541_v33  ;;  %8395 = vmatprep.subr.bf16.mxu0 %v19546_v14  ;;  %v19592_v33 = vld [vmem:[%s23766_s22 + $0x260] ss:$16 sps:$4 sm:$0xff]   ;;  %v19595_v14 = vld [vmem:[%s23766_s22 + $0x268] ss:$16 sps:$4 sm:$0xff]  }
 0x9a7   :  { %8501 = vmatprep.subr.bf16.mxu1 %v19549_v3  ;;  %v19600_v3 = vld [vmem:[%s23766_s22 + $0x284] ss:$16 sps:$4 sm:$0xff]  }
 0x9a9   :  { %8396 = vmatpush1.bf16.msra.mxu0 %v19544_v58  ;;  %v19603_v58 = vld [vmem:[%s23766_s22 + $0x28c] ss:$16 sps:$4 sm:$0xff]  }
 0x9aa   :  { %8502 = vmatpush1.bf16.msra.mxu1 %v19547_v54  ;;  %8397 = vmatprep.subr.bf16.mxu0 %v19552_v22  ;;  %v19598_v54 = vld [vmem:[%s23766_s22 + $0x280] ss:$16 sps:$4 sm:$0xff]   ;;  %v19601_v22 = vld [vmem:[%s23766_s22 + $0x288] ss:$16 sps:$4 sm:$0xff]  }
 0x9ab   :  { %8503 = vmatprep.subr.bf16.mxu1 %v19555_v31  ;;  %v19606_v31 = vld [vmem:[%s23766_s22 + $0x2a4] ss:$16 sps:$4 sm:$0xff]  }
 0x9ad   :  { %8398 = vmatpush1.bf16.msra.mxu0 %v19550_v57  ;;  %v19609_v57 = vld [vmem:[%s23766_s22 + $0x2ac] ss:$16 sps:$4 sm:$0xff]  }
 0x9ae   :  { %8504 = vmatpush1.bf16.msra.mxu1 %v19553_v21  ;;  %8399 = vmatprep.subr.bf16.mxu0 %v19558_v29  ;;  %v19604_v21 = vld [vmem:[%s23766_s22 + $0x2a0] ss:$16 sps:$4 sm:$0xff]   ;;  %v19607_v29 = vld [vmem:[%s23766_s22 + $0x2a8] ss:$16 sps:$4 sm:$0xff]  }
 0x9af   :  { %8505 = vmatprep.subr.bf16.mxu1 %v19561_v62  ;;  %v19612_v62 = vld [vmem:[%s23766_s22 + $0x2c4] ss:$16 sps:$4 sm:$0xff]  }
 0x9b1   :  { %8400 = vmatpush1.bf16.msra.mxu0 %v19556_v39  ;;  %v19615_v39 = vld [vmem:[%s23766_s22 + $0x2cc] ss:$16 sps:$4 sm:$0xff]  }
 0x9b2   :  { %8506 = vmatpush1.bf16.msra.mxu1 %v19559_v40  ;;  %8401 = vmatprep.subr.bf16.mxu0 %v19564_v42  ;;  %v19610_v40 = vld [vmem:[%s23766_s22 + $0x2c0] ss:$16 sps:$4 sm:$0xff]   ;;  %v19613_v42 = vld [vmem:[%s23766_s22 + $0x2c8] ss:$16 sps:$4 sm:$0xff]  }
 0x9b3   :  { %8507 = vmatprep.subr.bf16.mxu1 %v19567_v20  ;;  %v19618_v20 = vld [vmem:[%s23766_s22 + $0x2e4] ss:$16 sps:$4 sm:$0xff]  }
 0x9b5   :  { %8402 = vmatpush1.bf16.msra.mxu0 %v19562_v27  ;;  %v19621_v27 = vld [vmem:[%s23766_s22 + $0x2ec] ss:$16 sps:$4 sm:$0xff]  }
 0x9b6   :  { %8508 = vmatpush1.bf16.msra.mxu1 %v19565_v28  ;;  %8403 = vmatprep.subr.bf16.mxu0 %v19570_v30  ;;  %v19616_v28 = vld [vmem:[%s23766_s22 + $0x2e0] ss:$16 sps:$4 sm:$0xff]   ;;  %v19619_v30 = vld [vmem:[%s23766_s22 + $0x2e8] ss:$16 sps:$4 sm:$0xff]  }
 0x9b7   :  { %8509 = vmatprep.subr.bf16.mxu1 %v19573_v46  ;;  %v19624_v46 = vld [vmem:[%s23766_s22 + $0x304] ss:$16 sps:$4 sm:$0xff]  }
 0x9b9   :  { %8404 = vmatpush1.bf16.msra.mxu0 %v19568_v49  ;;  %v19627_v49 = vld [vmem:[%s23766_s22 + $0x30c] ss:$16 sps:$4 sm:$0xff]  }
 0x9ba   :  { %8510 = vmatpush1.bf16.msra.mxu1 %v19571_v52  ;;  %8426 = vmatprep.subr.bf16.mxu0 %v19576_v19  ;;  %v19622_v52 = vld [vmem:[%s23766_s22 + $0x300] ss:$16 sps:$4 sm:$0xff]   ;;  %v19625_v19 = vld [vmem:[%s23766_s22 + $0x308] ss:$16 sps:$4 sm:$0xff]  }
 0x9bb   :  { %8532 = vmatprep.subr.bf16.mxu1 %v19579_v2  ;;  %v19630_v2 = vld [vmem:[%s23766_s22 + $0x324] ss:$16 sps:$4 sm:$0xff]  }
 0xa4e   :  { %v7615_v7 = vpop.f32.mrb[132].mxu0 }
 0xa4f   :  { %v7617_v4 = vpop.f32.mrb[133].mxu0  ;;  %v7668_v17 = vpop.f32.mrb[140].mxu1 }
 0xa50   :  { %v7619_v61 = vpop.f32.mrb[134].mxu0  ;;  %v7670_v41 = vpop.f32.mrb[141].mxu1 }
 0xa51   :  { %v7687_v50 = vpack.c.bf16 %v7619_v61, %v7615_v7  ;;  %v7621_v63 = vpop.f32.mrb[135].mxu0  ;;  %v7672_v23 = vpop.f32.mrb[142].mxu1  ;;  %v19633_v7 = vld [vmem:[%s23766_s22 + $0x32c] ss:$16 sps:$4 sm:$0xff]   ;;  %v19636_v61 = vld [vmem:[%s23766_s22 + $0x344] ss:$16 sps:$4 sm:$0xff]  }
 0xa52   :  { %v7688_v60 = vpack.c.bf16 %v7621_v63, %v7617_v4  ;;  %v22557_v13 = vpack.c.bf16 %v7672_v23, %v7668_v17  ;;  %v7674_v43 = vpop.f32.mrb[143].mxu1  ;;  %v19628_v4 = vld [vmem:[%s23766_s22 + $0x320] ss:$16 sps:$4 sm:$0xff]   ;;  %v19631_v17 = vld [vmem:[%s23766_s22 + $0x328] ss:$16 sps:$4 sm:$0xff]  }
 0xa53   :  { %v7690_v1 = vpack.c.bf16 %v7674_v43, %v7670_v41  ;;  %v19639_v41 = vld [vmem:[%s23766_s22 + $0x34c] ss:$16 sps:$4 sm:$0xff]   ;;  %v19637_v63 = vld [vmem:[%s23766_s22 + $0x348] ss:$16 sps:$4 sm:$0xff]   ;;  %v19642_v23 = vld [vmem:[%s23766_s22 + $0x364] ss:$16 sps:$4 sm:$0xff]  }
 0xa54   :  { %8405 = vmatprep.mubr.bf16.mxu0 %v7688_v60  ;;  %8511 = vmatprep.mubr.bf16.mxu1 %v7688_v60  ;;  %v19645_v60 = vld [vmem:[%s23766_s22 + $0x36c] ss:$16 sps:$4 sm:$0xff]   ;;  %v5498_v43 = vld [vmem:[%s23768_s23] sm:$0xf] }
 0xa55   :  { %8406 = vmatmul.mubr.bf16.vlgmr.msra.gmra.mrb[124].mxu0 %v7687_v50  ;;  %8512 = vmatmul.mubr.bf16.vlgmr.msra.gmra.mrb[132].mxu1 %v7687_v50  ;;  %v19634_v50 = vld [vmem:[%s23766_s22 + $0x340] ss:$16 sps:$4 sm:$0xff]  }
 0xa56   :  { %8427 = vmatpush1.bf16.msra.mxu0 %v19574_v5  ;;  %8533 = vmatpush1.bf16.msra.mxu1 %v19577_v36  ;;  %v7625_v45 = vpop.f32.mrb[136].mxu0  ;;  %v19640_v5 = vld [vmem:[%s23766_s22 + $0x360] ss:$16 sps:$4 sm:$0xff]   ;;  %v19643_v36 = vld [vmem:[%s23766_s22 + $0x368] ss:$16 sps:$4 sm:$0xff]  }
 0xa57   :  { %8428 = vmatprep.subr.bf16.mxu0 %v19582_v59  ;;  %8534 = vmatprep.subr.bf16.mxu1 %v19585_v32  ;;  %v7627_v55 = vpop.f32.mrb[137].mxu0  ;;  %v7678_v25 = vpop.f32.mrb[144].mxu1  ;;  %v8605_v59 = vrot.slane %v5498_v43, %v21311_v11  ;;  %v8613_v32 = vrot.slane %v5498_v43, %v21313_v12 }
 0xa58   :  { %v7629_v37 = vpop.f32.mrb[138].mxu0  ;;  %v7680_v0 = vpop.f32.mrb[145].mxu1 }
 0xa59   :  { %v7691_v26 = vpack.c.bf16 %v7629_v37, %v7625_v45  ;;  %v7631_v18 = vpop.f32.mrb[139].mxu0  ;;  %v7682_v48 = vpop.f32.mrb[146].mxu1 }
 0xa5a   :  { %8429 = vmatpush1.bf16.msra.mxu0 %v19580_v51  ;;  %8535 = vmatpush1.bf16.msra.mxu1 %v19583_v9  ;;  %v7692_v38 = vpack.c.bf16 %v7631_v18, %v7627_v55  ;;  %v22567_v35 = vpack.c.bf16 %v7682_v48, %v7678_v25  ;;  %v7684_v56 = vpop.f32.mrb[147].mxu1 }
 0xa5b   :  { %8430 = vmatprep.subr.bf16.mxu0 %v19588_v24  ;;  %8536 = vmatprep.subr.bf16.mxu1 %v19591_v53  ;;  %v22571_v10 = vpack.c.bf16 %v7684_v56, %v7680_v0 }
 0xa5c   :  { %8415 = vmatprep.mubr.bf16.mxu0 %v7692_v38  ;;  %8521 = vmatprep.mubr.bf16.mxu1 %v7692_v38 }
 0xa5d   :  { %8416 = vmatmul.mubr.bf16.gmra.mrb[128].mxu0 %v7691_v26  ;;  %8522 = vmatmul.mubr.bf16.gmra.mrb[136].mxu1 %v7691_v26 }
 0xa5e   :  { %8431 = vmatpush1.bf16.msra.mxu0 %v19586_v6  ;;  %8537 = vmatpush1.bf16.msra.mxu1 %v19589_v34 }
 0xa5f   :  { %8432 = vmatprep.subr.bf16.mxu0 %v19594_v47  ;;  %8538 = vmatprep.subr.bf16.mxu1 %v19597_v8 }
 0xa60   :  { %16826 = vmatprep.mubr.msk.bf16.mxu0 %vm389_vm0, %v7690_v1  ;;  %16828 = vmatprep.mubr.msk.bf16.mxu1 %vm389_vm0, %v7690_v1  ;;  %v8617_v1 = vrot.slane %v5498_v43, %v21318_v16 }
 0xa62   :  { %8433 = vmatpush1.bf16.msra.mxu0 %v19592_v33  ;;  %8539 = vmatpush1.bf16.msra.mxu1 %v19595_v14 }
 0xa63   :  { %8434 = vmatprep.subr.bf16.mxu0 %v19600_v3  ;;  %8540 = vmatprep.subr.bf16.mxu1 %v19603_v58 }
 0xa66   :  { %8435 = vmatpush1.bf16.msra.mxu0 %v19598_v54  ;;  %8541 = vmatpush1.bf16.msra.mxu1 %v19601_v22 }
 0xa67   :  { %8436 = vmatprep.subr.bf16.mxu0 %v19606_v31  ;;  %8542 = vmatprep.subr.bf16.mxu1 %v19609_v57 }
 0xa6a   :  { %8437 = vmatpush1.bf16.msra.mxu0 %v19604_v21  ;;  %8543 = vmatpush1.bf16.msra.mxu1 %v19607_v29 }
 0xa6b   :  { %8438 = vmatprep.subr.bf16.mxu0 %v19612_v62  ;;  %8544 = vmatprep.subr.bf16.mxu1 %v19615_v39 }
 0xa6e   :  { %8439 = vmatpush1.bf16.msra.mxu0 %v19610_v40  ;;  %8545 = vmatpush1.bf16.msra.mxu1 %v19613_v42 }
 0xa6f   :  { %8440 = vmatprep.subr.bf16.mxu0 %v19618_v20  ;;  %8546 = vmatprep.subr.bf16.mxu1 %v19621_v27 }
 0xa72   :  { %8441 = vmatpush1.bf16.msra.mxu0 %v19616_v28  ;;  %8547 = vmatpush1.bf16.msra.mxu1 %v19619_v30 }
 0xa73   :  { %8442 = vmatprep.subr.bf16.mxu0 %v19624_v46  ;;  %8548 = vmatprep.subr.bf16.mxu1 %v19627_v49 }
 0xa76   :  { %8443 = vmatpush1.bf16.msra.mxu0 %v19622_v52  ;;  %8549 = vmatpush1.bf16.msra.mxu1 %v19625_v19 }
 0xa77   :  { %8444 = vmatprep.subr.bf16.mxu0 %v19630_v2  ;;  %8550 = vmatprep.subr.bf16.mxu1 %v19633_v7 }
 0xa7a   :  { %8445 = vmatpush1.bf16.msra.mxu0 %v19628_v4  ;;  %8551 = vmatpush1.bf16.msra.mxu1 %v19631_v17 }
 0xa7b   :  { %8446 = vmatprep.subr.bf16.mxu0 %v19636_v61  ;;  %8552 = vmatprep.subr.bf16.mxu1 %v19639_v41 }
 0xa7e   :  { %8447 = vmatpush1.bf16.msra.mxu0 %v19634_v50  ;;  %8553 = vmatpush1.bf16.msra.mxu1 %v19637_v63 }
 0xa7f   :  { %8448 = vmatprep.subr.bf16.mxu0 %v19642_v23  ;;  %8554 = vmatprep.subr.bf16.mxu1 %v19645_v60 }
 0xa82   :  { %8449 = vmatpush1.bf16.msra.mxu0 %v19640_v5  ;;  %8555 = vmatpush1.bf16.msra.mxu1 %v19643_v36 }
 0xa85   :  { %8459 = vmatmul.mubr.bf16.vlgmr.msra.gmra.mrb[124].mxu0 %v22557_v13  ;;  %8565 = vmatmul.mubr.bf16.vlgmr.msra.gmra.mrb[132].mxu1 %v22557_v13  ;;  %v8609_v13 = vrot.slane %v5498_v43, %v21316_v15 }
 0xa86   :  { %16827 = vmatprep.mubr.msk.bf16.mxu0 %vm389_vm0, %v22571_v10  ;;  %16829 = vmatprep.mubr.msk.bf16.mxu1 %vm389_vm0, %v22571_v10  ;;  %vm15502_vm0 = vcmask 31744  }
 0xa8d   :  { %8469 = vmatmul.mubr.bf16.gmra.mrb[128].mxu0 %v22567_v35  ;;  %8575 = vmatmul.mubr.bf16.gmra.mrb[136].mxu1 %v22567_v35 }
 0xa8e   :  { %8726 = vmatprep.mubr.bf16.mxu0 %v20774_v44  ;;  %8777 = vmatprep.mubr.bf16.mxu1 %v20774_v44 }
 0xb58   :  { %v8460_v51 = vpop.f32.mrb[124].mxu0  ;;  %v8566_v9 = vpop.f32.mrb[132].mxu1 }
 0xb59   :  { %v8622_v45 = vadd.f32 %v8605_v59, %v8460_v51  ;;  %v8624_v24 = vadd.f32 %v8613_v32, %v8566_v9  ;;  %v8462_v53 = vpop.f32.mrb[125].mxu0  ;;  %v8568_v55 = vpop.f32.mrb[133].mxu1  ;;  %v19677_v51 = vld [vmem:[%s23770_s28 + $0xc8] ss:$12 sps:$4 sm:$0xff]  }
 0xb5a   :  { %v8623_v25 = vadd.f32 %v8609_v13, %v8462_v53  ;;  %v8625_v37 = vadd.f32 %v8617_v1, %v8568_v55  ;;  %v8464_v0 = vpop.f32.mrb[126].mxu0  ;;  %v8570_v26 = vpop.f32.mrb[134].mxu1  ;;  %v19647_v9 = vld [vmem:[%s23769_s26 + $0x8] ss:$0 sps:$4 sm:$0x77]  }
 0xb5b   :  { %v8626_v18 = vadd.f32 %v8605_v59, %v8464_v0  ;;  %v8628_v48 = vadd.f32 %v8613_v32, %v8570_v26  ;;  %v8466_v6 = vpop.f32.mrb[127].mxu0  ;;  %v8572_v34 = vpop.f32.mrb[135].mxu1  ;;  %v8638_v56 = vmax.f32 %v8622_v45, 0.0  ;;  %v8640_v47 = vmax.f32 %v8624_v24, 0.0  ;;  %v19648_v45 = vld [vmem:[%s23771_s6] sm:$0xff]  }
 0xb5c   :  { %v8627_v38 = vadd.f32 %v8609_v13, %v8466_v6  ;;  %v8629_v35 = vadd.f32 %v8617_v1, %v8572_v34  ;;  %v8639_v10 = vmax.f32 %v8623_v25, 0.0  ;;  %v8641_v33 = vmax.f32 %v8625_v37, 0.0  ;;  %v19650_v24 = vld [vmem:[%s23770_s28] ss:$12 sps:$4 sm:$0xff]   ;;  %v19678_v53 = vld [vmem:[%s23770_s28 + $0x8] ss:$12 sps:$4 sm:$0xff]  }
 0xb5d   :  { %v8642_v8 = vmax.f32 %v8626_v18, 0.0  ;;  %v8644_v16 = vmax.f32 %v8628_v48, 0.0  ;;  %v19655_v55 = vld [vmem:[%s23770_s28 + $0x1c] ss:$12 sps:$4 sm:$0xff]   ;;  %v19682_v25 = vld [vmem:[%s23770_s28 + $0xe0] ss:$12 sps:$4 sm:$0xff]  }
 0xb5e   :  { %v8643_v14 = vmax.f32 %v8627_v38, 0.0  ;;  %v8645_v3 = vmax.f32 %v8629_v35, 0.0  ;;  %v19653_v37 = vld [vmem:[%s23770_s28 + $0x18] ss:$12 sps:$4 sm:$0xff]   ;;  %v19683_v0 = vld [vmem:[%s23770_s28 + $0x20] ss:$12 sps:$4 sm:$0xff]  }
 0xb5f   :  { %v22624_v58 = vpack.c.bf16 %v8642_v8, %v8638_v56  ;;  %v22626_v54 = vpack.c.bf16 %v8644_v16, %v8640_v47  ;;  %v19658_v26 = vld [vmem:[%s23770_s28 + $0x34] ss:$12 sps:$4 sm:$0xff]   ;;  %v19687_v18 = vld [vmem:[%s23770_s28 + $0xf8] ss:$12 sps:$4 sm:$0xff]   ;;  %v19656_v6 = vld [vmem:[%s23770_s28 + $0x30] ss:$12 sps:$4 sm:$0xff]  }
 0xb60   :  { %v22628_v22 = vpack.c.bf16 %v8643_v14, %v8639_v10  ;;  %v22630_v31 = vpack.c.bf16 %v8645_v3, %v8641_v33  ;;  %v8470_v57 = vpop.f32.mrb[128].mxu0  ;;  %v8576_v21 = vpop.f32.mrb[136].mxu1  ;;  %v19649_v48 = vld [vmem:[%s23771_s6 + $0x8] ss:$0 sps:$4 sm:$0x77]  }
 0xb61   :  { %v8630_v29 = vadd.f32 %v8605_v59, %v8470_v57  ;;  %v8632_v62 = vadd.f32 %v8613_v32, %v8576_v21  ;;  %v8472_v39 = vpop.f32.mrb[129].mxu0  ;;  %v8578_v40 = vpop.f32.mrb[137].mxu1  ;;  %v19688_v34 = vld [vmem:[%s23770_s28 + $0x38] ss:$12 sps:$4 sm:$0xff]   ;;  %v19659_v35 = vld [vmem:[%s23770_s28 + $0x48] ss:$12 sps:$4 sm:$0xff]  }
 0xb62   :  { %v8631_v42 = vadd.f32 %v8609_v13, %v8472_v39  ;;  %v8633_v20 = vadd.f32 %v8617_v1, %v8578_v40  ;;  %v8474_v27 = vpop.f32.mrb[130].mxu0  ;;  %v8580_v28 = vpop.f32.mrb[138].mxu1  ;;  %8694 = vmatprep.subr.bf16.mxu0 %v22628_v22  ;;  %8745 = vmatprep.subr.bf16.mxu1 %v22630_v31  ;;  %v19661_v38 = vld [vmem:[%s23770_s28 + $0x4c] ss:$12 sps:$4 sm:$0xff]   ;;  %v19664_v56 = vld [vmem:[%s23770_s28 + $0x64] ss:$12 sps:$4 sm:$0xff]  }
 0xb63   :  { %v8634_v30 = vadd.f32 %v8605_v59, %v8474_v27  ;;  %v8636_v46 = vadd.f32 %v8613_v32, %v8580_v28  ;;  %v8476_v49 = vpop.f32.mrb[131].mxu0  ;;  %v8582_v52 = vpop.f32.mrb[139].mxu1  ;;  %8695 = vmatpush1.bf16.msra.mxu0 %v22624_v58  ;;  %8746 = vmatpush1.bf16.msra.mxu1 %v22626_v54  ;;  %v8646_v7 = vmax.f32 %v8630_v29, 0.0  ;;  %v8648_v4 = vmax.f32 %v8632_v62, 0.0  ;;  %v19662_v47 = vld [vmem:[%s23770_s28 + $0x60] ss:$12 sps:$4 sm:$0xff]  }
 0xb64   :  { %v8635_v19 = vadd.f32 %v8609_v13, %v8476_v49  ;;  %v8637_v2 = vadd.f32 %v8617_v1, %v8582_v52  ;;  %v8647_v41 = vmax.f32 %v8631_v42, 0.0  ;;  %v8649_v50 = vmax.f32 %v8633_v20, 0.0  ;;  %v19646_v13 = vld [vmem:[%s23769_s26] sm:$0xff]   ;;  %v19667_v8 = vld [vmem:[%s23770_s28 + $0x7c] ss:$12 sps:$4 sm:$0xff]  }
 0xb65   :  { %v8650_v17 = vmax.f32 %v8634_v30, 0.0  ;;  %v8652_v61 = vmax.f32 %v8636_v46, 0.0  ;;  %v19652_v1 = vld [vmem:[%s23770_s28 + $0x4] ss:$12 sps:$4 sm:$0xff]   ;;  %v19670_v10 = vld [vmem:[%s23770_s28 + $0x94] ss:$12 sps:$4 sm:$0xff]  }
 0xb66   :  { %v8651_v63 = vmax.f32 %v8635_v19, 0.0  ;;  %v8653_v23 = vmax.f32 %v8637_v2, 0.0  ;;  %v19665_v16 = vld [vmem:[%s23770_s28 + $0x78] ss:$12 sps:$4 sm:$0xff]   ;;  %v19668_v33 = vld [vmem:[%s23770_s28 + $0x90] ss:$12 sps:$4 sm:$0xff]  }
 0xb67   :  { %v8658_v60 = vpack.c.bf16 %v8650_v17, %v8646_v7  ;;  %v8660_v5 = vpack.c.bf16 %v8652_v61, %v8648_v4  ;;  %v19673_v14 = vld [vmem:[%s23770_s28 + $0xac] ss:$12 sps:$4 sm:$0xff]   ;;  %v19671_v3 = vld [vmem:[%s23770_s28 + $0xa8] ss:$12 sps:$4 sm:$0xff]   ;;  %v19676_v57 = vld [vmem:[%s23770_s28 + $0xc4] ss:$12 sps:$4 sm:$0xff]  }
 0xb68   :  { %v22636_v36 = vpack.c.bf16 %v8651_v63, %v8647_v41  ;;  %v22638_v43 = vpack.c.bf16 %v8653_v23, %v8649_v50  ;;  %v19674_v21 = vld [vmem:[%s23770_s28 + $0xc0] ss:$12 sps:$4 sm:$0xff]   ;;  %v19681_v29 = vld [vmem:[%s23770_s28 + $0xdc] ss:$12 sps:$4 sm:$0xff]   ;;  %v19679_v62 = vld [vmem:[%s23770_s28 + $0xd8] ss:$12 sps:$4 sm:$0xff]  }
 0xb69   :  { %v22641_v59 = vsel %vm8681_vm6, %v8658_v60, 0  ;;  %v22644_v32 = vsel %vm8681_vm6, %v8660_v5, 0  ;;  %v19686_v39 = vld [vmem:[%s23770_s28 + $0xf4] ss:$12 sps:$4 sm:$0xff]   ;;  %v19684_v40 = vld [vmem:[%s23770_s28 + $0xf0] ss:$12 sps:$4 sm:$0xff]  }
 0xb6a   :  { %16832 = vmatprep.subr.msk.bf16.mxu0 %vm8681_vm6, %v22636_v36  ;;  %16835 = vmatprep.subr.msk.bf16.mxu1 %vm8681_vm6, %v22638_v43  ;;  %v19691_v42 = vld [vmem:[%s23770_s28 + $0x10c] ss:$12 sps:$4 sm:$0xff]   ;;  %v19692_v20 = vld [vmem:[%s23770_s28 + $0x110] ss:$12 sps:$4 sm:$0xff]   ;;  %v19689_v27 = vld [vmem:[%s23770_s28 + $0x108] ss:$12 sps:$4 sm:$0xff]  }
 0xb6b   :  { %8697 = vmatpush1.bf16.msra.mxu0 %v22641_v59  ;;  %8748 = vmatpush1.bf16.msra.mxu1 %v22644_v32  ;;  %v19693_v28 = vld [vmem:[%s23770_s28 + $0x50] ss:$12 sps:$4 sm:$0xff]   ;;  %v19694_v30 = vld [vmem:[%s23770_s28 + $0x120] ss:$12 sps:$4 sm:$0xff]   ;;  %v19697_v49 = vld [vmem:[%s23770_s28 + $0x128] ss:$12 sps:$4 sm:$0xff]  }
 0xb6c   :  { %8925 = vmatprep.subr.bf16.mxu0 %v22628_v22  ;;  %8976 = vmatprep.subr.bf16.mxu1 %v22630_v31  ;;  %v19696_v46 = vld [vmem:[%s23770_s28 + $0x124] ss:$12 sps:$4 sm:$0xff]   ;;  %v19698_v52 = vld [vmem:[%s23770_s28 + $0x68] ss:$12 sps:$4 sm:$0xff]   ;;  %v19702_v2 = vld [vmem:[%s23770_s28 + $0x140] ss:$12 sps:$4 sm:$0xff]  }
 0xb6d   :  { %v19701_v19 = vld [vmem:[%s23770_s28 + $0x13c] ss:$12 sps:$4 sm:$0xff]   ;;  %v19699_v7 = vld [vmem:[%s23770_s28 + $0x138] ss:$12 sps:$4 sm:$0xff]   ;;  %v19703_v4 = vld [vmem:[%s23770_s28 + $0x80] ss:$12 sps:$4 sm:$0xff]  }
 0xb6e   :  { %16833 = vmatmul.mubr.msk.bf16.vlgmr.msra.gmra.mrb[140].mxu0 %vm8674_vm7, %v19646_v13  ;;  %16836 = vmatmul.mubr.msk.bf16.vlgmr.msra.gmra.mrb[148].mxu1 %vm8674_vm7, %v19646_v13  ;;  %v19704_v17 = vld [vmem:[%s23770_s28 + $0x150] ss:$12 sps:$4 sm:$0xff]   ;;  %v19706_v61 = vld [vmem:[%s23770_s28 + $0x154] ss:$12 sps:$4 sm:$0xff]   ;;  %v19707_v41 = vld [vmem:[%s23770_s28 + $0x158] ss:$12 sps:$4 sm:$0xff]  }
 0xb6f   :  { %8926 = vmatpush1.bf16.msra.mxu0 %v22624_v58  ;;  %8977 = vmatpush1.bf16.msra.mxu1 %v22626_v54  ;;  %v19708_v50 = vld [vmem:[%s23770_s28 + $0x98] ss:$12 sps:$4 sm:$0xff]   ;;  %v19712_v23 = vld [vmem:[%s23770_s28 + $0x170] ss:$12 sps:$4 sm:$0xff]   ;;  %v19709_v60 = vld [vmem:[%s23770_s28 + $0x168] ss:$12 sps:$4 sm:$0xff]  }
 0xb70   :  { %16840 = vmatprep.subr.msk.bf16.mxu0 %vm8681_vm6, %v22636_v36  ;;  %16843 = vmatprep.subr.msk.bf16.mxu1 %vm8681_vm6, %v22638_v43  ;;  %v19711_v63 = vld [vmem:[%s23770_s28 + $0x16c] ss:$12 sps:$4 sm:$0xff]   ;;  %v19713_v5 = vld [vmem:[%s23770_s28 + $0xb0] ss:$12 sps:$4 sm:$0xff]  }
 0xb71   :  { %8736 = vmatprep.mubr.bf16.mxu0 %v20774_v44  ;;  %8787 = vmatprep.mubr.bf16.mxu1 %v20774_v44  ;;  %v19716_v13 = vld [vmem:[%s23770_s28 + $0x184] ss:$12 sps:$4 sm:$0xff]  }
 0xb73   :  { %8928 = vmatpush1.bf16.msra.mxu0 %v22641_v59  ;;  %8979 = vmatpush1.bf16.msra.mxu1 %v22644_v32 }
 0xb74   :  { %9562 = vmatprep.subr.bf16.mxu0 %v19652_v1  ;;  %17543 = vmatprep.subr.bf16.mxu1 %v19677_v51 }
 0xb76   :  { %16834 = vmatmul.mubr.msk.bf16.gmra.mrb[144].mxu0 %vm8674_vm7, %v19647_v9  ;;  %16837 = vmatmul.mubr.msk.bf16.gmra.mrb[152].mxu1 %vm8674_vm7, %v19647_v9 }
 0xb77   :  { %8957 = vmatprep.mubr.bf16.mxu0 %v20774_v44  ;;  %9008 = vmatprep.mubr.bf16.mxu1 %v20774_v44 }
 0xb7e   :  { %16841 = vmatmul.mubr.msk.bf16.vlgmr.msra.gmra.mrb[148].mxu0 %vm8674_vm7, %v19648_v45  ;;  %16844 = vmatmul.mubr.msk.bf16.vlgmr.msra.gmra.mrb[156].mxu1 %vm8674_vm7, %v19648_v45 }
 0xb7f   :  { %8967 = vmatprep.mubr.bf16.mxu0 %v20774_v44  ;;  %9018 = vmatprep.mubr.bf16.mxu1 %v20774_v44 }
 0xb80   :  { %9563 = vmatpush1.bf16.msra.mxu0 %v19650_v24  ;;  %17544 = vmatpush3.bf16.msra.mxu1 %v19678_v53 }
 0xb81   :  { %9564 = vmatprep.subr.bf16.mxu0 %v19655_v55  ;;  %17545 = vmatprep.subr.bf16.mxu1 %v19682_v25 }
 0xb84   :  { %9565 = vmatpush1.bf16.msra.mxu0 %v19653_v37  ;;  %17546 = vmatpush3.bf16.msra.mxu1 %v19683_v0 }
 0xb85   :  { %9566 = vmatprep.subr.bf16.mxu0 %v19658_v26  ;;  %17547 = vmatprep.subr.bf16.mxu1 %v19687_v18 }
 0xb86   :  { %16842 = vmatmul.mubr.msk.bf16.gmra.mrb[152].mxu0 %vm8674_vm7, %v19649_v48  ;;  %16845 = vmatmul.mubr.msk.bf16.gmra.mrb[160].mxu1 %vm8674_vm7, %v19649_v48 }
 0xb88   :  { %9567 = vmatpush1.bf16.msra.mxu0 %v19656_v6  ;;  %17548 = vmatpush3.bf16.msra.mxu1 %v19688_v34 }
 0xb89   :  { %9568 = vmatprep.subr.bf16.mxu0 %v19661_v38  ;;  %17549 = vmatprep.subr.bf16.mxu1 %v19692_v20  ;;  %v19717_v20 = vld [vmem:[%s23770_s28 + $0x188] ss:$12 sps:$4 sm:$0xff]  }
 0xb8c   :  { %9569 = vmatpush1.bf16.msra.mxu0 %v19659_v35  ;;  %17550 = vmatpush3.bf16.msra.mxu1 %v19693_v28  ;;  %v19720_v28 = vld [vmem:[%s23770_s28 + $0x19c] ss:$12 sps:$4 sm:$0xff]  }
 0xb8d   :  { %9570 = vmatprep.subr.bf16.mxu0 %v19664_v56  ;;  %17551 = vmatprep.subr.bf16.mxu1 %v19697_v49 }
 0xb90   :  { %9571 = vmatpush1.bf16.msra.mxu0 %v19662_v47  ;;  %17552 = vmatpush3.bf16.msra.mxu1 %v19698_v52 }
 0xb91   :  { %9572 = vmatprep.subr.bf16.mxu0 %v19667_v8  ;;  %17553 = vmatprep.subr.bf16.mxu1 %v19702_v2 }
 0xb94   :  { %9573 = vmatpush1.bf16.msra.mxu0 %v19665_v16  ;;  %17554 = vmatpush3.bf16.msra.mxu1 %v19703_v4 }
 0xb95   :  { %9574 = vmatprep.subr.bf16.mxu0 %v19670_v10  ;;  %17555 = vmatprep.subr.bf16.mxu1 %v19707_v41 }
 0xb98   :  { %9575 = vmatpush1.bf16.msra.mxu0 %v19668_v33  ;;  %17556 = vmatpush3.bf16.msra.mxu1 %v19708_v50 }
 0xb99   :  { %9576 = vmatprep.subr.bf16.mxu0 %v19673_v14  ;;  %17557 = vmatprep.subr.bf16.mxu1 %v19712_v23  ;;  %v19722_v23 = vld [vmem:[%s23770_s28 + $0x1b0] ss:$12 sps:$4 sm:$0xff]  }
 0xb9c   :  { %9577 = vmatpush1.bf16.msra.mxu0 %v19671_v3  ;;  %17558 = vmatpush3.bf16.msra.mxu1 %v19713_v5  ;;  %v19728_v5 = vld [vmem:[%s23770_s28 + $0x1cc] ss:$12 sps:$4 sm:$0xff]  }
 0xb9d   :  { %9578 = vmatprep.subr.bf16.mxu0 %v19676_v57  ;;  %9712 = vmatprep.subr.bf16.mxu1 %v20774_v44 }
 0xba0   :  { %9579 = vmatpush1.bf16.msra.mxu0 %v19674_v21 }
 0xba1   :  { %9580 = vmatprep.subr.bf16.mxu0 %v19681_v29 }
 0xba4   :  { %9581 = vmatpush1.bf16.msra.mxu0 %v19679_v62 }
 0xba5   :  { %9582 = vmatprep.subr.bf16.mxu0 %v19686_v39 }
 0xba8   :  { %9583 = vmatpush1.bf16.msra.mxu0 %v19684_v40 }
 0xba9   :  { %9584 = vmatprep.subr.bf16.mxu0 %v19691_v42  ;;  %v19714_v42 = vld [vmem:[%s23770_s28 + $0x180] ss:$12 sps:$4 sm:$0xff]  }
 0xbac   :  { %9585 = vmatpush1.bf16.msra.mxu0 %v19689_v27 }
 0xbad   :  { %9586 = vmatprep.subr.bf16.mxu0 %v19696_v46  ;;  %v19721_v46 = vld [vmem:[%s23770_s28 + $0x1a0] ss:$12 sps:$4 sm:$0xff]  }
 0xbb0   :  { %9587 = vmatpush1.bf16.msra.mxu0 %v19694_v30  ;;  %v19718_v30 = vld [vmem:[%s23770_s28 + $0x198] ss:$12 sps:$4 sm:$0xff]  }
 0xbb1   :  { %9588 = vmatprep.subr.bf16.mxu0 %v19701_v19  ;;  %v19724_v19 = vld [vmem:[%s23770_s28 + $0x1b4] ss:$12 sps:$4 sm:$0xff]  }
 0xbb4   :  { %9589 = vmatpush1.bf16.msra.mxu0 %v19699_v7 }
 0xbb5   :  { %9590 = vmatprep.subr.bf16.mxu0 %v19706_v61 }
 0xbb8   :  { %9591 = vmatpush1.bf16.msra.mxu0 %v19704_v17 }
 0xbb9   :  { %9592 = vmatprep.subr.bf16.mxu0 %v19711_v63 }
 0xbbc   :  { %9593 = vmatpush1.bf16.msra.mxu0 %v19709_v60  ;;  %v19725_v60 = vld [vmem:[%s23770_s28 + $0x1b8] ss:$12 sps:$4 sm:$0xff]  }
 0xbbd   :  { %9613 = vmatprep.subr.bf16.mxu0 %v19716_v13  ;;  %v19726_v13 = vld [vmem:[%s23770_s28 + $0x1c8] ss:$12 sps:$4 sm:$0xff]  }
 0xc41   :  { %v8728_v1 = vpop.f32.mrb[140].mxu0  ;;  %v8779_v51 = vpop.f32.mrb[148].mxu1 }
 0xc42   :  { %v8730_v9 = vpop.f32.mrb[141].mxu0  ;;  %v8781_v45 = vpop.f32.mrb[149].mxu1 }
 0xc43   :  { %v8732_v24 = vpop.f32.mrb[142].mxu0  ;;  %v8783_v53 = vpop.f32.mrb[150].mxu1 }
 0xc44   :  { %v22730_v55 = vpack.c.bf16 %v8732_v24, %v8728_v1  ;;  %v8734_v25 = vpop.f32.mrb[143].mxu0  ;;  %v22732_v37 = vpack.c.bf16 %v8783_v53, %v8779_v51  ;;  %v8785_v0 = vpop.f32.mrb[151].mxu1  ;;  %v19729_v1 = vld [vmem:[%s23770_s28 + $0x1d0] ss:$12 sps:$4 sm:$0xff]   ;;  %v19734_v53 = vld [vmem:[%s23770_s28 + $0x1f8] ss:$12 sps:$4 sm:$0xff]  }
 0xc45   :  { %v22734_v26 = vpack.c.bf16 %v8734_v25, %v8730_v9  ;;  %v22736_v18 = vpack.c.bf16 %v8785_v0, %v8781_v45  ;;  %v19732_v51 = vld [vmem:[%s23770_s28 + $0x1e4] ss:$12 sps:$4 sm:$0xff]   ;;  %v19730_v9 = vld [vmem:[%s23770_s28 + $0x1e0] ss:$12 sps:$4 sm:$0xff]   ;;  %v19733_v45 = vld [vmem:[%s23770_s28 + $0x1e8] ss:$12 sps:$4 sm:$0xff]  }
 0xc46   :  { %v19736_v24 = vld [vmem:[%s23770_s28 + $0x1fc] ss:$12 sps:$4 sm:$0xff]   ;;  %v19737_v25 = vld [vmem:[%s23770_s28 + $0x200] ss:$12 sps:$4 sm:$0xff]  }
 0xc47   :  { %v19740_v0 = vld [vmem:[%s23770_s28 + $0x214] ss:$12 sps:$4 sm:$0xff]  }
 0xc49   :  { %v22738_v48 = vpop.f32.mrb[144].mxu0  ;;  %v22740_v6 = vpop.f32.mrb[152].mxu1 }
 0xc4a   :  { %v22742_v34 = vpop.f32.mrb[145].mxu0  ;;  %v22744_v38 = vpop.f32.mrb[153].mxu1 }
 0xc4b   :  { %v8742_v35 = vpop.f32.mrb[146].mxu0  ;;  %v8793_v56 = vpop.f32.mrb[154].mxu1 }
 0xc4c   :  { %v8743_v47 = vpop.f32.mrb[147].mxu0  ;;  %v8794_v8 = vpop.f32.mrb[155].mxu1  ;;  %v19738_v35 = vld [vmem:[%s23770_s28 + $0x210] ss:$12 sps:$4 sm:$0xff]   ;;  %v19741_v56 = vld [vmem:[%s23770_s28 + $0x218] ss:$12 sps:$4 sm:$0xff]  }
 0xc4d   :  { %v19744_v47 = vld [vmem:[%s23770_s28 + $0x22c] ss:$12 sps:$4 sm:$0xff]   ;;  %v19742_v8 = vld [vmem:[%s23770_s28 + $0x228] ss:$12 sps:$4 sm:$0xff]  }
 0xc51   :  { %v8959_v16 = vpop.f32.mrb[148].mxu0  ;;  %v9010_v10 = vpop.f32.mrb[156].mxu1 }
 0xc52   :  { %v8961_v33 = vpop.f32.mrb[149].mxu0  ;;  %v9012_v14 = vpop.f32.mrb[157].mxu1 }
 0xc53   :  { %v8963_v3 = vpop.f32.mrb[150].mxu0  ;;  %v9014_v57 = vpop.f32.mrb[158].mxu1 }
 0xc54   :  { %v9027_v21 = vpack.c.bf16 %v8963_v3, %v8959_v16  ;;  %v8965_v29 = vpop.f32.mrb[151].mxu0  ;;  %v22746_v62 = vpack.c.bf16 %v9014_v57, %v9010_v10  ;;  %v9016_v39 = vpop.f32.mrb[159].mxu1  ;;  %v19745_v16 = vld [vmem:[%s23770_s28 + $0x230] ss:$12 sps:$4 sm:$0xff]   ;;  %v19750_v57 = vld [vmem:[%s23770_s28 + $0x258] ss:$12 sps:$4 sm:$0xff]  }
 0xc55   :  { %v9028_v40 = vpack.c.bf16 %v8965_v29, %v8961_v33  ;;  %v9030_v27 = vpack.c.bf16 %v9016_v39, %v9012_v14  ;;  %v19748_v10 = vld [vmem:[%s23770_s28 + $0x244] ss:$12 sps:$4 sm:$0xff]   ;;  %v19746_v33 = vld [vmem:[%s23770_s28 + $0x240] ss:$12 sps:$4 sm:$0xff]   ;;  %v19749_v14 = vld [vmem:[%s23770_s28 + $0x248] ss:$12 sps:$4 sm:$0xff]  }
 0xc56   :  { %v19752_v3 = vld [vmem:[%s23770_s28 + $0x25c] ss:$12 sps:$4 sm:$0xff]   ;;  %v19756_v29 = vld [vmem:[%s23772_s27 + $0x4] ss:$12 sps:$4 sm:$0xff]  }
 0xc57   :  { %9594 = vmatprep.mubr.bf16.mxu0 %v9028_v40  ;;  %9696 = vmatprep.mubr.bf16.mxu1 %v9028_v40  ;;  %v19757_v39 = vld [vmem:[%s23772_s27 + $0xc8] ss:$12 sps:$4 sm:$0xff]   ;;  %v19754_v40 = vld [vmem:[%s23772_s27] ss:$12 sps:$4 sm:$0xff]  }
 0xc58   :  { %9595 = vmatmul.mubr.bf16.vlgmr.msra.gmra.mrb[156].mxu0 %v9027_v21  ;;  %9697 = vmatmul.mubr.bf16.vlgmr.msra.gmra.mrb[164].mxu1 %v9027_v21  ;;  %v19753_v21 = vld [vmem:[%s23770_s28 + $0x260] ss:$12 sps:$4 sm:$0xff]  }
 0xc59   :  { %9614 = vmatpush1.bf16.msra.mxu0 %v19714_v42  ;;  %9713 = vmatpush1.bf16.msra.mxu1 %v19717_v20  ;;  %v8969_v49 = vpop.f32.mrb[152].mxu0  ;;  %v22753_v52 = vpop.f32.mrb[160].mxu1  ;;  %v19758_v42 = vld [vmem:[%s23772_s27 + $0x8] ss:$12 sps:$4 sm:$0xff]  }
 0xc5a   :  { %9615 = vmatprep.subr.bf16.mxu0 %v19720_v28  ;;  %9714 = vmatprep.subr.bf16.mxu1 %v20774_v44  ;;  %v8971_v2 = vpop.f32.mrb[153].mxu0  ;;  %v22757_v7 = vpop.f32.mrb[161].mxu1  ;;  %v9031_v41 = vpack.c.bf16 %v8969_v49, %v8969_v49  ;;  %v19761_v20 = vld [vmem:[%s23772_s27 + $0x1c] ss:$12 sps:$4 sm:$0xff]   ;;  %v19766_v49 = vld [vmem:[%s23772_s27 + $0x34] ss:$12 sps:$4 sm:$0xff]  }
 0xc5b   :  { %v9032_v4 = vpack.c.bf16 %v8971_v2, %v8971_v2  ;;  %v8973_v17 = vpop.f32.mrb[154].mxu0  ;;  %v9024_v61 = vpop.f32.mrb[162].mxu1  ;;  %v9034_v28 = vpack.c.bf16 %v22757_v7, %v22757_v7  ;;  %v9033_v2 = vpack.c.bf16 %v22753_v52, %v22753_v52  ;;  %v19768_v7 = vld [vmem:[%s23772_s27 + $0x38] ss:$12 sps:$4 sm:$0xff]   ;;  %v19769_v52 = vld [vmem:[%s23772_s27 + $0x48] ss:$12 sps:$4 sm:$0xff]  }
 0xc5c   :  { %v8974_v50 = vpop.f32.mrb[155].mxu0  ;;  %v9025_v63 = vpop.f32.mrb[163].mxu1  ;;  %v19772_v17 = vld [vmem:[%s23772_s27 + $0x110] ss:$12 sps:$4 sm:$0xff]  }
 0xc5d   :  { %9616 = vmatpush1.bf16.msra.mxu0 %v19718_v30  ;;  %9715 = vmatpush1.bf16.msra.mxu1 %v19721_v46  ;;  %v19759_v30 = vld [vmem:[%s23772_s27 + $0x18] ss:$12 sps:$4 sm:$0xff]   ;;  %v19763_v46 = vld [vmem:[%s23772_s27 + $0x20] ss:$12 sps:$4 sm:$0xff]   ;;  %v19773_v61 = vld [vmem:[%s23772_s27 + $0x50] ss:$12 sps:$4 sm:$0xff]  }
 0xc5e   :  { %9617 = vmatprep.subr.bf16.mxu0 %v19724_v19  ;;  %9716 = vmatprep.subr.bf16.mxu1 %v20774_v44  ;;  %v19767_v19 = vld [vmem:[%s23772_s27 + $0xf8] ss:$12 sps:$4 sm:$0xff]   ;;  %v19777_v50 = vld [vmem:[%s23772_s27 + $0x128] ss:$12 sps:$4 sm:$0xff]   ;;  %v19774_v63 = vld [vmem:[%s23772_s27 + $0x60] ss:$12 sps:$4 sm:$0xff]  }
 0xc5f   :  { %9604 = vmatprep.mubr.bf16.mxu0 %v9032_v4  ;;  %9704 = vmatprep.mubr.bf16.mxu1 %v9032_v4  ;;  %v19771_v4 = vld [vmem:[%s23772_s27 + $0x4c] ss:$12 sps:$4 sm:$0xff]  }
 0xc60   :  { %9605 = vmatmul.mubr.bf16.gmra.mrb[160].mxu0 %v9031_v41  ;;  %9705 = vmatmul.mubr.bf16.gmra.mrb[168].mxu1 %v9031_v41  ;;  %v19776_v41 = vld [vmem:[%s23772_s27 + $0x64] ss:$12 sps:$4 sm:$0xff]  }
 0xc61   :  { %9618 = vmatpush1.bf16.msra.mxu0 %v19722_v23  ;;  %9717 = vmatpush1.bf16.msra.mxu1 %v19725_v60  ;;  %v19778_v23 = vld [vmem:[%s23772_s27 + $0x68] ss:$12 sps:$4 sm:$0xff]  }
 0xc62   :  { %9619 = vmatprep.subr.bf16.mxu0 %v19728_v5  ;;  %9718 = vmatprep.subr.bf16.mxu1 %v20774_v44  ;;  %v19781_v60 = vld [vmem:[%s23772_s27 + $0x7c] ss:$12 sps:$4 sm:$0xff]   ;;  %v19782_v5 = vld [vmem:[%s23772_s27 + $0x140] ss:$12 sps:$4 sm:$0xff]  }
 0xc63   :  { %16924 = vmatprep.mubr.msk.bf16.mxu0 %vm9555_vm8, %v9030_v27  ;;  %16926 = vmatprep.mubr.msk.bf16.mxu1 %vm9555_vm8, %v9030_v27  ;;  %v19762_v27 = vld [vmem:[%s23772_s27 + $0xe0] ss:$12 sps:$4 sm:$0xff]  }
 0xc65   :  { %9620 = vmatpush1.bf16.msra.mxu0 %v19726_v13  ;;  %9719 = vmatpush1.bf16.msra.mxu1 %v19729_v1  ;;  %v19783_v13 = vld [vmem:[%s23772_s27 + $0x80] ss:$12 sps:$4 sm:$0xff]  }
 0xc66   :  { %9621 = vmatprep.subr.bf16.mxu0 %v19732_v51  ;;  %9720 = vmatprep.subr.bf16.mxu1 %v20774_v44  ;;  %v19786_v1 = vld [vmem:[%s23772_s27 + $0x94] ss:$12 sps:$4 sm:$0xff]   ;;  %v19787_v51 = vld [vmem:[%s23772_s27 + $0x158] ss:$12 sps:$4 sm:$0xff]  }
 0xc69   :  { %9622 = vmatpush1.bf16.msra.mxu0 %v19730_v9  ;;  %9721 = vmatpush1.bf16.msra.mxu1 %v19733_v45  ;;  %v19784_v9 = vld [vmem:[%s23772_s27 + $0x90] ss:$12 sps:$4 sm:$0xff]   ;;  %v19788_v45 = vld [vmem:[%s23772_s27 + $0x98] ss:$12 sps:$4 sm:$0xff]  }
 0xc6a   :  { %9623 = vmatprep.subr.bf16.mxu0 %v19736_v24  ;;  %9722 = vmatprep.subr.bf16.mxu1 %v20774_v44  ;;  %v19791_v24 = vld [vmem:[%s23772_s27 + $0xac] ss:$12 sps:$4 sm:$0xff]  }
 0xc6d   :  { %9624 = vmatpush1.bf16.msra.mxu0 %v19734_v53  ;;  %9723 = vmatpush1.bf16.msra.mxu1 %v19737_v25  ;;  %v19792_v53 = vld [vmem:[%s23772_s27 + $0x170] ss:$12 sps:$4 sm:$0xff]   ;;  %v19789_v25 = vld [vmem:[%s23772_s27 + $0xa8] ss:$12 sps:$4 sm:$0xff]  }
 0xc6e   :  { %9625 = vmatprep.subr.bf16.mxu0 %v19740_v0  ;;  %9724 = vmatprep.subr.bf16.mxu1 %v20774_v44  ;;  %v19793_v0 = vld [vmem:[%s23772_s27 + $0xb0] ss:$12 sps:$4 sm:$0xff]  }
 0xc71   :  { %9626 = vmatpush1.bf16.msra.mxu0 %v19738_v35  ;;  %9725 = vmatpush1.bf16.msra.mxu1 %v19741_v56  ;;  %v19796_v35 = vld [vmem:[%s23772_s27 + $0xc4] ss:$12 sps:$4 sm:$0xff]   ;;  %v19794_v56 = vld [vmem:[%s23772_s27 + $0xc0] ss:$12 sps:$4 sm:$0xff]  }
 0xc72   :  { %9627 = vmatprep.subr.bf16.mxu0 %v19744_v47  ;;  %9726 = vmatprep.subr.bf16.mxu1 %v20774_v44  ;;  %v19797_v47 = vld [vmem:[%s23772_s27 + $0x188] ss:$12 sps:$4 sm:$0xff]  }
 0xc75   :  { %9628 = vmatpush1.bf16.msra.mxu0 %v19742_v8  ;;  %9727 = vmatpush1.bf16.msra.mxu1 %v19745_v16  ;;  %v19800_v8 = vld [vmem:[%s23772_s27 + $0xdc] ss:$12 sps:$4 sm:$0xff]   ;;  %v8801_v16 = vpack.c.bf16 %v22742_v34, %v22742_v34  ;;  %v19805_v34 = vld [vmem:[%s23772_s27 + $0x1b8] ss:$12 sps:$4 sm:$0xff]  }
 0xc76   :  { %9629 = vmatprep.subr.bf16.mxu0 %v19748_v10  ;;  %9728 = vmatprep.subr.bf16.mxu1 %v20774_v44  ;;  %v19798_v10 = vld [vmem:[%s23772_s27 + $0xd8] ss:$12 sps:$4 sm:$0xff]  }
 0xc79   :  { %9630 = vmatpush1.bf16.msra.mxu0 %v19746_v33  ;;  %9729 = vmatpush1.bf16.msra.mxu1 %v19749_v14  ;;  %v19801_v33 = vld [vmem:[%s23772_s27 + $0x1a0] ss:$12 sps:$4 sm:$0xff]  }
 0xc7a   :  { %9631 = vmatprep.subr.bf16.mxu0 %v19752_v3  ;;  %9730 = vmatprep.subr.bf16.mxu1 %v20774_v44  ;;  %v19804_v14 = vld [vmem:[%s23772_s27 + $0xf4] ss:$12 sps:$4 sm:$0xff]   ;;  %v19802_v3 = vld [vmem:[%s23772_s27 + $0xf0] ss:$12 sps:$4 sm:$0xff]  }
 0xc7d   :  { %9632 = vmatpush1.bf16.msra.mxu0 %v19750_v57  ;;  %9731 = vmatpush1.bf16.msra.mxu1 %v19753_v21  ;;  %v22850_v57 = vpack.c.bf16 %v22738_v48, %v22738_v48  ;;  %v19808_v21 = vld [vmem:[%s23772_s27 + $0x10c] ss:$12 sps:$4 sm:$0xff]  }
 0xc7e   :  { %10182 = vmatprep.subr.bf16.mxu0 %v19756_v29  ;;  %17571 = vmatprep.subr.bf16.mxu1 %v19757_v39  ;;  %v19806_v29 = vld [vmem:[%s23772_s27 + $0x108] ss:$12 sps:$4 sm:$0xff]   ;;  %v19809_v39 = vld [vmem:[%s23772_s27 + $0x1d0] ss:$12 sps:$4 sm:$0xff]   ;;  %v19810_v48 = vld [vmem:[%s23772_s27 + $0x120] ss:$12 sps:$4 sm:$0xff]  }
 0xc80   :  { %9646 = vmatmul.mubr.bf16.vlgmr.msra.gmra.mrb[156].mxu0 %v22746_v62  ;;  %9745 = vmatmul.mubr.bf16.vlgmr.msra.gmra.mrb[172].mxu1 %v22746_v62  ;;  %v19764_v62 = vld [vmem:[%s23772_s27 + $0x30] ss:$12 sps:$4 sm:$0xff]  }
 0xc81   :  { %10183 = vmatpush1.bf16.msra.mxu0 %v19754_v40  ;;  %17572 = vmatpush3.bf16.msra.mxu1 %v19758_v42  ;;  %v19812_v40 = vld [vmem:[%s23772_s27 + $0x124] ss:$12 sps:$4 sm:$0xff]   ;;  %v19813_v42 = vld [vmem:[%s23772_s27 + $0x1e8] ss:$12 sps:$4 sm:$0xff]  }
 0xc82   :  { %10184 = vmatprep.subr.bf16.mxu0 %v19761_v20  ;;  %17573 = vmatprep.subr.bf16.mxu1 %v19762_v27  ;;  %v19816_v20 = vld [vmem:[%s23772_s27 + $0x13c] ss:$12 sps:$4 sm:$0xff]   ;;  %v19814_v27 = vld [vmem:[%s23772_s27 + $0x138] ss:$12 sps:$4 sm:$0xff]  }
 0xc83   :  { %16925 = vmatprep.mubr.msk.bf16.mxu0 %vm9555_vm8, %v9034_v28  ;;  %16927 = vmatprep.mubr.msk.bf16.mxu1 %vm9555_vm8, %v9034_v28  ;;  %v19817_v28 = vld [vmem:[%s23772_s27 + $0x200] ss:$12 sps:$4 sm:$0xff]  }
 0xc85   :  { %10185 = vmatpush1.bf16.msra.mxu0 %v19759_v30  ;;  %17574 = vmatpush3.bf16.msra.mxu1 %v19763_v46  ;;  %v19820_v30 = vld [vmem:[%s23772_s27 + $0x154] ss:$12 sps:$4 sm:$0xff]   ;;  %v19818_v46 = vld [vmem:[%s23772_s27 + $0x150] ss:$12 sps:$4 sm:$0xff]  }
 0xc86   :  { %10186 = vmatprep.subr.bf16.mxu0 %v19766_v49  ;;  %17575 = vmatprep.subr.bf16.mxu1 %v19767_v19  ;;  %v19821_v49 = vld [vmem:[%s23772_s27 + $0x218] ss:$12 sps:$4 sm:$0xff]  }
 0xc87   :  { %v19824_v19 = vld [vmem:[%s23772_s27 + $0x16c] ss:$12 sps:$4 sm:$0xff]  }
 0xc88   :  { %9656 = vmatmul.mubr.bf16.gmra.mrb[164].mxu0 %v9033_v2  ;;  %9753 = vmatmul.mubr.bf16.gmra.mrb[176].mxu1 %v9033_v2  ;;  %v19822_v2 = vld [vmem:[%s23772_s27 + $0x168] ss:$12 sps:$4 sm:$0xff]  }
 0xc89   :  { %10187 = vmatpush1.bf16.msra.mxu0 %v19764_v62  ;;  %10214 = vmatprep.mubr.bf16.mxu0 %v22734_v26  ;;  %v19825_v62 = vld [vmem:[%s23772_s27 + $0x230] ss:$12 sps:$4 sm:$0xff]  }
 0xc8a   :  { %17576 = vmatpush3.bf16.msra.mxu1 %v19768_v7  ;;  %10316 = vmatprep.mubr.bf16.mxu1 %v22734_v26  ;;  %v19779_v26 = vld [vmem:[%s23772_s27 + $0x78] ss:$12 sps:$4 sm:$0xff]  }
 0xc8b   :  { %10188 = vmatprep.subr.bf16.mxu0 %v19771_v4  ;;  %17577 = vmatprep.subr.bf16.mxu1 %v19772_v17  ;;  %v19828_v7 = vld [vmem:[%s23772_s27 + $0x184] ss:$12 sps:$4 sm:$0xff]   ;;  %v19826_v4 = vld [vmem:[%s23772_s27 + $0x180] ss:$12 sps:$4 sm:$0xff]   ;;  %v19829_v17 = vld [vmem:[%s23772_s27 + $0x248] ss:$12 sps:$4 sm:$0xff]  }
 0xc8d   :  { %10189 = vmatpush1.bf16.msra.mxu0 %v19769_v52  ;;  %v19832_v52 = vld [vmem:[%s23772_s27 + $0x19c] ss:$12 sps:$4 sm:$0xff]  }
 0xc8e   :  { %17578 = vmatpush3.bf16.msra.mxu1 %v19773_v61  ;;  %10190 = vmatprep.subr.bf16.mxu0 %v19776_v41  ;;  %v19830_v61 = vld [vmem:[%s23772_s27 + $0x198] ss:$12 sps:$4 sm:$0xff]   ;;  %v19833_v41 = vld [vmem:[%s23772_s27 + $0x260] ss:$12 sps:$4 sm:$0xff]  }
 0xc8f   :  { %17579 = vmatprep.subr.bf16.mxu1 %v19777_v50  ;;  %v19836_v50 = vld [vmem:[%s23772_s27 + $0x1b4] ss:$12 sps:$4 sm:$0xff]  }
 0xc91   :  { %10191 = vmatpush1.bf16.msra.mxu0 %v19774_v63  ;;  %v19834_v63 = vld [vmem:[%s23772_s27 + $0x1b0] ss:$12 sps:$4 sm:$0xff]  }
 0xc92   :  { %17580 = vmatpush3.bf16.msra.mxu1 %v19778_v23  ;;  %10192 = vmatprep.subr.bf16.mxu0 %v19781_v60  ;;  %v8803_v23 = vpack.c.bf16 %v22744_v38, %v22744_v38  ;;  %v19837_v60 = vld [vmem:[%s23772_s27 + $0x1c8] ss:$12 sps:$4 sm:$0xff]  }
 0xc93   :  { %17581 = vmatprep.subr.bf16.mxu1 %v19782_v5  ;;  %v19842_v5 = vld [vmem:[%s23772_s27 + $0x1e4] ss:$12 sps:$4 sm:$0xff]   ;;  %v19845_v38 = vld [vmem:[%s23772_s27 + $0x1fc] ss:$12 sps:$4 sm:$0xff]  }
 0xc95   :  { %10193 = vmatpush1.bf16.msra.mxu0 %v19779_v26  ;;  %v19846_v26 = vld [vmem:[%s23772_s27 + $0x210] ss:$12 sps:$4 sm:$0xff]  }
 0xc96   :  { %17582 = vmatpush3.bf16.msra.mxu1 %v19783_v13  ;;  %10194 = vmatprep.subr.bf16.mxu0 %v19786_v1  ;;  %v19849_v13 = vld [vmem:[%s23773_s1] sm:$0xff]  }
 0xc97   :  { %17583 = vmatprep.subr.bf16.mxu1 %v19787_v51  ;;  %v19853_v1 = vld [vmem:[%s23772_s27 + $0x240] ss:$12 sps:$4 sm:$0xff]   ;;  %v19859_v51 = vld [vmem:[%s23773_s1 + $0x8] ss:$0 sps:$4 sm:$0x77]  }
 0xc99   :  { %10195 = vmatpush1.bf16.msra.mxu0 %v19784_v9  ;;  %v19858_v9 = vld [vmem:[%s23772_s27 + $0x25c] ss:$12 sps:$4 sm:$0xff]  }
 0xc9a   :  { %17584 = vmatpush3.bf16.msra.mxu1 %v19788_v45  ;;  %10196 = vmatprep.subr.bf16.mxu0 %v19791_v24  ;;  %v19856_v45 = vld [vmem:[%s23772_s27 + $0x258] ss:$12 sps:$4 sm:$0xff]  }
 0xc9b   :  { %17585 = vmatprep.subr.bf16.mxu1 %v19792_v53  ;;  %v19863_v24 = vld [vmem:[%s23774_s2 + $0x18] ss:$12 sps:$4 sm:$0xff]   ;;  %v19868_v53 = vld [vmem:[%s23774_s2 + $0x34] ss:$12 sps:$4 sm:$0xff]  }
 0xc9d   :  { %10197 = vmatpush1.bf16.msra.mxu0 %v19789_v25  ;;  %v19871_v25 = vld [vmem:[%s23774_s2 + $0x4c] ss:$12 sps:$4 sm:$0xff]  }
 0xc9e   :  { %17586 = vmatpush3.bf16.msra.mxu1 %v19793_v0  ;;  %10198 = vmatprep.subr.bf16.mxu0 %v19796_v35  ;;  %v19869_v0 = vld [vmem:[%s23774_s2 + $0x48] ss:$12 sps:$4 sm:$0xff]   ;;  %v19874_v35 = vld [vmem:[%s23774_s2 + $0x64] ss:$12 sps:$4 sm:$0xff]  }
 0xc9f   :  { %10332 = vmatprep.subr.bf16.mxu1 %v20774_v44 }
 0xca1   :  { %10317 = vmatmul.mubr.bf16.vlgmr.msra.gmra.mrb[180].mxu1 %v22730_v55  ;;  %10199 = vmatpush1.bf16.msra.mxu0 %v19794_v56  ;;  %v19872_v56 = vld [vmem:[%s23774_s2 + $0x60] ss:$12 sps:$4 sm:$0xff]  }
 0xca2   :  { %10324 = vmatprep.mubr.bf16.mxu1 %v8801_v16  ;;  %10333 = vmatpush1.bf16.msra.mxu1 %v19797_v47  ;;  %v19877_v47 = vld [vmem:[%s23774_s2 + $0x7c] ss:$12 sps:$4 sm:$0xff]  }
 0xca3   :  { %10200 = vmatprep.subr.bf16.mxu0 %v19800_v8  ;;  %10334 = vmatprep.subr.bf16.mxu1 %v20774_v44  ;;  %v19887_v8 = vld [vmem:[%s23774_s2 + $0xc8] ss:$12 sps:$4 sm:$0xff]  }
 0xca5   :  { %10201 = vmatpush1.bf16.msra.mxu0 %v19798_v10  ;;  %v19892_v10 = vld [vmem:[%s23774_s2 + $0xe0] ss:$12 sps:$4 sm:$0xff]  }
 0xca6   :  { %10335 = vmatpush1.bf16.msra.mxu1 %v19801_v33  ;;  %10202 = vmatprep.subr.bf16.mxu0 %v19804_v14  ;;  %v19875_v33 = vld [vmem:[%s23774_s2 + $0x78] ss:$12 sps:$4 sm:$0xff]   ;;  %v19880_v14 = vld [vmem:[%s23774_s2 + $0x94] ss:$12 sps:$4 sm:$0xff]  }
 0xca7   :  { %10336 = vmatprep.subr.bf16.mxu1 %v20774_v44 }
 0xca9   :  { %10325 = vmatmul.mubr.bf16.gmra.mrb[184].mxu1 %v22850_v57  ;;  %10203 = vmatpush1.bf16.msra.mxu0 %v19802_v3  ;;  %v19893_v3 = vld [vmem:[%s23774_s2 + $0x20] ss:$12 sps:$4 sm:$0xff]  }
 0xcaa   :  { %10337 = vmatpush1.bf16.msra.mxu1 %v19805_v34  ;;  %17008 = vmatprep.mubr.msk.bf16.mxu1 %vm9555_vm8, %v22736_v18  ;;  %v19897_v34 = vld [vmem:[%s23774_s2 + $0xf8] ss:$12 sps:$4 sm:$0xff]  }
 0xcab   :  { %10204 = vmatprep.subr.bf16.mxu0 %v19808_v21  ;;  %10338 = vmatprep.subr.bf16.mxu1 %v20774_v44  ;;  %v19883_v21 = vld [vmem:[%s23774_s2 + $0xac] ss:$12 sps:$4 sm:$0xff]  }
 0xcad   :  { %10205 = vmatpush1.bf16.msra.mxu0 %v19806_v29  ;;  %v19898_v29 = vld [vmem:[%s23774_s2 + $0x38] ss:$12 sps:$4 sm:$0xff]  }
 0xcae   :  { %10339 = vmatpush1.bf16.msra.mxu1 %v19809_v39  ;;  %10206 = vmatprep.subr.bf16.mxu0 %v19812_v40  ;;  %v19881_v39 = vld [vmem:[%s23774_s2 + $0xa8] ss:$12 sps:$4 sm:$0xff]   ;;  %v19886_v40 = vld [vmem:[%s23774_s2 + $0xc4] ss:$12 sps:$4 sm:$0xff]  }
 0xcaf   :  { %10340 = vmatprep.subr.bf16.mxu1 %v20774_v44 }
 0xcb1   :  { %10207 = vmatpush1.bf16.msra.mxu0 %v19810_v48  ;;  %v19884_v48 = vld [vmem:[%s23774_s2 + $0xc0] ss:$12 sps:$4 sm:$0xff]  }
 0xcb2   :  { %10341 = vmatpush1.bf16.msra.mxu1 %v19813_v42  ;;  %10208 = vmatprep.subr.bf16.mxu0 %v19816_v20  ;;  %v19891_v42 = vld [vmem:[%s23774_s2 + $0xdc] ss:$12 sps:$4 sm:$0xff]   ;;  %v19889_v20 = vld [vmem:[%s23774_s2 + $0xd8] ss:$12 sps:$4 sm:$0xff]  }
 0xcb3   :  { %10342 = vmatprep.subr.bf16.mxu1 %v20774_v44 }
 0xcb5   :  { %10209 = vmatpush1.bf16.msra.mxu0 %v19814_v27  ;;  %v19896_v27 = vld [vmem:[%s23774_s2 + $0xf4] ss:$12 sps:$4 sm:$0xff]  }
 0xcb6   :  { %10343 = vmatpush1.bf16.msra.mxu1 %v19817_v28  ;;  %10210 = vmatprep.subr.bf16.mxu0 %v19820_v30  ;;  %v19894_v28 = vld [vmem:[%s23774_s2 + $0xf0] ss:$12 sps:$4 sm:$0xff]   ;;  %v19901_v30 = vld [vmem:[%s23774_s2 + $0x10c] ss:$12 sps:$4 sm:$0xff]  }
 0xcb7   :  { %10344 = vmatprep.subr.bf16.mxu1 %v20774_v44 }
 0xcb9   :  { %10211 = vmatpush1.bf16.msra.mxu0 %v19818_v46  ;;  %v19902_v46 = vld [vmem:[%s23774_s2 + $0x110] ss:$12 sps:$4 sm:$0xff]  }
 0xcba   :  { %10345 = vmatpush1.bf16.msra.mxu1 %v19821_v49  ;;  %10212 = vmatprep.subr.bf16.mxu0 %v19824_v19  ;;  %v19899_v49 = vld [vmem:[%s23774_s2 + $0x108] ss:$12 sps:$4 sm:$0xff]   ;;  %v19903_v19 = vld [vmem:[%s23774_s2 + $0x50] ss:$12 sps:$4 sm:$0xff]  }
 0xcbb   :  { %10346 = vmatprep.subr.bf16.mxu1 %v20774_v44 }
 0xcbd   :  { %10213 = vmatpush1.bf16.msra.mxu0 %v19822_v2  ;;  %v19906_v2 = vld [vmem:[%s23774_s2 + $0x124] ss:$12 sps:$4 sm:$0xff]  }
 0xcbe   :  { %10347 = vmatpush1.bf16.msra.mxu1 %v19825_v62  ;;  %10233 = vmatprep.subr.bf16.mxu0 %v19828_v7  ;;  %v19907_v62 = vld [vmem:[%s23774_s2 + $0x128] ss:$12 sps:$4 sm:$0xff]   ;;  %v19904_v7 = vld [vmem:[%s23774_s2 + $0x120] ss:$12 sps:$4 sm:$0xff]  }
 0xcbf   :  { %10348 = vmatprep.subr.bf16.mxu1 %v20774_v44 }
 0xcc0   :  { %10215 = vmatmul.mubr.bf16.vlgmr.msra.gmra.mrb[156].mxu0 %v22730_v55  ;;  %v19839_v55 = vld [vmem:[%s23772_s27 + $0x1cc] ss:$12 sps:$4 sm:$0xff]  }
 0xcc1   :  { %10224 = vmatprep.mubr.bf16.mxu0 %v8801_v16  ;;  %10234 = vmatpush1.bf16.msra.mxu0 %v19826_v4  ;;  %v19888_v16 = vld [vmem:[%s23774_s2 + $0x8] ss:$12 sps:$4 sm:$0xff]  }
 0xcc2   :  { %10349 = vmatpush1.bf16.msra.mxu1 %v19829_v17  ;;  %10235 = vmatprep.subr.bf16.mxu0 %v19832_v52  ;;  %v19908_v4 = vld [vmem:[%s23774_s2 + $0x68] ss:$12 sps:$4 sm:$0xff]   ;;  %v19912_v52 = vld [vmem:[%s23774_s2 + $0x140] ss:$12 sps:$4 sm:$0xff]  }
 0xcc3   :  { %10350 = vmatprep.subr.bf16.mxu1 %v20774_v44  ;;  %v19911_v17 = vld [vmem:[%s23774_s2 + $0x13c] ss:$12 sps:$4 sm:$0xff]  }
 0xcc5   :  { %10236 = vmatpush1.bf16.msra.mxu0 %v19830_v61  ;;  %v19909_v61 = vld [vmem:[%s23774_s2 + $0x138] ss:$12 sps:$4 sm:$0xff]  }
 0xcc6   :  { %10351 = vmatpush1.bf16.msra.mxu1 %v19833_v41  ;;  %10237 = vmatprep.subr.bf16.mxu0 %v19836_v50  ;;  %v19913_v41 = vld [vmem:[%s23774_s2 + $0x80] ss:$12 sps:$4 sm:$0xff]  }
 0xcc7   :  { %10397 = vmatprep.subr.bf16.mxu1 %v22628_v22  ;;  %v19840_v22 = vld [vmem:[%s23772_s27 + $0x1e0] ss:$12 sps:$4 sm:$0xff]  }
 0xcc8   :  { %10225 = vmatmul.mubr.bf16.gmra.mrb[168].mxu0 %v22850_v57  ;;  %v19878_v57 = vld [vmem:[%s23774_s2 + $0x90] ss:$12 sps:$4 sm:$0xff]   ;;  %v19916_v50 = vld [vmem:[%s23774_s2 + $0x154] ss:$12 sps:$4 sm:$0xff]  }
 0xcc9   :  { %10365 = vmatmul.mubr.bf16.vlgmr.msra.gmra.mrb[188].mxu1 %v22732_v37  ;;  %10238 = vmatpush1.bf16.msra.mxu0 %v19834_v63  ;;  %v19917_v63 = vld [vmem:[%s23774_s2 + $0x158] ss:$12 sps:$4 sm:$0xff]  }
 0xcca   :  { %17006 = vmatprep.mubr.msk.bf16.mxu0 %vm9555_vm8, %v22736_v18  ;;  %17009 = vmatprep.mubr.msk.bf16.mxu1 %vm9555_vm8, %v8803_v23  ;;  %v8802_v18 = vpack.c.bf16 %v22740_v6, %v22740_v6  ;;  %v19852_v6 = vld [vmem:[%s23772_s27 + $0x22c] ss:$12 sps:$4 sm:$0xff]  }
 0xccb   :  { %10398 = vmatpush1.bf16.msra.mxu1 %v22624_v58  ;;  %10239 = vmatprep.subr.bf16.mxu0 %v19839_v55  ;;  %v19843_v58 = vld [vmem:[%s23772_s27 + $0x1f8] ss:$12 sps:$4 sm:$0xff]   ;;  %v19914_v55 = vld [vmem:[%s23774_s2 + $0x150] ss:$12 sps:$4 sm:$0xff]  }
 0xccc   :  { %17012 = vmatprep.subr.msk.bf16.mxu1 %vm8681_vm6, %v22636_v36  ;;  %v19848_v36 = vld [vmem:[%s23772_s27 + $0x214] ss:$12 sps:$4 sm:$0xff]  }
 0xccd   :  { %10240 = vmatpush1.bf16.msra.mxu0 %v19837_v60 }
 0xcce   :  { %10241 = vmatprep.subr.bf16.mxu0 %v19842_v5 }
 0xccf   :  { %10400 = vmatpush1.bf16.msra.mxu1 %v22641_v59  ;;  %v19855_v59 = vld [vmem:[%s23772_s27 + $0x244] ss:$12 sps:$4 sm:$0xff]  }
 0xcd0   :  { %10448 = vmatprep.subr.bf16.mxu1 %v22630_v31  ;;  %v19850_v31 = vld [vmem:[%s23772_s27 + $0x228] ss:$12 sps:$4 sm:$0xff]  }
 0xcd1   :  { %10373 = vmatmul.mubr.bf16.gmra.mrb[192].mxu1 %v8802_v18  ;;  %10242 = vmatpush1.bf16.msra.mxu0 %v19840_v22 }
 0xcd2   :  { %10243 = vmatprep.subr.bf16.mxu0 %v19845_v38  ;;  %10429 = vmatprep.mubr.bf16.mxu1 %v20774_v44 }
 0xcd5   :  { %10244 = vmatpush1.bf16.msra.mxu0 %v19843_v58  ;;  %v19922_v58 = vld [vmem:[%s23774_s2 + $0x170] ss:$12 sps:$4 sm:$0xff]  }
 0xcd6   :  { %10245 = vmatprep.subr.bf16.mxu0 %v19848_v36 }
 0xcd9   :  { %17013 = vmatmul.mubr.msk.bf16.vlgmr.msra.gmra.mrb[196].mxu1 %vm8674_vm7, %v19849_v13  ;;  %10246 = vmatpush1.bf16.msra.mxu0 %v19846_v26  ;;  %v19919_v26 = vld [vmem:[%s23774_s2 + $0x168] ss:$12 sps:$4 sm:$0xff]  }
 0xcda   :  { %10449 = vmatpush1.bf16.msra.mxu1 %v22626_v54  ;;  %10247 = vmatprep.subr.bf16.mxu0 %v19852_v6  ;;  %v19862_v54 = vld [vmem:[%s23774_s2 + $0x4] ss:$12 sps:$4 sm:$0xff]  }
 0xcdb   :  { %17015 = vmatprep.subr.msk.bf16.mxu1 %vm8681_vm6, %v22638_v43  ;;  %10439 = vmatprep.mubr.bf16.mxu1 %v20774_v44  ;;  %v19860_v43 = vld [vmem:[%s23774_s2] ss:$12 sps:$4 sm:$0xff]  }
 0xcdd   :  { %10248 = vmatpush1.bf16.msra.mxu0 %v19850_v31  ;;  %v19926_v31 = vld [vmem:[%s23774_s2 + $0x184] ss:$12 sps:$4 sm:$0xff]  }
 0xcde   :  { %10451 = vmatpush1.bf16.msra.mxu1 %v22644_v32  ;;  %10249 = vmatprep.subr.bf16.mxu0 %v19855_v59  ;;  %v19865_v32 = vld [vmem:[%s23774_s2 + $0x1c] ss:$12 sps:$4 sm:$0xff]  }
 0xcdf   :  { %17599 = vmatprep.subr.bf16.mxu1 %v19887_v8 }
 0xce1   :  { %10250 = vmatpush1.bf16.msra.mxu0 %v19853_v1  ;;  %17014 = vmatmul.mubr.msk.bf16.gmra.mrb[200].mxu1 %vm8674_vm7, %v19859_v51 }
 0xce2   :  { %10251 = vmatprep.subr.bf16.mxu0 %v19858_v9  ;;  %10480 = vmatprep.mubr.bf16.mxu1 %v20774_v44 }
 0xce5   :  { %10252 = vmatpush1.bf16.msra.mxu0 %v19856_v45 }
 0xce6   :  { %11033 = vmatprep.subr.bf16.mxu0 %v19862_v54 }
 0xce8   :  { %10266 = vmatmul.mubr.bf16.vlgmr.msra.gmra.mrb[156].mxu0 %v22732_v37  ;;  %v19866_v37 = vld [vmem:[%s23774_s2 + $0x30] ss:$12 sps:$4 sm:$0xff]  }
 0xce9   :  { %17007 = vmatprep.mubr.msk.bf16.mxu0 %vm9555_vm8, %v8803_v23  ;;  %17016 = vmatmul.mubr.msk.bf16.vlgmr.msra.gmra.mrb[204].mxu1 %vm8674_vm7, %v19849_v13  ;;  %v19918_v23 = vld [vmem:[%s23774_s2 + $0x98] ss:$12 sps:$4 sm:$0xff]   ;;  %v19923_v13 = vld [vmem:[%s23774_s2 + $0xb0] ss:$12 sps:$4 sm:$0xff]  }
 0xcea   :  { %10490 = vmatprep.mubr.bf16.mxu1 %v20774_v44  ;;  %11034 = vmatpush1.bf16.msra.mxu0 %v19860_v43 }
 0xceb   :  { %11035 = vmatprep.subr.bf16.mxu0 %v19865_v32  ;;  %17600 = vmatpush3.bf16.msra.mxu1 %v19888_v16 }
 0xcec   :  { %17601 = vmatprep.subr.bf16.mxu1 %v19892_v10 }
 0xcee   :  { %11036 = vmatpush1.bf16.msra.mxu0 %v19863_v24 }
 0xcef   :  { %11037 = vmatprep.subr.bf16.mxu0 %v19868_v53  ;;  %17602 = vmatpush3.bf16.msra.mxu1 %v19893_v3 }
 0xcf0   :  { %10276 = vmatmul.mubr.bf16.gmra.mrb[172].mxu0 %v8802_v18  ;;  %17603 = vmatprep.subr.bf16.mxu1 %v19897_v34  ;;  %v19921_v18 = vld [vmem:[%s23774_s2 + $0x16c] ss:$12 sps:$4 sm:$0xff]  }
 0xcf1   :  { %17017 = vmatmul.mubr.msk.bf16.gmra.mrb[208].mxu1 %vm8674_vm7, %v19859_v51 }
 0xcf2   :  { %11038 = vmatpush1.bf16.msra.mxu0 %v19866_v37 }
 0xcf3   :  { %11039 = vmatprep.subr.bf16.mxu0 %v19871_v25  ;;  %17604 = vmatpush3.bf16.msra.mxu1 %v19898_v29 }
 0xcf4   :  { %17605 = vmatprep.subr.bf16.mxu1 %v19902_v46 }
 0xcf6   :  { %11040 = vmatpush1.bf16.msra.mxu0 %v19869_v0 }
 0xcf7   :  { %11041 = vmatprep.subr.bf16.mxu0 %v19874_v35  ;;  %17606 = vmatpush3.bf16.msra.mxu1 %v19903_v19 }
 0xcf8   :  { %17607 = vmatprep.subr.bf16.mxu1 %v19907_v62 }
 0xcfa   :  { %11042 = vmatpush1.bf16.msra.mxu0 %v19872_v56 }
 0xcfb   :  { %11043 = vmatprep.subr.bf16.mxu0 %v19877_v47  ;;  %17608 = vmatpush3.bf16.msra.mxu1 %v19908_v4 }
 0xcfc   :  { %17609 = vmatprep.subr.bf16.mxu1 %v19912_v52 }
 0xcfe   :  { %11044 = vmatpush1.bf16.msra.mxu0 %v19875_v33 }
 0xcff   :  { %11045 = vmatprep.subr.bf16.mxu0 %v19880_v14  ;;  %17610 = vmatpush3.bf16.msra.mxu1 %v19913_v41 }
 0xd00   :  { %17611 = vmatprep.subr.bf16.mxu1 %v19917_v63 }
 0xd02   :  { %11046 = vmatpush1.bf16.msra.mxu0 %v19878_v57 }
 0xd03   :  { %11047 = vmatprep.subr.bf16.mxu0 %v19883_v21  ;;  %17612 = vmatpush3.bf16.msra.mxu1 %v19918_v23 }
 0xd04   :  { %17613 = vmatprep.subr.bf16.mxu1 %v19922_v58 }
 0xd06   :  { %11048 = vmatpush1.bf16.msra.mxu0 %v19881_v39 }
 0xd07   :  { %11049 = vmatprep.subr.bf16.mxu0 %v19886_v40  ;;  %17614 = vmatpush3.bf16.msra.mxu1 %v19923_v13 }
 0xd08   :  { %11183 = vmatprep.subr.bf16.mxu1 %v20774_v44 }
 0xd0a   :  { %11050 = vmatpush1.bf16.msra.mxu0 %v19884_v48 }
 0xd0b   :  { %11051 = vmatprep.subr.bf16.mxu0 %v19891_v42 }
 0xd0e   :  { %11052 = vmatpush1.bf16.msra.mxu0 %v19889_v20 }
 0xd0f   :  { %11053 = vmatprep.subr.bf16.mxu0 %v19896_v27 }
 0xd12   :  { %11054 = vmatpush1.bf16.msra.mxu0 %v19894_v28 }
 0xd13   :  { %11055 = vmatprep.subr.bf16.mxu0 %v19901_v30 }
 0xd16   :  { %11056 = vmatpush1.bf16.msra.mxu0 %v19899_v49 }
 0xd17   :  { %11057 = vmatprep.subr.bf16.mxu0 %v19906_v2 }
 0xd1a   :  { %11058 = vmatpush1.bf16.msra.mxu0 %v19904_v7 }
 0xd1b   :  { %11059 = vmatprep.subr.bf16.mxu0 %v19911_v17 }
 0xd1e   :  { %11060 = vmatpush1.bf16.msra.mxu0 %v19909_v61 }
 0xd1f   :  { %11061 = vmatprep.subr.bf16.mxu0 %v19916_v50 }
 0xd22   :  { %11062 = vmatpush1.bf16.msra.mxu0 %v19914_v55 }
 0xd23   :  { %11063 = vmatprep.subr.bf16.mxu0 %v19921_v18 }
 0xd26   :  { %11064 = vmatpush1.bf16.msra.mxu0 %v19919_v26 }
 0xd27   :  { %11084 = vmatprep.subr.bf16.mxu0 %v19926_v31 }
 0xd2b   :  { %v17559_v60 = vpop.f32.mrb[164].mxu1 }
 0xd2c   :  { %v17560_v5 = vpop.f32.mrb[165].mxu1 }
 0xd2d   :  { %v17561_v22 = vadd.f32 %v17560_v5, %v17559_v60  ;;  %v17562_v38 = vpop.f32.mrb[166].mxu1 }
 0xd2e   :  { %v17563_v36 = vpop.f32.mrb[167].mxu1 }
 0xd2f   :  { %v17564_v6 = vadd.f32 %v17563_v36, %v17562_v38 }
 0xd33   :  { %v9606_v59 = vpop.f32.mrb[160].mxu0  ;;  %v17565_v1 = vpop.f32.mrb[168].mxu1 }
 0xd34   :  { %v9608_v51 = vpop.f32.mrb[161].mxu0  ;;  %v17566_v9 = vpop.f32.mrb[169].mxu1 }
 0xd35   :  { %v17567_v45 = vadd.f32 %v17566_v9, %v17565_v1  ;;  %v9610_v54 = vpop.f32.mrb[162].mxu0  ;;  %v17568_v43 = vpop.f32.mrb[170].mxu1  ;;  %v19924_v9 = vld [vmem:[%s23774_s2 + $0x180] ss:$12 sps:$4 sm:$0xff]  }
 0xd36   :  { %v9611_v32 = vpop.f32.mrb[163].mxu0  ;;  %v17569_v24 = vpop.f32.mrb[171].mxu1  ;;  %v19930_v54 = vld [vmem:[%s23774_s2 + $0x19c] ss:$12 sps:$4 sm:$0xff]   ;;  %v19928_v43 = vld [vmem:[%s23774_s2 + $0x198] ss:$12 sps:$4 sm:$0xff]  }
 0xd37   :  { %v19931_v32 = vld [vmem:[%s23774_s2 + $0x1a0] ss:$12 sps:$4 sm:$0xff]  }
 0xd53   :  { %v9746_v37 = vpop.f32.mrb[172].mxu1 }
 0xd54   :  { %v9747_v53 = vadd.f32 %v17561_v22, %v9746_v37  ;;  %v9748_v25 = vpop.f32.mrb[173].mxu1  ;;  %v19934_v37 = vld [vmem:[%s23774_s2 + $0x1b4] ss:$12 sps:$4 sm:$0xff]  }
 0xd55   :  { %v9749_v0 = vpop.f32.mrb[174].mxu1 }
 0xd56   :  { %v9750_v35 = vadd.f32 %v17564_v6, %v9749_v0  ;;  %v9751_v56 = vpop.f32.mrb[175].mxu1 }
 0xd5b   :  { %v9657_v47 = vpop.f32.mrb[164].mxu0  ;;  %v9754_v8 = vpop.f32.mrb[176].mxu1 }
 0xd5c   :  { %v9658_v16 = vadd.f32 %v9657_v47, %v9606_v59  ;;  %v9755_v10 = vadd.f32 %v17567_v45, %v9754_v8  ;;  %v9659_v33 = vpop.f32.mrb[165].mxu0  ;;  %v9756_v14 = vpop.f32.mrb[177].mxu1  ;;  %v19927_v45 = vld [vmem:[%s23774_s2 + $0x188] ss:$12 sps:$4 sm:$0xff]   ;;  %v19932_v47 = vld [vmem:[%s23774_s2 + $0x1b0] ss:$12 sps:$4 sm:$0xff]  }
 0xd5d   :  { %v9660_v3 = vadd.f32 %v9659_v33, %v9608_v51  ;;  %v9661_v34 = vpop.f32.mrb[166].mxu0  ;;  %v9757_v57 = vpop.f32.mrb[178].mxu1  ;;  %v19935_v8 = vld [vmem:[%s23774_s2 + $0x1b8] ss:$12 sps:$4 sm:$0xff]   ;;  %v19939_v33 = vld [vmem:[%s23774_s2 + $0x1d0] ss:$12 sps:$4 sm:$0xff]  }
 0xd5e   :  { %v9662_v21 = vpop.f32.mrb[167].mxu0  ;;  %v9758_v29 = vpop.f32.mrb[179].mxu1 }
 0xd74   :  { %v17587_v39 = vpop.f32.mrb[180].mxu1 }
 0xd75   :  { %v17588_v40 = vpop.f32.mrb[181].mxu1 }
 0xd76   :  { %v17589_v48 = vadd.f32 %v17588_v40, %v17587_v39  ;;  %v17590_v42 = vpop.f32.mrb[182].mxu1  ;;  %v19940_v39 = vld [vmem:[%s23774_s2 + $0x1e0] ss:$12 sps:$4 sm:$0xff]   ;;  %v19943_v40 = vld [vmem:[%s23774_s2 + $0x1e8] ss:$12 sps:$4 sm:$0xff]  }
 0xd77   :  { %v17591_v20 = vpop.f32.mrb[183].mxu1 }
 0xd78   :  { %v17592_v27 = vadd.f32 %v17591_v20, %v17590_v42  ;;  %v10319_v28 = vadd.f32 %v17589_v48, %v9747_v53  ;;  %v19946_v42 = vld [vmem:[%s23774_s2 + $0x1fc] ss:$12 sps:$4 sm:$0xff]  }
 0xd7a   :  { %v10322_v30 = vadd.f32 %v17592_v27, %v9750_v35 }
 0xd7c   :  { %v17593_v46 = vpop.f32.mrb[184].mxu1 }
 0xd7d   :  { %v17594_v49 = vpop.f32.mrb[185].mxu1 }
 0xd7e   :  { %v17595_v19 = vadd.f32 %v17594_v49, %v17593_v46  ;;  %v17596_v2 = vpop.f32.mrb[186].mxu1  ;;  %v19947_v46 = vld [vmem:[%s23774_s2 + $0x200] ss:$12 sps:$4 sm:$0xff]  }
 0xd7f   :  { %v17597_v62 = vpop.f32.mrb[187].mxu1 }
 0xd80   :  { %v10327_v7 = vadd.f32 %v17595_v19, %v9755_v10  ;;  %v19936_v10 = vld [vmem:[%s23774_s2 + $0x1c8] ss:$12 sps:$4 sm:$0xff]  }
 0xd81   :  { %v19950_v62 = vld [vmem:[%s23774_s2 + $0x214] ss:$12 sps:$4 sm:$0xff]  }
 0xd9b   :  { %v10226_v4 = vpop.f32.mrb[168].mxu0 }
 0xd9c   :  { %v22982_v17 = vadd.f32 %v10226_v4, %v9658_v16  ;;  %v10366_v52 = vpop.f32.mrb[188].mxu1  ;;  %v10228_v61 = vpop.f32.mrb[169].mxu0  ;;  %v19938_v16 = vld [vmem:[%s23774_s2 + $0x1cc] ss:$12 sps:$4 sm:$0xff]  }
 0xd9d   :  { %v22984_v41 = vadd.f32 %v10366_v52, %v10319_v28  ;;  %v22986_v50 = vadd.f32 %v10228_v61, %v9660_v3  ;;  %v10368_v63 = vpop.f32.mrb[189].mxu1  ;;  %v10230_v55 = vpop.f32.mrb[170].mxu0  ;;  %v19942_v3 = vld [vmem:[%s23774_s2 + $0x1e4] ss:$12 sps:$4 sm:$0xff]  }
 0xd9e   :  { %v10369_v23 = vpop.f32.mrb[190].mxu1  ;;  %v10231_v60 = vpop.f32.mrb[171].mxu0  ;;  %v19948_v61 = vld [vmem:[%s23774_s2 + $0x210] ss:$12 sps:$4 sm:$0xff]   ;;  %v19951_v63 = vld [vmem:[%s23774_s2 + $0x218] ss:$12 sps:$4 sm:$0xff]  }
 0xd9f   :  { %v22988_v5 = vadd.f32 %v10369_v23, %v10322_v30  ;;  %v10371_v22 = vpop.f32.mrb[191].mxu1  ;;  %v19944_v30 = vld [vmem:[%s23774_s2 + $0x1f8] ss:$12 sps:$4 sm:$0xff]   ;;  %v19952_v55 = vld [vmem:[%s23774_s2 + $0x228] ss:$12 sps:$4 sm:$0xff]  }
 0xda0   :  { %v19955_v23 = vld [vmem:[%s23774_s2 + $0x230] ss:$12 sps:$4 sm:$0xff]   ;;  %v19956_v22 = vld [vmem:[%s23774_s2 + $0x240] ss:$12 sps:$4 sm:$0xff]  }
 0xda1   :  { %v19958_v60 = vld [vmem:[%s23774_s2 + $0x244] ss:$12 sps:$4 sm:$0xff]  }
 0xda4   :  { %v10374_v38 = vpop.f32.mrb[192].mxu1 }
 0xda5   :  { %v22990_v18 = vadd.f32 %v10374_v38, %v10327_v7  ;;  %v10376_v58 = vpop.f32.mrb[193].mxu1  ;;  %v19959_v38 = vld [vmem:[%s23774_s2 + $0x248] ss:$12 sps:$4 sm:$0xff]  }
 0xda6   :  { %v10377_v36 = vpop.f32.mrb[194].mxu1  ;;  %v19962_v58 = vld [vmem:[%s23774_s2 + $0x25c] ss:$12 sps:$4 sm:$0xff]  }
 0xda7   :  { %v10378_v26 = vpop.f32.mrb[195].mxu1  ;;  %v19960_v36 = vld [vmem:[%s23774_s2 + $0x258] ss:$12 sps:$4 sm:$0xff]  }
 0xda8   :  { %v19963_v26 = vld [vmem:[%s23774_s2 + $0x260] ss:$12 sps:$4 sm:$0xff]  }
 0xdac   :  { %v10431_v13 = vpop.f32.mrb[196].mxu1 }
 0xdad   :  { %v10433_v6 = vpop.f32.mrb[197].mxu1 }
 0xdae   :  { %v10435_v31 = vpop.f32.mrb[198].mxu1 }
 0xdaf   :  { %v10499_v59 = vpack.c.bf16 %v10435_v31, %v10431_v13  ;;  %v10437_v1 = vpop.f32.mrb[199].mxu1  ;;  %v19968_v31 = vld [vmem:[%s23775_s4] ss:$12 sps:$4 sm:$0xff]  }
 0xdb0   :  { %v10500_v51 = vpack.c.bf16 %v10437_v1, %v10433_v6  ;;  %v19973_v1 = vld [vmem:[%s23775_s4 + $0x1c] ss:$12 sps:$4 sm:$0xff]  }
 0xdb2   :  { %11065 = vmatprep.mubr.bf16.mxu0 %v10500_v51  ;;  %11167 = vmatprep.mubr.bf16.mxu1 %v10500_v51  ;;  %v19971_v51 = vld [vmem:[%s23775_s4 + $0x18] ss:$12 sps:$4 sm:$0xff]  }
 0xdb3   :  { %11066 = vmatmul.mubr.bf16.vlgmr.msra.gmra.mrb[156].mxu0 %v10499_v59  ;;  %11168 = vmatmul.mubr.bf16.vlgmr.msra.gmra.mrb[212].mxu1 %v10499_v59  ;;  %v19970_v59 = vld [vmem:[%s23775_s4 + $0x4] ss:$12 sps:$4 sm:$0xff]  }
 0xdb4   :  { %11085 = vmatpush1.bf16.msra.mxu0 %v19924_v9  ;;  %11184 = vmatpush1.bf16.msra.mxu1 %v19927_v45  ;;  %v10441_v24 = vpop.f32.mrb[200].mxu1  ;;  %v19976_v9 = vld [vmem:[%s23775_s4 + $0x34] ss:$12 sps:$4 sm:$0xff]   ;;  %v19974_v45 = vld [vmem:[%s23775_s4 + $0x30] ss:$12 sps:$4 sm:$0xff]  }
 0xdb5   :  { %11086 = vmatprep.subr.bf16.mxu0 %v19930_v54  ;;  %11185 = vmatprep.subr.bf16.mxu1 %v20774_v44  ;;  %v10443_v53 = vpop.f32.mrb[201].mxu1  ;;  %v10503_v35 = vpack.c.bf16 %v10441_v24, %v10441_v24  ;;  %v19979_v54 = vld [vmem:[%s23775_s4 + $0x4c] ss:$12 sps:$4 sm:$0xff]  }
 0xdb6   :  { %v10504_v25 = vpack.c.bf16 %v10443_v53, %v10443_v53  ;;  %v10445_v0 = vpop.f32.mrb[202].mxu1  ;;  %v19980_v24 = vld [vmem:[%s23775_s4 + $0x60] ss:$12 sps:$4 sm:$0xff]   ;;  %v19983_v53 = vld [vmem:[%s23775_s4 + $0x78] ss:$12 sps:$4 sm:$0xff]  }
 0xdb7   :  { %v10446_v56 = vpop.f32.mrb[203].mxu1  ;;  %v19986_v0 = vld [vmem:[%s23775_s4 + $0x90] ss:$12 sps:$4 sm:$0xff]  }
 0xdb8   :  { %11087 = vmatpush1.bf16.msra.mxu0 %v19928_v43  ;;  %11186 = vmatpush1.bf16.msra.mxu1 %v19931_v32  ;;  %v19977_v43 = vld [vmem:[%s23775_s4 + $0x48] ss:$12 sps:$4 sm:$0xff]   ;;  %v19982_v32 = vld [vmem:[%s23775_s4 + $0x64] ss:$12 sps:$4 sm:$0xff]   ;;  %v19991_v56 = vld [vmem:[%s23775_s4 + $0xac] ss:$12 sps:$4 sm:$0xff]  }
 0xdb9   :  { %11088 = vmatprep.subr.bf16.mxu0 %v19934_v37  ;;  %11187 = vmatprep.subr.bf16.mxu1 %v20774_v44  ;;  %v19985_v37 = vld [vmem:[%s23775_s4 + $0x7c] ss:$12 sps:$4 sm:$0xff]  }
 0xdba   :  { %11075 = vmatprep.mubr.bf16.mxu0 %v10504_v25  ;;  %11175 = vmatprep.mubr.bf16.mxu1 %v10504_v25  ;;  %v19988_v25 = vld [vmem:[%s23775_s4 + $0x94] ss:$12 sps:$4 sm:$0xff]  }
 0xdbb   :  { %11076 = vmatmul.mubr.bf16.gmra.mrb[176].mxu0 %v10503_v35  ;;  %11176 = vmatmul.mubr.bf16.gmra.mrb[216].mxu1 %v10503_v35 }
 0xdbc   :  { %11089 = vmatpush1.bf16.msra.mxu0 %v19932_v47  ;;  %11188 = vmatpush1.bf16.msra.mxu1 %v19935_v8  ;;  %v10482_v14 = vpop.f32.mrb[204].mxu1 }
 0xdbd   :  { %11090 = vmatprep.subr.bf16.mxu0 %v19938_v16  ;;  %11189 = vmatprep.subr.bf16.mxu1 %v20774_v44  ;;  %v10484_v34 = vpop.f32.mrb[205].mxu1 }
 0xdbe   :  { %v10486_v57 = vpop.f32.mrb[206].mxu1 }
 0xdbf   :  { %v10501_v21 = vpack.c.bf16 %v10486_v57, %v10482_v14  ;;  %v10488_v29 = vpop.f32.mrb[207].mxu1 }
 0xdc0   :  { %11091 = vmatpush1.bf16.msra.mxu0 %v19936_v10  ;;  %11190 = vmatpush1.bf16.msra.mxu1 %v19939_v33  ;;  %v10502_v48 = vpack.c.bf16 %v10488_v29, %v10484_v34  ;;  %v19989_v33 = vld [vmem:[%s23775_s4 + $0xa8] ss:$12 sps:$4 sm:$0xff]   ;;  %v19992_v34 = vld [vmem:[%s23775_s4 + $0xc0] ss:$12 sps:$4 sm:$0xff]  }
 0xdc1   :  { %11092 = vmatprep.subr.bf16.mxu0 %v19942_v3  ;;  %11191 = vmatprep.subr.bf16.mxu1 %v20774_v44  ;;  %v19994_v3 = vld [vmem:[%s23775_s4 + $0xc4] ss:$12 sps:$4 sm:$0xff]  }
 0xdc2   :  { %17096 = vmatprep.mubr.msk.bf16.mxu0 %vm9555_vm8, %v10502_v48  ;;  %17098 = vmatprep.mubr.msk.bf16.mxu1 %vm9555_vm8, %v10502_v48 }
 0xdc3   :  { %v10277_v20 = vpop.f32.mrb[172].mxu0 }
 0xdc4   :  { %11093 = vmatpush1.bf16.msra.mxu0 %v19940_v39  ;;  %11192 = vmatpush1.bf16.msra.mxu1 %v19943_v40  ;;  %v23014_v27 = vadd.f32 %v10277_v20, %v22982_v17  ;;  %v10279_v28 = vpop.f32.mrb[173].mxu0  ;;  %v10492_v49 = vpop.f32.mrb[208].mxu1 }
 0xdc5   :  { %v23019_v19 = vadd.f32 %v10279_v28, %v22986_v50  ;;  %v10281_v2 = vpop.f32.mrb[174].mxu0  ;;  %11094 = vmatprep.subr.bf16.mxu0 %v19946_v42  ;;  %11193 = vmatprep.subr.bf16.mxu1 %v20774_v44  ;;  %v10494_v7 = vpop.f32.mrb[209].mxu1  ;;  %v19954_v50 = vld [vmem:[%s23774_s2 + $0x22c] ss:$12 sps:$4 sm:$0xff]   ;;  %v10505_v6 = vpack.c.bf16 %v10492_v49, %v10492_v49 }
 0xdc6   :  { %v10282_v4 = vpop.f32.mrb[175].mxu0  ;;  %v10496_v17 = vpop.f32.mrb[210].mxu1  ;;  %v10506_v13 = vpack.c.bf16 %v10494_v7, %v10494_v7 }
 0xdc7   :  { %v10497_v52 = vpop.f32.mrb[211].mxu1 }
 0xdc8   :  { %11095 = vmatpush1.bf16.msra.mxu0 %v19944_v30  ;;  %11194 = vmatpush1.bf16.msra.mxu1 %v19947_v46  ;;  %v8662_v30 = vld [vmem:[%s23776_s7] sm:$0x7] }
 0xdc9   :  { %11096 = vmatprep.subr.bf16.mxu0 %v19950_v62  ;;  %11195 = vmatprep.subr.bf16.mxu1 %v20774_v44  ;;  %v11244_v46 = vrot.slane %v8662_v30, %v21311_v11  ;;  %v11248_v49 = vrot.slane %v8662_v30, %v21316_v15  ;;  %v11252_v17 = vrot.slane %v8662_v30, %v21313_v12  ;;  %v19967_v30 = vld [vmem:[%s23778_s10 + $0x8] ss:$0 sps:$4 sm:$0x11]  }
 0xdcc   :  { %11097 = vmatpush1.bf16.msra.mxu0 %v19948_v61  ;;  %11196 = vmatpush1.bf16.msra.mxu1 %v19951_v63 }
 0xdcd   :  { %11098 = vmatprep.subr.bf16.mxu0 %v19954_v50  ;;  %11197 = vmatprep.subr.bf16.mxu1 %v20774_v44 }
 0xdd0   :  { %11099 = vmatpush1.bf16.msra.mxu0 %v19952_v55  ;;  %11198 = vmatpush1.bf16.msra.mxu1 %v19955_v23 }
 0xdd1   :  { %11100 = vmatprep.subr.bf16.mxu0 %v19958_v60  ;;  %11199 = vmatprep.subr.bf16.mxu1 %v20774_v44 }
 0xdd4   :  { %11101 = vmatpush1.bf16.msra.mxu0 %v19956_v22  ;;  %11200 = vmatpush1.bf16.msra.mxu1 %v19959_v38 }
 0xdd5   :  { %11102 = vmatprep.subr.bf16.mxu0 %v19962_v58  ;;  %11201 = vmatprep.subr.bf16.mxu1 %v20774_v44 }
 0xdd8   :  { %11103 = vmatpush1.bf16.msra.mxu0 %v19960_v36  ;;  %11202 = vmatpush1.bf16.msra.mxu1 %v19963_v26 }
 0xdd9   :  { %12070 = vmatprep.subr.bf16.mxu0 %v19970_v59 }
 0xddb   :  { %11117 = vmatmul.mubr.bf16.vlgmr.msra.gmra.mrb[156].mxu0 %v10501_v21  ;;  %11216 = vmatmul.mubr.bf16.vlgmr.msra.gmra.mrb[220].mxu1 %v10501_v21 }
 0xddc   :  { %17097 = vmatprep.mubr.msk.bf16.mxu0 %vm9555_vm8, %v10506_v13  ;;  %17099 = vmatprep.mubr.msk.bf16.mxu1 %vm9555_vm8, %v10506_v13 }
 0xddd   :  { %12071 = vmatpush1.bf16.msra.mxu0 %v19968_v31 }
 0xdde   :  { %12072 = vmatprep.subr.bf16.mxu0 %v19973_v1 }
 0xde1   :  { %12073 = vmatpush1.bf16.msra.mxu0 %v19971_v51 }
 0xde2   :  { %12074 = vmatprep.subr.bf16.mxu0 %v19976_v9 }
 0xde3   :  { %11127 = vmatmul.mubr.bf16.gmra.mrb[180].mxu0 %v10505_v6  ;;  %11224 = vmatmul.mubr.bf16.gmra.mrb[224].mxu1 %v10505_v6 }
 0xde4   :  { %11341 = vmatprep.mubr.bf16.mxu1 %v20774_v44 }
 0xde5   :  { %12075 = vmatpush1.bf16.msra.mxu0 %v19974_v45 }
 0xde6   :  { %12076 = vmatprep.subr.bf16.mxu0 %v19979_v54 }
 0xde9   :  { %12077 = vmatpush1.bf16.msra.mxu0 %v19977_v43 }
 0xdea   :  { %12078 = vmatprep.subr.bf16.mxu0 %v19982_v32 }
 0xded   :  { %12079 = vmatpush1.bf16.msra.mxu0 %v19980_v24 }
 0xdee   :  { %12080 = vmatprep.subr.bf16.mxu0 %v19985_v37 }
 0xdf1   :  { %12081 = vmatpush1.bf16.msra.mxu0 %v19983_v53 }
 0xdf2   :  { %12082 = vmatprep.subr.bf16.mxu0 %v19988_v25 }
 0xdf5   :  { %12083 = vmatpush1.bf16.msra.mxu0 %v19986_v0 }
 0xdf6   :  { %12084 = vmatprep.subr.bf16.mxu0 %v19991_v56 }
 0xdf9   :  { %12085 = vmatpush1.bf16.msra.mxu0 %v19989_v33 }
 0xdfa   :  { %12086 = vmatprep.subr.bf16.mxu0 %v19994_v3 }
 0xdfd   :  { %12087 = vmatpush1.bf16.msra.mxu0 %v19992_v34 }
 0xe86   :  { %v17615_v35 = vpop.f32.mrb[212].mxu1 }
 0xe87   :  { %v17616_v47 = vpop.f32.mrb[213].mxu1 }
 0xe88   :  { %v17617_v8 = vadd.f32 %v17616_v47, %v17615_v35  ;;  %v17618_v16 = vpop.f32.mrb[214].mxu1 }
 0xe89   :  { %v17619_v10 = vpop.f32.mrb[215].mxu1 }
 0xe8a   :  { %v17620_v14 = vadd.f32 %v17619_v10, %v17618_v16 }
 0xe8e   :  { %v11077_v57 = vpop.f32.mrb[176].mxu0  ;;  %v17621_v21 = vpop.f32.mrb[216].mxu1 }
 0xe8f   :  { %v11079_v29 = vpop.f32.mrb[177].mxu0  ;;  %v17622_v39 = vpop.f32.mrb[217].mxu1 }
 0xe90   :  { %v17623_v40 = vadd.f32 %v17622_v39, %v17621_v21  ;;  %v11081_v48 = vpop.f32.mrb[178].mxu0  ;;  %v17624_v42 = vpop.f32.mrb[218].mxu1 }
 0xe91   :  { %v11082_v20 = vpop.f32.mrb[179].mxu0  ;;  %v17625_v28 = vpop.f32.mrb[219].mxu1  ;;  %v19965_v42 = vld [vmem:[%s23777_s30 + $0x8] ss:$0 sps:$4 sm:$0x11]  }
 0xe92   :  { %v19966_v20 = vld [vmem:[%s23778_s10] sm:$0xff]   ;;  %v19995_v28 = vld [vmem:[%s23775_s4 + $0xc8] ss:$12 sps:$4 sm:$0xff]  }
 0xeae   :  { %v11118_v2 = vpop.f32.mrb[156].mxu0  ;;  %v11217_v62 = vpop.f32.mrb[220].mxu1 }
 0xeaf   :  { %v11256_v7 = vadd.f32 %v11244_v46, %v11118_v2  ;;  %v11218_v4 = vadd.f32 %v17617_v8, %v11217_v62  ;;  %v11120_v52 = vpop.f32.mrb[157].mxu0  ;;  %v11219_v61 = vpop.f32.mrb[221].mxu1  ;;  %v20000_v2 = vld [vmem:[%s23775_s4 + $0xe0] ss:$12 sps:$4 sm:$0xff]   ;;  %v19997_v62 = vld [vmem:[%s23775_s4 + $0xd8] ss:$12 sps:$4 sm:$0xff]  }
 0xeb0   :  { %v11257_v63 = vadd.f32 %v11248_v49, %v11120_v52  ;;  %v11122_v50 = vpop.f32.mrb[158].mxu0  ;;  %v11220_v55 = vpop.f32.mrb[222].mxu1  ;;  %v20005_v52 = vld [vmem:[%s23775_s4 + $0xf8] ss:$12 sps:$4 sm:$0xff]  }
 0xeb1   :  { %v11233_v23 = vadd.f32 %v11218_v4, %v22984_v41  ;;  %v11259_v60 = vadd.f32 %v11244_v46, %v11122_v50  ;;  %v11221_v22 = vadd.f32 %v17620_v14, %v11220_v55  ;;  %v11124_v38 = vpop.f32.mrb[159].mxu0  ;;  %v11222_v58 = vpop.f32.mrb[223].mxu1  ;;  %v11265_v26 = vmax.f32 %v11256_v7, 0.0  ;;  %v20001_v7 = vld [vmem:[%s23775_s4 + $0x20] ss:$12 sps:$4 sm:$0xff]  }
 0xeb2   :  { %v11260_v36 = vadd.f32 %v11248_v49, %v11124_v38  ;;  %v11266_v59 = vmax.f32 %v11257_v63, 0.0  ;;  %v20002_v4 = vld [vmem:[%s23775_s4 + $0xf0] ss:$12 sps:$4 sm:$0xff]   ;;  %v20006_v61 = vld [vmem:[%s23775_s4 + $0x38] ss:$12 sps:$4 sm:$0xff]  }
 0xeb3   :  { %v11258_v13 = vadd.f32 %v11252_v17, %v11233_v23  ;;  %v11268_v6 = vmax.f32 %v11259_v60, 0.0  ;;  %v11236_v31 = vadd.f32 %v11221_v22, %v22988_v5  ;;  %v20009_v63 = vld [vmem:[%s23775_s4 + $0x10c] ss:$12 sps:$4 sm:$0xff]   ;;  %v20010_v50 = vld [vmem:[%s23775_s4 + $0x110] ss:$12 sps:$4 sm:$0xff]  }
 0xeb4   :  { %v11269_v1 = vmax.f32 %v11260_v36, 0.0  ;;  %v20007_v55 = vld [vmem:[%s23775_s4 + $0x108] ss:$12 sps:$4 sm:$0xff]   ;;  %v20011_v23 = vld [vmem:[%s23775_s4 + $0x50] ss:$12 sps:$4 sm:$0xff]  }
 0xeb5   :  { %v23065_v51 = vpack.c.bf16 %v11268_v6, %v11265_v26  ;;  %v11261_v9 = vadd.f32 %v11252_v17, %v11236_v31  ;;  %v11267_v41 = vmax.f32 %v11258_v13, 0.0  ;;  %v20014_v60 = vld [vmem:[%s23775_s4 + $0x124] ss:$12 sps:$4 sm:$0xff]   ;;  %v20015_v22 = vld [vmem:[%s23775_s4 + $0x128] ss:$12 sps:$4 sm:$0xff]  }
 0xeb6   :  { %v23067_v45 = vpack.c.bf16 %v11269_v1, %v11266_v59  ;;  %v11128_v54 = vpop.f32.mrb[180].mxu0  ;;  %v11225_v43 = vpop.f32.mrb[224].mxu1  ;;  %v20012_v38 = vld [vmem:[%s23775_s4 + $0x120] ss:$12 sps:$4 sm:$0xff]   ;;  %v20016_v58 = vld [vmem:[%s23775_s4 + $0x68] ss:$12 sps:$4 sm:$0xff]  }
 0xeb7   :  { %v11270_v32 = vmax.f32 %v11261_v9, 0.0  ;;  %v11129_v24 = vadd.f32 %v11128_v54, %v11077_v57  ;;  %v11226_v37 = vadd.f32 %v17623_v40, %v11225_v43  ;;  %v11130_v53 = vpop.f32.mrb[181].mxu0  ;;  %v11227_v25 = vpop.f32.mrb[225].mxu1  ;;  %v19964_v40 = vld [vmem:[%s23777_s30] sm:$0xff]   ;;  %v20019_v36 = vld [vmem:[%s23775_s4 + $0x13c] ss:$12 sps:$4 sm:$0xff]  }
 0xeb8   :  { %v11131_v0 = vadd.f32 %v11130_v53, %v11079_v29  ;;  %v11132_v35 = vpop.f32.mrb[182].mxu0  ;;  %v11228_v56 = vpop.f32.mrb[226].mxu1  ;;  %11309 = vmatprep.subr.bf16.mxu1 %v23067_v45  ;;  %v20020_v26 = vld [vmem:[%s23775_s4 + $0x140] ss:$12 sps:$4 sm:$0xff]   ;;  %v20017_v13 = vld [vmem:[%s23775_s4 + $0x138] ss:$12 sps:$4 sm:$0xff]  }
 0xeb9   :  { %v23070_v5 = vpack.c.bf16 %v11270_v32, %v11267_v41  ;;  %v11237_v47 = vadd.f32 %v11129_v24, %v23014_v27  ;;  %v11239_v8 = vadd.f32 %v11226_v37, %v22990_v18  ;;  %v11133_v16 = vpop.f32.mrb[183].mxu0  ;;  %v11229_v10 = vpop.f32.mrb[227].mxu1  ;;  %11310 = vmatpush1.bf16.msra.mxu1 %v23065_v51  ;;  %v20021_v6 = vld [vmem:[%s23775_s4 + $0x80] ss:$12 sps:$4 sm:$0xff]   ;;  %v20022_v31 = vld [vmem:[%s23775_s4 + $0x150] ss:$12 sps:$4 sm:$0xff]  }
 0xeba   :  { %v11238_v33 = vadd.f32 %v11131_v0, %v23019_v19  ;;  %v20024_v59 = vld [vmem:[%s23775_s4 + $0x154] ss:$12 sps:$4 sm:$0xff]   ;;  %v20025_v1 = vld [vmem:[%s23775_s4 + $0x158] ss:$12 sps:$4 sm:$0xff]   ;;  %v20030_v43 = vld [vmem:[%s23775_s4 + $0x170] ss:$12 sps:$4 sm:$0xff]  }
 0xebb   :  { %v11262_v14 = vadd.f32 %v11244_v46, %v11237_v47  ;;  %v11264_v57 = vadd.f32 %v11252_v17, %v11239_v8  ;;  %v19996_v46 = vld [vmem:[%s23775_s4 + $0x8] ss:$12 sps:$4 sm:$0xff]   ;;  %v20026_v9 = vld [vmem:[%s23775_s4 + $0x98] ss:$12 sps:$4 sm:$0xff]   ;;  %v20031_v32 = vld [vmem:[%s23775_s4 + $0xb0] ss:$12 sps:$4 sm:$0xff]  }
 0xebc   :  { %v11263_v3 = vadd.f32 %v11248_v49, %v11238_v33  ;;  %v19999_v49 = vld [vmem:[%s23775_s4 + $0xdc] ss:$12 sps:$4 sm:$0xff]   ;;  %v20004_v17 = vld [vmem:[%s23775_s4 + $0xf4] ss:$12 sps:$4 sm:$0xff]   ;;  %v20029_v54 = vld [vmem:[%s23775_s4 + $0x16c] ss:$12 sps:$4 sm:$0xff]  }
 0xebd   :  { %v11271_v34 = vmax.f32 %v11262_v14, 0.0  ;;  %v11273_v18 = vmax.f32 %v11264_v57, 0.0  ;;  %12088 = vmatprep.subr.bf16.mxu0 %v19999_v49  ;;  %v20027_v41 = vld [vmem:[%s23775_s4 + $0x168] ss:$12 sps:$4 sm:$0xff]   ;;  %v20034_v24 = vld [vmem:[%s23775_s4 + $0x184] ss:$12 sps:$4 sm:$0xff]  }
 0xebe   :  { %v11272_v21 = vmax.f32 %v11263_v3, 0.0  ;;  %12089 = vmatpush1.bf16.msra.mxu0 %v19997_v62  ;;  %v20035_v37 = vld [vmem:[%s23775_s4 + $0x188] ss:$12 sps:$4 sm:$0xff]   ;;  %v20039_v49 = vld [vmem:[%s23775_s4 + $0x1a0] ss:$12 sps:$4 sm:$0xff]  }
 0xebf   :  { %v11277_v29 = vpack.c.bf16 %v11271_v34, %v11271_v34  ;;  %v23086_v19 = vpack.c.bf16 %v11273_v18, %v11273_v18  ;;  %12090 = vmatprep.subr.bf16.mxu0 %v20004_v17  ;;  %v20043_v17 = vld [vmem:[%s23775_s4 + $0x1b8] ss:$12 sps:$4 sm:$0xff]  }
 0xec0   :  { %v23076_v39 = vpack.c.bf16 %v11272_v21, %v11272_v21 }
 0xec1   :  { %v23079_v27 = vsel %vm11299_vm9, %v11277_v29, 0  ;;  %v23095_v48 = vsel %vm11299_vm9, %v23086_v19, 0 }
 0xec2   :  { %17102 = vmatprep.subr.msk.bf16.mxu1 %vm11299_vm9, %v23076_v39  ;;  %12091 = vmatpush1.bf16.msra.mxu0 %v20002_v4  ;;  %v20042_v4 = vld [vmem:[%s23775_s4 + $0x1b4] ss:$12 sps:$4 sm:$0xff]  }
 0xec3   :  { %11312 = vmatpush1.bf16.msra.mxu1 %v23079_v27  ;;  %12092 = vmatprep.subr.bf16.mxu0 %v20009_v63 }
 0xec4   :  { %17900 = vmatprep.subr.bf16.mxu1 %v23070_v5 }
 0xec6   :  { %17103 = vmatmul.mubr.msk.bf16.vlgmr.msra.gmra.mrb[228].mxu1 %vm11292_vm10, %v19964_v40  ;;  %12093 = vmatpush1.bf16.msra.mxu0 %v20007_v55  ;;  %v20040_v55 = vld [vmem:[%s23775_s4 + $0x1b0] ss:$12 sps:$4 sm:$0xff]  }
 0xec7   :  { %17901 = vmatpush3.bf16.msra.mxu1 %v23070_v5  ;;  %11351 = vmatprep.mubr.bf16.mxu1 %v20774_v44 }
 0xec8   :  { %18390 = vmatprep.subr.msk.bf16.mxu1 %vm11299_vm9, %v23086_v19  ;;  %12094 = vmatprep.subr.bf16.mxu0 %v20014_v60  ;;  %v20047_v60 = vld [vmem:[%s23775_s4 + $0x1d0] ss:$12 sps:$4 sm:$0xff]  }
 0xeca   :  { %12095 = vmatpush1.bf16.msra.mxu0 %v20012_v38 }
 0xecb   :  { %17903 = vmatpush3.bf16.msra.mxu1 %v23095_v48  ;;  %12096 = vmatprep.subr.bf16.mxu0 %v20019_v36  ;;  %v20050_v36 = vld [vmem:[%s23775_s4 + $0x1e4] ss:$12 sps:$4 sm:$0xff]  }
 0xecc   :  { %11519 = vmatprep.subr.bf16.mxu1 %v23067_v45 }
 0xece   :  { %17104 = vmatmul.mubr.msk.bf16.gmra.mrb[232].mxu1 %vm11292_vm10, %v19965_v42  ;;  %12097 = vmatpush1.bf16.msra.mxu0 %v20017_v13 }
 0xecf   :  { %17904 = vmatprep.mubr.msk.bf16.mxu1 %vm11292_vm10, %v19964_v40  ;;  %12098 = vmatprep.subr.bf16.mxu0 %v20024_v59 }
 0xed2   :  { %12099 = vmatpush1.bf16.msra.mxu0 %v20022_v31  ;;  %v20048_v31 = vld [vmem:[%s23775_s4 + $0x1e0] ss:$12 sps:$4 sm:$0xff]  }
 0xed3   :  { %12100 = vmatprep.subr.bf16.mxu0 %v20029_v54  ;;  %v20052_v54 = vld [vmem:[%s23775_s4 + $0x1f8] ss:$12 sps:$4 sm:$0xff]  }
 0xed6   :  { %17905 = vmatmul.mubr.msk.bf16.vlgmr.msra.gmra.mrb[236].mxu1 %vm11292_vm10, %v19965_v42  ;;  %12101 = vmatpush1.bf16.msra.mxu0 %v20027_v41  ;;  %v20059_v41 = vld [vmem:[%s23779_s19 + $0xc8] ss:$12 sps:$4 sm:$0xff]  }
 0xed7   :  { %11520 = vmatpush1.bf16.msra.mxu1 %v23065_v51  ;;  %11551 = vmatprep.mubr.bf16.mxu1 %v20774_v44 }
 0xed8   :  { %17109 = vmatprep.subr.msk.bf16.mxu1 %vm11299_vm9, %v23076_v39  ;;  %12121 = vmatprep.subr.bf16.mxu0 %v20034_v24  ;;  %v20060_v24 = vld [vmem:[%s23779_s19 + $0x8] ss:$12 sps:$4 sm:$0xff]  }
 0xedb   :  { %11522 = vmatpush1.bf16.msra.mxu1 %v23079_v27 }
 0xedc   :  { %17908 = vmatprep.subr.bf16.mxu1 %v23070_v5 }
 0xede   :  { %17110 = vmatmul.mubr.msk.bf16.vlgmr.msra.gmra.mrb[240].mxu1 %vm11292_vm10, %v19966_v20 }
 0xedf   :  { %17909 = vmatpush3.bf16.msra.mxu1 %v23070_v5  ;;  %11561 = vmatprep.mubr.bf16.mxu1 %v20774_v44 }
 0xee0   :  { %18391 = vmatprep.subr.msk.bf16.mxu1 %vm11299_vm9, %v23086_v19 }
 0xee3   :  { %17911 = vmatpush3.bf16.msra.mxu1 %v23095_v48 }
 0xee4   :  { %17635 = vmatprep.subr.bf16.mxu1 %v19995_v28 }
 0xee6   :  { %17111 = vmatmul.mubr.msk.bf16.gmra.mrb[244].mxu1 %vm11292_vm10, %v19967_v30 }
 0xee7   :  { %17912 = vmatprep.mubr.msk.bf16.mxu1 %vm11292_vm10, %v19966_v20 }
 0xeee   :  { %17913 = vmatmul.mubr.msk.bf16.vlgmr.msra.gmra.mrb[248].mxu1 %vm11292_vm10, %v19967_v30  ;;  %v20032_v30 = vld [vmem:[%s23775_s4 + $0x180] ss:$12 sps:$4 sm:$0xff]  }
 0xeef   :  { %17636 = vmatpush3.bf16.msra.mxu1 %v19996_v46  ;;  %v20038_v46 = vld [vmem:[%s23775_s4 + $0x19c] ss:$12 sps:$4 sm:$0xff]  }
 0xef0   :  { %17637 = vmatprep.subr.bf16.mxu1 %v20000_v2  ;;  %v20036_v2 = vld [vmem:[%s23775_s4 + $0x198] ss:$12 sps:$4 sm:$0xff]  }
 0xef3   :  { %17638 = vmatpush3.bf16.msra.mxu1 %v20001_v7 }
 0xef4   :  { %17639 = vmatprep.subr.bf16.mxu1 %v20005_v52 }
 0xef7   :  { %17640 = vmatpush3.bf16.msra.mxu1 %v20006_v61 }
 0xef8   :  { %17641 = vmatprep.subr.bf16.mxu1 %v20010_v50 }
 0xefb   :  { %17642 = vmatpush3.bf16.msra.mxu1 %v20011_v23  ;;  %v20046_v23 = vld [vmem:[%s23775_s4 + $0x1cc] ss:$12 sps:$4 sm:$0xff]  }
 0xefc   :  { %17643 = vmatprep.subr.bf16.mxu1 %v20015_v22  ;;  %v20044_v22 = vld [vmem:[%s23775_s4 + $0x1c8] ss:$12 sps:$4 sm:$0xff]  }
 0xeff   :  { %17644 = vmatpush3.bf16.msra.mxu1 %v20016_v58 }
 0xf00   :  { %17645 = vmatprep.subr.bf16.mxu1 %v20020_v26  ;;  %v20051_v26 = vld [vmem:[%s23775_s4 + $0x1e8] ss:$12 sps:$4 sm:$0xff]  }
 0xf03   :  { %17646 = vmatpush3.bf16.msra.mxu1 %v20021_v6 }
 0xf04   :  { %17647 = vmatprep.subr.bf16.mxu1 %v20025_v1  ;;  %v20054_v1 = vld [vmem:[%s23775_s4 + $0x1fc] ss:$12 sps:$4 sm:$0xff]  }
 0xf07   :  { %17648 = vmatpush3.bf16.msra.mxu1 %v20026_v9  ;;  %v20055_v9 = vld [vmem:[%s23775_s4 + $0x200] ss:$12 sps:$4 sm:$0xff]  }
 0xf08   :  { %17649 = vmatprep.subr.bf16.mxu1 %v20030_v43  ;;  %v20058_v43 = vld [vmem:[%s23779_s19 + $0x4] ss:$12 sps:$4 sm:$0xff]  }
 0xf0b   :  { %17650 = vmatpush3.bf16.msra.mxu1 %v20031_v32  ;;  %v20056_v32 = vld [vmem:[%s23779_s19] ss:$12 sps:$4 sm:$0xff]  }
 0xf0c   :  { %17916 = vmatprep.subr.bf16.mxu1 %v20035_v37 }
 0xf99   :  { %v11343_v53 = vpop.f32.mrb[228].mxu1 }
 0xf9a   :  { %v11345_v25 = vpop.f32.mrb[229].mxu1 }
 0xf9b   :  { %v11347_v0 = vpop.f32.mrb[230].mxu1 }
 0xf9c   :  { %v23152_v35 = vpack.c.bf16 %v11347_v0, %v11343_v53  ;;  %v11349_v56 = vpop.f32.mrb[231].mxu1  ;;  %v20063_v53 = vld [vmem:[%s23779_s19 + $0x1c] ss:$12 sps:$4 sm:$0xff]   ;;  %v20061_v0 = vld [vmem:[%s23779_s19 + $0x18] ss:$12 sps:$4 sm:$0xff]  }
 0xf9d   :  { %v23154_v47 = vpack.c.bf16 %v11349_v56, %v11345_v25  ;;  %v20064_v25 = vld [vmem:[%s23779_s19 + $0xe0] ss:$12 sps:$4 sm:$0xff]  }
 0xf9e   :  { %v20065_v56 = vld [vmem:[%s23779_s19 + $0x20] ss:$12 sps:$4 sm:$0xff]  }
 0xfa1   :  { %v23156_v8 = vpop.f32.mrb[232].mxu1 }
 0xfa2   :  { %v23158_v16 = vpop.f32.mrb[233].mxu1 }
 0xfa3   :  { %v11357_v10 = vpop.f32.mrb[234].mxu1 }
 0xfa4   :  { %v11358_v33 = vpop.f32.mrb[235].mxu1  ;;  %v20068_v10 = vld [vmem:[%s23779_s19 + $0x34] ss:$12 sps:$4 sm:$0xff]  }
 0xfa5   :  { %v20069_v33 = vld [vmem:[%s23779_s19 + $0xf8] ss:$12 sps:$4 sm:$0xff]  }
 0xfa9   :  { %v23160_v14 = vpop.f32.mrb[236].mxu1 }
 0xfaa   :  { %v11394_v3 = vpop.f32.mrb[237].mxu1 }
 0xfab   :  { %v17907_v34 = vpop.f32.mrb[238].mxu1 }
 0xfac   :  { %v11397_v57 = vpop.f32.mrb[239].mxu1  ;;  %v20070_v34 = vld [vmem:[%s23779_s19 + $0x38] ss:$12 sps:$4 sm:$0xff]  }
 0xfad   :  { %v23162_v21 = vpack.c.bf16 %v11397_v57, %v11394_v3  ;;  %v20066_v3 = vld [vmem:[%s23779_s19 + $0x30] ss:$12 sps:$4 sm:$0xff]   ;;  %v20073_v57 = vld [vmem:[%s23779_s19 + $0x4c] ss:$12 sps:$4 sm:$0xff]  }
 0xfb1   :  { %v11553_v29 = vpop.f32.mrb[240].mxu1 }
 0xfb2   :  { %v11555_v18 = vpop.f32.mrb[241].mxu1 }
 0xfb3   :  { %v11557_v40 = vpop.f32.mrb[242].mxu1 }
 0xfb4   :  { %v11618_v42 = vpack.c.bf16 %v11557_v40, %v11553_v29  ;;  %v11559_v20 = vpop.f32.mrb[243].mxu1  ;;  %v20074_v29 = vld [vmem:[%s23779_s19 + $0x110] ss:$12 sps:$4 sm:$0xff]  }
 0xfb5   :  { %v11619_v28 = vpack.c.bf16 %v11559_v20, %v11555_v18  ;;  %v20071_v18 = vld [vmem:[%s23779_s19 + $0x48] ss:$12 sps:$4 sm:$0xff]   ;;  %v20075_v40 = vld [vmem:[%s23779_s19 + $0x50] ss:$12 sps:$4 sm:$0xff]  }
 0xfb6   :  { %v20079_v20 = vld [vmem:[%s23779_s19 + $0x128] ss:$12 sps:$4 sm:$0xff]  }
 0xfb7   :  { %12102 = vmatprep.mubr.bf16.mxu0 %v11619_v28  ;;  %12204 = vmatprep.mubr.bf16.mxu1 %v11619_v28  ;;  %v20076_v28 = vld [vmem:[%s23779_s19 + $0x60] ss:$12 sps:$4 sm:$0xff]  }
 0xfb8   :  { %12103 = vmatmul.mubr.bf16.vlgmr.msra.gmra.mrb[184].mxu0 %v11618_v42  ;;  %12205 = vmatmul.mubr.bf16.vlgmr.msra.gmra.mrb[252].mxu1 %v11618_v42  ;;  %v20078_v42 = vld [vmem:[%s23779_s19 + $0x64] ss:$12 sps:$4 sm:$0xff]  }
 0xfb9   :  { %12122 = vmatpush1.bf16.msra.mxu0 %v20032_v30  ;;  %17917 = vmatpush3.bf16.msra.mxu1 %v20035_v37  ;;  %v11563_v62 = vpop.f32.mrb[244].mxu1  ;;  %v20080_v30 = vld [vmem:[%s23779_s19 + $0x68] ss:$12 sps:$4 sm:$0xff]  }
 0xfba   :  { %12123 = vmatprep.subr.bf16.mxu0 %v20038_v46  ;;  %17918 = vmatprep.subr.bf16.mxu1 %v20039_v49  ;;  %v11565_v7 = vpop.f32.mrb[245].mxu1  ;;  %v11621_v63 = vpack.c.bf16 %v11563_v62, %v11563_v62  ;;  %v20083_v46 = vld [vmem:[%s23779_s19 + $0x7c] ss:$12 sps:$4 sm:$0xff]   ;;  %v20088_v62 = vld [vmem:[%s23779_s19 + $0x94] ss:$12 sps:$4 sm:$0xff]  }
 0xfbb   :  { %v11622_v52 = vpack.c.bf16 %v11565_v7, %v11565_v7  ;;  %v11567_v61 = vpop.f32.mrb[246].mxu1  ;;  %v20089_v7 = vld [vmem:[%s23779_s19 + $0x158] ss:$12 sps:$4 sm:$0xff]  }
 0xfbc   :  { %v11568_v50 = vpop.f32.mrb[247].mxu1  ;;  %v20094_v61 = vld [vmem:[%s23779_s19 + $0x170] ss:$12 sps:$4 sm:$0xff]  }
 0xfbd   :  { %12124 = vmatpush1.bf16.msra.mxu0 %v20036_v2  ;;  %17919 = vmatpush3.bf16.msra.mxu1 %v20039_v49  ;;  %v20081_v49 = vld [vmem:[%s23779_s19 + $0x78] ss:$12 sps:$4 sm:$0xff]   ;;  %v20085_v2 = vld [vmem:[%s23779_s19 + $0x80] ss:$12 sps:$4 sm:$0xff]   ;;  %v20095_v50 = vld [vmem:[%s23779_s19 + $0xb0] ss:$12 sps:$4 sm:$0xff]  }
 0xfbe   :  { %12125 = vmatprep.subr.bf16.mxu0 %v20042_v4  ;;  %17920 = vmatprep.subr.bf16.mxu1 %v20043_v17  ;;  %v20086_v4 = vld [vmem:[%s23779_s19 + $0x90] ss:$12 sps:$4 sm:$0xff]  }
 0xfbf   :  { %12112 = vmatprep.mubr.bf16.mxu0 %v11622_v52  ;;  %12212 = vmatprep.mubr.bf16.mxu1 %v11622_v52  ;;  %v20093_v52 = vld [vmem:[%s23779_s19 + $0xac] ss:$12 sps:$4 sm:$0xff]  }
 0xfc0   :  { %12113 = vmatmul.mubr.bf16.gmra.mrb[188].mxu0 %v11621_v63  ;;  %12213 = vmatmul.mubr.bf16.gmra.mrb[0].mxu1 %v11621_v63  ;;  %v20091_v63 = vld [vmem:[%s23779_s19 + $0xa8] ss:$12 sps:$4 sm:$0xff]  }
 0xfc1   :  { %12126 = vmatpush1.bf16.msra.mxu0 %v20040_v55  ;;  %17921 = vmatpush3.bf16.msra.mxu1 %v20043_v17  ;;  %v17914_v38 = vpop.f32.mrb[248].mxu1  ;;  %v20090_v17 = vld [vmem:[%s23779_s19 + $0x98] ss:$12 sps:$4 sm:$0xff]  }
 0xfc2   :  { %12127 = vmatprep.subr.bf16.mxu0 %v20046_v23  ;;  %17922 = vmatprep.subr.bf16.mxu1 %v20047_v60  ;;  %v11604_v58 = vpop.f32.mrb[249].mxu1  ;;  %v11623_v37 = vpack.c.bf16 %v17914_v38, %v17914_v38  ;;  %v20098_v55 = vld [vmem:[%s23779_s19 + $0xc4] ss:$12 sps:$4 sm:$0xff]   ;;  %v20099_v23 = vld [vmem:[%s23779_s19 + $0x188] ss:$12 sps:$4 sm:$0xff]  }
 0xfc3   :  { %v17915_v13 = vpop.f32.mrb[250].mxu1  ;;  %12153 = vmatprep.mubr.bf16.mxu0 %v20774_v44  ;;  %v20103_v38 = vld [vmem:[%s23779_s19 + $0x1a0] ss:$12 sps:$4 sm:$0xff]  }
 0xfc4   :  { %v11607_v6 = vpop.f32.mrb[251].mxu1  ;;  %v20107_v13 = vld [vmem:[%s23779_s19 + $0x1b8] ss:$12 sps:$4 sm:$0xff]  }
 0xfc5   :  { %12128 = vmatpush1.bf16.msra.mxu0 %v20044_v22  ;;  %17923 = vmatpush3.bf16.msra.mxu1 %v20047_v60  ;;  %v11620_v59 = vpack.c.bf16 %v11607_v6, %v11604_v58  ;;  %v20096_v60 = vld [vmem:[%s23779_s19 + $0xc0] ss:$12 sps:$4 sm:$0xff]   ;;  %v20102_v22 = vld [vmem:[%s23779_s19 + $0xdc] ss:$12 sps:$4 sm:$0xff]   ;;  %v23227_v58 = vpack.c.bf16 %v23158_v16, %v23158_v16  ;;  %v23237_v16 = vpack.c.bf16 %v23156_v8, %v23156_v8 }
 0xfc6   :  { %12129 = vmatprep.subr.bf16.mxu0 %v20050_v36  ;;  %17924 = vmatprep.subr.bf16.mxu1 %v20051_v26  ;;  %v20100_v36 = vld [vmem:[%s23779_s19 + $0xd8] ss:$12 sps:$4 sm:$0xff]   ;;  %v20104_v6 = vld [vmem:[%s23779_s19 + $0xf0] ss:$12 sps:$4 sm:$0xff]   ;;  %v20115_v8 = vld [vmem:[%s23779_s19 + $0x1e8] ss:$12 sps:$4 sm:$0xff]  }
 0xfc7   :  { %17928 = vmatprep.mubr.msk.bf16.mxu1 %vm748_vm1, %v11620_v59 }
 0xfc9   :  { %12130 = vmatpush1.bf16.msra.mxu0 %v20048_v31  ;;  %17925 = vmatpush3.bf16.msra.mxu1 %v20051_v26  ;;  %v20106_v26 = vld [vmem:[%s23779_s19 + $0xf4] ss:$12 sps:$4 sm:$0xff]   ;;  %v20110_v31 = vld [vmem:[%s23779_s19 + $0x10c] ss:$12 sps:$4 sm:$0xff]  }
 0xfca   :  { %12131 = vmatprep.subr.bf16.mxu0 %v20054_v1  ;;  %17926 = vmatprep.subr.bf16.mxu1 %v20055_v9  ;;  %v20108_v1 = vld [vmem:[%s23779_s19 + $0x108] ss:$12 sps:$4 sm:$0xff]  }
 0xfcd   :  { %12132 = vmatpush1.bf16.msra.mxu0 %v20052_v54  ;;  %17927 = vmatpush3.bf16.msra.mxu1 %v20055_v9  ;;  %v20114_v9 = vld [vmem:[%s23779_s19 + $0x124] ss:$12 sps:$4 sm:$0xff]   ;;  %v20112_v54 = vld [vmem:[%s23779_s19 + $0x120] ss:$12 sps:$4 sm:$0xff]  }
 0xfce   :  { %12626 = vmatprep.subr.bf16.mxu0 %v20058_v43  ;;  %17671 = vmatprep.subr.bf16.mxu1 %v20059_v41  ;;  %v20118_v43 = vld [vmem:[%s23779_s19 + $0x13c] ss:$12 sps:$4 sm:$0xff]   ;;  %v20119_v41 = vld [vmem:[%s23779_s19 + $0x200] ss:$12 sps:$4 sm:$0xff]  }
 0xfd0   :  { %17180 = vmatmul.mubr.msk.bf16.vlgmr.msra.gmra.mrb[184].mxu0 %vm748_vm1, %v11620_v59  ;;  %17929 = vmatmul.mubr.msk.bf16.vlgmr.msra.gmra.mrb[4].mxu1 %vm748_vm1, %v11623_v37  ;;  %v20111_v59 = vld [vmem:[%s23779_s19 + $0x1d0] ss:$12 sps:$4 sm:$0xff]  }
 0xfd1   :  { %12627 = vmatpush1.bf16.msra.mxu0 %v20056_v32  ;;  %17672 = vmatpush3.bf16.msra.mxu1 %v20060_v24  ;;  %v20116_v32 = vld [vmem:[%s23779_s19 + $0x138] ss:$12 sps:$4 sm:$0xff]   ;;  %v20122_v24 = vld [vmem:[%s23779_s19 + $0x154] ss:$12 sps:$4 sm:$0xff]  }
 0xfd2   :  { %12760 = vmatprep.mubr.bf16.mxu1 %v23154_v47  ;;  %12628 = vmatprep.subr.bf16.mxu0 %v20063_v53  ;;  %v20125_v53 = vld [vmem:[%s23779_s19 + $0x16c] ss:$12 sps:$4 sm:$0xff]  }
 0xfd3   :  { %17673 = vmatprep.subr.bf16.mxu1 %v20064_v25  ;;  %12163 = vmatprep.mubr.bf16.mxu0 %v20774_v44  ;;  %v23256_v25 = vpack.c.bf16 %v23160_v14, %v23160_v14  ;;  %v20129_v14 = vld [vmem:[%s23780_s0] sm:$0xff]  }
 0xfd5   :  { %12629 = vmatpush1.bf16.msra.mxu0 %v20061_v0  ;;  %17674 = vmatpush3.bf16.msra.mxu1 %v20065_v56  ;;  %v20123_v0 = vld [vmem:[%s23779_s19 + $0x168] ss:$12 sps:$4 sm:$0xff]   ;;  %v20128_v56 = vld [vmem:[%s23779_s19 + $0x184] ss:$12 sps:$4 sm:$0xff]  }
 0xfd6   :  { %12630 = vmatprep.subr.bf16.mxu0 %v20068_v10  ;;  %17675 = vmatprep.subr.bf16.mxu1 %v20069_v33  ;;  %v20136_v10 = vld [vmem:[%s23780_s0 + $0x8] ss:$0 sps:$4 sm:$0x11]   ;;  %v20142_v33 = vld [vmem:[%s23779_s19 + $0x1e4] ss:$12 sps:$4 sm:$0xff]  }
 0xfd8   :  { %17181 = vmatmul.mubr.msk.bf16.gmra.mrb[192].mxu0 %vm748_vm1, %v11623_v37  ;;  %v20120_v37 = vld [vmem:[%s23779_s19 + $0x150] ss:$12 sps:$4 sm:$0xff]  }
 0xfd9   :  { %12631 = vmatpush1.bf16.msra.mxu0 %v20066_v3  ;;  %12658 = vmatprep.mubr.bf16.mxu0 %v23154_v47  ;;  %v20084_v47 = vld [vmem:[%s23779_s19 + $0x140] ss:$12 sps:$4 sm:$0xff]   ;;  %v20145_v3 = vld [vmem:[%s23779_s19 + $0x1fc] ss:$12 sps:$4 sm:$0xff]  }
 0xfda   :  { %17676 = vmatpush3.bf16.msra.mxu1 %v20070_v34  ;;  %12632 = vmatprep.subr.bf16.mxu0 %v20073_v57  ;;  %v20143_v34 = vld [vmem:[%s23779_s19 + $0x1f8] ss:$12 sps:$4 sm:$0xff]   ;;  %v20146_v57 = vld [vmem:[%s23781_s11] ss:$12 sps:$4 sm:$0xff]  }
 0xfdb   :  { %17677 = vmatprep.subr.bf16.mxu1 %v20074_v29  ;;  %v20148_v29 = vld [vmem:[%s23781_s11 + $0x4] ss:$12 sps:$4 sm:$0xff]  }
 0xfdd   :  { %12633 = vmatpush1.bf16.msra.mxu0 %v20071_v18  ;;  %v20151_v18 = vld [vmem:[%s23781_s11 + $0x1c] ss:$12 sps:$4 sm:$0xff]  }
 0xfde   :  { %17678 = vmatpush3.bf16.msra.mxu1 %v20075_v40  ;;  %12634 = vmatprep.subr.bf16.mxu0 %v20078_v42  ;;  %v20149_v40 = vld [vmem:[%s23781_s11 + $0x18] ss:$12 sps:$4 sm:$0xff]   ;;  %v20154_v42 = vld [vmem:[%s23781_s11 + $0x34] ss:$12 sps:$4 sm:$0xff]  }
 0xfdf   :  { %17679 = vmatprep.subr.bf16.mxu1 %v20079_v20  ;;  %v20152_v20 = vld [vmem:[%s23781_s11 + $0x30] ss:$12 sps:$4 sm:$0xff]  }
 0xfe1   :  { %12635 = vmatpush1.bf16.msra.mxu0 %v20076_v28  ;;  %v20157_v28 = vld [vmem:[%s23781_s11 + $0x4c] ss:$12 sps:$4 sm:$0xff]  }
 0xfe2   :  { %17680 = vmatpush3.bf16.msra.mxu1 %v20080_v30  ;;  %12636 = vmatprep.subr.bf16.mxu0 %v20083_v46  ;;  %v20160_v30 = vld [vmem:[%s23781_s11 + $0x64] ss:$12 sps:$4 sm:$0xff]   ;;  %v20158_v46 = vld [vmem:[%s23781_s11 + $0x60] ss:$12 sps:$4 sm:$0xff]  }
 0xfe3   :  { %17681 = vmatprep.subr.bf16.mxu1 %v20084_v47  ;;  %v20163_v47 = vld [vmem:[%s23781_s11 + $0x7c] ss:$12 sps:$4 sm:$0xff]  }
 0xfe5   :  { %12637 = vmatpush1.bf16.msra.mxu0 %v20081_v49  ;;  %v20161_v49 = vld [vmem:[%s23781_s11 + $0x78] ss:$12 sps:$4 sm:$0xff]  }
 0xfe6   :  { %17682 = vmatpush3.bf16.msra.mxu1 %v20085_v2  ;;  %12638 = vmatprep.subr.bf16.mxu0 %v20088_v62  ;;  %v20166_v2 = vld [vmem:[%s23781_s11 + $0x94] ss:$12 sps:$4 sm:$0xff]   ;;  %v20164_v62 = vld [vmem:[%s23781_s11 + $0x90] ss:$12 sps:$4 sm:$0xff]  }
 0xfe7   :  { %17683 = vmatprep.subr.bf16.mxu1 %v20089_v7  ;;  %v20169_v7 = vld [vmem:[%s23781_s11 + $0xac] ss:$12 sps:$4 sm:$0xff]  }
 0xfe9   :  { %12639 = vmatpush1.bf16.msra.mxu0 %v20086_v4  ;;  %v20167_v4 = vld [vmem:[%s23781_s11 + $0xa8] ss:$12 sps:$4 sm:$0xff]  }
 0xfea   :  { %17684 = vmatpush3.bf16.msra.mxu1 %v20090_v17  ;;  %12640 = vmatprep.subr.bf16.mxu0 %v20093_v52  ;;  %v20170_v17 = vld [vmem:[%s23781_s11 + $0xc0] ss:$12 sps:$4 sm:$0xff]   ;;  %v20172_v52 = vld [vmem:[%s23781_s11 + $0xc4] ss:$12 sps:$4 sm:$0xff]  }
 0xfeb   :  { %17685 = vmatprep.subr.bf16.mxu1 %v20094_v61  ;;  %v20173_v61 = vld [vmem:[%s23781_s11 + $0xc8] ss:$12 sps:$4 sm:$0xff]  }
 0xfed   :  { %12641 = vmatpush1.bf16.msra.mxu0 %v20091_v63  ;;  %v20174_v63 = vld [vmem:[%s23781_s11 + $0x8] ss:$12 sps:$4 sm:$0xff]  }
 0xfee   :  { %17686 = vmatpush3.bf16.msra.mxu1 %v20095_v50  ;;  %12642 = vmatprep.subr.bf16.mxu0 %v20098_v55  ;;  %v20177_v50 = vld [vmem:[%s23781_s11 + $0xdc] ss:$12 sps:$4 sm:$0xff]   ;;  %v20178_v55 = vld [vmem:[%s23781_s11 + $0xe0] ss:$12 sps:$4 sm:$0xff]  }
 0xfef   :  { %17932 = vmatprep.subr.bf16.mxu1 %v20099_v23 }
 0xff1   :  { %12761 = vmatmul.mubr.bf16.vlgmr.msra.gmra.mrb[8].mxu1 %v23152_v35  ;;  %12643 = vmatpush1.bf16.msra.mxu0 %v20096_v60  ;;  %v20179_v60 = vld [vmem:[%s23781_s11 + $0x20] ss:$12 sps:$4 sm:$0xff]  }
 0xff2   :  { %12768 = vmatprep.mubr.bf16.mxu1 %v23227_v58  ;;  %17933 = vmatpush3.bf16.msra.mxu1 %v20099_v23  ;;  %v20175_v23 = vld [vmem:[%s23781_s11 + $0xd8] ss:$12 sps:$4 sm:$0xff]  }
 0xff3   :  { %12644 = vmatprep.subr.bf16.mxu0 %v20102_v22  ;;  %17934 = vmatprep.subr.bf16.mxu1 %v20103_v38  ;;  %v20180_v22 = vld [vmem:[%s23781_s11 + $0xf0] ss:$12 sps:$4 sm:$0xff]  }
 0xff5   :  { %12645 = vmatpush1.bf16.msra.mxu0 %v20100_v36  ;;  %v20184_v36 = vld [vmem:[%s23781_s11 + $0x38] ss:$12 sps:$4 sm:$0xff]  }
 0xff6   :  { %17935 = vmatpush3.bf16.msra.mxu1 %v20103_v38  ;;  %12646 = vmatprep.subr.bf16.mxu0 %v20106_v26  ;;  %v20182_v38 = vld [vmem:[%s23781_s11 + $0xf4] ss:$12 sps:$4 sm:$0xff]   ;;  %v20187_v26 = vld [vmem:[%s23781_s11 + $0x10c] ss:$12 sps:$4 sm:$0xff]  }
 0xff7   :  { %17936 = vmatprep.subr.bf16.mxu1 %v20107_v13 }
 0xff9   :  { %12769 = vmatmul.mubr.bf16.gmra.mrb[12].mxu1 %v23237_v16  ;;  %12647 = vmatpush1.bf16.msra.mxu0 %v20104_v6  ;;  %v20185_v6 = vld [vmem:[%s23781_s11 + $0x108] ss:$12 sps:$4 sm:$0xff]  }
 0xffa   :  { %17937 = vmatpush3.bf16.msra.mxu1 %v20107_v13  ;;  %17944 = vmatprep.mubr.msk.bf16.mxu1 %vm748_vm1, %v23162_v21  ;;  %v20188_v13 = vld [vmem:[%s23781_s11 + $0x110] ss:$12 sps:$4 sm:$0xff]  }
 0xffb   :  { %12648 = vmatprep.subr.bf16.mxu0 %v20110_v31  ;;  %17938 = vmatprep.subr.bf16.mxu1 %v20111_v59  ;;  %v20192_v31 = vld [vmem:[%s23781_s11 + $0x124] ss:$12 sps:$4 sm:$0xff]  }
 0xffd   :  { %12649 = vmatpush1.bf16.msra.mxu0 %v20108_v1  ;;  %v20190_v1 = vld [vmem:[%s23781_s11 + $0x120] ss:$12 sps:$4 sm:$0xff]  }
 0xffe   :  { %17939 = vmatpush3.bf16.msra.mxu1 %v20111_v59  ;;  %12650 = vmatprep.subr.bf16.mxu0 %v20114_v9  ;;  %v20193_v59 = vld [vmem:[%s23781_s11 + $0x128] ss:$12 sps:$4 sm:$0xff]  }
 0xfff   :  { %17940 = vmatprep.subr.bf16.mxu1 %v20115_v8  ;;  %v20194_v9 = vld [vmem:[%s23781_s11 + $0x68] ss:$12 sps:$4 sm:$0xff]  }
0x1001   :  { %12651 = vmatpush1.bf16.msra.mxu0 %v20112_v54  ;;  %v20198_v54 = vld [vmem:[%s23781_s11 + $0x140] ss:$12 sps:$4 sm:$0xff]  }
0x1002   :  { %17941 = vmatpush3.bf16.msra.mxu1 %v20115_v8  ;;  %12652 = vmatprep.subr.bf16.mxu0 %v20118_v43  ;;  %v20197_v8 = vld [vmem:[%s23781_s11 + $0x13c] ss:$12 sps:$4 sm:$0xff]   ;;  %v20195_v43 = vld [vmem:[%s23781_s11 + $0x138] ss:$12 sps:$4 sm:$0xff]  }
0x1003   :  { %17942 = vmatprep.subr.bf16.mxu1 %v20119_v41 }
0x1005   :  { %12653 = vmatpush1.bf16.msra.mxu0 %v20116_v32  ;;  %v20200_v32 = vld [vmem:[%s23781_s11 + $0x150] ss:$12 sps:$4 sm:$0xff]  }
0x1006   :  { %17943 = vmatpush3.bf16.msra.mxu1 %v20119_v41  ;;  %12654 = vmatprep.subr.bf16.mxu0 %v20122_v24  ;;  %v20199_v41 = vld [vmem:[%s23781_s11 + $0x80] ss:$12 sps:$4 sm:$0xff]  }
0x1007   :  { %12841 = vmatprep.subr.bf16.mxu1 %v23067_v45  ;;  %v20126_v45 = vld [vmem:[%s23779_s19 + $0x180] ss:$12 sps:$4 sm:$0xff]  }
0x1008   :  { %v20202_v24 = vld [vmem:[%s23781_s11 + $0x154] ss:$12 sps:$4 sm:$0xff]  }
0x1009   :  { %17945 = vmatmul.mubr.msk.bf16.vlgmr.msra.gmra.mrb[16].mxu1 %vm748_vm1, %v23256_v25  ;;  %12655 = vmatpush1.bf16.msra.mxu0 %v20120_v37  ;;  %v20203_v37 = vld [vmem:[%s23781_s11 + $0x158] ss:$12 sps:$4 sm:$0xff]  }
0x100a   :  { %12842 = vmatpush1.bf16.msra.mxu1 %v23065_v51  ;;  %12656 = vmatprep.subr.bf16.mxu0 %v20125_v53  ;;  %v20132_v51 = vld [vmem:[%s23779_s19 + $0x19c] ss:$12 sps:$4 sm:$0xff]   ;;  %v20204_v53 = vld [vmem:[%s23781_s11 + $0x98] ss:$12 sps:$4 sm:$0xff]  }
0x100b   :  { %17256 = vmatprep.subr.msk.bf16.mxu1 %vm11299_vm9, %v23076_v39  ;;  %12873 = vmatprep.mubr.bf16.mxu1 %v20774_v44  ;;  %v20130_v39 = vld [vmem:[%s23779_s19 + $0x198] ss:$12 sps:$4 sm:$0xff]  }
0x100d   :  { %12657 = vmatpush1.bf16.msra.mxu0 %v20123_v0  ;;  %v20208_v0 = vld [vmem:[%s23781_s11 + $0x170] ss:$12 sps:$4 sm:$0xff]  }
0x100e   :  { %12844 = vmatpush1.bf16.msra.mxu1 %v23079_v27  ;;  %12677 = vmatprep.subr.bf16.mxu0 %v20128_v56  ;;  %v20135_v27 = vld [vmem:[%s23779_s19 + $0x1b4] ss:$12 sps:$4 sm:$0xff]  }
0x100f   :  { %17948 = vmatprep.subr.bf16.mxu1 %v23070_v5  ;;  %v20205_v56 = vld [vmem:[%s23781_s11 + $0x168] ss:$12 sps:$4 sm:$0xff]  }
0x1010   :  { %12659 = vmatmul.mubr.bf16.vlgmr.msra.gmra.mrb[184].mxu0 %v23152_v35  ;;  %v20133_v35 = vld [vmem:[%s23779_s19 + $0x1b0] ss:$12 sps:$4 sm:$0xff]  }
0x1011   :  { %17257 = vmatmul.mubr.msk.bf16.vlgmr.msra.gmra.mrb[20].mxu1 %vm11292_vm10, %v20129_v14  ;;  %12668 = vmatprep.mubr.bf16.mxu0 %v23227_v58  ;;  %v20183_v58 = vld [vmem:[%s23781_s11 + $0xf8] ss:$12 sps:$4 sm:$0xff]  }
0x1012   :  { %12678 = vmatpush1.bf16.msra.mxu0 %v20126_v45  ;;  %17949 = vmatpush3.bf16.msra.mxu1 %v23070_v5  ;;  %v20139_v5 = vld [vmem:[%s23779_s19 + $0x1cc] ss:$12 sps:$4 sm:$0xff]   ;;  %v20212_v45 = vld [vmem:[%s23781_s11 + $0x184] ss:$12 sps:$4 sm:$0xff]  }
0x1013   :  { %18392 = vmatprep.subr.msk.bf16.mxu1 %vm11299_vm9, %v23086_v19  ;;  %12679 = vmatprep.subr.bf16.mxu0 %v20132_v51  ;;  %v20137_v19 = vld [vmem:[%s23779_s19 + $0x1c8] ss:$12 sps:$4 sm:$0xff]  }
0x1014   :  { %12883 = vmatprep.mubr.bf16.mxu1 %v20774_v44  ;;  %v23350_v51 = vld [vmem:[%s23781_s11 + $0x188] ss:$12 sps:$4 sm:$0xff]  }
0x1016   :  { %12680 = vmatpush1.bf16.msra.mxu0 %v20130_v39  ;;  %17951 = vmatpush3.bf16.msra.mxu1 %v23095_v48  ;;  %v20140_v48 = vld [vmem:[%s23779_s19 + $0x1e0] ss:$12 sps:$4 sm:$0xff]  }
0x1017   :  { %12681 = vmatprep.subr.bf16.mxu0 %v20135_v27  ;;  %17711 = vmatprep.subr.bf16.mxu1 %v20173_v61 }
0x1018   :  { %12669 = vmatmul.mubr.bf16.gmra.mrb[196].mxu0 %v23237_v16  ;;  %v20189_v16 = vld [vmem:[%s23781_s11 + $0x50] ss:$12 sps:$4 sm:$0xff]  }
0x1019   :  { %17258 = vmatmul.mubr.msk.bf16.gmra.mrb[24].mxu1 %vm11292_vm10, %v20136_v10  ;;  %12709 = vmatprep.mubr.bf16.mxu0 %v20774_v44 }
0x101a   :  { %12682 = vmatpush1.bf16.msra.mxu0 %v20133_v35  ;;  %17952 = vmatprep.mubr.msk.bf16.mxu1 %vm11292_vm10, %v20129_v14  ;;  %v20209_v14 = vld [vmem:[%s23781_s11 + $0xb0] ss:$12 sps:$4 sm:$0xff]  }
0x101b   :  { %12683 = vmatprep.subr.bf16.mxu0 %v20139_v5 }
0x101e   :  { %12684 = vmatpush1.bf16.msra.mxu0 %v20137_v19 }
0x101f   :  { %12685 = vmatprep.subr.bf16.mxu0 %v20142_v33 }
0x1021   :  { %17953 = vmatmul.mubr.msk.bf16.vlgmr.msra.gmra.mrb[28].mxu1 %vm11292_vm10, %v20136_v10 }
0x1022   :  { %12686 = vmatpush1.bf16.msra.mxu0 %v20140_v48  ;;  %17712 = vmatpush3.bf16.msra.mxu1 %v20174_v63 }
0x1023   :  { %12687 = vmatprep.subr.bf16.mxu0 %v20145_v3  ;;  %17713 = vmatprep.subr.bf16.mxu1 %v20178_v55 }
0x1026   :  { %12688 = vmatpush1.bf16.msra.mxu0 %v20143_v34  ;;  %17714 = vmatpush3.bf16.msra.mxu1 %v20179_v60 }
0x1027   :  { %13392 = vmatprep.subr.bf16.mxu0 %v20148_v29  ;;  %17715 = vmatprep.subr.bf16.mxu1 %v20183_v58 }
0x1029   :  { %17250 = vmatmul.mubr.msk.bf16.vlgmr.msra.gmra.mrb[184].mxu0 %vm748_vm1, %v23162_v21  ;;  %v20155_v21 = vld [vmem:[%s23781_s11 + $0x48] ss:$12 sps:$4 sm:$0xff]  }
0x102a   :  { %12719 = vmatprep.mubr.bf16.mxu0 %v20774_v44  ;;  %13393 = vmatpush1.bf16.msra.mxu0 %v20146_v57 }
0x102b   :  { %13394 = vmatprep.subr.bf16.mxu0 %v20151_v18  ;;  %17716 = vmatpush3.bf16.msra.mxu1 %v20184_v36 }
0x102c   :  { %17717 = vmatprep.subr.bf16.mxu1 %v20188_v13 }
0x102e   :  { %13395 = vmatpush1.bf16.msra.mxu0 %v20149_v40 }
0x102f   :  { %13396 = vmatprep.subr.bf16.mxu0 %v20154_v42  ;;  %17718 = vmatpush3.bf16.msra.mxu1 %v20189_v16 }
0x1030   :  { %17719 = vmatprep.subr.bf16.mxu1 %v20193_v59 }
0x1031   :  { %17251 = vmatmul.mubr.msk.bf16.gmra.mrb[200].mxu0 %vm748_vm1, %v23256_v25  ;;  %v20207_v25 = vld [vmem:[%s23781_s11 + $0x16c] ss:$12 sps:$4 sm:$0xff]  }
0x1032   :  { %13397 = vmatpush1.bf16.msra.mxu0 %v20152_v20 }
0x1033   :  { %13398 = vmatprep.subr.bf16.mxu0 %v20157_v28  ;;  %17720 = vmatpush3.bf16.msra.mxu1 %v20194_v9 }
0x1034   :  { %17721 = vmatprep.subr.bf16.mxu1 %v20198_v54 }
0x1036   :  { %13399 = vmatpush1.bf16.msra.mxu0 %v20155_v21 }
0x1037   :  { %13400 = vmatprep.subr.bf16.mxu0 %v20160_v30  ;;  %17722 = vmatpush3.bf16.msra.mxu1 %v20199_v41 }
0x1038   :  { %17723 = vmatprep.subr.bf16.mxu1 %v20203_v37 }
0x103a   :  { %13401 = vmatpush1.bf16.msra.mxu0 %v20158_v46 }
0x103b   :  { %13402 = vmatprep.subr.bf16.mxu0 %v20163_v47  ;;  %17724 = vmatpush3.bf16.msra.mxu1 %v20204_v53 }
0x103c   :  { %17725 = vmatprep.subr.bf16.mxu1 %v20208_v0  ;;  %v20210_v0 = vld [vmem:[%s23781_s11 + $0x180] ss:$12 sps:$4 sm:$0xff]  }
0x103e   :  { %13403 = vmatpush1.bf16.msra.mxu0 %v20161_v49 }
0x103f   :  { %13404 = vmatprep.subr.bf16.mxu0 %v20166_v2  ;;  %17726 = vmatpush3.bf16.msra.mxu1 %v20209_v14  ;;  %v20217_v14 = vld [vmem:[%s23781_s11 + $0x1a0] ss:$12 sps:$4 sm:$0xff]  }
0x1040   :  { %17956 = vmatprep.subr.bf16.mxu1 %v23350_v51 }
0x1042   :  { %13405 = vmatpush1.bf16.msra.mxu0 %v20164_v62 }
0x1043   :  { %13406 = vmatprep.subr.bf16.mxu0 %v20169_v7 }
0x1046   :  { %13407 = vmatpush1.bf16.msra.mxu0 %v20167_v4 }
0x1047   :  { %13408 = vmatprep.subr.bf16.mxu0 %v20172_v52 }
0x104a   :  { %13409 = vmatpush1.bf16.msra.mxu0 %v20170_v17 }
0x104b   :  { %13410 = vmatprep.subr.bf16.mxu0 %v20177_v50 }
0x104e   :  { %13411 = vmatpush1.bf16.msra.mxu0 %v20175_v23 }
0x104f   :  { %13412 = vmatprep.subr.bf16.mxu0 %v20182_v38 }
0x1052   :  { %13413 = vmatpush1.bf16.msra.mxu0 %v20180_v22 }
0x1053   :  { %13414 = vmatprep.subr.bf16.mxu0 %v20187_v26 }
0x1056   :  { %13415 = vmatpush1.bf16.msra.mxu0 %v20185_v6 }
0x1057   :  { %13416 = vmatprep.subr.bf16.mxu0 %v20192_v31 }
0x105a   :  { %13417 = vmatpush1.bf16.msra.mxu0 %v20190_v1 }
0x105b   :  { %13418 = vmatprep.subr.bf16.mxu0 %v20197_v8 }
0x105e   :  { %13419 = vmatpush1.bf16.msra.mxu0 %v20195_v43 }
0x105f   :  { %13420 = vmatprep.subr.bf16.mxu0 %v20202_v24 }
0x1062   :  { %13421 = vmatpush1.bf16.msra.mxu0 %v20200_v32 }
0x1063   :  { %13422 = vmatprep.subr.bf16.mxu0 %v20207_v25 }
0x1066   :  { %13423 = vmatpush1.bf16.msra.mxu0 %v20205_v56  ;;  %v20216_v56 = vld [vmem:[%s23781_s11 + $0x19c] ss:$12 sps:$4 sm:$0xff]  }
0x1067   :  { %13443 = vmatprep.subr.bf16.mxu0 %v20212_v45 }
0x108b   :  { %v17651_v39 = vpop.f32.mrb[252].mxu1 }
0x108c   :  { %v17652_v27 = vpop.f32.mrb[253].mxu1 }
0x108d   :  { %v17653_v10 = vadd.f32 %v17652_v27, %v17651_v39  ;;  %v17654_v35 = vpop.f32.mrb[254].mxu1 }
0x108e   :  { %v17655_v5 = vpop.f32.mrb[255].mxu1 }
0x108f   :  { %v17656_v19 = vadd.f32 %v17655_v5, %v17654_v35 }
0x1093   :  { %v12114_v33 = vpop.f32.mrb[188].mxu0  ;;  %v17657_v48 = vpop.f32.mrb[0].mxu1 }
0x1094   :  { %v12116_v3 = vpop.f32.mrb[189].mxu0  ;;  %v17658_v34 = vpop.f32.mrb[1].mxu1 }
0x1095   :  { %v17659_v57 = vadd.f32 %v17658_v34, %v17657_v48  ;;  %v12118_v29 = vpop.f32.mrb[190].mxu0  ;;  %v17660_v18 = vpop.f32.mrb[2].mxu1  ;;  %v20220_v48 = vld [vmem:[%s23781_s11 + $0x1b4] ss:$12 sps:$4 sm:$0xff]  }
0x1096   :  { %v12119_v40 = vpop.f32.mrb[191].mxu0  ;;  %v17661_v42 = vpop.f32.mrb[3].mxu1 }
0x1097   :  { %v20218_v40 = vld [vmem:[%s23781_s11 + $0x1b0] ss:$12 sps:$4 sm:$0xff]   ;;  %v20224_v42 = vld [vmem:[%s23781_s11 + $0x1cc] ss:$12 sps:$4 sm:$0xff]  }
0x10a3   :  { %v17930_v20 = vpop.f32.mrb[4].mxu1 }
0x10a4   :  { %v12263_v28 = vadd.f32 %v17930_v20, %v17659_v57  ;;  %v12254_v21 = vpop.f32.mrb[5].mxu1  ;;  %v20225_v20 = vld [vmem:[%s23781_s11 + $0x1d0] ss:$12 sps:$4 sm:$0xff]  }
0x10a5   :  { %v12255_v30 = vadd.f32 %v17653_v10, %v12254_v21  ;;  %v17931_v46 = vpop.f32.mrb[6].mxu1  ;;  %v20214_v10 = vld [vmem:[%s23781_s11 + $0x198] ss:$12 sps:$4 sm:$0xff]  }
0x10a6   :  { %v12257_v47 = vpop.f32.mrb[7].mxu1  ;;  %v20228_v46 = vld [vmem:[%s23781_s11 + $0x1e4] ss:$12 sps:$4 sm:$0xff]  }
0x10a7   :  { %v12258_v49 = vadd.f32 %v17656_v19, %v12257_v47  ;;  %v20229_v47 = vld [vmem:[%s23781_s11 + $0x1e8] ss:$12 sps:$4 sm:$0xff]  }
0x10ab   :  { %v12165_v2 = vpop.f32.mrb[192].mxu0 }
0x10ac   :  { %v12166_v62 = vadd.f32 %v12165_v2, %v12114_v33  ;;  %v12167_v7 = vpop.f32.mrb[193].mxu0 }
0x10ad   :  { %v12168_v4 = vadd.f32 %v12167_v7, %v12116_v3  ;;  %v12169_v17 = vpop.f32.mrb[194].mxu0  ;;  %v20221_v3 = vld [vmem:[%s23781_s11 + $0x1b8] ss:$12 sps:$4 sm:$0xff]  }
0x10ae   :  { %v12170_v52 = vpop.f32.mrb[195].mxu0  ;;  %v20233_v17 = vld [vmem:[%s23781_s11 + $0x200] ss:$12 sps:$4 sm:$0xff]  }
0x10af   :  { %v20230_v52 = vld [vmem:[%s23781_s11 + $0x1f8] ss:$12 sps:$4 sm:$0xff]  }
0x10c4   :  { %v17687_v61 = vpop.f32.mrb[8].mxu1 }
0x10c5   :  { %v17688_v63 = vpop.f32.mrb[9].mxu1 }
0x10c6   :  { %v17689_v50 = vadd.f32 %v17688_v63, %v17687_v61  ;;  %v17690_v55 = vpop.f32.mrb[10].mxu1 }
0x10c7   :  { %v17691_v23 = vpop.f32.mrb[11].mxu1 }
0x10c8   :  { %v17692_v60 = vadd.f32 %v17691_v23, %v17690_v55  ;;  %v12763_v22 = vadd.f32 %v17689_v50, %v12255_v30 }
0x10ca   :  { %v12766_v38 = vadd.f32 %v17692_v60, %v12258_v49 }
0x10cc   :  { %v17693_v58 = vpop.f32.mrb[12].mxu1 }
0x10cd   :  { %v17694_v36 = vpop.f32.mrb[13].mxu1 }
0x10ce   :  { %v17695_v26 = vadd.f32 %v17694_v36, %v17693_v58  ;;  %v17696_v13 = vpop.f32.mrb[14].mxu1  ;;  %v20236_v58 = vld [vmem:[%s23782_s5 + $0x4] ss:$8 sps:$4 sm:$0xff]   ;;  %v20239_v36 = vld [vmem:[%s23782_s5 + $0x14] ss:$8 sps:$4 sm:$0xff]  }
0x10cf   :  { %v17697_v6 = vpop.f32.mrb[15].mxu1  ;;  %v20242_v13 = vld [vmem:[%s23782_s5 + $0x24] ss:$8 sps:$4 sm:$0xff]  }
0x10d0   :  { %v12771_v16 = vadd.f32 %v17695_v26, %v12263_v28  ;;  %v20222_v28 = vld [vmem:[%s23781_s11 + $0x1c8] ss:$12 sps:$4 sm:$0xff]   ;;  %v20237_v26 = vld [vmem:[%s23782_s5 + $0x10] ss:$8 sps:$4 sm:$0xff]  }
0x10d1   :  { %v20240_v6 = vld [vmem:[%s23782_s5 + $0x20] ss:$8 sps:$4 sm:$0xff]  }
0x10dc   :  { %v17946_v31 = vpop.f32.mrb[16].mxu1 }
0x10dd   :  { %v23353_v59 = vadd.f32 %v17946_v31, %v12771_v16  ;;  %v12810_v1 = vpop.f32.mrb[17].mxu1  ;;  %v20245_v16 = vld [vmem:[%s23782_s5 + $0x34] ss:$8 sps:$4 sm:$0xff]   ;;  %v20243_v31 = vld [vmem:[%s23782_s5 + $0x30] ss:$8 sps:$4 sm:$0xff]  }
0x10de   :  { %v23355_v9 = vadd.f32 %v12810_v1, %v12763_v22  ;;  %v17947_v8 = vpop.f32.mrb[18].mxu1  ;;  %v20251_v1 = vld [vmem:[%s23782_s5 + $0x44] ss:$8 sps:$4 sm:$0xff]  }
0x10df   :  { %v12813_v54 = vpop.f32.mrb[19].mxu1  ;;  %v20249_v8 = vld [vmem:[%s23782_s5 + $0x40] ss:$8 sps:$4 sm:$0xff]  }
0x10e0   :  { %v23357_v43 = vadd.f32 %v12813_v54, %v12766_v38  ;;  %v20234_v38 = vld [vmem:[%s23782_s5] ss:$8 sps:$4 sm:$0xff]   ;;  %v20257_v54 = vld [vmem:[%s23782_s5 + $0x54] ss:$8 sps:$4 sm:$0xff]  }
0x10e4   :  { %v12875_v41 = vpop.f32.mrb[20].mxu1 }
0x10e5   :  { %v12877_v32 = vpop.f32.mrb[21].mxu1 }
0x10e6   :  { %v12879_v24 = vpop.f32.mrb[22].mxu1 }
0x10e7   :  { %v12940_v37 = vpack.c.bf16 %v12879_v24, %v12875_v41  ;;  %v12881_v53 = vpop.f32.mrb[23].mxu1  ;;  %v20255_v41 = vld [vmem:[%s23782_s5 + $0x50] ss:$8 sps:$4 sm:$0xff]   ;;  %v20261_v24 = vld [vmem:[%s23782_s5 + $0x60] ss:$8 sps:$4 sm:$0xff]  }
0x10e8   :  { %v12941_v25 = vpack.c.bf16 %v12881_v53, %v12877_v32  ;;  %v20263_v32 = vld [vmem:[%s23782_s5 + $0x64] ss:$8 sps:$4 sm:$0xff]   ;;  %v20267_v53 = vld [vmem:[%s23782_s5 + $0x70] ss:$8 sps:$4 sm:$0xff]  }
0x10ea   :  { %13424 = vmatprep.mubr.bf16.mxu0 %v12941_v25  ;;  %13526 = vmatprep.mubr.bf16.mxu1 %v12941_v25  ;;  %v20275_v25 = vld [vmem:[%s23782_s5 + $0x84] ss:$8 sps:$4 sm:$0xff]  }
0x10eb   :  { %13425 = vmatmul.mubr.bf16.vlgmr.msra.gmra.mrb[184].mxu0 %v12940_v37  ;;  %13527 = vmatmul.mubr.bf16.vlgmr.msra.gmra.mrb[32].mxu1 %v12940_v37  ;;  %v12670_v45 = vpop.f32.mrb[196].mxu0  ;;  %v20269_v37 = vld [vmem:[%s23782_s5 + $0x74] ss:$8 sps:$4 sm:$0xff]  }
0x10ec   :  { %13444 = vmatpush1.bf16.msra.mxu0 %v20210_v0  ;;  %17957 = vmatpush3.bf16.msra.mxu1 %v23350_v51  ;;  %v12671_v39 = vadd.f32 %v12670_v45, %v12166_v62  ;;  %v12672_v27 = vpop.f32.mrb[197].mxu0  ;;  %v12885_v35 = vpop.f32.mrb[24].mxu1  ;;  %v20226_v62 = vld [vmem:[%s23781_s11 + $0x1e0] ss:$12 sps:$4 sm:$0xff]  }
0x10ed   :  { %v12673_v5 = vadd.f32 %v12672_v27, %v12168_v4  ;;  %v12674_v19 = vpop.f32.mrb[198].mxu0  ;;  %13445 = vmatprep.subr.bf16.mxu0 %v20216_v56  ;;  %17958 = vmatprep.subr.bf16.mxu1 %v20217_v14  ;;  %v12887_v33 = vpop.f32.mrb[25].mxu1  ;;  %v12943_v18 = vpack.c.bf16 %v12885_v35, %v12885_v35  ;;  %v20232_v4 = vld [vmem:[%s23781_s11 + $0x1fc] ss:$12 sps:$4 sm:$0xff]   ;;  %v20287_v45 = vld [vmem:[%s23782_s5 + $0xa4] ss:$8 sps:$4 sm:$0xff]  }
0x10ee   :  { %v12675_v34 = vpop.f32.mrb[199].mxu0  ;;  %v12944_v57 = vpack.c.bf16 %v12887_v33, %v12887_v33  ;;  %v12889_v29 = vpop.f32.mrb[26].mxu1  ;;  %v20273_v0 = vld [vmem:[%s23782_s5 + $0x80] ss:$8 sps:$4 sm:$0xff]   ;;  %v20281_v56 = vld [vmem:[%s23782_s5 + $0x94] ss:$8 sps:$4 sm:$0xff]  }
0x10ef   :  { %v12890_v51 = vpop.f32.mrb[27].mxu1  ;;  %v20293_v27 = vld [vmem:[%s23782_s5 + $0xb4] ss:$8 sps:$4 sm:$0xff]   ;;  %v20299_v35 = vld [vmem:[%s23782_s5 + $0xc4] ss:$8 sps:$4 sm:$0xff]  }
0x10f0   :  { %13446 = vmatpush1.bf16.msra.mxu0 %v20214_v10  ;;  %17959 = vmatpush3.bf16.msra.mxu1 %v20217_v14  ;;  %v20279_v14 = vld [vmem:[%s23782_s5 + $0x90] ss:$8 sps:$4 sm:$0xff]   ;;  %v20305_v19 = vld [vmem:[%s23782_s5 + $0xd4] ss:$8 sps:$4 sm:$0xff]  }
0x10f1   :  { %13447 = vmatprep.subr.bf16.mxu0 %v20220_v48  ;;  %17960 = vmatprep.subr.bf16.mxu1 %v20221_v3  ;;  %v20291_v10 = vld [vmem:[%s23782_s5 + $0xb0] ss:$8 sps:$4 sm:$0xff]   ;;  %v20311_v48 = vld [vmem:[%s23782_s5 + $0xe4] ss:$8 sps:$4 sm:$0xff]  }
0x10f2   :  { %13434 = vmatprep.mubr.bf16.mxu0 %v12944_v57  ;;  %13534 = vmatprep.mubr.bf16.mxu1 %v12944_v57  ;;  %v20303_v33 = vld [vmem:[%s23782_s5 + $0xd0] ss:$8 sps:$4 sm:$0xff]  }
0x10f3   :  { %13435 = vmatmul.mubr.bf16.gmra.mrb[204].mxu0 %v12943_v18  ;;  %13535 = vmatmul.mubr.bf16.gmra.mrb[36].mxu1 %v12943_v18 }
0x10f4   :  { %13448 = vmatpush1.bf16.msra.mxu0 %v20218_v40  ;;  %17961 = vmatpush3.bf16.msra.mxu1 %v20221_v3  ;;  %v17954_v21 = vpop.f32.mrb[28].mxu1  ;;  %v20309_v3 = vld [vmem:[%s23782_s5 + $0xe0] ss:$8 sps:$4 sm:$0xff]  }
0x10f5   :  { %13449 = vmatprep.subr.bf16.mxu0 %v20224_v42  ;;  %17962 = vmatprep.subr.bf16.mxu1 %v20225_v20  ;;  %v12926_v30 = vpop.f32.mrb[29].mxu1  ;;  %v12945_v61 = vpack.c.bf16 %v17954_v21, %v17954_v21 }
0x10f6   :  { %v17955_v49 = vpop.f32.mrb[30].mxu1  ;;  %13475 = vmatprep.mubr.bf16.mxu0 %v20774_v44 }
0x10f7   :  { %v12929_v2 = vpop.f32.mrb[31].mxu1 }
0x10f8   :  { %13450 = vmatpush1.bf16.msra.mxu0 %v20222_v28  ;;  %17963 = vmatpush3.bf16.msra.mxu1 %v20225_v20  ;;  %v12942_v7 = vpack.c.bf16 %v12929_v2, %v12926_v30 }
0x10f9   :  { %13451 = vmatprep.subr.bf16.mxu0 %v20228_v46  ;;  %17964 = vmatprep.subr.bf16.mxu1 %v20229_v47 }
0x10fa   :  { %17968 = vmatprep.mubr.msk.bf16.mxu1 %vm748_vm1, %v12942_v7 }
0x10fc   :  { %13452 = vmatpush1.bf16.msra.mxu0 %v20226_v62  ;;  %17965 = vmatpush3.bf16.msra.mxu1 %v20229_v47  ;;  %v11280_v62 = vld [vmem:[#allocation2] sm:$0x7] }
0x10fd   :  { %13453 = vmatprep.subr.bf16.mxu0 %v20232_v4  ;;  %17966 = vmatprep.subr.bf16.mxu1 %v20233_v17  ;;  %v13607_v4 = vrot.slane %v11280_v62, %v21316_v15 }
0x1100   :  { %13454 = vmatpush1.bf16.msra.mxu0 %v20230_v52  ;;  %17967 = vmatpush3.bf16.msra.mxu1 %v20233_v17 }
0x1101   :  { %14347 = vmatprep.subr.bf16.mxu0 %v20236_v58 }
0x1103   :  { %17327 = vmatmul.mubr.msk.bf16.vlgmr.msra.gmra.mrb[184].mxu0 %vm748_vm1, %v12942_v7  ;;  %17969 = vmatmul.mubr.msk.bf16.vlgmr.msra.gmra.mrb[40].mxu1 %vm748_vm1, %v12945_v61  ;;  %v13603_v7 = vrot.slane %v11280_v62, %v21311_v11 }
0x1104   :  { %v12721_v63 = vpop.f32.mrb[200].mxu0  ;;  %13485 = vmatprep.mubr.bf16.mxu0 %v20774_v44  ;;  %13687 = vmatprep.mubr.bf16.mxu1 %v20774_v44 }
0x1105   :  { %v23382_v50 = vadd.f32 %v12721_v63, %v12671_v39  ;;  %v12723_v55 = vpop.f32.mrb[201].mxu0  ;;  %14348 = vmatpush1.bf16.msra.mxu0 %v20234_v38  ;;  %v20285_v39 = vld [vmem:[%s23782_s5 + $0xa0] ss:$8 sps:$4 sm:$0xff]  }
0x1106   :  { %v23384_v23 = vadd.f32 %v12723_v55, %v12673_v5  ;;  %v12725_v60 = vpop.f32.mrb[202].mxu0  ;;  %14349 = vmatprep.subr.bf16.mxu0 %v20239_v36  ;;  %v20297_v5 = vld [vmem:[%s23782_s5 + $0xc0] ss:$8 sps:$4 sm:$0xff]  }
0x1107   :  { %v12726_v22 = vpop.f32.mrb[203].mxu0 }
0x1108   :  { %v13611_v22 = vrot.slane %v11280_v62, %v21313_v12  ;;  %v20266_v62 = vld [vmem:[%s23785_s21 + $0x34] ss:$8 sps:$4 sm:$0xff]  }
0x1109   :  { %14350 = vmatpush1.bf16.msra.mxu0 %v20237_v26 }
0x110a   :  { %14351 = vmatprep.subr.bf16.mxu0 %v20242_v13 }
0x110b   :  { %17328 = vmatmul.mubr.msk.bf16.gmra.mrb[208].mxu0 %vm748_vm1, %v12945_v61  ;;  %vm15834_vm1 = vcmask 74752  }
0x110d   :  { %14352 = vmatpush1.bf16.msra.mxu0 %v20240_v6 }
0x110e   :  { %14353 = vmatprep.subr.bf16.mxu0 %v20245_v16 }
0x1111   :  { %14354 = vmatpush1.bf16.msra.mxu0 %v20243_v31 }
0x1112   :  { %14355 = vmatprep.subr.bf16.mxu0 %v20251_v1 }
0x1115   :  { %14356 = vmatpush1.bf16.msra.mxu0 %v20249_v8 }
0x1116   :  { %14357 = vmatprep.subr.bf16.mxu0 %v20257_v54 }
0x1119   :  { %14358 = vmatpush1.bf16.msra.mxu0 %v20255_v41 }
0x111a   :  { %14359 = vmatprep.subr.bf16.mxu0 %v20263_v32 }
0x111d   :  { %14360 = vmatpush1.bf16.msra.mxu0 %v20261_v24 }
0x111e   :  { %14361 = vmatprep.subr.bf16.mxu0 %v20269_v37 }
0x1121   :  { %14362 = vmatpush1.bf16.msra.mxu0 %v20267_v53 }
0x1122   :  { %14363 = vmatprep.subr.bf16.mxu0 %v20275_v25 }
0x1125   :  { %14364 = vmatpush1.bf16.msra.mxu0 %v20273_v0 }
0x1126   :  { %14365 = vmatprep.subr.bf16.mxu0 %v20281_v56 }
0x1129   :  { %14366 = vmatpush1.bf16.msra.mxu0 %v20279_v14 }
0x112a   :  { %14367 = vmatprep.subr.bf16.mxu0 %v20287_v45 }
0x112d   :  { %14368 = vmatpush1.bf16.msra.mxu0 %v20285_v39 }
0x112e   :  { %14369 = vmatprep.subr.bf16.mxu0 %v20293_v27 }
0x1131   :  { %14370 = vmatpush1.bf16.msra.mxu0 %v20291_v10 }
0x1132   :  { %14371 = vmatprep.subr.bf16.mxu0 %v20299_v35 }
0x1135   :  { %14372 = vmatpush1.bf16.msra.mxu0 %v20297_v5 }
0x1136   :  { %14373 = vmatprep.subr.bf16.mxu0 %v20305_v19 }
0x1139   :  { %14374 = vmatpush1.bf16.msra.mxu0 %v20303_v33 }
0x113a   :  { %14375 = vmatprep.subr.bf16.mxu0 %v20311_v48 }
0x113d   :  { %14376 = vmatpush1.bf16.msra.mxu0 %v20309_v3 }
0x11be   :  { %v17727_v34 = vpop.f32.mrb[32].mxu1 }
0x11bf   :  { %v17728_v57 = vpop.f32.mrb[33].mxu1 }
0x11c0   :  { %v17729_v29 = vadd.f32 %v17728_v57, %v17727_v34  ;;  %v17730_v18 = vpop.f32.mrb[34].mxu1 }
0x11c1   :  { %v17731_v51 = vpop.f32.mrb[35].mxu1 }
0x11c2   :  { %v17732_v40 = vadd.f32 %v17731_v51, %v17730_v18 }
0x11c6   :  { %v13436_v42 = vpop.f32.mrb[204].mxu0  ;;  %v17733_v20 = vpop.f32.mrb[36].mxu1 }
0x11c7   :  { %v13438_v28 = vpop.f32.mrb[205].mxu0  ;;  %v17734_v21 = vpop.f32.mrb[37].mxu1 }
0x11c8   :  { %v17735_v30 = vadd.f32 %v17734_v21, %v17733_v20  ;;  %v13440_v46 = vpop.f32.mrb[206].mxu0  ;;  %v17736_v47 = vpop.f32.mrb[38].mxu1  ;;  %v20248_v21 = vld [vmem:[%s23785_s21 + $0x4] ss:$8 sps:$4 sm:$0xff]  }
0x11c9   :  { %v13441_v49 = vpop.f32.mrb[207].mxu0  ;;  %v17737_v2 = vpop.f32.mrb[39].mxu1  ;;  %v20254_v46 = vld [vmem:[%s23785_s21 + $0x14] ss:$8 sps:$4 sm:$0xff]   ;;  %v20252_v47 = vld [vmem:[%s23785_s21 + $0x10] ss:$8 sps:$4 sm:$0xff]  }
0x11ca   :  { %v20260_v49 = vld [vmem:[%s23785_s21 + $0x24] ss:$8 sps:$4 sm:$0xff]   ;;  %v20258_v2 = vld [vmem:[%s23785_s21 + $0x20] ss:$8 sps:$4 sm:$0xff]  }
0x11d6   :  { %v13477_v17 = vpop.f32.mrb[184].mxu0  ;;  %v17970_v52 = vpop.f32.mrb[40].mxu1 }
0x11d7   :  { %v13615_v61 = vadd.f32 %v13603_v7, %v13477_v17  ;;  %v13585_v63 = vadd.f32 %v17970_v52, %v17735_v30  ;;  %v13479_v55 = vpop.f32.mrb[185].mxu0  ;;  %v13576_v60 = vpop.f32.mrb[41].mxu1  ;;  %v20246_v30 = vld [vmem:[%s23785_s21] ss:$8 sps:$4 sm:$0xff]   ;;  %v20278_v52 = vld [vmem:[%s23785_s21 + $0x54] ss:$8 sps:$4 sm:$0xff]  }
0x11d8   :  { %v13616_v38 = vadd.f32 %v13607_v4, %v13479_v55  ;;  %v13577_v58 = vadd.f32 %v17729_v29, %v13576_v60  ;;  %v13481_v36 = vpop.f32.mrb[186].mxu0  ;;  %v17971_v26 = vpop.f32.mrb[42].mxu1  ;;  %v20270_v17 = vld [vmem:[%s23785_s21 + $0x40] ss:$8 sps:$4 sm:$0xff]   ;;  %v20290_v60 = vld [vmem:[%s23785_s21 + $0x74] ss:$8 sps:$4 sm:$0xff]  }
0x11d9   :  { %v13598_v13 = vadd.f32 %v13585_v63, %v23353_v59  ;;  %v13618_v6 = vadd.f32 %v13603_v7, %v13481_v36  ;;  %v13483_v16 = vpop.f32.mrb[187].mxu0  ;;  %v13579_v31 = vpop.f32.mrb[43].mxu1  ;;  %v13624_v41 = vmax.f32 %v13615_v61, 0.0  ;;  %v20276_v61 = vld [vmem:[%s23785_s21 + $0x50] ss:$8 sps:$4 sm:$0xff]  }
0x11da   :  { %v13592_v1 = vadd.f32 %v13577_v58, %v23355_v9  ;;  %v13619_v8 = vadd.f32 %v13607_v4, %v13483_v16  ;;  %v13580_v54 = vadd.f32 %v17732_v40, %v13579_v31  ;;  %v13625_v24 = vmax.f32 %v13616_v38, 0.0  ;;  %v13640_v40 = vld [vmem:[%s23783_s9] sm:$0xf]  ;;  %v20284_v63 = vld [vmem:[%s23785_s21 + $0x64] ss:$8 sps:$4 sm:$0xff]  }
0x11db   :  { %v13627_v32 = vmax.f32 %v13618_v6, 0.0  ;;  %v13623_v34 = vadd.f32 %v13611_v22, %v13598_v13  ;;  %v20282_v55 = vld [vmem:[%s23785_s21 + $0x60] ss:$8 sps:$4 sm:$0xff]   ;;  %v20296_v38 = vld [vmem:[%s23785_s21 + $0x84] ss:$8 sps:$4 sm:$0xff]  }
0x11dc   :  { %v13617_v37 = vadd.f32 %v13611_v22, %v13592_v1  ;;  %v13628_v53 = vmax.f32 %v13619_v8, 0.0  ;;  %v13595_v12 = vadd.f32 %v13580_v54, %v23357_v43  ;;  %v20294_v58 = vld [vmem:[%s23785_s21 + $0x80] ss:$8 sps:$4 sm:$0xff]   ;;  %v20302_v36 = vld [vmem:[%s23785_s21 + $0x94] ss:$8 sps:$4 sm:$0xff]  }
0x11dd   :  { %v23423_v25 = vpack.c.bf16 %v13627_v32, %v13624_v41  ;;  %v20300_v26 = vld [vmem:[%s23785_s21 + $0x90] ss:$8 sps:$4 sm:$0xff]   ;;  %v20308_v13 = vld [vmem:[%s23785_s21 + $0xa4] ss:$8 sps:$4 sm:$0xff]   ;;  %v20306_v6 = vld [vmem:[%s23785_s21 + $0xa0] ss:$8 sps:$4 sm:$0xff]  }
0x11de   :  { %v23425_v0 = vpack.c.bf16 %v13628_v53, %v13625_v24  ;;  %v13620_v56 = vadd.f32 %v13611_v22, %v13595_v12  ;;  %v13487_v59 = vpop.f32.mrb[208].mxu0  ;;  %v13626_v39 = vmax.f32 %v13617_v37, 0.0  ;;  %v20288_v22 = vld [vmem:[%s23785_s21 + $0x70] ss:$8 sps:$4 sm:$0xff]   ;;  %v20314_v16 = vld [vmem:[%s23785_s21 + $0xb4] ss:$8 sps:$4 sm:$0xff]  }
0x11df   :  { %v13488_v14 = vadd.f32 %v13487_v59, %v13436_v42  ;;  %v13489_v45 = vpop.f32.mrb[209].mxu0  ;;  %v20312_v31 = vld [vmem:[%s23785_s21 + $0xb0] ss:$8 sps:$4 sm:$0xff]   ;;  %v20317_v1 = vld [vmem:[%s23782_s5 + $0xf4] ss:$8 sps:$4 sm:$0xff]  }
0x11e0   :  { %v13629_v27 = vmax.f32 %v13620_v56, 0.0  ;;  %v13490_v9 = vadd.f32 %v13489_v45, %v13438_v28  ;;  %v13491_v10 = vpop.f32.mrb[210].mxu0  ;;  %13655 = vmatprep.subr.bf16.mxu1 %v23425_v0  ;;  %v13775_v28 = vld [vmem:[%s23784_s13] sm:$0xf]  ;;  %v20315_v8 = vld [vmem:[%s23782_s5 + $0xf0] ss:$8 sps:$4 sm:$0xff]   ;;  %14377 = vmatprep.subr.bf16.mxu0 %v20317_v1 }
0x11e1   :  { %v13596_v35 = vadd.f32 %v13488_v14, %v23382_v50  ;;  %v13492_v5 = vpop.f32.mrb[211].mxu0  ;;  %13656 = vmatpush1.bf16.msra.mxu1 %v23423_v25  ;;  %v13632_v50 = vmax.f32 %v13623_v34, 0.0  ;;  %14378 = vmatpush1.bf16.msra.mxu0 %v20315_v8  ;;  %v20320_v54 = vld [vmem:[%s23785_s21 + $0xc4] ss:$8 sps:$4 sm:$0xff]   ;;  %v20318_v41 = vld [vmem:[%s23785_s21 + $0xc0] ss:$8 sps:$4 sm:$0xff]  }
0x11e2   :  { %v23430_v43 = vpack.c.bf16 %v13629_v27, %v13626_v39  ;;  %v13597_v19 = vadd.f32 %v13490_v9, %v23384_v23  ;;  %v20775_v23 = vmov 0.0   ;;  %v20323_v32 = vld [vmem:[%s23785_s21 + $0xd4] ss:$8 sps:$4 sm:$0xff]   ;;  %v20321_v24 = vld [vmem:[%s23785_s21 + $0xd0] ss:$8 sps:$4 sm:$0xff]  }
0x11e3   :  { %v13621_v33 = vadd.f32 %v13603_v7, %v13596_v35  ;;  %v13638_v42 = vpack.c.bf16 %v13632_v50, %v13632_v50  ;;  %v20264_v7 = vld [vmem:[%s23785_s21 + $0x30] ss:$8 sps:$4 sm:$0xff]   ;;  %v20326_v37 = vld [vmem:[%s23785_s21 + $0xe4] ss:$8 sps:$4 sm:$0xff]   ;;  %v20324_v53 = vld [vmem:[%s23785_s21 + $0xe0] ss:$8 sps:$4 sm:$0xff]  }
0x11e4   :  { %v13622_v48 = vadd.f32 %v13607_v4, %v13597_v19  ;;  %v20272_v4 = vld [vmem:[%s23785_s21 + $0x44] ss:$8 sps:$4 sm:$0xff]   ;;  %v20329_v12 = vld [vmem:[%s23785_s21 + $0xf4] ss:$8 sps:$4 sm:$0xff]   ;;  %v20327_v56 = vld [vmem:[%s23785_s21 + $0xf0] ss:$8 sps:$4 sm:$0xff]  }
0x11e5   :  { %v13630_v3 = vmax.f32 %v13621_v33, 0.0  ;;  %v23449_v20 = vsel %vm13645_vm11, %v13638_v42, 0  ;;  %v20332_v59 = vld [vmem:[%s23785_s21 + $0x104] ss:$8 sps:$4 sm:$0xff]   ;;  %v20335_v42 = vld [vmem:[%s23785_s21 + $0x114] ss:$8 sps:$4 sm:$0xff]  }
0x11e6   :  { %v13631_v57 = vmax.f32 %v13622_v48, 0.0  ;;  %v20369_v1 = vld [vmem:[%s23787_s29 + $0x90] ss:$8 sps:$4 sm:$0xff]   ;;  %v20372_v8 = vld [vmem:[%s23787_s29 + $0xa0] ss:$8 sps:$4 sm:$0xff]  }
0x11e7   :  { %v13636_v29 = vpack.c.bf16 %v13630_v3, %v13630_v3 }
0x11e8   :  { %v23433_v18 = vpack.c.bf16 %v13631_v57, %v13631_v57 }
0x11e9   :  { %v23436_v51 = vsel %vm13645_vm11, %v13636_v29, 0  ;;  %v20330_v29 = vld [vmem:[%s23785_s21 + $0x100] ss:$8 sps:$4 sm:$0xff]  }
0x11ea   :  { %17331 = vmatprep.subr.msk.bf16.mxu1 %vm13645_vm11, %v23433_v18 }
0x11eb   :  { %13658 = vmatpush1.bf16.msra.mxu1 %v23436_v51 }
0x11ec   :  { %17972 = vmatprep.subr.bf16.mxu1 %v20775_v23 }
0x11ee   :  { %17332 = vmatmul.mubr.msk.bf16.vlgmr.msra.gmra.mrb[44].mxu1 %vm13641_vm12, %v13640_v40 }
0x11ef   :  { %17973 = vmatpush3.bf16.msra.mxu1 %v23430_v43  ;;  %17976 = vmatprep.mubr.msk.bf16.mxu1 %vm20776_vm13, %v20775_v23 }
0x11f0   :  { %17974 = vmatprep.subr.bf16.mxu1 %v20775_v23 }
0x11f3   :  { %17975 = vmatpush3.bf16.msra.mxu1 %v23449_v20 }
0x11f4   :  { %13779 = vmatprep.subr.bf16.mxu1 %v23425_v0 }
0x11f6   :  { %17977 = vmatmul.mubr.msk.bf16.vlgmr.msra.gmra.mrb[48].mxu1 %vm13641_vm12, %v13640_v40 }
0x11f7   :  { %13780 = vmatpush1.bf16.msra.mxu1 %v23423_v25  ;;  %13811 = vmatprep.mubr.bf16.mxu1 %v20774_v44 }
0x11f8   :  { %17334 = vmatprep.subr.msk.bf16.mxu1 %vm13645_vm11, %v23433_v18 }
0x11fb   :  { %13782 = vmatpush1.bf16.msra.mxu1 %v23436_v51 }
0x11fc   :  { %17980 = vmatprep.subr.bf16.mxu1 %v20775_v23 }
0x11fe   :  { %17335 = vmatmul.mubr.msk.bf16.vlgmr.msra.gmra.mrb[52].mxu1 %vm13641_vm12, %v13775_v28 }
0x11ff   :  { %17981 = vmatpush3.bf16.msra.mxu1 %v23430_v43  ;;  %17984 = vmatprep.mubr.msk.bf16.mxu1 %vm20776_vm13, %v20775_v23 }
0x1200   :  { %17982 = vmatprep.subr.bf16.mxu1 %v20775_v23 }
0x1203   :  { %17983 = vmatpush3.bf16.msra.mxu1 %v23449_v20 }
0x1204   :  { %14082 = vmatprep.subr.bf16.mxu1 %v20248_v21  ;;  %v20338_v21 = vld [vmem:[%s23782_s5 + $0x104] ss:$8 sps:$4 sm:$0xff]  }
0x1206   :  { %17985 = vmatmul.mubr.msk.bf16.vlgmr.msra.gmra.mrb[68].mxu1 %vm13641_vm12, %v13775_v28  ;;  %v20333_v28 = vld [vmem:[%s23785_s21 + $0x110] ss:$8 sps:$4 sm:$0xff]  }
0x1207   :  { %14083 = vmatpush1.bf16.msra.mxu1 %v20246_v30 }
0x1208   :  { %14084 = vmatprep.subr.bf16.mxu1 %v20254_v46 }
0x120b   :  { %14085 = vmatpush1.bf16.msra.mxu1 %v20252_v47 }
0x120c   :  { %14086 = vmatprep.subr.bf16.mxu1 %v20260_v49 }
0x120f   :  { %14087 = vmatpush1.bf16.msra.mxu1 %v20258_v2  ;;  %v20336_v2 = vld [vmem:[%s23782_s5 + $0x100] ss:$8 sps:$4 sm:$0xff]  }
0x1210   :  { %14088 = vmatprep.subr.bf16.mxu1 %v20266_v62 }
0x1213   :  { %14089 = vmatpush1.bf16.msra.mxu1 %v20264_v7  ;;  %v20341_v7 = vld [vmem:[%s23782_s5 + $0x114] ss:$8 sps:$4 sm:$0xff]  }
0x1214   :  { %14090 = vmatprep.subr.bf16.mxu1 %v20272_v4  ;;  %v20339_v4 = vld [vmem:[%s23782_s5 + $0x110] ss:$8 sps:$4 sm:$0xff]  }
0x1217   :  { %14091 = vmatpush1.bf16.msra.mxu1 %v20270_v17 }
0x1218   :  { %14092 = vmatprep.subr.bf16.mxu1 %v20278_v52  ;;  %v14429_v52 = vld [vmem:[%s23786_s25] sm:$0xf] }
0x121b   :  { %14093 = vmatpush1.bf16.msra.mxu1 %v20276_v61  ;;  %v20348_v61 = vld [vmem:[%s23787_s29 + $0x20] ss:$8 sps:$4 sm:$0xff]  }
0x121c   :  { %14094 = vmatprep.subr.bf16.mxu1 %v20284_v63  ;;  %v20351_v63 = vld [vmem:[%s23787_s29 + $0x30] ss:$8 sps:$4 sm:$0xff]  }
0x121f   :  { %14095 = vmatpush1.bf16.msra.mxu1 %v20282_v55  ;;  %v20356_v55 = vld [vmem:[%s23787_s29 + $0x44] ss:$8 sps:$4 sm:$0xff]  }
0x1220   :  { %14096 = vmatprep.subr.bf16.mxu1 %v20290_v60  ;;  %v20354_v60 = vld [vmem:[%s23787_s29 + $0x40] ss:$8 sps:$4 sm:$0xff]  }
0x1223   :  { %14097 = vmatpush1.bf16.msra.mxu1 %v20288_v22  ;;  %v20359_v22 = vld [vmem:[%s23787_s29 + $0x54] ss:$8 sps:$4 sm:$0xff]  }
0x1224   :  { %14098 = vmatprep.subr.bf16.mxu1 %v20296_v38  ;;  %v20357_v38 = vld [vmem:[%s23787_s29 + $0x50] ss:$8 sps:$4 sm:$0xff]  }
0x1227   :  { %14099 = vmatpush1.bf16.msra.mxu1 %v20294_v58  ;;  %v20360_v58 = vld [vmem:[%s23787_s29 + $0x60] ss:$8 sps:$4 sm:$0xff]  }
0x1228   :  { %14100 = vmatprep.subr.bf16.mxu1 %v20302_v36  ;;  %v20362_v36 = vld [vmem:[%s23787_s29 + $0x64] ss:$8 sps:$4 sm:$0xff]  }
0x122b   :  { %14101 = vmatpush1.bf16.msra.mxu1 %v20300_v26  ;;  %v20365_v26 = vld [vmem:[%s23787_s29 + $0x74] ss:$8 sps:$4 sm:$0xff]  }
0x122c   :  { %14102 = vmatprep.subr.bf16.mxu1 %v20308_v13  ;;  %v20363_v13 = vld [vmem:[%s23787_s29 + $0x70] ss:$8 sps:$4 sm:$0xff]  }
0x122f   :  { %14103 = vmatpush1.bf16.msra.mxu1 %v20306_v6  ;;  %v20368_v6 = vld [vmem:[%s23787_s29 + $0x84] ss:$8 sps:$4 sm:$0xff]  }
0x1230   :  { %14104 = vmatprep.subr.bf16.mxu1 %v20314_v16  ;;  %v20366_v16 = vld [vmem:[%s23787_s29 + $0x80] ss:$8 sps:$4 sm:$0xff]  }
0x1233   :  { %14105 = vmatpush1.bf16.msra.mxu1 %v20312_v31  ;;  %v20371_v31 = vld [vmem:[%s23787_s29 + $0x94] ss:$8 sps:$4 sm:$0xff]  }
0x1234   :  { %14106 = vmatprep.subr.bf16.mxu1 %v20320_v54  ;;  %v20374_v54 = vld [vmem:[%s23787_s29 + $0xa4] ss:$8 sps:$4 sm:$0xff]  }
0x1237   :  { %14107 = vmatpush1.bf16.msra.mxu1 %v20318_v41  ;;  %v20377_v41 = vld [vmem:[%s23787_s29 + $0xb4] ss:$8 sps:$4 sm:$0xff]  }
0x1238   :  { %14108 = vmatprep.subr.bf16.mxu1 %v20323_v32  ;;  %v20375_v32 = vld [vmem:[%s23787_s29 + $0xb0] ss:$8 sps:$4 sm:$0xff]  }
0x123b   :  { %14109 = vmatpush1.bf16.msra.mxu1 %v20321_v24  ;;  %v20378_v24 = vld [vmem:[%s23787_s29 + $0xc0] ss:$8 sps:$4 sm:$0xff]  }
0x123c   :  { %14110 = vmatprep.subr.bf16.mxu1 %v20326_v37  ;;  %v20380_v37 = vld [vmem:[%s23787_s29 + $0xc4] ss:$8 sps:$4 sm:$0xff]  }
0x123f   :  { %14111 = vmatpush1.bf16.msra.mxu1 %v20324_v53  ;;  %v20383_v53 = vld [vmem:[%s23787_s29 + $0xd4] ss:$8 sps:$4 sm:$0xff]  }
0x1240   :  { %14112 = vmatprep.subr.bf16.mxu1 %v20329_v12  ;;  %v20381_v12 = vld [vmem:[%s23787_s29 + $0xd0] ss:$8 sps:$4 sm:$0xff]  }
0x1243   :  { %14113 = vmatpush1.bf16.msra.mxu1 %v20327_v56  ;;  %v20384_v56 = vld [vmem:[%s23787_s29 + $0xe0] ss:$8 sps:$4 sm:$0xff]  }
0x1244   :  { %14123 = vmatprep.subr.bf16.mxu1 %v20332_v59  ;;  %v20386_v59 = vld [vmem:[%s23787_s29 + $0xe4] ss:$8 sps:$4 sm:$0xff]  }
0x12c1   :  { %v13689_v14 = vpop.f32.mrb[44].mxu1 }
0x12c2   :  { %v13691_v45 = vpop.f32.mrb[45].mxu1  ;;  %v13736_v9 = vpack.c.bf16 %v13689_v14, %v13689_v14  ;;  %v20389_v14 = vld [vmem:[%s23787_s29 + $0xf4] ss:$8 sps:$4 sm:$0xff]  }
0x12c3   :  { %v13737_v39 = vpack.c.bf16 %v13691_v45, %v13691_v45  ;;  %v13693_v27 = vpop.f32.mrb[46].mxu1  ;;  %v20387_v45 = vld [vmem:[%s23787_s29 + $0xf0] ss:$8 sps:$4 sm:$0xff]  }
0x12c4   :  { %v13694_v10 = vpop.f32.mrb[47].mxu1  ;;  %v20390_v27 = vld [vmem:[%s23787_s29 + $0x100] ss:$8 sps:$4 sm:$0xff]  }
0x12c5   :  { %14379 = vmatprep.mubr.bf16.mxu0 %v13737_v39  ;;  %v20392_v39 = vld [vmem:[%s23787_s29 + $0x104] ss:$8 sps:$4 sm:$0xff]   ;;  %v20395_v10 = vld [vmem:[%s23787_s29 + $0x114] ss:$8 sps:$4 sm:$0xff]  }
0x12c6   :  { %14380 = vmatmul.mubr.bf16.vlgmr.msra.gmra.mrb[212].mxu0 %v13736_v9  ;;  %14777 = vmatprep.subr.bf16.mxu0 %v20392_v39  ;;  %v20393_v9 = vld [vmem:[%s23787_s29 + $0x110] ss:$8 sps:$4 sm:$0xff]  }
0x12c7   :  { %14809 = vmatprep.mubr.bf16.mxu0 %v20774_v44  ;;  %14778 = vmatpush1.bf16.msra.mxu0 %v20390_v27 }
0x12c8   :  { %14779 = vmatprep.subr.bf16.mxu0 %v20395_v10 }
0x12c9   :  { %v13730_v35 = vpop.f32.mrb[48].mxu1 }
0x12ca   :  { %v17978_v5 = vpop.f32.mrb[49].mxu1  ;;  %v13738_v17 = vpack.c.bf16 %v13730_v35, %v13730_v35 }
0x12cb   :  { %v13733_v19 = vpop.f32.mrb[50].mxu1  ;;  %14780 = vmatpush1.bf16.msra.mxu0 %v20393_v9 }
0x12cc   :  { %v17979_v33 = vpop.f32.mrb[51].mxu1 }
0x12d1   :  { %v13813_v48 = vpop.f32.mrb[52].mxu1 }
0x12d2   :  { %v13815_v3 = vpop.f32.mrb[53].mxu1  ;;  %v13860_v50 = vpack.c.bf16 %v13813_v48, %v13813_v48 }
0x12d3   :  { %v13861_v34 = vpack.c.bf16 %v13815_v3, %v13815_v3  ;;  %v13817_v57 = vpop.f32.mrb[54].mxu1 }
0x12d4   :  { %v13818_v40 = vpop.f32.mrb[55].mxu1 }
0x12d5   :  { %14114 = vmatprep.mubr.bf16.mxu1 %v13861_v34 }
0x12d6   :  { %14115 = vmatmul.mubr.bf16.vlgmr.msra.gmra.mrb[72].mxu1 %v13860_v50 }
0x12d7   :  { %14124 = vmatpush1.bf16.msra.mxu1 %v20330_v29  ;;  %14155 = vmatprep.mubr.bf16.mxu1 %v20774_v44 }
0x12d8   :  { %14125 = vmatprep.subr.bf16.mxu1 %v20335_v42 }
0x12d9   :  { %v13854_v30 = vpop.f32.mrb[68].mxu1 }
0x12da   :  { %v13862_v46 = vpack.c.bf16 %v13854_v30, %v13854_v30  ;;  %v17986_v47 = vpop.f32.mrb[69].mxu1 }
0x12db   :  { %14126 = vmatpush1.bf16.msra.mxu1 %v20333_v28  ;;  %v13857_v49 = vpop.f32.mrb[70].mxu1 }
0x12dc   :  { %v17987_v62 = vpop.f32.mrb[71].mxu1  ;;  %14388 = vmatprep.subr.bf16.mxu1 %v20338_v21 }
0x12de   :  { %17373 = vmatmul.mubr.msk.bf16.vlgmr.msra.gmra.mrb[76].mxu1 %vm9555_vm8, %v13862_v46 }
0x12df   :  { %14389 = vmatpush1.bf16.msra.mxu1 %v20336_v2  ;;  %14420 = vmatprep.mubr.bf16.mxu1 %v20774_v44 }
0x12e0   :  { %14390 = vmatprep.subr.bf16.mxu1 %v20341_v7 }
0x12e3   :  { %14391 = vmatpush1.bf16.msra.mxu1 %v20339_v4 }
0x12e4   :  { %14433 = vmatprep.subr.bf16.mxu1 %v23425_v0  ;;  %v20342_v0 = vld [vmem:[%s23787_s29] ss:$8 sps:$4 sm:$0xff]  }
0x12e6   :  { %17410 = vmatmul.mubr.msk.bf16.vlgmr.msra.gmra.mrb[80].mxu1 %vm9555_vm8, %v13738_v17 }
0x12e7   :  { %14434 = vmatpush1.bf16.msra.mxu1 %v23423_v25  ;;  %14465 = vmatprep.mubr.bf16.mxu1 %v20774_v44  ;;  %v20344_v25 = vld [vmem:[%s23787_s29 + $0x4] ss:$8 sps:$4 sm:$0xff]  }
0x12e8   :  { %17411 = vmatprep.subr.msk.bf16.mxu1 %vm13645_vm11, %v23433_v18  ;;  %v20347_v18 = vld [vmem:[%s23787_s29 + $0x14] ss:$8 sps:$4 sm:$0xff]  }
0x12eb   :  { %14436 = vmatpush1.bf16.msra.mxu1 %v23436_v51  ;;  %v20350_v51 = vld [vmem:[%s23787_s29 + $0x24] ss:$8 sps:$4 sm:$0xff]  }
0x12ec   :  { %17988 = vmatprep.subr.bf16.mxu1 %v20775_v23 }
0x12ee   :  { %17412 = vmatmul.mubr.msk.bf16.vlgmr.msra.gmra.mrb[84].mxu1 %vm13641_vm12, %v14429_v52 }
0x12ef   :  { %17989 = vmatpush3.bf16.msra.mxu1 %v23430_v43  ;;  %17992 = vmatprep.mubr.msk.bf16.mxu1 %vm20776_vm13, %v20775_v23  ;;  %v20345_v43 = vld [vmem:[%s23787_s29 + $0x10] ss:$8 sps:$4 sm:$0xff]  }
0x12f0   :  { %17990 = vmatprep.subr.bf16.mxu1 %v20775_v23 }
0x12f3   :  { %17991 = vmatpush3.bf16.msra.mxu1 %v23449_v20  ;;  %v20353_v20 = vld [vmem:[%s23787_s29 + $0x34] ss:$8 sps:$4 sm:$0xff]  }
0x12f4   :  { %14736 = vmatprep.subr.bf16.mxu1 %v20344_v25 }
0x12f6   :  { %17993 = vmatmul.mubr.msk.bf16.vlgmr.msra.gmra.mrb[88].mxu1 %vm13641_vm12, %v14429_v52 }
0x12f7   :  { %14737 = vmatpush1.bf16.msra.mxu1 %v20342_v0 }
0x12f8   :  { %14738 = vmatprep.subr.bf16.mxu1 %v20347_v18 }
0x12fb   :  { %14739 = vmatpush1.bf16.msra.mxu1 %v20345_v43 }
0x12fc   :  { %14740 = vmatprep.subr.bf16.mxu1 %v20350_v51 }
0x12ff   :  { %14741 = vmatpush1.bf16.msra.mxu1 %v20348_v61 }
0x1300   :  { %14742 = vmatprep.subr.bf16.mxu1 %v20353_v20 }
0x1303   :  { %14743 = vmatpush1.bf16.msra.mxu1 %v20351_v63 }
0x1304   :  { %14744 = vmatprep.subr.bf16.mxu1 %v20356_v55 }
0x1307   :  { %14745 = vmatpush1.bf16.msra.mxu1 %v20354_v60  ;;  %v20412_v60 = vld [vmem:[%s23788_s8 + $0x40] sm:$0xff]  }
0x1308   :  { %14746 = vmatprep.subr.bf16.mxu1 %v20359_v22  ;;  %v20413_v22 = vld [vmem:[%s23788_s8] sm:$0xff]  }
0x130b   :  { %14747 = vmatpush1.bf16.msra.mxu1 %v20357_v38  ;;  %v20414_v38 = vld [vmem:[%s23788_s8 + $0x48] sm:$0xff]  }
0x130c   :  { %14748 = vmatprep.subr.bf16.mxu1 %v20362_v36  ;;  %v20416_v36 = vld [vmem:[%s23788_s8 + $0x50] sm:$0xff]  }
0x130f   :  { %14749 = vmatpush1.bf16.msra.mxu1 %v20360_v58  ;;  %v20415_v58 = vld [vmem:[%s23788_s8 + $0x8] sm:$0xff]  }
0x1310   :  { %14750 = vmatprep.subr.bf16.mxu1 %v20365_v26  ;;  %v20417_v26 = vld [vmem:[%s23788_s8 + $0x10] sm:$0xff]  }
0x1313   :  { %14751 = vmatpush1.bf16.msra.mxu1 %v20363_v13  ;;  %v20418_v13 = vld [vmem:[%s23788_s8 + $0x58] sm:$0xff]  }
0x1314   :  { %14752 = vmatprep.subr.bf16.mxu1 %v20368_v6  ;;  %v20419_v6 = vld [vmem:[%s23788_s8 + $0x18] sm:$0xff]  }
0x1317   :  { %14753 = vmatpush1.bf16.msra.mxu1 %v20366_v16  ;;  %v20420_v16 = vld [vmem:[%s23788_s8 + $0x60] sm:$0xff]  }
0x1318   :  { %14754 = vmatprep.subr.bf16.mxu1 %v20371_v31  ;;  %v20421_v31 = vld [vmem:[%s23788_s8 + $0x20] sm:$0xff]  }
0x131b   :  { %14755 = vmatpush1.bf16.msra.mxu1 %v20369_v1  ;;  %v20422_v1 = vld [vmem:[%s23788_s8 + $0x68] sm:$0xff]  }
0x131c   :  { %14756 = vmatprep.subr.bf16.mxu1 %v20374_v54  ;;  %v20424_v54 = vld [vmem:[%s23788_s8 + $0x70] sm:$0xff]  }
0x131f   :  { %14757 = vmatpush1.bf16.msra.mxu1 %v20372_v8  ;;  %v20423_v8 = vld [vmem:[%s23788_s8 + $0x28] sm:$0xff]  }
0x1320   :  { %14758 = vmatprep.subr.bf16.mxu1 %v20377_v41  ;;  %v20425_v41 = vld [vmem:[%s23788_s8 + $0x30] sm:$0xff]  }
0x1323   :  { %14759 = vmatpush1.bf16.msra.mxu1 %v20375_v32 }
0x1324   :  { %14760 = vmatprep.subr.bf16.mxu1 %v20380_v37 }
0x1327   :  { %14761 = vmatpush1.bf16.msra.mxu1 %v20378_v24 }
0x1328   :  { %14762 = vmatprep.subr.bf16.mxu1 %v20383_v53 }
0x132b   :  { %14763 = vmatpush1.bf16.msra.mxu1 %v20381_v12  ;;  %v13639_v12 = vld [vmem:[#allocation5] sm:$0x3] }
0x132c   :  { %14764 = vmatprep.subr.bf16.mxu1 %v20386_v59  ;;  %v14828_v27 = vrot.slane %v13639_v12, %v21316_v15  ;;  %v20396_v15 = vld [vmem:[%s23789_s24 + $0x40] sm:$0xff]  }
0x132f   :  { %14765 = vmatpush1.bf16.msra.mxu1 %v20384_v56 }
0x1330   :  { %14766 = vmatprep.subr.bf16.mxu1 %v20389_v14  ;;  %v14824_v14 = vrot.slane %v13639_v12, %v21311_v11  ;;  %v14838_v11 = vld [vmem:[#allocation7] sm:$0x3]  ;;  %v20440_v12 = vld [vmem:[%s23790_s15 + $0x70] sm:$0xff]  }
0x1333   :  { %14767 = vmatpush1.bf16.msra.mxu1 %v20387_v45 }
0x1334   :  { %17778 = vmatprep.subr.bf16.mxu1 %v20412_v60 }
0x1399   :  { %v14381_v35 = vpop.f32.mrb[212].mxu0 }
0x139a   :  { %v14383_v5 = vpop.f32.mrb[213].mxu0 }
0x139b   :  { %v14385_v19 = vpop.f32.mrb[214].mxu0 }
0x139c   :  { %v14386_v33 = vpop.f32.mrb[215].mxu0 }
0x13a9   :  { %v14116_v48 = vpop.f32.mrb[72].mxu1 }
0x13aa   :  { %v14118_v3 = vpop.f32.mrb[73].mxu1 }
0x13ab   :  { %v14120_v34 = vpop.f32.mrb[74].mxu1 }
0x13ac   :  { %v14121_v57 = vpop.f32.mrb[75].mxu1 }
0x13b1   :  { %v14157_v29 = vpop.f32.mrb[76].mxu1 }
0x13b2   :  { %v14158_v50 = vadd.f32 %v14157_v29, %v14116_v48  ;;  %v14159_v40 = vpop.f32.mrb[77].mxu1 }
0x13b3   :  { %v14160_v42 = vadd.f32 %v14159_v40, %v14118_v3  ;;  %v14161_v28 = vpop.f32.mrb[78].mxu1  ;;  %v20397_v40 = vld [vmem:[%s23789_s24] sm:$0xff]  }
0x13b4   :  { %v14162_v21 = vpop.f32.mrb[79].mxu1  ;;  %v14382_v30 = vadd.f32 %v14381_v35, %v14158_v50  ;;  %v14924_v50 = vld [vmem:[#allocation8] sm:$0x3] }
0x13b5   :  { %v14384_v46 = vadd.f32 %v14383_v5, %v14160_v42  ;;  %v20398_v42 = vld [vmem:[%s23789_s24 + $0x48] sm:$0xff]   ;;  %v20400_v21 = vld [vmem:[%s23789_s24 + $0x50] sm:$0xff]  }
0x13b6   :  { %v20399_v28 = vld [vmem:[%s23789_s24 + $0x8] sm:$0xff]  }
0x13b9   :  { %v14422_v47 = vpop.f32.mrb[80].mxu1 }
0x13ba   :  { %v14423_v49 = vadd.f32 %v14422_v47, %v14382_v30  ;;  %v14424_v2 = vpop.f32.mrb[81].mxu1  ;;  %v20401_v30 = vld [vmem:[%s23789_s24 + $0x10] sm:$0xff]   ;;  %v20403_v47 = vld [vmem:[%s23789_s24 + $0x18] sm:$0xff]  }
0x13bb   :  { %v14425_v62 = vadd.f32 %v14424_v2, %v14384_v46  ;;  %v14426_v7 = vpop.f32.mrb[82].mxu1  ;;  %v20402_v46 = vld [vmem:[%s23789_s24 + $0x58] sm:$0xff]   ;;  %v20405_v2 = vld [vmem:[%s23789_s24 + $0x20] sm:$0xff]  }
0x13bc   :  { %v14427_v4 = vpop.f32.mrb[83].mxu1  ;;  %v20407_v7 = vld [vmem:[%s23789_s24 + $0x28] sm:$0xff]  }
0x13bd   :  { %v20408_v4 = vld [vmem:[%s23789_s24 + $0x70] sm:$0xff]  }
0x13c1   :  { %v14467_v17 = vpop.f32.mrb[84].mxu1 }
0x13c2   :  { %v14469_v52 = vpop.f32.mrb[85].mxu1  ;;  %v14514_v18 = vpack.c.bf16 %v14467_v17, %v14467_v17  ;;  %v20409_v17 = vld [vmem:[%s23789_s24 + $0x30] sm:$0xff]  }
0x13c3   :  { %v14515_v25 = vpack.c.bf16 %v14469_v52, %v14469_v52  ;;  %v14471_v0 = vpop.f32.mrb[86].mxu1  ;;  %v20410_v52 = vld [vmem:[%s23789_s24 + $0x78] sm:$0xff]  }
0x13c4   :  { %v14472_v43 = vpop.f32.mrb[87].mxu1  ;;  %v20426_v0 = vld [vmem:[%s23788_s8 + $0x78] sm:$0xff]  }
0x13c5   :  { %14768 = vmatprep.mubr.bf16.mxu1 %v14515_v25  ;;  %v20411_v25 = vld [vmem:[%s23789_s24 + $0x38] sm:$0xff]  }
0x13c6   :  { %14769 = vmatmul.mubr.bf16.vlgmr.msra.gmra.mrb[92].mxu1 %v14514_v18  ;;  %v20427_v18 = vld [vmem:[%s23788_s8 + $0x38] sm:$0xff]  }
0x13c7   :  { %17779 = vmatpush3.bf16.msra.mxu1 %v20413_v22 }
0x13c8   :  { %17780 = vmatprep.subr.bf16.mxu1 %v20414_v38 }
0x13c9   :  { %v14508_v51 = vpop.f32.mrb[88].mxu1 }
0x13ca   :  { %v14516_v61 = vpack.c.bf16 %v14508_v51, %v14508_v51  ;;  %v17994_v20 = vpop.f32.mrb[89].mxu1 }
0x13cb   :  { %v14511_v63 = vpop.f32.mrb[90].mxu1  ;;  %17781 = vmatpush3.bf16.msra.mxu1 %v20415_v58 }
0x13cc   :  { %v17995_v55 = vpop.f32.mrb[91].mxu1  ;;  %17450 = vmatmul.mubr.msk.bf16.vlgmr.msra.gmra.mrb[216].mxu0 %vm9555_vm8, %v14516_v61  ;;  %17782 = vmatprep.subr.bf16.mxu1 %v20416_v36 }
0x13cd   :  { %14881 = vmatprep.mubr.bf16.mxu0 %v20774_v44 }
0x13cf   :  { %17783 = vmatpush3.bf16.msra.mxu1 %v20417_v26 }
0x13d0   :  { %17784 = vmatprep.subr.bf16.mxu1 %v20418_v13  ;;  %v20428_v13 = vld [vmem:[%s23790_s15 + $0x40] sm:$0xff]  }
0x13d3   :  { %17785 = vmatpush3.bf16.msra.mxu1 %v20419_v6  ;;  %v15275_v6 = vld [vmem:[#allocation10] sm:$0x3] }
0x13d4   :  { %17786 = vmatprep.subr.bf16.mxu1 %v20420_v16  ;;  %v20429_v16 = vld [vmem:[%s23790_s15] sm:$0xff]  }
0x13d7   :  { %17787 = vmatpush3.bf16.msra.mxu1 %v20421_v31  ;;  %v20430_v31 = vld [vmem:[%s23790_s15 + $0x48] sm:$0xff]  }
0x13d8   :  { %17788 = vmatprep.subr.bf16.mxu1 %v20422_v1  ;;  %v20431_v1 = vld [vmem:[%s23790_s15 + $0x8] sm:$0xff]  }
0x13db   :  { %17789 = vmatpush3.bf16.msra.mxu1 %v20423_v8  ;;  %v20432_v8 = vld [vmem:[%s23790_s15 + $0x50] sm:$0xff]  }
0x13dc   :  { %17790 = vmatprep.subr.bf16.mxu1 %v20424_v54  ;;  %v20433_v54 = vld [vmem:[%s23790_s15 + $0x10] sm:$0xff]  }
0x13df   :  { %17791 = vmatpush3.bf16.msra.mxu1 %v20425_v41  ;;  %v20435_v41 = vld [vmem:[%s23790_s15 + $0x18] sm:$0xff]  }
0x13e0   :  { %17792 = vmatprep.subr.bf16.mxu1 %v20426_v0  ;;  %v20447_v0 = vld [vmem:[%s23791_s16 + $0x18] sm:$0xff]  }
0x13e3   :  { %17793 = vmatpush3.bf16.msra.mxu1 %v20427_v18  ;;  %v20448_v18 = vld [vmem:[%s23791_s16 + $0x20] sm:$0xff]  }
0x13e4   :  { %17996 = vmatprep.subr.bf16.mxu1 %v20775_v23 }
0x1499   :  { %v14770_v32 = vpop.f32.mrb[92].mxu1 }
0x149a   :  { %v14772_v24 = vpop.f32.mrb[93].mxu1 }
0x149b   :  { %v14774_v37 = vpop.f32.mrb[94].mxu1 }
0x149c   :  { %v14775_v53 = vpop.f32.mrb[95].mxu1  ;;  %v20438_v37 = vld [vmem:[%s23790_s15 + $0x68] sm:$0xff]  }
0x149d   :  { %v20439_v53 = vld [vmem:[%s23790_s15 + $0x28] sm:$0xff]  }
0x149f   :  { %v14811_v56 = vpop.f32.mrb[216].mxu0 }
0x14a0   :  { %v14812_v59 = vadd.f32 %v14811_v56, %v14770_v32  ;;  %v14813_v45 = vpop.f32.mrb[217].mxu0  ;;  %v20436_v32 = vld [vmem:[%s23790_s15 + $0x60] sm:$0xff]   ;;  %v20441_v56 = vld [vmem:[%s23790_s15 + $0x30] sm:$0xff]  }
0x14a1   :  { %v14814_v39 = vadd.f32 %v14813_v45, %v14772_v24  ;;  %v14815_v9 = vpop.f32.mrb[218].mxu0  ;;  %v20437_v24 = vld [vmem:[%s23790_s15 + $0x20] sm:$0xff]  }
0x14a2   :  { %v14818_v10 = vadd.f32 %v14812_v59, %v14423_v49  ;;  %v14816_v35 = vpop.f32.mrb[219].mxu0  ;;  %v20404_v49 = vld [vmem:[%s23789_s24 + $0x60] sm:$0xff]   ;;  %v20442_v59 = vld [vmem:[%s23790_s15 + $0x78] sm:$0xff]  }
0x14a3   :  { %v14819_v5 = vadd.f32 %v14814_v39, %v14425_v62  ;;  %v20406_v62 = vld [vmem:[%s23789_s24 + $0x68] sm:$0xff]  }
0x14a4   :  { %v14831_v19 = vadd.f32 %v14824_v14, %v14818_v10  ;;  %v20443_v14 = vld [vmem:[%s23790_s15 + $0x38] sm:$0xff]  }
0x14a5   :  { %v14832_v33 = vadd.f32 %v14828_v27, %v14819_v5 }
0x14a6   :  { %v14833_v48 = vmax.f32 %v14831_v19, 0.0 }
0x14a7   :  { %v14834_v3 = vmax.f32 %v14832_v33, 0.0 }
0x14a8   :  { %v14835_v34 = vpack.c.bf16 %v14833_v48, %v14833_v48 }
0x14a9   :  { %v14836_v57 = vpack.c.bf16 %v14834_v3, %v14834_v3 }
0x14aa   :  { %v23585_v29 = vsel %vm5520_vm4, %v14835_v34, 0 }
0x14ab   :  { %17451 = vmatprep.subr.msk.bf16.mxu0 %vm5520_vm4, %v14836_v57 }
0x14ac   :  { %14850 = vmatpush1.bf16.msra.mxu0 %v23585_v29 }
0x14ad   :  { %17453 = vmatprep.subr.msk.bf16.mxu0 %vm5520_vm4, %v14836_v57 }
0x14af   :  { %17452 = vmatmul.mubr.msk.bf16.vlgmr.msra.gmra.mrb[220].mxu0 %vm14839_vm14, %v14838_v11 }
0x14b0   :  { %14929 = vmatpush1.bf16.msra.mxu0 %v23585_v29  ;;  %14960 = vmatprep.mubr.bf16.mxu0 %v20774_v44 }
0x14b1   :  { %17756 = vmatprep.subr.bf16.mxu0 %v20396_v15 }
0x14b7   :  { %17454 = vmatmul.mubr.msk.bf16.vlgmr.msra.gmra.mrb[224].mxu0 %vm14839_vm14, %v14924_v50 }
0x14b8   :  { %17757 = vmatpush3.bf16.msra.mxu0 %v20397_v40 }
0x14b9   :  { %17758 = vmatprep.subr.bf16.mxu0 %v20398_v42 }
0x14bc   :  { %17759 = vmatpush3.bf16.msra.mxu0 %v20399_v28 }
0x14bd   :  { %17760 = vmatprep.subr.bf16.mxu0 %v20400_v21 }
0x14c0   :  { %17761 = vmatpush3.bf16.msra.mxu0 %v20401_v30  ;;  %v17505_v30 = vld [vmem:[#allocation11] ss:$0 sm:$0xff] }
0x14c1   :  { %17762 = vmatprep.subr.bf16.mxu0 %v20402_v46 }
0x14c4   :  { %17763 = vmatpush3.bf16.msra.mxu0 %v20403_v47 }
0x14c5   :  { %17764 = vmatprep.subr.bf16.mxu0 %v20404_v49 }
0x14c8   :  { %17765 = vmatpush3.bf16.msra.mxu0 %v20405_v2 }
0x14c9   :  { %17766 = vmatprep.subr.bf16.mxu0 %v20406_v62 }
0x14cc   :  { %17767 = vmatpush3.bf16.msra.mxu0 %v20407_v7 }
0x14cd   :  { %17768 = vmatprep.subr.bf16.mxu0 %v20408_v4  ;;  %v15501_v4 = vld [vmem:[#allocation13] sm:$0x3] }
0x14d0   :  { %17769 = vmatpush3.bf16.msra.mxu0 %v20409_v17  ;;  %v20444_v17 = vld [vmem:[%s23791_s16] sm:$0xff]  }
0x14d1   :  { %17770 = vmatprep.subr.bf16.mxu0 %v20410_v52  ;;  %v20445_v52 = vld [vmem:[%s23791_s16 + $0x8] sm:$0xff]  }
0x14d4   :  { %17771 = vmatpush3.bf16.msra.mxu0 %v20411_v25  ;;  %v20446_v25 = vld [vmem:[%s23791_s16 + $0x10] sm:$0xff]  }
0x14d5   :  { %17487 = vmatprep.subr.msk.bf16.mxu0 %vm5520_vm4, %v14836_v57 }
0x1582   :  { %v14883_v43 = vpop.f32.mrb[220].mxu0 }
0x1583   :  { %v14885_v51 = vpop.f32.mrb[221].mxu0  ;;  %v14890_v63 = vpack.c.bf16 %v14883_v43, %v14883_v43  ;;  %v20449_v43 = vld [vmem:[%s23791_s16 + $0x28] sm:$0xff]  }
0x1584   :  { %v14891_v61 = vpack.c.bf16 %v14885_v51, %v14885_v51  ;;  %v14887_v20 = vpop.f32.mrb[222].mxu0  ;;  %v20450_v51 = vld [vmem:[%s23791_s16 + $0x30] sm:$0xff]  }
0x1585   :  { %v14888_v55 = vpop.f32.mrb[223].mxu0 }
0x1586   :  { %15267 = vmatprep.mubr.bf16.mxu1 %v14891_v61  ;;  %v20451_v61 = vld [vmem:[%s23791_s16 + $0x38] sm:$0xff]  }
0x1587   :  { %15268 = vmatmul.mubr.bf16.vlgmr.msra.gmra.mrb[96].mxu1 %v14890_v63 }
0x1588   :  { %17998 = vmatprep.mubr.msk.bf16.mxu1 %vm20776_vm13, %v20775_v23 }
0x158a   :  { %v14962_v60 = vpop.f32.mrb[224].mxu0 }
0x158b   :  { %v14964_v22 = vpop.f32.mrb[225].mxu0  ;;  %v14969_v36 = vpack.c.bf16 %v14962_v60, %v14962_v60 }
0x158c   :  { %v14970_v38 = vpack.c.bf16 %v14964_v22, %v14964_v22  ;;  %v14966_v58 = vpop.f32.mrb[226].mxu0 }
0x158d   :  { %v14967_v26 = vpop.f32.mrb[227].mxu0 }
0x158e   :  { %15131 = vmatprep.mubr.bf16.mxu0 %v14970_v38  ;;  %v17507_v38 = vld [vmem:[#allocation14] ss:$0 sm:$0xff] }
0x158f   :  { %15132 = vmatmul.mubr.bf16.vlgmr.msra.gmra.mrb[228].mxu0 %v14969_v36 }
0x1590   :  { %15280 = vmatpush1.bf16.msra.mxu0 %v23585_v29  ;;  %15311 = vmatprep.mubr.bf16.mxu0 %v20774_v44  ;;  %v20434_v44 = vld [vmem:[%s23790_s15 + $0x58] sm:$0xff]  }
0x1591   :  { %17800 = vmatprep.subr.bf16.mxu0 %v20428_v13 }
0x1597   :  { %17488 = vmatmul.mubr.msk.bf16.vlgmr.msra.gmra.mrb[232].mxu0 %vm14839_vm14, %v15275_v6 }
0x1598   :  { %17801 = vmatpush3.bf16.msra.mxu0 %v20429_v16 }
0x1599   :  { %17802 = vmatprep.subr.bf16.mxu0 %v20430_v31  ;;  %v15741_v31 = vld [vmem:[%s21057_s3] sm:$0xff] }
0x159c   :  { %17803 = vmatpush3.bf16.msra.mxu0 %v20431_v1  ;;  %v15742_v1 = vld [vmem:[%s21057_s3 + $0x8] sm:$0xff] }
0x159d   :  { %17804 = vmatprep.subr.bf16.mxu0 %v20432_v8 }
0x15a0   :  { %17805 = vmatpush3.bf16.msra.mxu0 %v20433_v54 }
0x15a1   :  { %17806 = vmatprep.subr.bf16.mxu0 %v20434_v44  ;;  %v15663_v44 = vld [vmem:[#allocation16] sm:$0x3] }
0x15a4   :  { %17807 = vmatpush3.bf16.msra.mxu0 %v20435_v41  ;;  %v18063_v41 = vpack.c.bf16 %v15742_v1, %v15741_v31 }
0x15a5   :  { %17808 = vmatprep.subr.bf16.mxu0 %v20436_v32  ;;  %v15743_v32 = vld [vmem:[%s21057_s3 + $0x10] sm:$0xff] }
0x15a8   :  { %17809 = vmatpush3.bf16.msra.mxu0 %v20437_v24  ;;  %v15744_v24 = vld [vmem:[%s21057_s3 + $0x18] sm:$0xff] }
0x15a9   :  { %17810 = vmatprep.subr.bf16.mxu0 %v20438_v37  ;;  %v20777_v37 = vmov 0.0|0.0  }
0x15ac   :  { %17811 = vmatpush3.bf16.msra.mxu0 %v20439_v53  ;;  %v18066_v53 = vpack.c.bf16 %v15744_v24, %v15743_v32 }
0x15ad   :  { %17812 = vmatprep.subr.bf16.mxu0 %v20440_v12  ;;  %v15745_v12 = vld [vmem:[%s21057_s3 + $0x20] sm:$0xff] }
0x15b0   :  { %17813 = vmatpush3.bf16.msra.mxu0 %v20441_v56  ;;  %v15746_v56 = vld [vmem:[%s21057_s3 + $0x28] sm:$0xff] }
0x15b1   :  { %17814 = vmatprep.subr.bf16.mxu0 %v20442_v59  ;;  %v18069_v59 = vpack.c.bf16 %v15746_v56, %v15745_v12 }
0x15b4   :  { %17815 = vmatpush3.bf16.msra.mxu0 %v20443_v14  ;;  %v15747_v14 = vld [vmem:[%s21057_s3 + $0x30] sm:$0xff] }
0x15b5   :  { %18022 = vmatprep.subr.mxu0 %v20775_v23 }
0x165a   :  { %v17794_v45 = vpop.f32.mrb[96].mxu1 }
0x165b   :  { %v17795_v39 = vpop.f32.mrb[97].mxu1 }
0x165c   :  { %v17796_v27 = vadd.f32 %v17795_v39, %v17794_v45  ;;  %v17797_v9 = vpop.f32.mrb[98].mxu1  ;;  %v15748_v45 = vld [vmem:[%s21057_s3 + $0x38] sm:$0xff] }
0x165d   :  { %v17798_v10 = vpop.f32.mrb[99].mxu1  ;;  %v18072_v39 = vpack.c.bf16 %v15748_v45, %v15747_v14  ;;  %v15750_v9 = vld [vmem:[%s21057_s3 + $0x48] sm:$0xff] }
0x165e   :  { %v15751_v10 = vld [vmem:[%s21057_s3 + $0x50] sm:$0xff] }
0x1662   :  { %v17772_v35 = vpop.f32.mrb[228].mxu0 }
0x1663   :  { %v17773_v5 = vpop.f32.mrb[229].mxu0 }
0x1664   :  { %v17774_v19 = vadd.f32 %v17773_v5, %v17772_v35  ;;  %v17775_v33 = vpop.f32.mrb[230].mxu0  ;;  %v15752_v35 = vld [vmem:[%s21057_s3 + $0x58] sm:$0xff] }
0x1665   :  { %v17776_v48 = vpop.f32.mrb[231].mxu0  ;;  %v18078_v5 = vpack.c.bf16 %v15752_v35, %v15751_v10  ;;  %v15754_v33 = vld [vmem:[%s21057_s3 + $0x68] sm:$0xff] }
0x1666   :  { %v15270_v3 = vadd.f32 %v17796_v27, %v17774_v19  ;;  %v15749_v27 = vld [vmem:[%s21057_s3 + $0x40] sm:$0xff] }
0x1667   :  { %v15753_v19 = vld [vmem:[%s21057_s3 + $0x60] sm:$0xff] }
0x1668   :  { %v18081_v48 = vpack.c.bf16 %v15754_v33, %v15753_v19 }
0x166a   :  { %v15313_v34 = vpop.f32.mrb[232].mxu0 }
0x166b   :  { %v15315_v57 = vpop.f32.mrb[233].mxu0  ;;  %v15320_v15 = vpack.c.bf16 %v15313_v34, %v15313_v34  ;;  %v15756_v34 = vld [vmem:[%s21057_s3 + $0x78] sm:$0xff] }
0x166c   :  { %v15321_v29 = vpack.c.bf16 %v15315_v57, %v15315_v57  ;;  %v15317_v11 = vpop.f32.mrb[234].mxu0 }
0x166d   :  { %v15318_v50 = vpop.f32.mrb[235].mxu0 }
0x166e   :  { %15482 = vmatprep.mubr.bf16.mxu0 %v15321_v29 }
0x166f   :  { %15483 = vmatmul.mubr.bf16.vlgmr.msra.gmra.mrb[236].mxu0 %v15320_v15  ;;  %v17518_v15 = vld [vmem:[#allocation17] ss:$0 sm:$0xff] }
0x1670   :  { %18024 = vmatprep.mubr.msk.f32.mxu0 %vm20776_vm13, %v20775_v23 }
0x1742   :  { %v17816_v40 = vpop.f32.mrb[236].mxu0 }
0x1743   :  { %v17817_v42 = vpop.f32.mrb[237].mxu0 }
0x1744   :  { %v17818_v28 = vadd.f32 %v17817_v42, %v17816_v40  ;;  %v17819_v21 = vpop.f32.mrb[238].mxu0 }
0x1745   :  { %v17820_v46 = vpop.f32.mrb[239].mxu0 }
0x1746   :  { %v15490_v47 = vadd.f32 %v17818_v28, %v15270_v3  ;;  %v15755_v3 = vld [vmem:[%s21057_s3 + $0x70] sm:$0xff] }
0x1747   :  { %v18084_v57 = vpack.c.bf16 %v15756_v34, %v15755_v3 }
0x1748   :  { %v15497_v49 = vadd.f32 %v17505_v30, %v15490_v47 }
0x174a   :  { %v15498_v2 = vmax.f32 %v15497_v49, 0.0 }
0x174c   :  { %v15499_v62 = vpack.c.bf16 %v15498_v2, %v15498_v2 }
0x174e   :  { %v15508_v7 = vsel %vm15506_vm15, %v15499_v62, 0 }
0x174f   :  { %17997 = vmatpush3.bf16.msra.mxu1 %v15508_v7 }
0x1750   :  { %18002 = vmatprep.subr.bf16.mxu1 %v20775_v23 }
0x1752   :  { %17999 = vmatmul.mubr.msk.bf16.vlgmr.msra.gmra.mrb[100].mxu1 %vm15502_vm0, %v15501_v4 }
0x1753   :  { %18003 = vmatpush3.bf16.msra.mxu1 %v20444_v17  ;;  %18018 = vmatprep.mubr.msk.bf16.mxu1 %vm20776_vm13, %v20775_v23 }
0x1754   :  { %18004 = vmatprep.subr.bf16.mxu1 %v20775_v23 }
0x1757   :  { %18005 = vmatpush3.bf16.msra.mxu1 %v20445_v52 }
0x1758   :  { %18006 = vmatprep.subr.bf16.mxu1 %v20775_v23 }
0x175b   :  { %18007 = vmatpush3.bf16.msra.mxu1 %v20446_v25 }
0x175c   :  { %18008 = vmatprep.subr.bf16.mxu1 %v20775_v23 }
0x175f   :  { %18009 = vmatpush3.bf16.msra.mxu1 %v20447_v0 }
0x1760   :  { %18010 = vmatprep.subr.bf16.mxu1 %v20775_v23 }
0x1763   :  { %18011 = vmatpush3.bf16.msra.mxu1 %v20448_v18 }
0x1764   :  { %18012 = vmatprep.subr.bf16.mxu1 %v20775_v23 }
0x1767   :  { %18013 = vmatpush3.bf16.msra.mxu1 %v20449_v43 }
0x1768   :  { %18014 = vmatprep.subr.bf16.mxu1 %v20775_v23 }
0x176b   :  { %18015 = vmatpush3.bf16.msra.mxu1 %v20450_v51 }
0x176c   :  { %18016 = vmatprep.subr.bf16.mxu1 %v20775_v23 }
0x176f   :  { %18017 = vmatpush3.bf16.msra.mxu1 %v20451_v61 }
0x1825   :  { %v15544_v20 = vpop.f32.mrb[100].mxu1 }
0x1826   :  { %v15550_v63 = vpack.c.bf16 %v15544_v20, %v15544_v20  ;;  %v18000_v55 = vpop.f32.mrb[101].mxu1 }
0x1827   :  { %v15547_v60 = vpop.f32.mrb[102].mxu1 }
0x1828   :  { %v18001_v22 = vpop.f32.mrb[103].mxu1  ;;  %18019 = vmatmul.mubr.bf16.vlgmr.msra.gmra.mrb[56].mxu1 %v15550_v63 }
0x18fb   :  { %v15655_v58 = vpop.f32.mrb[56].mxu1 }
0x18fc   :  { %v15656_v36 = vadd.f32 %v17507_v38, %v15655_v58  ;;  %v18020_v26 = vpop.f32.mrb[57].mxu1 }
0x18fd   :  { %v15658_v13 = vpop.f32.mrb[58].mxu1 }
0x18fe   :  { %v15661_v6 = vmax.f32 %v15656_v36, 0.0  ;;  %v18021_v16 = vpop.f32.mrb[59].mxu1 }
0x1900   :  { %v15662_v8 = vpack.c.bf16 %v15661_v6, %v15661_v6 }
0x1902   :  { %v15664_v54 = vunpack.c.l.bf16 %v15662_v8 }
0x1904   :  { %18023 = vmatpush3.msk.msra.mxu0 %vm5520_vm4, %v15664_v54 }
0x1905   :  { %18025 = vmatmul.mubr.msk.f32.vlgmr.msra.gmra.mrb[240].mxu0 %vm15502_vm0, %v15663_v44  ;;  %18062 = vmatprep.subr.bf16.mxu0 %v20777_v37 }
0x1906   :  { %18064 = vmatpush3.bf16.msra.mxu0 %v18063_v41  ;;  %18059 = vmatprep.mubr.msk.f32.mxu0 %vm20776_vm13, %v20775_v23  ;;  %v18075_v23 = vpack.c.bf16 %v15750_v9, %v15749_v27 }
0x1907   :  { %18065 = vmatprep.subr.bf16.mxu0 %v20777_v37 }
0x190a   :  { %18067 = vmatpush3.bf16.msra.mxu0 %v18066_v53 }
0x190b   :  { %18068 = vmatprep.subr.bf16.mxu0 %v20777_v37 }
0x190e   :  { %18070 = vmatpush3.bf16.msra.mxu0 %v18069_v59 }
0x190f   :  { %18071 = vmatprep.subr.bf16.mxu0 %v20777_v37 }
0x1912   :  { %18073 = vmatpush3.bf16.msra.mxu0 %v18072_v39 }
0x1913   :  { %18074 = vmatprep.subr.bf16.mxu0 %v20777_v37 }
0x1916   :  { %18076 = vmatpush3.bf16.msra.mxu0 %v18075_v23 }
0x1917   :  { %18077 = vmatprep.subr.bf16.mxu0 %v20777_v37 }
0x191a   :  { %18079 = vmatpush3.bf16.msra.mxu0 %v18078_v5 }
0x191b   :  { %18080 = vmatprep.subr.bf16.mxu0 %v20777_v37 }
0x191e   :  { %18082 = vmatpush3.bf16.msra.mxu0 %v18081_v48 }
0x191f   :  { %18083 = vmatprep.subr.bf16.mxu0 %v20777_v37 }
0x1922   :  { %18085 = vmatpush3.bf16.msra.mxu0 %v18084_v57 }
0x19d8   :  { %v15737_v29 = vpop.f32.mrb[240].mxu0 }
0x19d9   :  { %v18026_v11 = vpop.f32.mrb[241].mxu0  ;;  %18060 = vmatmul.mubr.f32.vlgmr.msra.gmra.mrb[242].mxu0 %v15737_v29 }
0x1aac   :  { %v15830_v50 = vpop.f32.mrb[242].mxu0 }
0x1aad   :  { %v15831_v40 = vadd.f32 %v17518_v15, %v15830_v50  ;;  %v18061_v42 = vpop.f32.mrb[243].mxu0 }
0x1aaf   :  { %15835 = vst.msk [vmem:[#allocation19] sm:$0x3] %vm15834_vm1, %v15831_v40 }
0x1ab0   :  { %20683 = shalt.err (!%p20680_p0)
}
0x1ab1   :  { %s20684_s3 = scalar_lea.hbm %s21067_s17, 32 }
0x1ab2   :  { %p20685_p1 = scmp.ne.s32.totalorder %s21067_s17, %s20684_s3  ;;  %p20688_p2 = scmp.lt.u32.totalorder %s20684_s3, %s21067_s17 }
0x1ab4   :  { %p20690_p3 = pnand %p20688_p2, %p20685_p1 }
0x1ab6   :  { %20693 = shalt.err (!%p20690_p3)
}
0x1ab7   :  { %15845 = dma.vmem_to_hbm [thread:$0]  %s15843_s18, 32, %s21067_s17, [#allocation4]  }
0x1ab8   :  { %20706 = dma.done.wait [#allocation4], 32  }
0x1ab9   :  { %20707 = vsyncadd [#allocation4], 4294967264 }
0x1aba   :  { %15849 = vsyncpa [#allocation3], 1 }
0x1abb   :  { %15850 = vsyncpa [#allocation6], 1 }
0x1abc   :  { %15851 = vsyncpa [#allocation9], 1 }
0x1abd   :  { %15852 = vsyncpa [#allocation12], 1 }
0x1abe   :  { %15853 = vsyncpa [#allocation15], 1 }
0x1abf   :  { %15854 = vsyncpa [#allocation18], 1 }
0x1ac0   :  { %15855 = vsyncpa [#allocation4], 1 }

</bundles_post_ra>
